<compile_context>
chip_gen: v7x
topology: tpu7x:2x2x1
jax: 0.10.0
libtpu: 0.0.40
codegen_flags: <defaults>
</compile_context>

<pallas_src>
import math
import functools

import jax
import jax.numpy as jnp
from jax import lax
from jax.experimental import pallas as pl
from jax.experimental.pallas import tpu as pltpu  # noqa: F401  (TPU backend)


NEG_INF = -1e30

GLOBAL_KEYS = ("in_w", "in_b", "out_w", "out_b",
               "enc_n_w", "enc_n_b", "dec_n_w", "dec_n_b")
ENC_KEYS = ("qkv_w", "qkv_b", "op_w", "op_b",
            "ff1_w", "ff1_b", "ff2_w", "ff2_b",
            "n1_w", "n1_b", "n2_w", "n2_b")
DEC_KEYS = ("sa_qkv_w", "sa_qkv_b", "sa_op_w", "sa_op_b",
            "ca_qkv_w", "ca_qkv_b", "ca_op_w", "ca_op_b",
            "ff1_w", "ff1_b", "ff2_w", "ff2_b",
            "n1_w", "n1_b", "n2_w", "n2_b", "n3_w", "n3_b")


# ----------------------------------------------------------------------------
# In-kernel helpers (operate on VMEM-resident values)
# ----------------------------------------------------------------------------

def _linear(x, w, b):
    return jnp.dot(x, w, preferred_element_type=jnp.float32) + b


def _layernorm(x, w, b, eps=1e-5):
    mean = jnp.mean(x, axis=-1, keepdims=True)
    c = x - mean
    var = jnp.mean(c * c, axis=-1, keepdims=True)
    return c * lax.rsqrt(var + eps) * w + b


def _softmax_rows(s):
    s = s - jnp.max(s, axis=-1, keepdims=True)
    p = jnp.exp(s)
    return p / jnp.sum(p, axis=-1, keepdims=True)


def _batch_block_mask(Rq, Rk, Sq, Sk, B):
    """Block-diagonal mask so row i (batch i//Sq) only attends within its batch."""
    row = lax.broadcasted_iota(jnp.int32, (Rq, Rk), 0)
    col = lax.broadcasted_iota(jnp.int32, (Rq, Rk), 1)
    bmask = jnp.zeros((Rq, Rk), dtype=jnp.bool_)
    for b in range(B):  # B is a small static int
        in_b = ((row >= b * Sq) & (row < (b + 1) * Sq) &
                (col >= b * Sk) & (col < (b + 1) * Sk))
        bmask = bmask | in_b
    return bmask


def _mha(xq, xkv, qkv_w, qkv_b, op_w, op_b, *, nhead, Sq, Sk, B):
    """Multi-head attention on flattened (B*S, D) slabs, all heads in one pass.

    xkv=None means self-attention (reuse the fused QKV projection of xq).
    """
    D = op_w.shape[0]
    Dh = D // nhead
    scale = 1.0 / math.sqrt(Dh)

    # Fused QKV projection: one (D -> 3D) matmul.
    pq = jnp.dot(xq, qkv_w, preferred_element_type=jnp.float32) + qkv_b      # (Rq, 3D)
    if xkv is None:
        pkv = pq
    else:
        pkv = jnp.dot(xkv, qkv_w, preferred_element_type=jnp.float32) + qkv_b  # (Rk, 3D)

    q = pq[:, 0:D]
    k = pkv[:, D:2 * D]
    v = pkv[:, 2 * D:3 * D]

    Rq = B * Sq
    Rk = B * Sk
    bmask = _batch_block_mask(Rq, Rk, Sq, Sk, B)

    lane_q = lax.broadcasted_iota(jnp.int32, (Rq, D), 1)
    lane_k = lax.broadcasted_iota(jnp.int32, (Rk, D), 1)

    out = jnp.zeros((Rq, D), jnp.float32)
    for h in range(nhead):  # static unrolled loop over heads
        mq = ((lane_q >= h * Dh) & (lane_q < (h + 1) * Dh)).astype(jnp.float32)
        mk = ((lane_k >= h * Dh) & (lane_k < (h + 1) * Dh)).astype(jnp.float32)
        # (Q masked to head-h columns) @ K^T == Q_h @ K_h^T
        s = lax.dot_general(q * mq, k, (((1,), (1,)), ((), ())),
                            preferred_element_type=jnp.float32) * scale
        s = jnp.where(bmask, s, NEG_INF)
        p = _softmax_rows(s)                                   # (Rq, Rk)
        # P_h @ (V masked to head-h columns) lands in head-h output columns.
        out = out + jnp.dot(p, v * mk, preferred_element_type=jnp.float32)

    return jnp.dot(out, op_w, preferred_element_type=jnp.float32) + op_b


def _encoder_layer(x, prm, *, nhead, S, B):
    a = _mha(x, None, prm["qkv_w"], prm["qkv_b"], prm["op_w"], prm["op_b"],
             nhead=nhead, Sq=S, Sk=S, B=B)
    x = _layernorm(x + a, prm["n1_w"], prm["n1_b"])
    h = jnp.maximum(_linear(x, prm["ff1_w"], prm["ff1_b"]), 0.0)
    h = _linear(h, prm["ff2_w"], prm["ff2_b"])
    return _layernorm(x + h, prm["n2_w"], prm["n2_b"])


def _decoder_layer(x, mem, prm, *, nhead, St, Ss, B):
    a = _mha(x, None, prm["sa_qkv_w"], prm["sa_qkv_b"], prm["sa_op_w"], prm["sa_op_b"],
             nhead=nhead, Sq=St, Sk=St, B=B)
    x = _layernorm(x + a, prm["n1_w"], prm["n1_b"])
    c = _mha(x, mem, prm["ca_qkv_w"], prm["ca_qkv_b"], prm["ca_op_w"], prm["ca_op_b"],
             nhead=nhead, Sq=St, Sk=Ss, B=B)
    x = _layernorm(x + c, prm["n2_w"], prm["n2_b"])
    h = jnp.maximum(_linear(x, prm["ff1_w"], prm["ff1_b"]), 0.0)
    h = _linear(h, prm["ff2_w"], prm["ff2_b"])
    return _layernorm(x + h, prm["n3_w"], prm["n3_b"])


# ----------------------------------------------------------------------------
# The single fused kernel
# ----------------------------------------------------------------------------

def _fused_forward_kernel(*refs, n_enc, n_dec, nhead, B, Ss, St, sqrt_d):
    it = iter(refs)
    src = next(it)[...]      # (B*Ss, In)
    tgt = next(it)[...]      # (B*St, In)
    pe_s = next(it)[...]     # (B*Ss, D)
    pe_t = next(it)[...]     # (B*St, D)
    g = {k: next(it)[...] for k in GLOBAL_KEYS}
    enc_layers = [{k: next(it)[...] for k in ENC_KEYS} for _ in range(n_enc)]
    dec_layers = [{k: next(it)[...] for k in DEC_KEYS} for _ in range(n_dec)]
    o_ref = next(it)

    # input_fc(x) * sqrt(d_model) + positional encoding (dropout = identity)
    s = (jnp.dot(src, g["in_w"], preferred_element_type=jnp.float32)
         + g["in_b"]) * sqrt_d + pe_s
    t = (jnp.dot(tgt, g["in_w"], preferred_element_type=jnp.float32)
         + g["in_b"]) * sqrt_d + pe_t

    # encoder stack + final encoder norm
    mem = s
    for prm in enc_layers:
        mem = _encoder_layer(mem, prm, nhead=nhead, S=Ss, B=B)
    mem = _layernorm(mem, g["enc_n_w"], g["enc_n_b"])

    # decoder stack + final decoder norm
    x = t
    for prm in dec_layers:
        x = _decoder_layer(x, mem, prm, nhead=nhead, St=St, Ss=Ss, B=B)
    x = _layernorm(x, g["dec_n_w"], g["dec_n_b"])

    # output_fc
    o_ref[...] = (jnp.dot(x, g["out_w"], preferred_element_type=jnp.float32)
                  + g["out_b"]).astype(o_ref.dtype)


# ----------------------------------------------------------------------------
# Host wrapper
# ----------------------------------------------------------------------------

@functools.partial(jax.jit, static_argnames=("d_model", "nhead"))
def lidar_transformer_forward(params, src, tgt, *, d_model, nhead):
    B, Ss, In = src.shape
    St = tgt.shape[1]
    pe = params["pe"]

    # Positional encodings pre-tiled per batch so the kernel just adds them.
    pe_s = jnp.tile(pe[:Ss], (B, 1))
    pe_t = jnp.tile(pe[:St], (B, 1))

    def row(v):
        return v.reshape(1, -1)

    inputs = [src.reshape(B * Ss, In), tgt.reshape(B * St, In), pe_s, pe_t,
              params["input_fc_w"].T, row(params["input_fc_b"]),
              params["output_fc_w"].T, row(params["output_fc_b"]),
              row(params["enc_norm_w"]), row(params["enc_norm_b"]),
              row(params["dec_norm_w"]), row(params["dec_norm_b"])]

    def attn_inputs(ap):
        return [ap["in_proj_weight"].T, row(ap["in_proj_bias"]),
                ap["out_proj_weight"].T, row(ap["out_proj_bias"])]

    for lp in params["encoder_layers"]:
        inputs += attn_inputs(lp["self_attn"])
        inputs += [lp["linear1_w"].T, row(lp["linear1_b"]),
                   lp["linear2_w"].T, row(lp["linear2_b"]),
                   row(lp["norm1_w"]), row(lp["norm1_b"]),
                   row(lp["norm2_w"]), row(lp["norm2_b"])]

    for lp in params["decoder_layers"]:
        inputs += attn_inputs(lp["self_attn"])
        inputs += attn_inputs(lp["cross_attn"])
        inputs += [lp["linear1_w"].T, row(lp["linear1_b"]),
                   lp["linear2_w"].T, row(lp["linear2_b"]),
                   row(lp["norm1_w"]), row(lp["norm1_b"]),
                   row(lp["norm2_w"]), row(lp["norm2_b"]),
                   row(lp["norm3_w"]), row(lp["norm3_b"])]

    kernel = functools.partial(
        _fused_forward_kernel,
        n_enc=len(params["encoder_layers"]),
        n_dec=len(params["decoder_layers"]),
        nhead=nhead, B=B, Ss=Ss, St=St, sqrt_d=math.sqrt(d_model))

    out2d = pl.pallas_call(
        kernel,
        out_shape=jax.ShapeDtypeStruct((B * St, In), jnp.float32),
    )(*inputs)
    return out2d.reshape(B, St, In)


# ----------------------------------------------------------------------------
# Pure-JAX reference (mirrors PyTorch nn.Transformer, eval mode) for self-check
# ----------------------------------------------------------------------------

def _reference_forward(params, src, tgt, *, d_model, nhead):
    B, Ss, In = src.shape
    St = tgt.shape[1]
    Dh = d_model // nhead
    pe = params["pe"]

    def linear(x, w, b):
        return x @ w.T + b

    def layernorm(x, w, b, eps=1e-5):
        m = x.mean(-1, keepdims=True)
        v = ((x - m) ** 2).mean(-1, keepdims=True)
        return (x - m) / jnp.sqrt(v + eps) * w + b

    def mha(q_in, kv_in, p):
        Sq, Sk = q_in.shape[1], kv_in.shape[1]
        wq, wk, wv = jnp.split(p["in_proj_weight"], 3, axis=0)
        bq, bk, bv = jnp.split(p["in_proj_bias"], 3)
        q = (q_in @ wq.T + bq).reshape(B, Sq, nhead, Dh).transpose(0, 2, 1, 3)
        k = (kv_in @ wk.T + bk).reshape(B, Sk, nhead, Dh).transpose(0, 2, 1, 3)
        v = (kv_in @ wv.T + bv).reshape(B, Sk, nhead, Dh).transpose(0, 2, 1, 3)
        s = jnp.einsum("bhqd,bhkd->bhqk", q, k) / math.sqrt(Dh)
        a = jax.nn.softmax(s, axis=-1)
        o = jnp.einsum("bhqk,bhkd->bhqd", a, v)
        o = o.transpose(0, 2, 1, 3).reshape(B, Sq, d_model)
        return o @ p["out_proj_weight"].T + p["out_proj_bias"]

    def enc_layer(x, p):
        x = layernorm(x + mha(x, x, p["self_attn"]), p["norm1_w"], p["norm1_b"])
        h = jax.nn.relu(linear(x, p["linear1_w"], p["linear1_b"]))
        h = linear(h, p["linear2_w"], p["linear2_b"])
        return layernorm(x + h, p["norm2_w"], p["norm2_b"])

    def dec_layer(x, mem, p):
        x = layernorm(x + mha(x, x, p["self_attn"]), p["norm1_w"], p["norm1_b"])
        x = layernorm(x + mha(x, mem, p["cross_attn"]), p["norm2_w"], p["norm2_b"])
        h = jax.nn.relu(linear(x, p["linear1_w"], p["linear1_b"]))
        h = linear(h, p["linear2_w"], p["linear2_b"])
        return layernorm(x + h, p["norm3_w"], p["norm3_b"])

    s = linear(src, params["input_fc_w"], params["input_fc_b"]) * math.sqrt(d_model) + pe[:Ss]
    t = linear(tgt, params["input_fc_w"], params["input_fc_b"]) * math.sqrt(d_model) + pe[:St]
    mem = s
    for lp in params["encoder_layers"]:
        mem = enc_layer(mem, lp)
    mem = layernorm(mem, params["enc_norm_w"], params["enc_norm_b"])
    x = t
    for lp in params["decoder_layers"]:
        x = dec_layer(x, mem, lp)
    x = layernorm(x, params["dec_norm_w"], params["dec_norm_b"])
    return linear(x, params["output_fc_w"], params["output_fc_b"])


# ----------------------------------------------------------------------------
# Deterministic parameter init (PyTorch (out, in) weight convention)
# ----------------------------------------------------------------------------

def make_positional_encoding(max_len, d_model):
    position = jnp.arange(max_len, dtype=jnp.float32)[:, None]
    div_term = jnp.exp(
        jnp.arange(0, d_model, 2, dtype=jnp.float32) * (-math.log(10000.0) / d_model))
    pe = jnp.zeros((max_len, d_model), dtype=jnp.float32)
    pe = pe.at[:, 0::2].set(jnp.sin(position * div_term))
    pe = pe.at[:, 1::2].set(jnp.cos(position * div_term))
    return pe


def init_params(key, input_dim, d_model, n_enc, n_dec, dff, max_len=64):
    state = {"key": key}

    def w(shape):
        state["key"], sub = jax.random.split(state["key"])
        return jax.random.normal(sub, shape, jnp.float32) * 0.02

    def attn_params():
        return {
            "in_proj_weight": w((3 * d_model, d_model)),
            "in_proj_bias": w((3 * d_model,)),
            "out_proj_weight": w((d_model, d_model)),
            "out_proj_bias": w((d_model,)),
        }

    def enc_layer():
        return {
            "self_attn": attn_params(),
            "linear1_w": w((dff, d_model)), "linear1_b": w((dff,)),
            "linear2_w": w((d_model, dff)), "linear2_b": w((d_model,)),
            "norm1_w": jnp.ones((d_model,), jnp.float32), "norm1_b": jnp.zeros((d_model,), jnp.float32),
            "norm2_w": jnp.ones((d_model,), jnp.float32), "norm2_b": jnp.zeros((d_model,), jnp.float32),
        }

    def dec_layer():
        d = enc_layer()
        d["cross_attn"] = attn_params()
        d["norm3_w"] = jnp.ones((d_model,), jnp.float32)
        d["norm3_b"] = jnp.zeros((d_model,), jnp.float32)
        return d

    return {
        "input_fc_w": w((d_model, input_dim)),
        "input_fc_b": w((d_model,)),
        "output_fc_w": w((input_dim, d_model)),
        "output_fc_b": w((input_dim,)),
        "encoder_layers": [enc_layer() for _ in range(n_enc)],
        "decoder_layers": [dec_layer() for _ in range(n_dec)],
        "enc_norm_w": jnp.ones((d_model,), jnp.float32),
        "enc_norm_b": jnp.zeros((d_model,), jnp.float32),
        "dec_norm_w": jnp.ones((d_model,), jnp.float32),
        "dec_norm_b": jnp.zeros((d_model,), jnp.float32),
        "pe": make_positional_encoding(max_len, d_model),
    }


# ----------------------------------------------------------------------------

if __name__ == "__main__":
    # Small shapes consistent with the module: src (B, H_prev, input_dim),
    # tgt (B, H_post - 1, input_dim)
    B, H_prev, H_post_m1 = 2, 8, 7
    input_dim, d_model, nhead = 64, 32, 4
    num_encoder_layers = num_decoder_layers = 2
    dim_feedforward = 64

    key = jax.random.PRNGKey(0)
    k_params, k_src, k_tgt = jax.random.split(key, 3)

    params = init_params(k_params, input_dim, d_model,
                         num_encoder_layers, num_decoder_layers, dim_feedforward)
    src = jax.random.normal(k_src, (B, H_prev, input_dim), jnp.float32)
    tgt = jax.random.normal(k_tgt, (B, H_post_m1, input_dim), jnp.float32)

    out = lidar_transformer_forward(params, src, tgt, d_model=d_model, nhead=nhead)
    out = jax.block_until_ready(out)
    assert out.shape == (B, H_post_m1, input_dim)
    assert bool(jnp.all(jnp.isfinite(out)))

    # Self-check against a pure-JAX reference of the same forward pass.
    ref = jax.block_until_ready(
        _reference_forward(params, src, tgt, d_model=d_model, nhead=nhead))
    max_diff = float(jnp.max(jnp.abs(out - ref)))
    tol = 1e-2 * (1.0 + float(jnp.max(jnp.abs(ref))))
    assert max_diff < tol, f"mismatch vs reference: max_diff={max_diff}, tol={tol}"

    print("KERNEL_OK")
</pallas_src>

<mosaic_0001>
module attributes {stable_mosaic.version = 11 : i64} {
  func.func @_fused_forward_kernel(%arg0: memref<16x64xf32, #tpu.memory_space<vmem>>, %arg1: memref<14x64xf32, #tpu.memory_space<vmem>>, %arg2: memref<16x32xf32, #tpu.memory_space<vmem>>, %arg3: memref<14x32xf32, #tpu.memory_space<vmem>>, %arg4: memref<64x32xf32, #tpu.memory_space<vmem>>, %arg5: memref<1x32xf32, #tpu.memory_space<vmem>>, %arg6: memref<32x64xf32, #tpu.memory_space<vmem>>, %arg7: memref<1x64xf32, #tpu.memory_space<vmem>>, %arg8: memref<1x32xf32, #tpu.memory_space<vmem>>, %arg9: memref<1x32xf32, #tpu.memory_space<vmem>>, %arg10: memref<1x32xf32, #tpu.memory_space<vmem>>, %arg11: memref<1x32xf32, #tpu.memory_space<vmem>>, %arg12: memref<32x96xf32, #tpu.memory_space<vmem>>, %arg13: memref<1x96xf32, #tpu.memory_space<vmem>>, %arg14: memref<32x32xf32, #tpu.memory_space<vmem>>, %arg15: memref<1x32xf32, #tpu.memory_space<vmem>>, %arg16: memref<32x64xf32, #tpu.memory_space<vmem>>, %arg17: memref<1x64xf32, #tpu.memory_space<vmem>>, %arg18: memref<64x32xf32, #tpu.memory_space<vmem>>, %arg19: memref<1x32xf32, #tpu.memory_space<vmem>>, %arg20: memref<1x32xf32, #tpu.memory_space<vmem>>, %arg21: memref<1x32xf32, #tpu.memory_space<vmem>>, %arg22: memref<1x32xf32, #tpu.memory_space<vmem>>, %arg23: memref<1x32xf32, #tpu.memory_space<vmem>>, %arg24: memref<32x96xf32, #tpu.memory_space<vmem>>, %arg25: memref<1x96xf32, #tpu.memory_space<vmem>>, %arg26: memref<32x32xf32, #tpu.memory_space<vmem>>, %arg27: memref<1x32xf32, #tpu.memory_space<vmem>>, %arg28: memref<32x64xf32, #tpu.memory_space<vmem>>, %arg29: memref<1x64xf32, #tpu.memory_space<vmem>>, %arg30: memref<64x32xf32, #tpu.memory_space<vmem>>, %arg31: memref<1x32xf32, #tpu.memory_space<vmem>>, %arg32: memref<1x32xf32, #tpu.memory_space<vmem>>, %arg33: memref<1x32xf32, #tpu.memory_space<vmem>>, %arg34: memref<1x32xf32, #tpu.memory_space<vmem>>, %arg35: memref<1x32xf32, #tpu.memory_space<vmem>>, %arg36: memref<32x96xf32, #tpu.memory_space<vmem>>, %arg37: memref<1x96xf32, #tpu.memory_space<vmem>>, %arg38: memref<32x32xf32, #tpu.memory_space<vmem>>, %arg39: memref<1x32xf32, #tpu.memory_space<vmem>>, %arg40: memref<32x96xf32, #tpu.memory_space<vmem>>, %arg41: memref<1x96xf32, #tpu.memory_space<vmem>>, %arg42: memref<32x32xf32, #tpu.memory_space<vmem>>, %arg43: memref<1x32xf32, #tpu.memory_space<vmem>>, %arg44: memref<32x64xf32, #tpu.memory_space<vmem>>, %arg45: memref<1x64xf32, #tpu.memory_space<vmem>>, %arg46: memref<64x32xf32, #tpu.memory_space<vmem>>, %arg47: memref<1x32xf32, #tpu.memory_space<vmem>>, %arg48: memref<1x32xf32, #tpu.memory_space<vmem>>, %arg49: memref<1x32xf32, #tpu.memory_space<vmem>>, %arg50: memref<1x32xf32, #tpu.memory_space<vmem>>, %arg51: memref<1x32xf32, #tpu.memory_space<vmem>>, %arg52: memref<1x32xf32, #tpu.memory_space<vmem>>, %arg53: memref<1x32xf32, #tpu.memory_space<vmem>>, %arg54: memref<32x96xf32, #tpu.memory_space<vmem>>, %arg55: memref<1x96xf32, #tpu.memory_space<vmem>>, %arg56: memref<32x32xf32, #tpu.memory_space<vmem>>, %arg57: memref<1x32xf32, #tpu.memory_space<vmem>>, %arg58: memref<32x96xf32, #tpu.memory_space<vmem>>, %arg59: memref<1x96xf32, #tpu.memory_space<vmem>>, %arg60: memref<32x32xf32, #tpu.memory_space<vmem>>, %arg61: memref<1x32xf32, #tpu.memory_space<vmem>>, %arg62: memref<32x64xf32, #tpu.memory_space<vmem>>, %arg63: memref<1x64xf32, #tpu.memory_space<vmem>>, %arg64: memref<64x32xf32, #tpu.memory_space<vmem>>, %arg65: memref<1x32xf32, #tpu.memory_space<vmem>>, %arg66: memref<1x32xf32, #tpu.memory_space<vmem>>, %arg67: memref<1x32xf32, #tpu.memory_space<vmem>>, %arg68: memref<1x32xf32, #tpu.memory_space<vmem>>, %arg69: memref<1x32xf32, #tpu.memory_space<vmem>>, %arg70: memref<1x32xf32, #tpu.memory_space<vmem>>, %arg71: memref<1x32xf32, #tpu.memory_space<vmem>>, %arg72: memref<14x64xf32, #tpu.memory_space<vmem>>) attributes {dimension_semantics = [], scalar_prefetch = 0 : i64, scratch_operands = 0 : i64, tpu.core_type = #tpu.core_type<tc>} {
    %c0 = arith.constant 0 : index
    %c0_0 = arith.constant 0 : index
    %0 = vector.load %arg0[%c0, %c0_0] : memref<16x64xf32, #tpu.memory_space<vmem>>, vector<16x64xf32>
    %c0_1 = arith.constant 0 : index
    %c0_2 = arith.constant 0 : index
    %1 = vector.load %arg1[%c0_1, %c0_2] : memref<14x64xf32, #tpu.memory_space<vmem>>, vector<14x64xf32>
    %c0_3 = arith.constant 0 : index
    %c0_4 = arith.constant 0 : index
    %2 = vector.load %arg2[%c0_3, %c0_4] : memref<16x32xf32, #tpu.memory_space<vmem>>, vector<16x32xf32>
    %c0_5 = arith.constant 0 : index
    %c0_6 = arith.constant 0 : index
    %3 = vector.load %arg3[%c0_5, %c0_6] : memref<14x32xf32, #tpu.memory_space<vmem>>, vector<14x32xf32>
    %c0_7 = arith.constant 0 : index
    %c0_8 = arith.constant 0 : index
    %4 = vector.load %arg4[%c0_7, %c0_8] : memref<64x32xf32, #tpu.memory_space<vmem>>, vector<64x32xf32>
    %c0_9 = arith.constant 0 : index
    %c0_10 = arith.constant 0 : index
    %5 = vector.load %arg5[%c0_9, %c0_10] : memref<1x32xf32, #tpu.memory_space<vmem>>, vector<1x32xf32>
    %c0_11 = arith.constant 0 : index
    %c0_12 = arith.constant 0 : index
    %6 = vector.load %arg6[%c0_11, %c0_12] : memref<32x64xf32, #tpu.memory_space<vmem>>, vector<32x64xf32>
    %c0_13 = arith.constant 0 : index
    %c0_14 = arith.constant 0 : index
    %7 = vector.load %arg7[%c0_13, %c0_14] : memref<1x64xf32, #tpu.memory_space<vmem>>, vector<1x64xf32>
    %c0_15 = arith.constant 0 : index
    %c0_16 = arith.constant 0 : index
    %8 = vector.load %arg8[%c0_15, %c0_16] : memref<1x32xf32, #tpu.memory_space<vmem>>, vector<1x32xf32>
    %c0_17 = arith.constant 0 : index
    %c0_18 = arith.constant 0 : index
    %9 = vector.load %arg9[%c0_17, %c0_18] : memref<1x32xf32, #tpu.memory_space<vmem>>, vector<1x32xf32>
    %c0_19 = arith.constant 0 : index
    %c0_20 = arith.constant 0 : index
    %10 = vector.load %arg10[%c0_19, %c0_20] : memref<1x32xf32, #tpu.memory_space<vmem>>, vector<1x32xf32>
    %c0_21 = arith.constant 0 : index
    %c0_22 = arith.constant 0 : index
    %11 = vector.load %arg11[%c0_21, %c0_22] : memref<1x32xf32, #tpu.memory_space<vmem>>, vector<1x32xf32>
    %c0_23 = arith.constant 0 : index
    %c0_24 = arith.constant 0 : index
    %12 = vector.load %arg12[%c0_23, %c0_24] : memref<32x96xf32, #tpu.memory_space<vmem>>, vector<32x96xf32>
    %c0_25 = arith.constant 0 : index
    %c0_26 = arith.constant 0 : index
    %13 = vector.load %arg13[%c0_25, %c0_26] : memref<1x96xf32, #tpu.memory_space<vmem>>, vector<1x96xf32>
    %c0_27 = arith.constant 0 : index
    %c0_28 = arith.constant 0 : index
    %14 = vector.load %arg14[%c0_27, %c0_28] : memref<32x32xf32, #tpu.memory_space<vmem>>, vector<32x32xf32>
    %c0_29 = arith.constant 0 : index
    %c0_30 = arith.constant 0 : index
    %15 = vector.load %arg15[%c0_29, %c0_30] : memref<1x32xf32, #tpu.memory_space<vmem>>, vector<1x32xf32>
    %c0_31 = arith.constant 0 : index
    %c0_32 = arith.constant 0 : index
    %16 = vector.load %arg16[%c0_31, %c0_32] : memref<32x64xf32, #tpu.memory_space<vmem>>, vector<32x64xf32>
    %c0_33 = arith.constant 0 : index
    %c0_34 = arith.constant 0 : index
    %17 = vector.load %arg17[%c0_33, %c0_34] : memref<1x64xf32, #tpu.memory_space<vmem>>, vector<1x64xf32>
    %c0_35 = arith.constant 0 : index
    %c0_36 = arith.constant 0 : index
    %18 = vector.load %arg18[%c0_35, %c0_36] : memref<64x32xf32, #tpu.memory_space<vmem>>, vector<64x32xf32>
    %c0_37 = arith.constant 0 : index
    %c0_38 = arith.constant 0 : index
    %19 = vector.load %arg19[%c0_37, %c0_38] : memref<1x32xf32, #tpu.memory_space<vmem>>, vector<1x32xf32>
    %c0_39 = arith.constant 0 : index
    %c0_40 = arith.constant 0 : index
    %20 = vector.load %arg20[%c0_39, %c0_40] : memref<1x32xf32, #tpu.memory_space<vmem>>, vector<1x32xf32>
    %c0_41 = arith.constant 0 : index
    %c0_42 = arith.constant 0 : index
    %21 = vector.load %arg21[%c0_41, %c0_42] : memref<1x32xf32, #tpu.memory_space<vmem>>, vector<1x32xf32>
    %c0_43 = arith.constant 0 : index
    %c0_44 = arith.constant 0 : index
    %22 = vector.load %arg22[%c0_43, %c0_44] : memref<1x32xf32, #tpu.memory_space<vmem>>, vector<1x32xf32>
    %c0_45 = arith.constant 0 : index
    %c0_46 = arith.constant 0 : index
    %23 = vector.load %arg23[%c0_45, %c0_46] : memref<1x32xf32, #tpu.memory_space<vmem>>, vector<1x32xf32>
    %c0_47 = arith.constant 0 : index
    %c0_48 = arith.constant 0 : index
    %24 = vector.load %arg24[%c0_47, %c0_48] : memref<32x96xf32, #tpu.memory_space<vmem>>, vector<32x96xf32>
    %c0_49 = arith.constant 0 : index
    %c0_50 = arith.constant 0 : index
    %25 = vector.load %arg25[%c0_49, %c0_50] : memref<1x96xf32, #tpu.memory_space<vmem>>, vector<1x96xf32>
    %c0_51 = arith.constant 0 : index
    %c0_52 = arith.constant 0 : index
    %26 = vector.load %arg26[%c0_51, %c0_52] : memref<32x32xf32, #tpu.memory_space<vmem>>, vector<32x32xf32>
    %c0_53 = arith.constant 0 : index
    %c0_54 = arith.constant 0 : index
    %27 = vector.load %arg27[%c0_53, %c0_54] : memref<1x32xf32, #tpu.memory_space<vmem>>, vector<1x32xf32>
    %c0_55 = arith.constant 0 : index
    %c0_56 = arith.constant 0 : index
    %28 = vector.load %arg28[%c0_55, %c0_56] : memref<32x64xf32, #tpu.memory_space<vmem>>, vector<32x64xf32>
    %c0_57 = arith.constant 0 : index
    %c0_58 = arith.constant 0 : index
    %29 = vector.load %arg29[%c0_57, %c0_58] : memref<1x64xf32, #tpu.memory_space<vmem>>, vector<1x64xf32>
    %c0_59 = arith.constant 0 : index
    %c0_60 = arith.constant 0 : index
    %30 = vector.load %arg30[%c0_59, %c0_60] : memref<64x32xf32, #tpu.memory_space<vmem>>, vector<64x32xf32>
    %c0_61 = arith.constant 0 : index
    %c0_62 = arith.constant 0 : index
    %31 = vector.load %arg31[%c0_61, %c0_62] : memref<1x32xf32, #tpu.memory_space<vmem>>, vector<1x32xf32>
    %c0_63 = arith.constant 0 : index
    %c0_64 = arith.constant 0 : index
    %32 = vector.load %arg32[%c0_63, %c0_64] : memref<1x32xf32, #tpu.memory_space<vmem>>, vector<1x32xf32>
    %c0_65 = arith.constant 0 : index
    %c0_66 = arith.constant 0 : index
    %33 = vector.load %arg33[%c0_65, %c0_66] : memref<1x32xf32, #tpu.memory_space<vmem>>, vector<1x32xf32>
    %c0_67 = arith.constant 0 : index
    %c0_68 = arith.constant 0 : index
    %34 = vector.load %arg34[%c0_67, %c0_68] : memref<1x32xf32, #tpu.memory_space<vmem>>, vector<1x32xf32>
    %c0_69 = arith.constant 0 : index
    %c0_70 = arith.constant 0 : index
    %35 = vector.load %arg35[%c0_69, %c0_70] : memref<1x32xf32, #tpu.memory_space<vmem>>, vector<1x32xf32>
    %c0_71 = arith.constant 0 : index
    %c0_72 = arith.constant 0 : index
    %36 = vector.load %arg36[%c0_71, %c0_72] : memref<32x96xf32, #tpu.memory_space<vmem>>, vector<32x96xf32>
    %c0_73 = arith.constant 0 : index
    %c0_74 = arith.constant 0 : index
    %37 = vector.load %arg37[%c0_73, %c0_74] : memref<1x96xf32, #tpu.memory_space<vmem>>, vector<1x96xf32>
    %c0_75 = arith.constant 0 : index
    %c0_76 = arith.constant 0 : index
    %38 = vector.load %arg38[%c0_75, %c0_76] : memref<32x32xf32, #tpu.memory_space<vmem>>, vector<32x32xf32>
    %c0_77 = arith.constant 0 : index
    %c0_78 = arith.constant 0 : index
    %39 = vector.load %arg39[%c0_77, %c0_78] : memref<1x32xf32, #tpu.memory_space<vmem>>, vector<1x32xf32>
    %c0_79 = arith.constant 0 : index
    %c0_80 = arith.constant 0 : index
    %40 = vector.load %arg40[%c0_79, %c0_80] : memref<32x96xf32, #tpu.memory_space<vmem>>, vector<32x96xf32>
    %c0_81 = arith.constant 0 : index
    %c0_82 = arith.constant 0 : index
    %41 = vector.load %arg41[%c0_81, %c0_82] : memref<1x96xf32, #tpu.memory_space<vmem>>, vector<1x96xf32>
    %c0_83 = arith.constant 0 : index
    %c0_84 = arith.constant 0 : index
    %42 = vector.load %arg42[%c0_83, %c0_84] : memref<32x32xf32, #tpu.memory_space<vmem>>, vector<32x32xf32>
    %c0_85 = arith.constant 0 : index
    %c0_86 = arith.constant 0 : index
    %43 = vector.load %arg43[%c0_85, %c0_86] : memref<1x32xf32, #tpu.memory_space<vmem>>, vector<1x32xf32>
    %c0_87 = arith.constant 0 : index
    %c0_88 = arith.constant 0 : index
    %44 = vector.load %arg44[%c0_87, %c0_88] : memref<32x64xf32, #tpu.memory_space<vmem>>, vector<32x64xf32>
    %c0_89 = arith.constant 0 : index
    %c0_90 = arith.constant 0 : index
    %45 = vector.load %arg45[%c0_89, %c0_90] : memref<1x64xf32, #tpu.memory_space<vmem>>, vector<1x64xf32>
    %c0_91 = arith.constant 0 : index
    %c0_92 = arith.constant 0 : index
    %46 = vector.load %arg46[%c0_91, %c0_92] : memref<64x32xf32, #tpu.memory_space<vmem>>, vector<64x32xf32>
    %c0_93 = arith.constant 0 : index
    %c0_94 = arith.constant 0 : index
    %47 = vector.load %arg47[%c0_93, %c0_94] : memref<1x32xf32, #tpu.memory_space<vmem>>, vector<1x32xf32>
    %c0_95 = arith.constant 0 : index
    %c0_96 = arith.constant 0 : index
    %48 = vector.load %arg48[%c0_95, %c0_96] : memref<1x32xf32, #tpu.memory_space<vmem>>, vector<1x32xf32>
    %c0_97 = arith.constant 0 : index
    %c0_98 = arith.constant 0 : index
    %49 = vector.load %arg49[%c0_97, %c0_98] : memref<1x32xf32, #tpu.memory_space<vmem>>, vector<1x32xf32>
    %c0_99 = arith.constant 0 : index
    %c0_100 = arith.constant 0 : index
    %50 = vector.load %arg50[%c0_99, %c0_100] : memref<1x32xf32, #tpu.memory_space<vmem>>, vector<1x32xf32>
    %c0_101 = arith.constant 0 : index
    %c0_102 = arith.constant 0 : index
    %51 = vector.load %arg51[%c0_101, %c0_102] : memref<1x32xf32, #tpu.memory_space<vmem>>, vector<1x32xf32>
    %c0_103 = arith.constant 0 : index
    %c0_104 = arith.constant 0 : index
    %52 = vector.load %arg52[%c0_103, %c0_104] : memref<1x32xf32, #tpu.memory_space<vmem>>, vector<1x32xf32>
    %c0_105 = arith.constant 0 : index
    %c0_106 = arith.constant 0 : index
    %53 = vector.load %arg53[%c0_105, %c0_106] : memref<1x32xf32, #tpu.memory_space<vmem>>, vector<1x32xf32>
    %c0_107 = arith.constant 0 : index
    %c0_108 = arith.constant 0 : index
    %54 = vector.load %arg54[%c0_107, %c0_108] : memref<32x96xf32, #tpu.memory_space<vmem>>, vector<32x96xf32>
    %c0_109 = arith.constant 0 : index
    %c0_110 = arith.constant 0 : index
    %55 = vector.load %arg55[%c0_109, %c0_110] : memref<1x96xf32, #tpu.memory_space<vmem>>, vector<1x96xf32>
    %c0_111 = arith.constant 0 : index
    %c0_112 = arith.constant 0 : index
    %56 = vector.load %arg56[%c0_111, %c0_112] : memref<32x32xf32, #tpu.memory_space<vmem>>, vector<32x32xf32>
    %c0_113 = arith.constant 0 : index
    %c0_114 = arith.constant 0 : index
    %57 = vector.load %arg57[%c0_113, %c0_114] : memref<1x32xf32, #tpu.memory_space<vmem>>, vector<1x32xf32>
    %c0_115 = arith.constant 0 : index
    %c0_116 = arith.constant 0 : index
    %58 = vector.load %arg58[%c0_115, %c0_116] : memref<32x96xf32, #tpu.memory_space<vmem>>, vector<32x96xf32>
    %c0_117 = arith.constant 0 : index
    %c0_118 = arith.constant 0 : index
    %59 = vector.load %arg59[%c0_117, %c0_118] : memref<1x96xf32, #tpu.memory_space<vmem>>, vector<1x96xf32>
    %c0_119 = arith.constant 0 : index
    %c0_120 = arith.constant 0 : index
    %60 = vector.load %arg60[%c0_119, %c0_120] : memref<32x32xf32, #tpu.memory_space<vmem>>, vector<32x32xf32>
    %c0_121 = arith.constant 0 : index
    %c0_122 = arith.constant 0 : index
    %61 = vector.load %arg61[%c0_121, %c0_122] : memref<1x32xf32, #tpu.memory_space<vmem>>, vector<1x32xf32>
    %c0_123 = arith.constant 0 : index
    %c0_124 = arith.constant 0 : index
    %62 = vector.load %arg62[%c0_123, %c0_124] : memref<32x64xf32, #tpu.memory_space<vmem>>, vector<32x64xf32>
    %c0_125 = arith.constant 0 : index
    %c0_126 = arith.constant 0 : index
    %63 = vector.load %arg63[%c0_125, %c0_126] : memref<1x64xf32, #tpu.memory_space<vmem>>, vector<1x64xf32>
    %c0_127 = arith.constant 0 : index
    %c0_128 = arith.constant 0 : index
    %64 = vector.load %arg64[%c0_127, %c0_128] : memref<64x32xf32, #tpu.memory_space<vmem>>, vector<64x32xf32>
    %c0_129 = arith.constant 0 : index
    %c0_130 = arith.constant 0 : index
    %65 = vector.load %arg65[%c0_129, %c0_130] : memref<1x32xf32, #tpu.memory_space<vmem>>, vector<1x32xf32>
    %c0_131 = arith.constant 0 : index
    %c0_132 = arith.constant 0 : index
    %66 = vector.load %arg66[%c0_131, %c0_132] : memref<1x32xf32, #tpu.memory_space<vmem>>, vector<1x32xf32>
    %c0_133 = arith.constant 0 : index
    %c0_134 = arith.constant 0 : index
    %67 = vector.load %arg67[%c0_133, %c0_134] : memref<1x32xf32, #tpu.memory_space<vmem>>, vector<1x32xf32>
    %c0_135 = arith.constant 0 : index
    %c0_136 = arith.constant 0 : index
    %68 = vector.load %arg68[%c0_135, %c0_136] : memref<1x32xf32, #tpu.memory_space<vmem>>, vector<1x32xf32>
    %c0_137 = arith.constant 0 : index
    %c0_138 = arith.constant 0 : index
    %69 = vector.load %arg69[%c0_137, %c0_138] : memref<1x32xf32, #tpu.memory_space<vmem>>, vector<1x32xf32>
    %c0_139 = arith.constant 0 : index
    %c0_140 = arith.constant 0 : index
    %70 = vector.load %arg70[%c0_139, %c0_140] : memref<1x32xf32, #tpu.memory_space<vmem>>, vector<1x32xf32>
    %c0_141 = arith.constant 0 : index
    %c0_142 = arith.constant 0 : index
    %71 = vector.load %arg71[%c0_141, %c0_142] : memref<1x32xf32, #tpu.memory_space<vmem>>, vector<1x32xf32>
    %cst = arith.constant dense<0.000000e+00> : vector<16x32xf32>
    %72 = tpu.matmul %0, %4, %cst {dimension_numbers = #tpu.dot_dimension_numbers<[1], [0], [0], [1], [0, 0, 1, 1], [], []>} : vector<16x64xf32>, vector<64x32xf32>, vector<16x32xf32> -> vector<16x32xf32>
    %73 = vector.broadcast %5 : vector<1x32xf32> to vector<16x32xf32>
    %74 = arith.addf %72, %73 : vector<16x32xf32>
    %cst_143 = arith.constant 5.65685415 : f32
    %75 = vector.broadcast %cst_143 : f32 to vector<16x32xf32>
    %76 = arith.mulf %74, %75 : vector<16x32xf32>
    %77 = arith.addf %76, %2 : vector<16x32xf32>
    %cst_144 = arith.constant dense<0.000000e+00> : vector<14x32xf32>
    %78 = tpu.matmul %1, %4, %cst_144 {dimension_numbers = #tpu.dot_dimension_numbers<[1], [0], [0], [1], [0, 0, 1, 1], [], []>} : vector<14x64xf32>, vector<64x32xf32>, vector<14x32xf32> -> vector<14x32xf32>
    %79 = vector.broadcast %5 : vector<1x32xf32> to vector<14x32xf32>
    %80 = arith.addf %78, %79 : vector<14x32xf32>
    %cst_145 = arith.constant 5.65685415 : f32
    %81 = vector.broadcast %cst_145 : f32 to vector<14x32xf32>
    %82 = arith.mulf %80, %81 : vector<14x32xf32>
    %83 = arith.addf %82, %3 : vector<14x32xf32>
    %cst_146 = arith.constant dense<0.000000e+00> : vector<16x96xf32>
    %84 = tpu.matmul %77, %12, %cst_146 {dimension_numbers = #tpu.dot_dimension_numbers<[1], [0], [0], [1], [0, 0, 1, 1], [], []>} : vector<16x32xf32>, vector<32x96xf32>, vector<16x96xf32> -> vector<16x96xf32>
    %85 = vector.broadcast %13 : vector<1x96xf32> to vector<16x96xf32>
    %86 = arith.addf %84, %85 : vector<16x96xf32>
    %87 = vector.extract_strided_slice %86 {offsets = [0, 0], sizes = [16, 32], strides = [1, 1]} : vector<16x96xf32> to vector<16x32xf32>
    %88 = vector.extract_strided_slice %86 {offsets = [0, 32], sizes = [16, 32], strides = [1, 1]} : vector<16x96xf32> to vector<16x32xf32>
    %89 = vector.extract_strided_slice %86 {offsets = [0, 64], sizes = [16, 32], strides = [1, 1]} : vector<16x96xf32> to vector<16x32xf32>
    %90 = tpu.iota {dimensions = array<i32: 0>} : vector<16x16xi32>
    %91 = tpu.iota {dimensions = array<i32: 1>} : vector<16x16xi32>
    %false = arith.constant false
    %92 = vector.broadcast %false : i1 to vector<16x16xi1>
    %c0_i32 = arith.constant 0 : i32
    %93 = vector.broadcast %c0_i32 : i32 to vector<16x16xi32>
    %94 = arith.cmpi sge, %90, %93 : vector<16x16xi32>
    %c8_i32 = arith.constant 8 : i32
    %95 = vector.broadcast %c8_i32 : i32 to vector<16x16xi32>
    %96 = arith.cmpi slt, %90, %95 : vector<16x16xi32>
    %97 = arith.andi %94, %96 : vector<16x16xi1>
    %c0_i32_147 = arith.constant 0 : i32
    %98 = vector.broadcast %c0_i32_147 : i32 to vector<16x16xi32>
    %99 = arith.cmpi sge, %91, %98 : vector<16x16xi32>
    %100 = arith.andi %97, %99 : vector<16x16xi1>
    %c8_i32_148 = arith.constant 8 : i32
    %101 = vector.broadcast %c8_i32_148 : i32 to vector<16x16xi32>
    %102 = arith.cmpi slt, %91, %101 : vector<16x16xi32>
    %103 = arith.andi %100, %102 : vector<16x16xi1>
    %104 = arith.ori %92, %103 : vector<16x16xi1>
    %c8_i32_149 = arith.constant 8 : i32
    %105 = vector.broadcast %c8_i32_149 : i32 to vector<16x16xi32>
    %106 = arith.cmpi sge, %90, %105 : vector<16x16xi32>
    %c16_i32 = arith.constant 16 : i32
    %107 = vector.broadcast %c16_i32 : i32 to vector<16x16xi32>
    %108 = arith.cmpi slt, %90, %107 : vector<16x16xi32>
    %109 = arith.andi %106, %108 : vector<16x16xi1>
    %c8_i32_150 = arith.constant 8 : i32
    %110 = vector.broadcast %c8_i32_150 : i32 to vector<16x16xi32>
    %111 = arith.cmpi sge, %91, %110 : vector<16x16xi32>
    %112 = arith.andi %109, %111 : vector<16x16xi1>
    %c16_i32_151 = arith.constant 16 : i32
    %113 = vector.broadcast %c16_i32_151 : i32 to vector<16x16xi32>
    %114 = arith.cmpi slt, %91, %113 : vector<16x16xi32>
    %115 = arith.andi %112, %114 : vector<16x16xi1>
    %116 = arith.ori %104, %115 : vector<16x16xi1>
    %117 = tpu.iota {dimensions = array<i32: 1>} : vector<16x32xi32>
    %118 = tpu.iota {dimensions = array<i32: 1>} : vector<16x32xi32>
    %cst_152 = arith.constant 0.000000e+00 : f32
    %119 = vector.broadcast %cst_152 : f32 to vector<16x32xf32>
    %c0_i32_153 = arith.constant 0 : i32
    %120 = vector.broadcast %c0_i32_153 : i32 to vector<16x32xi32>
    %121 = arith.cmpi sge, %117, %120 : vector<16x32xi32>
    %c8_i32_154 = arith.constant 8 : i32
    %122 = vector.broadcast %c8_i32_154 : i32 to vector<16x32xi32>
    %123 = arith.cmpi slt, %117, %122 : vector<16x32xi32>
    %124 = arith.andi %121, %123 : vector<16x32xi1>
    %125 = arith.extui %124 : vector<16x32xi1> to vector<16x32xi32>
    %126 = arith.sitofp %125 : vector<16x32xi32> to vector<16x32xf32>
    %c0_i32_155 = arith.constant 0 : i32
    %127 = vector.broadcast %c0_i32_155 : i32 to vector<16x32xi32>
    %128 = arith.cmpi sge, %118, %127 : vector<16x32xi32>
    %c8_i32_156 = arith.constant 8 : i32
    %129 = vector.broadcast %c8_i32_156 : i32 to vector<16x32xi32>
    %130 = arith.cmpi slt, %118, %129 : vector<16x32xi32>
    %131 = arith.andi %128, %130 : vector<16x32xi1>
    %132 = arith.extui %131 : vector<16x32xi1> to vector<16x32xi32>
    %133 = arith.sitofp %132 : vector<16x32xi32> to vector<16x32xf32>
    %134 = arith.mulf %87, %126 : vector<16x32xf32>
    %cst_157 = arith.constant dense<0.000000e+00> : vector<16x16xf32>
    %135 = tpu.matmul %134, %88, %cst_157 {dimension_numbers = #tpu.dot_dimension_numbers<[1], [1], [0], [0], [0, 0, 1, 0], [], []>} : vector<16x32xf32>, vector<16x32xf32>, vector<16x16xf32> -> vector<16x16xf32>
    %cst_158 = arith.constant 0.353553385 : f32
    %136 = vector.broadcast %cst_158 : f32 to vector<16x16xf32>
    %137 = arith.mulf %135, %136 : vector<16x16xf32>
    %cst_159 = arith.constant -1.000000e+30 : f32
    %138 = vector.broadcast %cst_159 : f32 to vector<16x16xf32>
    %139 = arith.select %116, %137, %138 : vector<16x16xi1>, vector<16x16xf32>
    %cst_160 = arith.constant dense<0xFF800000> : vector<16xf32>
    %140 = vector.multi_reduction <maximumf>, %139, %cst_160 [1] : vector<16x16xf32> to vector<16xf32>
    %141 = vector.shape_cast %140 : vector<16xf32> to vector<16x1xf32>
    %142 = vector.broadcast %141 : vector<16x1xf32> to vector<16x16xf32>
    %143 = arith.subf %139, %142 : vector<16x16xf32>
    %144 = math.exp %143 : vector<16x16xf32>
    %cst_161 = arith.constant dense<0.000000e+00> : vector<16xf32>
    %145 = vector.multi_reduction <add>, %144, %cst_161 [1] : vector<16x16xf32> to vector<16xf32>
    %146 = vector.shape_cast %145 : vector<16xf32> to vector<16x1xf32>
    %147 = vector.broadcast %146 : vector<16x1xf32> to vector<16x16xf32>
    %148 = arith.divf %144, %147 : vector<16x16xf32>
    %149 = arith.mulf %89, %133 : vector<16x32xf32>
    %cst_162 = arith.constant dense<0.000000e+00> : vector<16x32xf32>
    %150 = tpu.matmul %148, %149, %cst_162 {dimension_numbers = #tpu.dot_dimension_numbers<[1], [0], [0], [1], [0, 0, 1, 1], [], []>} : vector<16x16xf32>, vector<16x32xf32>, vector<16x32xf32> -> vector<16x32xf32>
    %151 = arith.addf %119, %150 : vector<16x32xf32>
    %c8_i32_163 = arith.constant 8 : i32
    %152 = vector.broadcast %c8_i32_163 : i32 to vector<16x32xi32>
    %153 = arith.cmpi sge, %117, %152 : vector<16x32xi32>
    %c16_i32_164 = arith.constant 16 : i32
    %154 = vector.broadcast %c16_i32_164 : i32 to vector<16x32xi32>
    %155 = arith.cmpi slt, %117, %154 : vector<16x32xi32>
    %156 = arith.andi %153, %155 : vector<16x32xi1>
    %157 = arith.extui %156 : vector<16x32xi1> to vector<16x32xi32>
    %158 = arith.sitofp %157 : vector<16x32xi32> to vector<16x32xf32>
    %c8_i32_165 = arith.constant 8 : i32
    %159 = vector.broadcast %c8_i32_165 : i32 to vector<16x32xi32>
    %160 = arith.cmpi sge, %118, %159 : vector<16x32xi32>
    %c16_i32_166 = arith.constant 16 : i32
    %161 = vector.broadcast %c16_i32_166 : i32 to vector<16x32xi32>
    %162 = arith.cmpi slt, %118, %161 : vector<16x32xi32>
    %163 = arith.andi %160, %162 : vector<16x32xi1>
    %164 = arith.extui %163 : vector<16x32xi1> to vector<16x32xi32>
    %165 = arith.sitofp %164 : vector<16x32xi32> to vector<16x32xf32>
    %166 = arith.mulf %87, %158 : vector<16x32xf32>
    %cst_167 = arith.constant dense<0.000000e+00> : vector<16x16xf32>
    %167 = tpu.matmul %166, %88, %cst_167 {dimension_numbers = #tpu.dot_dimension_numbers<[1], [1], [0], [0], [0, 0, 1, 0], [], []>} : vector<16x32xf32>, vector<16x32xf32>, vector<16x16xf32> -> vector<16x16xf32>
    %cst_168 = arith.constant 0.353553385 : f32
    %168 = vector.broadcast %cst_168 : f32 to vector<16x16xf32>
    %169 = arith.mulf %167, %168 : vector<16x16xf32>
    %cst_169 = arith.constant -1.000000e+30 : f32
    %170 = vector.broadcast %cst_169 : f32 to vector<16x16xf32>
    %171 = arith.select %116, %169, %170 : vector<16x16xi1>, vector<16x16xf32>
    %cst_170 = arith.constant dense<0xFF800000> : vector<16xf32>
    %172 = vector.multi_reduction <maximumf>, %171, %cst_170 [1] : vector<16x16xf32> to vector<16xf32>
    %173 = vector.shape_cast %172 : vector<16xf32> to vector<16x1xf32>
    %174 = vector.broadcast %173 : vector<16x1xf32> to vector<16x16xf32>
    %175 = arith.subf %171, %174 : vector<16x16xf32>
    %176 = math.exp %175 : vector<16x16xf32>
    %cst_171 = arith.constant dense<0.000000e+00> : vector<16xf32>
    %177 = vector.multi_reduction <add>, %176, %cst_171 [1] : vector<16x16xf32> to vector<16xf32>
    %178 = vector.shape_cast %177 : vector<16xf32> to vector<16x1xf32>
    %179 = vector.broadcast %178 : vector<16x1xf32> to vector<16x16xf32>
    %180 = arith.divf %176, %179 : vector<16x16xf32>
    %181 = arith.mulf %89, %165 : vector<16x32xf32>
    %cst_172 = arith.constant dense<0.000000e+00> : vector<16x32xf32>
    %182 = tpu.matmul %180, %181, %cst_172 {dimension_numbers = #tpu.dot_dimension_numbers<[1], [0], [0], [1], [0, 0, 1, 1], [], []>} : vector<16x16xf32>, vector<16x32xf32>, vector<16x32xf32> -> vector<16x32xf32>
    %183 = arith.addf %151, %182 : vector<16x32xf32>
    %c16_i32_173 = arith.constant 16 : i32
    %184 = vector.broadcast %c16_i32_173 : i32 to vector<16x32xi32>
    %185 = arith.cmpi sge, %117, %184 : vector<16x32xi32>
    %c24_i32 = arith.constant 24 : i32
    %186 = vector.broadcast %c24_i32 : i32 to vector<16x32xi32>
    %187 = arith.cmpi slt, %117, %186 : vector<16x32xi32>
    %188 = arith.andi %185, %187 : vector<16x32xi1>
    %189 = arith.extui %188 : vector<16x32xi1> to vector<16x32xi32>
    %190 = arith.sitofp %189 : vector<16x32xi32> to vector<16x32xf32>
    %c16_i32_174 = arith.constant 16 : i32
    %191 = vector.broadcast %c16_i32_174 : i32 to vector<16x32xi32>
    %192 = arith.cmpi sge, %118, %191 : vector<16x32xi32>
    %c24_i32_175 = arith.constant 24 : i32
    %193 = vector.broadcast %c24_i32_175 : i32 to vector<16x32xi32>
    %194 = arith.cmpi slt, %118, %193 : vector<16x32xi32>
    %195 = arith.andi %192, %194 : vector<16x32xi1>
    %196 = arith.extui %195 : vector<16x32xi1> to vector<16x32xi32>
    %197 = arith.sitofp %196 : vector<16x32xi32> to vector<16x32xf32>
    %198 = arith.mulf %87, %190 : vector<16x32xf32>
    %cst_176 = arith.constant dense<0.000000e+00> : vector<16x16xf32>
    %199 = tpu.matmul %198, %88, %cst_176 {dimension_numbers = #tpu.dot_dimension_numbers<[1], [1], [0], [0], [0, 0, 1, 0], [], []>} : vector<16x32xf32>, vector<16x32xf32>, vector<16x16xf32> -> vector<16x16xf32>
    %cst_177 = arith.constant 0.353553385 : f32
    %200 = vector.broadcast %cst_177 : f32 to vector<16x16xf32>
    %201 = arith.mulf %199, %200 : vector<16x16xf32>
    %cst_178 = arith.constant -1.000000e+30 : f32
    %202 = vector.broadcast %cst_178 : f32 to vector<16x16xf32>
    %203 = arith.select %116, %201, %202 : vector<16x16xi1>, vector<16x16xf32>
    %cst_179 = arith.constant dense<0xFF800000> : vector<16xf32>
    %204 = vector.multi_reduction <maximumf>, %203, %cst_179 [1] : vector<16x16xf32> to vector<16xf32>
    %205 = vector.shape_cast %204 : vector<16xf32> to vector<16x1xf32>
    %206 = vector.broadcast %205 : vector<16x1xf32> to vector<16x16xf32>
    %207 = arith.subf %203, %206 : vector<16x16xf32>
    %208 = math.exp %207 : vector<16x16xf32>
    %cst_180 = arith.constant dense<0.000000e+00> : vector<16xf32>
    %209 = vector.multi_reduction <add>, %208, %cst_180 [1] : vector<16x16xf32> to vector<16xf32>
    %210 = vector.shape_cast %209 : vector<16xf32> to vector<16x1xf32>
    %211 = vector.broadcast %210 : vector<16x1xf32> to vector<16x16xf32>
    %212 = arith.divf %208, %211 : vector<16x16xf32>
    %213 = arith.mulf %89, %197 : vector<16x32xf32>
    %cst_181 = arith.constant dense<0.000000e+00> : vector<16x32xf32>
    %214 = tpu.matmul %212, %213, %cst_181 {dimension_numbers = #tpu.dot_dimension_numbers<[1], [0], [0], [1], [0, 0, 1, 1], [], []>} : vector<16x16xf32>, vector<16x32xf32>, vector<16x32xf32> -> vector<16x32xf32>
    %215 = arith.addf %183, %214 : vector<16x32xf32>
    %c24_i32_182 = arith.constant 24 : i32
    %216 = vector.broadcast %c24_i32_182 : i32 to vector<16x32xi32>
    %217 = arith.cmpi sge, %117, %216 : vector<16x32xi32>
    %c32_i32 = arith.constant 32 : i32
    %218 = vector.broadcast %c32_i32 : i32 to vector<16x32xi32>
    %219 = arith.cmpi slt, %117, %218 : vector<16x32xi32>
    %220 = arith.andi %217, %219 : vector<16x32xi1>
    %221 = arith.extui %220 : vector<16x32xi1> to vector<16x32xi32>
    %222 = arith.sitofp %221 : vector<16x32xi32> to vector<16x32xf32>
    %c24_i32_183 = arith.constant 24 : i32
    %223 = vector.broadcast %c24_i32_183 : i32 to vector<16x32xi32>
    %224 = arith.cmpi sge, %118, %223 : vector<16x32xi32>
    %c32_i32_184 = arith.constant 32 : i32
    %225 = vector.broadcast %c32_i32_184 : i32 to vector<16x32xi32>
    %226 = arith.cmpi slt, %118, %225 : vector<16x32xi32>
    %227 = arith.andi %224, %226 : vector<16x32xi1>
    %228 = arith.extui %227 : vector<16x32xi1> to vector<16x32xi32>
    %229 = arith.sitofp %228 : vector<16x32xi32> to vector<16x32xf32>
    %230 = arith.mulf %87, %222 : vector<16x32xf32>
    %cst_185 = arith.constant dense<0.000000e+00> : vector<16x16xf32>
    %231 = tpu.matmul %230, %88, %cst_185 {dimension_numbers = #tpu.dot_dimension_numbers<[1], [1], [0], [0], [0, 0, 1, 0], [], []>} : vector<16x32xf32>, vector<16x32xf32>, vector<16x16xf32> -> vector<16x16xf32>
    %cst_186 = arith.constant 0.353553385 : f32
    %232 = vector.broadcast %cst_186 : f32 to vector<16x16xf32>
    %233 = arith.mulf %231, %232 : vector<16x16xf32>
    %cst_187 = arith.constant -1.000000e+30 : f32
    %234 = vector.broadcast %cst_187 : f32 to vector<16x16xf32>
    %235 = arith.select %116, %233, %234 : vector<16x16xi1>, vector<16x16xf32>
    %cst_188 = arith.constant dense<0xFF800000> : vector<16xf32>
    %236 = vector.multi_reduction <maximumf>, %235, %cst_188 [1] : vector<16x16xf32> to vector<16xf32>
    %237 = vector.shape_cast %236 : vector<16xf32> to vector<16x1xf32>
    %238 = vector.broadcast %237 : vector<16x1xf32> to vector<16x16xf32>
    %239 = arith.subf %235, %238 : vector<16x16xf32>
    %240 = math.exp %239 : vector<16x16xf32>
    %cst_189 = arith.constant dense<0.000000e+00> : vector<16xf32>
    %241 = vector.multi_reduction <add>, %240, %cst_189 [1] : vector<16x16xf32> to vector<16xf32>
    %242 = vector.shape_cast %241 : vector<16xf32> to vector<16x1xf32>
    %243 = vector.broadcast %242 : vector<16x1xf32> to vector<16x16xf32>
    %244 = arith.divf %240, %243 : vector<16x16xf32>
    %245 = arith.mulf %89, %229 : vector<16x32xf32>
    %cst_190 = arith.constant dense<0.000000e+00> : vector<16x32xf32>
    %246 = tpu.matmul %244, %245, %cst_190 {dimension_numbers = #tpu.dot_dimension_numbers<[1], [0], [0], [1], [0, 0, 1, 1], [], []>} : vector<16x16xf32>, vector<16x32xf32>, vector<16x32xf32> -> vector<16x32xf32>
    %247 = arith.addf %215, %246 : vector<16x32xf32>
    %cst_191 = arith.constant dense<0.000000e+00> : vector<16x32xf32>
    %248 = tpu.matmul %247, %14, %cst_191 {dimension_numbers = #tpu.dot_dimension_numbers<[1], [0], [0], [1], [0, 0, 1, 1], [], []>} : vector<16x32xf32>, vector<32x32xf32>, vector<16x32xf32> -> vector<16x32xf32>
    %249 = vector.broadcast %15 : vector<1x32xf32> to vector<16x32xf32>
    %250 = arith.addf %248, %249 : vector<16x32xf32>
    %251 = arith.addf %77, %250 : vector<16x32xf32>
    %cst_192 = arith.constant dense<0.000000e+00> : vector<16xf32>
    %252 = vector.multi_reduction <add>, %251, %cst_192 [1] : vector<16x32xf32> to vector<16xf32>
    %253 = vector.shape_cast %252 : vector<16xf32> to vector<16x1xf32>
    %cst_193 = arith.constant 3.200000e+01 : f32
    %254 = vector.broadcast %cst_193 : f32 to vector<16x1xf32>
    %255 = arith.divf %253, %254 : vector<16x1xf32>
    %256 = vector.broadcast %255 : vector<16x1xf32> to vector<16x32xf32>
    %257 = arith.subf %251, %256 : vector<16x32xf32>
    %258 = arith.mulf %257, %257 : vector<16x32xf32>
    %cst_194 = arith.constant dense<0.000000e+00> : vector<16xf32>
    %259 = vector.multi_reduction <add>, %258, %cst_194 [1] : vector<16x32xf32> to vector<16xf32>
    %260 = vector.shape_cast %259 : vector<16xf32> to vector<16x1xf32>
    %cst_195 = arith.constant 3.200000e+01 : f32
    %261 = vector.broadcast %cst_195 : f32 to vector<16x1xf32>
    %262 = arith.divf %260, %261 : vector<16x1xf32>
    %cst_196 = arith.constant 9.99999974E-6 : f32
    %263 = vector.broadcast %cst_196 : f32 to vector<16x1xf32>
    %264 = arith.addf %262, %263 : vector<16x1xf32>
    %265 = math.rsqrt %264 : vector<16x1xf32>
    %266 = vector.broadcast %265 : vector<16x1xf32> to vector<16x32xf32>
    %267 = arith.mulf %257, %266 : vector<16x32xf32>
    %268 = vector.broadcast %20 : vector<1x32xf32> to vector<16x32xf32>
    %269 = arith.mulf %267, %268 : vector<16x32xf32>
    %270 = vector.broadcast %21 : vector<1x32xf32> to vector<16x32xf32>
    %271 = arith.addf %269, %270 : vector<16x32xf32>
    %cst_197 = arith.constant dense<0.000000e+00> : vector<16x64xf32>
    %272 = tpu.matmul %271, %16, %cst_197 {dimension_numbers = #tpu.dot_dimension_numbers<[1], [0], [0], [1], [0, 0, 1, 1], [], []>} : vector<16x32xf32>, vector<32x64xf32>, vector<16x64xf32> -> vector<16x64xf32>
    %273 = vector.broadcast %17 : vector<1x64xf32> to vector<16x64xf32>
    %274 = arith.addf %272, %273 : vector<16x64xf32>
    %cst_198 = arith.constant 0.000000e+00 : f32
    %275 = vector.broadcast %cst_198 : f32 to vector<16x64xf32>
    %276 = arith.maximumf %274, %275 : vector<16x64xf32>
    %cst_199 = arith.constant dense<0.000000e+00> : vector<16x32xf32>
    %277 = tpu.matmul %276, %18, %cst_199 {dimension_numbers = #tpu.dot_dimension_numbers<[1], [0], [0], [1], [0, 0, 1, 1], [], []>} : vector<16x64xf32>, vector<64x32xf32>, vector<16x32xf32> -> vector<16x32xf32>
    %278 = vector.broadcast %19 : vector<1x32xf32> to vector<16x32xf32>
    %279 = arith.addf %277, %278 : vector<16x32xf32>
    %280 = arith.addf %271, %279 : vector<16x32xf32>
    %cst_200 = arith.constant dense<0.000000e+00> : vector<16xf32>
    %281 = vector.multi_reduction <add>, %280, %cst_200 [1] : vector<16x32xf32> to vector<16xf32>
    %282 = vector.shape_cast %281 : vector<16xf32> to vector<16x1xf32>
    %cst_201 = arith.constant 3.200000e+01 : f32
    %283 = vector.broadcast %cst_201 : f32 to vector<16x1xf32>
    %284 = arith.divf %282, %283 : vector<16x1xf32>
    %285 = vector.broadcast %284 : vector<16x1xf32> to vector<16x32xf32>
    %286 = arith.subf %280, %285 : vector<16x32xf32>
    %287 = arith.mulf %286, %286 : vector<16x32xf32>
    %cst_202 = arith.constant dense<0.000000e+00> : vector<16xf32>
    %288 = vector.multi_reduction <add>, %287, %cst_202 [1] : vector<16x32xf32> to vector<16xf32>
    %289 = vector.shape_cast %288 : vector<16xf32> to vector<16x1xf32>
    %cst_203 = arith.constant 3.200000e+01 : f32
    %290 = vector.broadcast %cst_203 : f32 to vector<16x1xf32>
    %291 = arith.divf %289, %290 : vector<16x1xf32>
    %cst_204 = arith.constant 9.99999974E-6 : f32
    %292 = vector.broadcast %cst_204 : f32 to vector<16x1xf32>
    %293 = arith.addf %291, %292 : vector<16x1xf32>
    %294 = math.rsqrt %293 : vector<16x1xf32>
    %295 = vector.broadcast %294 : vector<16x1xf32> to vector<16x32xf32>
    %296 = arith.mulf %286, %295 : vector<16x32xf32>
    %297 = vector.broadcast %22 : vector<1x32xf32> to vector<16x32xf32>
    %298 = arith.mulf %296, %297 : vector<16x32xf32>
    %299 = vector.broadcast %23 : vector<1x32xf32> to vector<16x32xf32>
    %300 = arith.addf %298, %299 : vector<16x32xf32>
    %cst_205 = arith.constant dense<0.000000e+00> : vector<16x96xf32>
    %301 = tpu.matmul %300, %24, %cst_205 {dimension_numbers = #tpu.dot_dimension_numbers<[1], [0], [0], [1], [0, 0, 1, 1], [], []>} : vector<16x32xf32>, vector<32x96xf32>, vector<16x96xf32> -> vector<16x96xf32>
    %302 = vector.broadcast %25 : vector<1x96xf32> to vector<16x96xf32>
    %303 = arith.addf %301, %302 : vector<16x96xf32>
    %304 = vector.extract_strided_slice %303 {offsets = [0, 0], sizes = [16, 32], strides = [1, 1]} : vector<16x96xf32> to vector<16x32xf32>
    %305 = vector.extract_strided_slice %303 {offsets = [0, 32], sizes = [16, 32], strides = [1, 1]} : vector<16x96xf32> to vector<16x32xf32>
    %306 = vector.extract_strided_slice %303 {offsets = [0, 64], sizes = [16, 32], strides = [1, 1]} : vector<16x96xf32> to vector<16x32xf32>
    %307 = tpu.iota {dimensions = array<i32: 0>} : vector<16x16xi32>
    %308 = tpu.iota {dimensions = array<i32: 1>} : vector<16x16xi32>
    %false_206 = arith.constant false
    %309 = vector.broadcast %false_206 : i1 to vector<16x16xi1>
    %c0_i32_207 = arith.constant 0 : i32
    %310 = vector.broadcast %c0_i32_207 : i32 to vector<16x16xi32>
    %311 = arith.cmpi sge, %307, %310 : vector<16x16xi32>
    %c8_i32_208 = arith.constant 8 : i32
    %312 = vector.broadcast %c8_i32_208 : i32 to vector<16x16xi32>
    %313 = arith.cmpi slt, %307, %312 : vector<16x16xi32>
    %314 = arith.andi %311, %313 : vector<16x16xi1>
    %c0_i32_209 = arith.constant 0 : i32
    %315 = vector.broadcast %c0_i32_209 : i32 to vector<16x16xi32>
    %316 = arith.cmpi sge, %308, %315 : vector<16x16xi32>
    %317 = arith.andi %314, %316 : vector<16x16xi1>
    %c8_i32_210 = arith.constant 8 : i32
    %318 = vector.broadcast %c8_i32_210 : i32 to vector<16x16xi32>
    %319 = arith.cmpi slt, %308, %318 : vector<16x16xi32>
    %320 = arith.andi %317, %319 : vector<16x16xi1>
    %321 = arith.ori %309, %320 : vector<16x16xi1>
    %c8_i32_211 = arith.constant 8 : i32
    %322 = vector.broadcast %c8_i32_211 : i32 to vector<16x16xi32>
    %323 = arith.cmpi sge, %307, %322 : vector<16x16xi32>
    %c16_i32_212 = arith.constant 16 : i32
    %324 = vector.broadcast %c16_i32_212 : i32 to vector<16x16xi32>
    %325 = arith.cmpi slt, %307, %324 : vector<16x16xi32>
    %326 = arith.andi %323, %325 : vector<16x16xi1>
    %c8_i32_213 = arith.constant 8 : i32
    %327 = vector.broadcast %c8_i32_213 : i32 to vector<16x16xi32>
    %328 = arith.cmpi sge, %308, %327 : vector<16x16xi32>
    %329 = arith.andi %326, %328 : vector<16x16xi1>
    %c16_i32_214 = arith.constant 16 : i32
    %330 = vector.broadcast %c16_i32_214 : i32 to vector<16x16xi32>
    %331 = arith.cmpi slt, %308, %330 : vector<16x16xi32>
    %332 = arith.andi %329, %331 : vector<16x16xi1>
    %333 = arith.ori %321, %332 : vector<16x16xi1>
    %334 = tpu.iota {dimensions = array<i32: 1>} : vector<16x32xi32>
    %335 = tpu.iota {dimensions = array<i32: 1>} : vector<16x32xi32>
    %cst_215 = arith.constant 0.000000e+00 : f32
    %336 = vector.broadcast %cst_215 : f32 to vector<16x32xf32>
    %c0_i32_216 = arith.constant 0 : i32
    %337 = vector.broadcast %c0_i32_216 : i32 to vector<16x32xi32>
    %338 = arith.cmpi sge, %334, %337 : vector<16x32xi32>
    %c8_i32_217 = arith.constant 8 : i32
    %339 = vector.broadcast %c8_i32_217 : i32 to vector<16x32xi32>
    %340 = arith.cmpi slt, %334, %339 : vector<16x32xi32>
    %341 = arith.andi %338, %340 : vector<16x32xi1>
    %342 = arith.extui %341 : vector<16x32xi1> to vector<16x32xi32>
    %343 = arith.sitofp %342 : vector<16x32xi32> to vector<16x32xf32>
    %c0_i32_218 = arith.constant 0 : i32
    %344 = vector.broadcast %c0_i32_218 : i32 to vector<16x32xi32>
    %345 = arith.cmpi sge, %335, %344 : vector<16x32xi32>
    %c8_i32_219 = arith.constant 8 : i32
    %346 = vector.broadcast %c8_i32_219 : i32 to vector<16x32xi32>
    %347 = arith.cmpi slt, %335, %346 : vector<16x32xi32>
    %348 = arith.andi %345, %347 : vector<16x32xi1>
    %349 = arith.extui %348 : vector<16x32xi1> to vector<16x32xi32>
    %350 = arith.sitofp %349 : vector<16x32xi32> to vector<16x32xf32>
    %351 = arith.mulf %304, %343 : vector<16x32xf32>
    %cst_220 = arith.constant dense<0.000000e+00> : vector<16x16xf32>
    %352 = tpu.matmul %351, %305, %cst_220 {dimension_numbers = #tpu.dot_dimension_numbers<[1], [1], [0], [0], [0, 0, 1, 0], [], []>} : vector<16x32xf32>, vector<16x32xf32>, vector<16x16xf32> -> vector<16x16xf32>
    %cst_221 = arith.constant 0.353553385 : f32
    %353 = vector.broadcast %cst_221 : f32 to vector<16x16xf32>
    %354 = arith.mulf %352, %353 : vector<16x16xf32>
    %cst_222 = arith.constant -1.000000e+30 : f32
    %355 = vector.broadcast %cst_222 : f32 to vector<16x16xf32>
    %356 = arith.select %333, %354, %355 : vector<16x16xi1>, vector<16x16xf32>
    %cst_223 = arith.constant dense<0xFF800000> : vector<16xf32>
    %357 = vector.multi_reduction <maximumf>, %356, %cst_223 [1] : vector<16x16xf32> to vector<16xf32>
    %358 = vector.shape_cast %357 : vector<16xf32> to vector<16x1xf32>
    %359 = vector.broadcast %358 : vector<16x1xf32> to vector<16x16xf32>
    %360 = arith.subf %356, %359 : vector<16x16xf32>
    %361 = math.exp %360 : vector<16x16xf32>
    %cst_224 = arith.constant dense<0.000000e+00> : vector<16xf32>
    %362 = vector.multi_reduction <add>, %361, %cst_224 [1] : vector<16x16xf32> to vector<16xf32>
    %363 = vector.shape_cast %362 : vector<16xf32> to vector<16x1xf32>
    %364 = vector.broadcast %363 : vector<16x1xf32> to vector<16x16xf32>
    %365 = arith.divf %361, %364 : vector<16x16xf32>
    %366 = arith.mulf %306, %350 : vector<16x32xf32>
    %cst_225 = arith.constant dense<0.000000e+00> : vector<16x32xf32>
    %367 = tpu.matmul %365, %366, %cst_225 {dimension_numbers = #tpu.dot_dimension_numbers<[1], [0], [0], [1], [0, 0, 1, 1], [], []>} : vector<16x16xf32>, vector<16x32xf32>, vector<16x32xf32> -> vector<16x32xf32>
    %368 = arith.addf %336, %367 : vector<16x32xf32>
    %c8_i32_226 = arith.constant 8 : i32
    %369 = vector.broadcast %c8_i32_226 : i32 to vector<16x32xi32>
    %370 = arith.cmpi sge, %334, %369 : vector<16x32xi32>
    %c16_i32_227 = arith.constant 16 : i32
    %371 = vector.broadcast %c16_i32_227 : i32 to vector<16x32xi32>
    %372 = arith.cmpi slt, %334, %371 : vector<16x32xi32>
    %373 = arith.andi %370, %372 : vector<16x32xi1>
    %374 = arith.extui %373 : vector<16x32xi1> to vector<16x32xi32>
    %375 = arith.sitofp %374 : vector<16x32xi32> to vector<16x32xf32>
    %c8_i32_228 = arith.constant 8 : i32
    %376 = vector.broadcast %c8_i32_228 : i32 to vector<16x32xi32>
    %377 = arith.cmpi sge, %335, %376 : vector<16x32xi32>
    %c16_i32_229 = arith.constant 16 : i32
    %378 = vector.broadcast %c16_i32_229 : i32 to vector<16x32xi32>
    %379 = arith.cmpi slt, %335, %378 : vector<16x32xi32>
    %380 = arith.andi %377, %379 : vector<16x32xi1>
    %381 = arith.extui %380 : vector<16x32xi1> to vector<16x32xi32>
    %382 = arith.sitofp %381 : vector<16x32xi32> to vector<16x32xf32>
    %383 = arith.mulf %304, %375 : vector<16x32xf32>
    %cst_230 = arith.constant dense<0.000000e+00> : vector<16x16xf32>
    %384 = tpu.matmul %383, %305, %cst_230 {dimension_numbers = #tpu.dot_dimension_numbers<[1], [1], [0], [0], [0, 0, 1, 0], [], []>} : vector<16x32xf32>, vector<16x32xf32>, vector<16x16xf32> -> vector<16x16xf32>
    %cst_231 = arith.constant 0.353553385 : f32
    %385 = vector.broadcast %cst_231 : f32 to vector<16x16xf32>
    %386 = arith.mulf %384, %385 : vector<16x16xf32>
    %cst_232 = arith.constant -1.000000e+30 : f32
    %387 = vector.broadcast %cst_232 : f32 to vector<16x16xf32>
    %388 = arith.select %333, %386, %387 : vector<16x16xi1>, vector<16x16xf32>
    %cst_233 = arith.constant dense<0xFF800000> : vector<16xf32>
    %389 = vector.multi_reduction <maximumf>, %388, %cst_233 [1] : vector<16x16xf32> to vector<16xf32>
    %390 = vector.shape_cast %389 : vector<16xf32> to vector<16x1xf32>
    %391 = vector.broadcast %390 : vector<16x1xf32> to vector<16x16xf32>
    %392 = arith.subf %388, %391 : vector<16x16xf32>
    %393 = math.exp %392 : vector<16x16xf32>
    %cst_234 = arith.constant dense<0.000000e+00> : vector<16xf32>
    %394 = vector.multi_reduction <add>, %393, %cst_234 [1] : vector<16x16xf32> to vector<16xf32>
    %395 = vector.shape_cast %394 : vector<16xf32> to vector<16x1xf32>
    %396 = vector.broadcast %395 : vector<16x1xf32> to vector<16x16xf32>
    %397 = arith.divf %393, %396 : vector<16x16xf32>
    %398 = arith.mulf %306, %382 : vector<16x32xf32>
    %cst_235 = arith.constant dense<0.000000e+00> : vector<16x32xf32>
    %399 = tpu.matmul %397, %398, %cst_235 {dimension_numbers = #tpu.dot_dimension_numbers<[1], [0], [0], [1], [0, 0, 1, 1], [], []>} : vector<16x16xf32>, vector<16x32xf32>, vector<16x32xf32> -> vector<16x32xf32>
    %400 = arith.addf %368, %399 : vector<16x32xf32>
    %c16_i32_236 = arith.constant 16 : i32
    %401 = vector.broadcast %c16_i32_236 : i32 to vector<16x32xi32>
    %402 = arith.cmpi sge, %334, %401 : vector<16x32xi32>
    %c24_i32_237 = arith.constant 24 : i32
    %403 = vector.broadcast %c24_i32_237 : i32 to vector<16x32xi32>
    %404 = arith.cmpi slt, %334, %403 : vector<16x32xi32>
    %405 = arith.andi %402, %404 : vector<16x32xi1>
    %406 = arith.extui %405 : vector<16x32xi1> to vector<16x32xi32>
    %407 = arith.sitofp %406 : vector<16x32xi32> to vector<16x32xf32>
    %c16_i32_238 = arith.constant 16 : i32
    %408 = vector.broadcast %c16_i32_238 : i32 to vector<16x32xi32>
    %409 = arith.cmpi sge, %335, %408 : vector<16x32xi32>
    %c24_i32_239 = arith.constant 24 : i32
    %410 = vector.broadcast %c24_i32_239 : i32 to vector<16x32xi32>
    %411 = arith.cmpi slt, %335, %410 : vector<16x32xi32>
    %412 = arith.andi %409, %411 : vector<16x32xi1>
    %413 = arith.extui %412 : vector<16x32xi1> to vector<16x32xi32>
    %414 = arith.sitofp %413 : vector<16x32xi32> to vector<16x32xf32>
    %415 = arith.mulf %304, %407 : vector<16x32xf32>
    %cst_240 = arith.constant dense<0.000000e+00> : vector<16x16xf32>
    %416 = tpu.matmul %415, %305, %cst_240 {dimension_numbers = #tpu.dot_dimension_numbers<[1], [1], [0], [0], [0, 0, 1, 0], [], []>} : vector<16x32xf32>, vector<16x32xf32>, vector<16x16xf32> -> vector<16x16xf32>
    %cst_241 = arith.constant 0.353553385 : f32
    %417 = vector.broadcast %cst_241 : f32 to vector<16x16xf32>
    %418 = arith.mulf %416, %417 : vector<16x16xf32>
    %cst_242 = arith.constant -1.000000e+30 : f32
    %419 = vector.broadcast %cst_242 : f32 to vector<16x16xf32>
    %420 = arith.select %333, %418, %419 : vector<16x16xi1>, vector<16x16xf32>
    %cst_243 = arith.constant dense<0xFF800000> : vector<16xf32>
    %421 = vector.multi_reduction <maximumf>, %420, %cst_243 [1] : vector<16x16xf32> to vector<16xf32>
    %422 = vector.shape_cast %421 : vector<16xf32> to vector<16x1xf32>
    %423 = vector.broadcast %422 : vector<16x1xf32> to vector<16x16xf32>
    %424 = arith.subf %420, %423 : vector<16x16xf32>
    %425 = math.exp %424 : vector<16x16xf32>
    %cst_244 = arith.constant dense<0.000000e+00> : vector<16xf32>
    %426 = vector.multi_reduction <add>, %425, %cst_244 [1] : vector<16x16xf32> to vector<16xf32>
    %427 = vector.shape_cast %426 : vector<16xf32> to vector<16x1xf32>
    %428 = vector.broadcast %427 : vector<16x1xf32> to vector<16x16xf32>
    %429 = arith.divf %425, %428 : vector<16x16xf32>
    %430 = arith.mulf %306, %414 : vector<16x32xf32>
    %cst_245 = arith.constant dense<0.000000e+00> : vector<16x32xf32>
    %431 = tpu.matmul %429, %430, %cst_245 {dimension_numbers = #tpu.dot_dimension_numbers<[1], [0], [0], [1], [0, 0, 1, 1], [], []>} : vector<16x16xf32>, vector<16x32xf32>, vector<16x32xf32> -> vector<16x32xf32>
    %432 = arith.addf %400, %431 : vector<16x32xf32>
    %c24_i32_246 = arith.constant 24 : i32
    %433 = vector.broadcast %c24_i32_246 : i32 to vector<16x32xi32>
    %434 = arith.cmpi sge, %334, %433 : vector<16x32xi32>
    %c32_i32_247 = arith.constant 32 : i32
    %435 = vector.broadcast %c32_i32_247 : i32 to vector<16x32xi32>
    %436 = arith.cmpi slt, %334, %435 : vector<16x32xi32>
    %437 = arith.andi %434, %436 : vector<16x32xi1>
    %438 = arith.extui %437 : vector<16x32xi1> to vector<16x32xi32>
    %439 = arith.sitofp %438 : vector<16x32xi32> to vector<16x32xf32>
    %c24_i32_248 = arith.constant 24 : i32
    %440 = vector.broadcast %c24_i32_248 : i32 to vector<16x32xi32>
    %441 = arith.cmpi sge, %335, %440 : vector<16x32xi32>
    %c32_i32_249 = arith.constant 32 : i32
    %442 = vector.broadcast %c32_i32_249 : i32 to vector<16x32xi32>
    %443 = arith.cmpi slt, %335, %442 : vector<16x32xi32>
    %444 = arith.andi %441, %443 : vector<16x32xi1>
    %445 = arith.extui %444 : vector<16x32xi1> to vector<16x32xi32>
    %446 = arith.sitofp %445 : vector<16x32xi32> to vector<16x32xf32>
    %447 = arith.mulf %304, %439 : vector<16x32xf32>
    %cst_250 = arith.constant dense<0.000000e+00> : vector<16x16xf32>
    %448 = tpu.matmul %447, %305, %cst_250 {dimension_numbers = #tpu.dot_dimension_numbers<[1], [1], [0], [0], [0, 0, 1, 0], [], []>} : vector<16x32xf32>, vector<16x32xf32>, vector<16x16xf32> -> vector<16x16xf32>
    %cst_251 = arith.constant 0.353553385 : f32
    %449 = vector.broadcast %cst_251 : f32 to vector<16x16xf32>
    %450 = arith.mulf %448, %449 : vector<16x16xf32>
    %cst_252 = arith.constant -1.000000e+30 : f32
    %451 = vector.broadcast %cst_252 : f32 to vector<16x16xf32>
    %452 = arith.select %333, %450, %451 : vector<16x16xi1>, vector<16x16xf32>
    %cst_253 = arith.constant dense<0xFF800000> : vector<16xf32>
    %453 = vector.multi_reduction <maximumf>, %452, %cst_253 [1] : vector<16x16xf32> to vector<16xf32>
    %454 = vector.shape_cast %453 : vector<16xf32> to vector<16x1xf32>
    %455 = vector.broadcast %454 : vector<16x1xf32> to vector<16x16xf32>
    %456 = arith.subf %452, %455 : vector<16x16xf32>
    %457 = math.exp %456 : vector<16x16xf32>
    %cst_254 = arith.constant dense<0.000000e+00> : vector<16xf32>
    %458 = vector.multi_reduction <add>, %457, %cst_254 [1] : vector<16x16xf32> to vector<16xf32>
    %459 = vector.shape_cast %458 : vector<16xf32> to vector<16x1xf32>
    %460 = vector.broadcast %459 : vector<16x1xf32> to vector<16x16xf32>
    %461 = arith.divf %457, %460 : vector<16x16xf32>
    %462 = arith.mulf %306, %446 : vector<16x32xf32>
    %cst_255 = arith.constant dense<0.000000e+00> : vector<16x32xf32>
    %463 = tpu.matmul %461, %462, %cst_255 {dimension_numbers = #tpu.dot_dimension_numbers<[1], [0], [0], [1], [0, 0, 1, 1], [], []>} : vector<16x16xf32>, vector<16x32xf32>, vector<16x32xf32> -> vector<16x32xf32>
    %464 = arith.addf %432, %463 : vector<16x32xf32>
    %cst_256 = arith.constant dense<0.000000e+00> : vector<16x32xf32>
    %465 = tpu.matmul %464, %26, %cst_256 {dimension_numbers = #tpu.dot_dimension_numbers<[1], [0], [0], [1], [0, 0, 1, 1], [], []>} : vector<16x32xf32>, vector<32x32xf32>, vector<16x32xf32> -> vector<16x32xf32>
    %466 = vector.broadcast %27 : vector<1x32xf32> to vector<16x32xf32>
    %467 = arith.addf %465, %466 : vector<16x32xf32>
    %468 = arith.addf %300, %467 : vector<16x32xf32>
    %cst_257 = arith.constant dense<0.000000e+00> : vector<16xf32>
    %469 = vector.multi_reduction <add>, %468, %cst_257 [1] : vector<16x32xf32> to vector<16xf32>
    %470 = vector.shape_cast %469 : vector<16xf32> to vector<16x1xf32>
    %cst_258 = arith.constant 3.200000e+01 : f32
    %471 = vector.broadcast %cst_258 : f32 to vector<16x1xf32>
    %472 = arith.divf %470, %471 : vector<16x1xf32>
    %473 = vector.broadcast %472 : vector<16x1xf32> to vector<16x32xf32>
    %474 = arith.subf %468, %473 : vector<16x32xf32>
    %475 = arith.mulf %474, %474 : vector<16x32xf32>
    %cst_259 = arith.constant dense<0.000000e+00> : vector<16xf32>
    %476 = vector.multi_reduction <add>, %475, %cst_259 [1] : vector<16x32xf32> to vector<16xf32>
    %477 = vector.shape_cast %476 : vector<16xf32> to vector<16x1xf32>
    %cst_260 = arith.constant 3.200000e+01 : f32
    %478 = vector.broadcast %cst_260 : f32 to vector<16x1xf32>
    %479 = arith.divf %477, %478 : vector<16x1xf32>
    %cst_261 = arith.constant 9.99999974E-6 : f32
    %480 = vector.broadcast %cst_261 : f32 to vector<16x1xf32>
    %481 = arith.addf %479, %480 : vector<16x1xf32>
    %482 = math.rsqrt %481 : vector<16x1xf32>
    %483 = vector.broadcast %482 : vector<16x1xf32> to vector<16x32xf32>
    %484 = arith.mulf %474, %483 : vector<16x32xf32>
    %485 = vector.broadcast %32 : vector<1x32xf32> to vector<16x32xf32>
    %486 = arith.mulf %484, %485 : vector<16x32xf32>
    %487 = vector.broadcast %33 : vector<1x32xf32> to vector<16x32xf32>
    %488 = arith.addf %486, %487 : vector<16x32xf32>
    %cst_262 = arith.constant dense<0.000000e+00> : vector<16x64xf32>
    %489 = tpu.matmul %488, %28, %cst_262 {dimension_numbers = #tpu.dot_dimension_numbers<[1], [0], [0], [1], [0, 0, 1, 1], [], []>} : vector<16x32xf32>, vector<32x64xf32>, vector<16x64xf32> -> vector<16x64xf32>
    %490 = vector.broadcast %29 : vector<1x64xf32> to vector<16x64xf32>
    %491 = arith.addf %489, %490 : vector<16x64xf32>
    %cst_263 = arith.constant 0.000000e+00 : f32
    %492 = vector.broadcast %cst_263 : f32 to vector<16x64xf32>
    %493 = arith.maximumf %491, %492 : vector<16x64xf32>
    %cst_264 = arith.constant dense<0.000000e+00> : vector<16x32xf32>
    %494 = tpu.matmul %493, %30, %cst_264 {dimension_numbers = #tpu.dot_dimension_numbers<[1], [0], [0], [1], [0, 0, 1, 1], [], []>} : vector<16x64xf32>, vector<64x32xf32>, vector<16x32xf32> -> vector<16x32xf32>
    %495 = vector.broadcast %31 : vector<1x32xf32> to vector<16x32xf32>
    %496 = arith.addf %494, %495 : vector<16x32xf32>
    %497 = arith.addf %488, %496 : vector<16x32xf32>
    %cst_265 = arith.constant dense<0.000000e+00> : vector<16xf32>
    %498 = vector.multi_reduction <add>, %497, %cst_265 [1] : vector<16x32xf32> to vector<16xf32>
    %499 = vector.shape_cast %498 : vector<16xf32> to vector<16x1xf32>
    %cst_266 = arith.constant 3.200000e+01 : f32
    %500 = vector.broadcast %cst_266 : f32 to vector<16x1xf32>
    %501 = arith.divf %499, %500 : vector<16x1xf32>
    %502 = vector.broadcast %501 : vector<16x1xf32> to vector<16x32xf32>
    %503 = arith.subf %497, %502 : vector<16x32xf32>
    %504 = arith.mulf %503, %503 : vector<16x32xf32>
    %cst_267 = arith.constant dense<0.000000e+00> : vector<16xf32>
    %505 = vector.multi_reduction <add>, %504, %cst_267 [1] : vector<16x32xf32> to vector<16xf32>
    %506 = vector.shape_cast %505 : vector<16xf32> to vector<16x1xf32>
    %cst_268 = arith.constant 3.200000e+01 : f32
    %507 = vector.broadcast %cst_268 : f32 to vector<16x1xf32>
    %508 = arith.divf %506, %507 : vector<16x1xf32>
    %cst_269 = arith.constant 9.99999974E-6 : f32
    %509 = vector.broadcast %cst_269 : f32 to vector<16x1xf32>
    %510 = arith.addf %508, %509 : vector<16x1xf32>
    %511 = math.rsqrt %510 : vector<16x1xf32>
    %512 = vector.broadcast %511 : vector<16x1xf32> to vector<16x32xf32>
    %513 = arith.mulf %503, %512 : vector<16x32xf32>
    %514 = vector.broadcast %34 : vector<1x32xf32> to vector<16x32xf32>
    %515 = arith.mulf %513, %514 : vector<16x32xf32>
    %516 = vector.broadcast %35 : vector<1x32xf32> to vector<16x32xf32>
    %517 = arith.addf %515, %516 : vector<16x32xf32>
    %cst_270 = arith.constant dense<0.000000e+00> : vector<16xf32>
    %518 = vector.multi_reduction <add>, %517, %cst_270 [1] : vector<16x32xf32> to vector<16xf32>
    %519 = vector.shape_cast %518 : vector<16xf32> to vector<16x1xf32>
    %cst_271 = arith.constant 3.200000e+01 : f32
    %520 = vector.broadcast %cst_271 : f32 to vector<16x1xf32>
    %521 = arith.divf %519, %520 : vector<16x1xf32>
    %522 = vector.broadcast %521 : vector<16x1xf32> to vector<16x32xf32>
    %523 = arith.subf %517, %522 : vector<16x32xf32>
    %524 = arith.mulf %523, %523 : vector<16x32xf32>
    %cst_272 = arith.constant dense<0.000000e+00> : vector<16xf32>
    %525 = vector.multi_reduction <add>, %524, %cst_272 [1] : vector<16x32xf32> to vector<16xf32>
    %526 = vector.shape_cast %525 : vector<16xf32> to vector<16x1xf32>
    %cst_273 = arith.constant 3.200000e+01 : f32
    %527 = vector.broadcast %cst_273 : f32 to vector<16x1xf32>
    %528 = arith.divf %526, %527 : vector<16x1xf32>
    %cst_274 = arith.constant 9.99999974E-6 : f32
    %529 = vector.broadcast %cst_274 : f32 to vector<16x1xf32>
    %530 = arith.addf %528, %529 : vector<16x1xf32>
    %531 = math.rsqrt %530 : vector<16x1xf32>
    %532 = vector.broadcast %531 : vector<16x1xf32> to vector<16x32xf32>
    %533 = arith.mulf %523, %532 : vector<16x32xf32>
    %534 = vector.broadcast %8 : vector<1x32xf32> to vector<16x32xf32>
    %535 = arith.mulf %533, %534 : vector<16x32xf32>
    %536 = vector.broadcast %9 : vector<1x32xf32> to vector<16x32xf32>
    %537 = arith.addf %535, %536 : vector<16x32xf32>
    %cst_275 = arith.constant dense<0.000000e+00> : vector<14x96xf32>
    %538 = tpu.matmul %83, %36, %cst_275 {dimension_numbers = #tpu.dot_dimension_numbers<[1], [0], [0], [1], [0, 0, 1, 1], [], []>} : vector<14x32xf32>, vector<32x96xf32>, vector<14x96xf32> -> vector<14x96xf32>
    %539 = vector.broadcast %37 : vector<1x96xf32> to vector<14x96xf32>
    %540 = arith.addf %538, %539 : vector<14x96xf32>
    %541 = vector.extract_strided_slice %540 {offsets = [0, 0], sizes = [14, 32], strides = [1, 1]} : vector<14x96xf32> to vector<14x32xf32>
    %542 = vector.extract_strided_slice %540 {offsets = [0, 32], sizes = [14, 32], strides = [1, 1]} : vector<14x96xf32> to vector<14x32xf32>
    %543 = vector.extract_strided_slice %540 {offsets = [0, 64], sizes = [14, 32], strides = [1, 1]} : vector<14x96xf32> to vector<14x32xf32>
    %544 = tpu.iota {dimensions = array<i32: 0>} : vector<14x14xi32>
    %545 = tpu.iota {dimensions = array<i32: 1>} : vector<14x14xi32>
    %false_276 = arith.constant false
    %546 = vector.broadcast %false_276 : i1 to vector<14x14xi1>
    %c0_i32_277 = arith.constant 0 : i32
    %547 = vector.broadcast %c0_i32_277 : i32 to vector<14x14xi32>
    %548 = arith.cmpi sge, %544, %547 : vector<14x14xi32>
    %c7_i32 = arith.constant 7 : i32
    %549 = vector.broadcast %c7_i32 : i32 to vector<14x14xi32>
    %550 = arith.cmpi slt, %544, %549 : vector<14x14xi32>
    %551 = arith.andi %548, %550 : vector<14x14xi1>
    %c0_i32_278 = arith.constant 0 : i32
    %552 = vector.broadcast %c0_i32_278 : i32 to vector<14x14xi32>
    %553 = arith.cmpi sge, %545, %552 : vector<14x14xi32>
    %554 = arith.andi %551, %553 : vector<14x14xi1>
    %c7_i32_279 = arith.constant 7 : i32
    %555 = vector.broadcast %c7_i32_279 : i32 to vector<14x14xi32>
    %556 = arith.cmpi slt, %545, %555 : vector<14x14xi32>
    %557 = arith.andi %554, %556 : vector<14x14xi1>
    %558 = arith.ori %546, %557 : vector<14x14xi1>
    %c7_i32_280 = arith.constant 7 : i32
    %559 = vector.broadcast %c7_i32_280 : i32 to vector<14x14xi32>
    %560 = arith.cmpi sge, %544, %559 : vector<14x14xi32>
    %c14_i32 = arith.constant 14 : i32
    %561 = vector.broadcast %c14_i32 : i32 to vector<14x14xi32>
    %562 = arith.cmpi slt, %544, %561 : vector<14x14xi32>
    %563 = arith.andi %560, %562 : vector<14x14xi1>
    %c7_i32_281 = arith.constant 7 : i32
    %564 = vector.broadcast %c7_i32_281 : i32 to vector<14x14xi32>
    %565 = arith.cmpi sge, %545, %564 : vector<14x14xi32>
    %566 = arith.andi %563, %565 : vector<14x14xi1>
    %c14_i32_282 = arith.constant 14 : i32
    %567 = vector.broadcast %c14_i32_282 : i32 to vector<14x14xi32>
    %568 = arith.cmpi slt, %545, %567 : vector<14x14xi32>
    %569 = arith.andi %566, %568 : vector<14x14xi1>
    %570 = arith.ori %558, %569 : vector<14x14xi1>
    %571 = tpu.iota {dimensions = array<i32: 1>} : vector<14x32xi32>
    %572 = tpu.iota {dimensions = array<i32: 1>} : vector<14x32xi32>
    %cst_283 = arith.constant 0.000000e+00 : f32
    %573 = vector.broadcast %cst_283 : f32 to vector<14x32xf32>
    %c0_i32_284 = arith.constant 0 : i32
    %574 = vector.broadcast %c0_i32_284 : i32 to vector<14x32xi32>
    %575 = arith.cmpi sge, %571, %574 : vector<14x32xi32>
    %c8_i32_285 = arith.constant 8 : i32
    %576 = vector.broadcast %c8_i32_285 : i32 to vector<14x32xi32>
    %577 = arith.cmpi slt, %571, %576 : vector<14x32xi32>
    %578 = arith.andi %575, %577 : vector<14x32xi1>
    %579 = arith.extui %578 : vector<14x32xi1> to vector<14x32xi32>
    %580 = arith.sitofp %579 : vector<14x32xi32> to vector<14x32xf32>
    %c0_i32_286 = arith.constant 0 : i32
    %581 = vector.broadcast %c0_i32_286 : i32 to vector<14x32xi32>
    %582 = arith.cmpi sge, %572, %581 : vector<14x32xi32>
    %c8_i32_287 = arith.constant 8 : i32
    %583 = vector.broadcast %c8_i32_287 : i32 to vector<14x32xi32>
    %584 = arith.cmpi slt, %572, %583 : vector<14x32xi32>
    %585 = arith.andi %582, %584 : vector<14x32xi1>
    %586 = arith.extui %585 : vector<14x32xi1> to vector<14x32xi32>
    %587 = arith.sitofp %586 : vector<14x32xi32> to vector<14x32xf32>
    %588 = arith.mulf %541, %580 : vector<14x32xf32>
    %cst_288 = arith.constant dense<0.000000e+00> : vector<14x14xf32>
    %589 = tpu.matmul %588, %542, %cst_288 {dimension_numbers = #tpu.dot_dimension_numbers<[1], [1], [0], [0], [0, 0, 1, 0], [], []>} : vector<14x32xf32>, vector<14x32xf32>, vector<14x14xf32> -> vector<14x14xf32>
    %cst_289 = arith.constant 0.353553385 : f32
    %590 = vector.broadcast %cst_289 : f32 to vector<14x14xf32>
    %591 = arith.mulf %589, %590 : vector<14x14xf32>
    %cst_290 = arith.constant -1.000000e+30 : f32
    %592 = vector.broadcast %cst_290 : f32 to vector<14x14xf32>
    %593 = arith.select %570, %591, %592 : vector<14x14xi1>, vector<14x14xf32>
    %cst_291 = arith.constant dense<0xFF800000> : vector<14xf32>
    %594 = vector.multi_reduction <maximumf>, %593, %cst_291 [1] : vector<14x14xf32> to vector<14xf32>
    %595 = vector.shape_cast %594 : vector<14xf32> to vector<14x1xf32>
    %596 = vector.broadcast %595 : vector<14x1xf32> to vector<14x14xf32>
    %597 = arith.subf %593, %596 : vector<14x14xf32>
    %598 = math.exp %597 : vector<14x14xf32>
    %cst_292 = arith.constant dense<0.000000e+00> : vector<14xf32>
    %599 = vector.multi_reduction <add>, %598, %cst_292 [1] : vector<14x14xf32> to vector<14xf32>
    %600 = vector.shape_cast %599 : vector<14xf32> to vector<14x1xf32>
    %601 = vector.broadcast %600 : vector<14x1xf32> to vector<14x14xf32>
    %602 = arith.divf %598, %601 : vector<14x14xf32>
    %603 = arith.mulf %543, %587 : vector<14x32xf32>
    %cst_293 = arith.constant dense<0.000000e+00> : vector<14x32xf32>
    %604 = tpu.matmul %602, %603, %cst_293 {dimension_numbers = #tpu.dot_dimension_numbers<[1], [0], [0], [1], [0, 0, 1, 1], [], []>} : vector<14x14xf32>, vector<14x32xf32>, vector<14x32xf32> -> vector<14x32xf32>
    %605 = arith.addf %573, %604 : vector<14x32xf32>
    %c8_i32_294 = arith.constant 8 : i32
    %606 = vector.broadcast %c8_i32_294 : i32 to vector<14x32xi32>
    %607 = arith.cmpi sge, %571, %606 : vector<14x32xi32>
    %c16_i32_295 = arith.constant 16 : i32
    %608 = vector.broadcast %c16_i32_295 : i32 to vector<14x32xi32>
    %609 = arith.cmpi slt, %571, %608 : vector<14x32xi32>
    %610 = arith.andi %607, %609 : vector<14x32xi1>
    %611 = arith.extui %610 : vector<14x32xi1> to vector<14x32xi32>
    %612 = arith.sitofp %611 : vector<14x32xi32> to vector<14x32xf32>
    %c8_i32_296 = arith.constant 8 : i32
    %613 = vector.broadcast %c8_i32_296 : i32 to vector<14x32xi32>
    %614 = arith.cmpi sge, %572, %613 : vector<14x32xi32>
    %c16_i32_297 = arith.constant 16 : i32
    %615 = vector.broadcast %c16_i32_297 : i32 to vector<14x32xi32>
    %616 = arith.cmpi slt, %572, %615 : vector<14x32xi32>
    %617 = arith.andi %614, %616 : vector<14x32xi1>
    %618 = arith.extui %617 : vector<14x32xi1> to vector<14x32xi32>
    %619 = arith.sitofp %618 : vector<14x32xi32> to vector<14x32xf32>
    %620 = arith.mulf %541, %612 : vector<14x32xf32>
    %cst_298 = arith.constant dense<0.000000e+00> : vector<14x14xf32>
    %621 = tpu.matmul %620, %542, %cst_298 {dimension_numbers = #tpu.dot_dimension_numbers<[1], [1], [0], [0], [0, 0, 1, 0], [], []>} : vector<14x32xf32>, vector<14x32xf32>, vector<14x14xf32> -> vector<14x14xf32>
    %cst_299 = arith.constant 0.353553385 : f32
    %622 = vector.broadcast %cst_299 : f32 to vector<14x14xf32>
    %623 = arith.mulf %621, %622 : vector<14x14xf32>
    %cst_300 = arith.constant -1.000000e+30 : f32
    %624 = vector.broadcast %cst_300 : f32 to vector<14x14xf32>
    %625 = arith.select %570, %623, %624 : vector<14x14xi1>, vector<14x14xf32>
    %cst_301 = arith.constant dense<0xFF800000> : vector<14xf32>
    %626 = vector.multi_reduction <maximumf>, %625, %cst_301 [1] : vector<14x14xf32> to vector<14xf32>
    %627 = vector.shape_cast %626 : vector<14xf32> to vector<14x1xf32>
    %628 = vector.broadcast %627 : vector<14x1xf32> to vector<14x14xf32>
    %629 = arith.subf %625, %628 : vector<14x14xf32>
    %630 = math.exp %629 : vector<14x14xf32>
    %cst_302 = arith.constant dense<0.000000e+00> : vector<14xf32>
    %631 = vector.multi_reduction <add>, %630, %cst_302 [1] : vector<14x14xf32> to vector<14xf32>
    %632 = vector.shape_cast %631 : vector<14xf32> to vector<14x1xf32>
    %633 = vector.broadcast %632 : vector<14x1xf32> to vector<14x14xf32>
    %634 = arith.divf %630, %633 : vector<14x14xf32>
    %635 = arith.mulf %543, %619 : vector<14x32xf32>
    %cst_303 = arith.constant dense<0.000000e+00> : vector<14x32xf32>
    %636 = tpu.matmul %634, %635, %cst_303 {dimension_numbers = #tpu.dot_dimension_numbers<[1], [0], [0], [1], [0, 0, 1, 1], [], []>} : vector<14x14xf32>, vector<14x32xf32>, vector<14x32xf32> -> vector<14x32xf32>
    %637 = arith.addf %605, %636 : vector<14x32xf32>
    %c16_i32_304 = arith.constant 16 : i32
    %638 = vector.broadcast %c16_i32_304 : i32 to vector<14x32xi32>
    %639 = arith.cmpi sge, %571, %638 : vector<14x32xi32>
    %c24_i32_305 = arith.constant 24 : i32
    %640 = vector.broadcast %c24_i32_305 : i32 to vector<14x32xi32>
    %641 = arith.cmpi slt, %571, %640 : vector<14x32xi32>
    %642 = arith.andi %639, %641 : vector<14x32xi1>
    %643 = arith.extui %642 : vector<14x32xi1> to vector<14x32xi32>
    %644 = arith.sitofp %643 : vector<14x32xi32> to vector<14x32xf32>
    %c16_i32_306 = arith.constant 16 : i32
    %645 = vector.broadcast %c16_i32_306 : i32 to vector<14x32xi32>
    %646 = arith.cmpi sge, %572, %645 : vector<14x32xi32>
    %c24_i32_307 = arith.constant 24 : i32
    %647 = vector.broadcast %c24_i32_307 : i32 to vector<14x32xi32>
    %648 = arith.cmpi slt, %572, %647 : vector<14x32xi32>
    %649 = arith.andi %646, %648 : vector<14x32xi1>
    %650 = arith.extui %649 : vector<14x32xi1> to vector<14x32xi32>
    %651 = arith.sitofp %650 : vector<14x32xi32> to vector<14x32xf32>
    %652 = arith.mulf %541, %644 : vector<14x32xf32>
    %cst_308 = arith.constant dense<0.000000e+00> : vector<14x14xf32>
    %653 = tpu.matmul %652, %542, %cst_308 {dimension_numbers = #tpu.dot_dimension_numbers<[1], [1], [0], [0], [0, 0, 1, 0], [], []>} : vector<14x32xf32>, vector<14x32xf32>, vector<14x14xf32> -> vector<14x14xf32>
    %cst_309 = arith.constant 0.353553385 : f32
    %654 = vector.broadcast %cst_309 : f32 to vector<14x14xf32>
    %655 = arith.mulf %653, %654 : vector<14x14xf32>
    %cst_310 = arith.constant -1.000000e+30 : f32
    %656 = vector.broadcast %cst_310 : f32 to vector<14x14xf32>
    %657 = arith.select %570, %655, %656 : vector<14x14xi1>, vector<14x14xf32>
    %cst_311 = arith.constant dense<0xFF800000> : vector<14xf32>
    %658 = vector.multi_reduction <maximumf>, %657, %cst_311 [1] : vector<14x14xf32> to vector<14xf32>
    %659 = vector.shape_cast %658 : vector<14xf32> to vector<14x1xf32>
    %660 = vector.broadcast %659 : vector<14x1xf32> to vector<14x14xf32>
    %661 = arith.subf %657, %660 : vector<14x14xf32>
    %662 = math.exp %661 : vector<14x14xf32>
    %cst_312 = arith.constant dense<0.000000e+00> : vector<14xf32>
    %663 = vector.multi_reduction <add>, %662, %cst_312 [1] : vector<14x14xf32> to vector<14xf32>
    %664 = vector.shape_cast %663 : vector<14xf32> to vector<14x1xf32>
    %665 = vector.broadcast %664 : vector<14x1xf32> to vector<14x14xf32>
    %666 = arith.divf %662, %665 : vector<14x14xf32>
    %667 = arith.mulf %543, %651 : vector<14x32xf32>
    %cst_313 = arith.constant dense<0.000000e+00> : vector<14x32xf32>
    %668 = tpu.matmul %666, %667, %cst_313 {dimension_numbers = #tpu.dot_dimension_numbers<[1], [0], [0], [1], [0, 0, 1, 1], [], []>} : vector<14x14xf32>, vector<14x32xf32>, vector<14x32xf32> -> vector<14x32xf32>
    %669 = arith.addf %637, %668 : vector<14x32xf32>
    %c24_i32_314 = arith.constant 24 : i32
    %670 = vector.broadcast %c24_i32_314 : i32 to vector<14x32xi32>
    %671 = arith.cmpi sge, %571, %670 : vector<14x32xi32>
    %c32_i32_315 = arith.constant 32 : i32
    %672 = vector.broadcast %c32_i32_315 : i32 to vector<14x32xi32>
    %673 = arith.cmpi slt, %571, %672 : vector<14x32xi32>
    %674 = arith.andi %671, %673 : vector<14x32xi1>
    %675 = arith.extui %674 : vector<14x32xi1> to vector<14x32xi32>
    %676 = arith.sitofp %675 : vector<14x32xi32> to vector<14x32xf32>
    %c24_i32_316 = arith.constant 24 : i32
    %677 = vector.broadcast %c24_i32_316 : i32 to vector<14x32xi32>
    %678 = arith.cmpi sge, %572, %677 : vector<14x32xi32>
    %c32_i32_317 = arith.constant 32 : i32
    %679 = vector.broadcast %c32_i32_317 : i32 to vector<14x32xi32>
    %680 = arith.cmpi slt, %572, %679 : vector<14x32xi32>
    %681 = arith.andi %678, %680 : vector<14x32xi1>
    %682 = arith.extui %681 : vector<14x32xi1> to vector<14x32xi32>
    %683 = arith.sitofp %682 : vector<14x32xi32> to vector<14x32xf32>
    %684 = arith.mulf %541, %676 : vector<14x32xf32>
    %cst_318 = arith.constant dense<0.000000e+00> : vector<14x14xf32>
    %685 = tpu.matmul %684, %542, %cst_318 {dimension_numbers = #tpu.dot_dimension_numbers<[1], [1], [0], [0], [0, 0, 1, 0], [], []>} : vector<14x32xf32>, vector<14x32xf32>, vector<14x14xf32> -> vector<14x14xf32>
    %cst_319 = arith.constant 0.353553385 : f32
    %686 = vector.broadcast %cst_319 : f32 to vector<14x14xf32>
    %687 = arith.mulf %685, %686 : vector<14x14xf32>
    %cst_320 = arith.constant -1.000000e+30 : f32
    %688 = vector.broadcast %cst_320 : f32 to vector<14x14xf32>
    %689 = arith.select %570, %687, %688 : vector<14x14xi1>, vector<14x14xf32>
    %cst_321 = arith.constant dense<0xFF800000> : vector<14xf32>
    %690 = vector.multi_reduction <maximumf>, %689, %cst_321 [1] : vector<14x14xf32> to vector<14xf32>
    %691 = vector.shape_cast %690 : vector<14xf32> to vector<14x1xf32>
    %692 = vector.broadcast %691 : vector<14x1xf32> to vector<14x14xf32>
    %693 = arith.subf %689, %692 : vector<14x14xf32>
    %694 = math.exp %693 : vector<14x14xf32>
    %cst_322 = arith.constant dense<0.000000e+00> : vector<14xf32>
    %695 = vector.multi_reduction <add>, %694, %cst_322 [1] : vector<14x14xf32> to vector<14xf32>
    %696 = vector.shape_cast %695 : vector<14xf32> to vector<14x1xf32>
    %697 = vector.broadcast %696 : vector<14x1xf32> to vector<14x14xf32>
    %698 = arith.divf %694, %697 : vector<14x14xf32>
    %699 = arith.mulf %543, %683 : vector<14x32xf32>
    %cst_323 = arith.constant dense<0.000000e+00> : vector<14x32xf32>
    %700 = tpu.matmul %698, %699, %cst_323 {dimension_numbers = #tpu.dot_dimension_numbers<[1], [0], [0], [1], [0, 0, 1, 1], [], []>} : vector<14x14xf32>, vector<14x32xf32>, vector<14x32xf32> -> vector<14x32xf32>
    %701 = arith.addf %669, %700 : vector<14x32xf32>
    %cst_324 = arith.constant dense<0.000000e+00> : vector<14x32xf32>
    %702 = tpu.matmul %701, %38, %cst_324 {dimension_numbers = #tpu.dot_dimension_numbers<[1], [0], [0], [1], [0, 0, 1, 1], [], []>} : vector<14x32xf32>, vector<32x32xf32>, vector<14x32xf32> -> vector<14x32xf32>
    %703 = vector.broadcast %39 : vector<1x32xf32> to vector<14x32xf32>
    %704 = arith.addf %702, %703 : vector<14x32xf32>
    %705 = arith.addf %83, %704 : vector<14x32xf32>
    %cst_325 = arith.constant dense<0.000000e+00> : vector<14xf32>
    %706 = vector.multi_reduction <add>, %705, %cst_325 [1] : vector<14x32xf32> to vector<14xf32>
    %707 = vector.shape_cast %706 : vector<14xf32> to vector<14x1xf32>
    %cst_326 = arith.constant 3.200000e+01 : f32
    %708 = vector.broadcast %cst_326 : f32 to vector<14x1xf32>
    %709 = arith.divf %707, %708 : vector<14x1xf32>
    %710 = vector.broadcast %709 : vector<14x1xf32> to vector<14x32xf32>
    %711 = arith.subf %705, %710 : vector<14x32xf32>
    %712 = arith.mulf %711, %711 : vector<14x32xf32>
    %cst_327 = arith.constant dense<0.000000e+00> : vector<14xf32>
    %713 = vector.multi_reduction <add>, %712, %cst_327 [1] : vector<14x32xf32> to vector<14xf32>
    %714 = vector.shape_cast %713 : vector<14xf32> to vector<14x1xf32>
    %cst_328 = arith.constant 3.200000e+01 : f32
    %715 = vector.broadcast %cst_328 : f32 to vector<14x1xf32>
    %716 = arith.divf %714, %715 : vector<14x1xf32>
    %cst_329 = arith.constant 9.99999974E-6 : f32
    %717 = vector.broadcast %cst_329 : f32 to vector<14x1xf32>
    %718 = arith.addf %716, %717 : vector<14x1xf32>
    %719 = math.rsqrt %718 : vector<14x1xf32>
    %720 = vector.broadcast %719 : vector<14x1xf32> to vector<14x32xf32>
    %721 = arith.mulf %711, %720 : vector<14x32xf32>
    %722 = vector.broadcast %48 : vector<1x32xf32> to vector<14x32xf32>
    %723 = arith.mulf %721, %722 : vector<14x32xf32>
    %724 = vector.broadcast %49 : vector<1x32xf32> to vector<14x32xf32>
    %725 = arith.addf %723, %724 : vector<14x32xf32>
    %cst_330 = arith.constant dense<0.000000e+00> : vector<14x96xf32>
    %726 = tpu.matmul %725, %40, %cst_330 {dimension_numbers = #tpu.dot_dimension_numbers<[1], [0], [0], [1], [0, 0, 1, 1], [], []>} : vector<14x32xf32>, vector<32x96xf32>, vector<14x96xf32> -> vector<14x96xf32>
    %727 = vector.broadcast %41 : vector<1x96xf32> to vector<14x96xf32>
    %728 = arith.addf %726, %727 : vector<14x96xf32>
    %cst_331 = arith.constant dense<0.000000e+00> : vector<16x96xf32>
    %729 = tpu.matmul %537, %40, %cst_331 {dimension_numbers = #tpu.dot_dimension_numbers<[1], [0], [0], [1], [0, 0, 1, 1], [], []>} : vector<16x32xf32>, vector<32x96xf32>, vector<16x96xf32> -> vector<16x96xf32>
    %730 = vector.broadcast %41 : vector<1x96xf32> to vector<16x96xf32>
    %731 = arith.addf %729, %730 : vector<16x96xf32>
    %732 = vector.extract_strided_slice %728 {offsets = [0, 0], sizes = [14, 32], strides = [1, 1]} : vector<14x96xf32> to vector<14x32xf32>
    %733 = vector.extract_strided_slice %731 {offsets = [0, 32], sizes = [16, 32], strides = [1, 1]} : vector<16x96xf32> to vector<16x32xf32>
    %734 = vector.extract_strided_slice %731 {offsets = [0, 64], sizes = [16, 32], strides = [1, 1]} : vector<16x96xf32> to vector<16x32xf32>
    %735 = tpu.iota {dimensions = array<i32: 0>} : vector<14x16xi32>
    %736 = tpu.iota {dimensions = array<i32: 1>} : vector<14x16xi32>
    %false_332 = arith.constant false
    %737 = vector.broadcast %false_332 : i1 to vector<14x16xi1>
    %c0_i32_333 = arith.constant 0 : i32
    %738 = vector.broadcast %c0_i32_333 : i32 to vector<14x16xi32>
    %739 = arith.cmpi sge, %735, %738 : vector<14x16xi32>
    %c7_i32_334 = arith.constant 7 : i32
    %740 = vector.broadcast %c7_i32_334 : i32 to vector<14x16xi32>
    %741 = arith.cmpi slt, %735, %740 : vector<14x16xi32>
    %742 = arith.andi %739, %741 : vector<14x16xi1>
    %c0_i32_335 = arith.constant 0 : i32
    %743 = vector.broadcast %c0_i32_335 : i32 to vector<14x16xi32>
    %744 = arith.cmpi sge, %736, %743 : vector<14x16xi32>
    %745 = arith.andi %742, %744 : vector<14x16xi1>
    %c8_i32_336 = arith.constant 8 : i32
    %746 = vector.broadcast %c8_i32_336 : i32 to vector<14x16xi32>
    %747 = arith.cmpi slt, %736, %746 : vector<14x16xi32>
    %748 = arith.andi %745, %747 : vector<14x16xi1>
    %749 = arith.ori %737, %748 : vector<14x16xi1>
    %c7_i32_337 = arith.constant 7 : i32
    %750 = vector.broadcast %c7_i32_337 : i32 to vector<14x16xi32>
    %751 = arith.cmpi sge, %735, %750 : vector<14x16xi32>
    %c14_i32_338 = arith.constant 14 : i32
    %752 = vector.broadcast %c14_i32_338 : i32 to vector<14x16xi32>
    %753 = arith.cmpi slt, %735, %752 : vector<14x16xi32>
    %754 = arith.andi %751, %753 : vector<14x16xi1>
    %c8_i32_339 = arith.constant 8 : i32
    %755 = vector.broadcast %c8_i32_339 : i32 to vector<14x16xi32>
    %756 = arith.cmpi sge, %736, %755 : vector<14x16xi32>
    %757 = arith.andi %754, %756 : vector<14x16xi1>
    %c16_i32_340 = arith.constant 16 : i32
    %758 = vector.broadcast %c16_i32_340 : i32 to vector<14x16xi32>
    %759 = arith.cmpi slt, %736, %758 : vector<14x16xi32>
    %760 = arith.andi %757, %759 : vector<14x16xi1>
    %761 = arith.ori %749, %760 : vector<14x16xi1>
    %762 = tpu.iota {dimensions = array<i32: 1>} : vector<14x32xi32>
    %763 = tpu.iota {dimensions = array<i32: 1>} : vector<16x32xi32>
    %cst_341 = arith.constant 0.000000e+00 : f32
    %764 = vector.broadcast %cst_341 : f32 to vector<14x32xf32>
    %c0_i32_342 = arith.constant 0 : i32
    %765 = vector.broadcast %c0_i32_342 : i32 to vector<14x32xi32>
    %766 = arith.cmpi sge, %762, %765 : vector<14x32xi32>
    %c8_i32_343 = arith.constant 8 : i32
    %767 = vector.broadcast %c8_i32_343 : i32 to vector<14x32xi32>
    %768 = arith.cmpi slt, %762, %767 : vector<14x32xi32>
    %769 = arith.andi %766, %768 : vector<14x32xi1>
    %770 = arith.extui %769 : vector<14x32xi1> to vector<14x32xi32>
    %771 = arith.sitofp %770 : vector<14x32xi32> to vector<14x32xf32>
    %c0_i32_344 = arith.constant 0 : i32
    %772 = vector.broadcast %c0_i32_344 : i32 to vector<16x32xi32>
    %773 = arith.cmpi sge, %763, %772 : vector<16x32xi32>
    %c8_i32_345 = arith.constant 8 : i32
    %774 = vector.broadcast %c8_i32_345 : i32 to vector<16x32xi32>
    %775 = arith.cmpi slt, %763, %774 : vector<16x32xi32>
    %776 = arith.andi %773, %775 : vector<16x32xi1>
    %777 = arith.extui %776 : vector<16x32xi1> to vector<16x32xi32>
    %778 = arith.sitofp %777 : vector<16x32xi32> to vector<16x32xf32>
    %779 = arith.mulf %732, %771 : vector<14x32xf32>
    %cst_346 = arith.constant dense<0.000000e+00> : vector<14x16xf32>
    %780 = tpu.matmul %779, %733, %cst_346 {dimension_numbers = #tpu.dot_dimension_numbers<[1], [1], [0], [0], [0, 0, 1, 0], [], []>} : vector<14x32xf32>, vector<16x32xf32>, vector<14x16xf32> -> vector<14x16xf32>
    %cst_347 = arith.constant 0.353553385 : f32
    %781 = vector.broadcast %cst_347 : f32 to vector<14x16xf32>
    %782 = arith.mulf %780, %781 : vector<14x16xf32>
    %cst_348 = arith.constant -1.000000e+30 : f32
    %783 = vector.broadcast %cst_348 : f32 to vector<14x16xf32>
    %784 = arith.select %761, %782, %783 : vector<14x16xi1>, vector<14x16xf32>
    %cst_349 = arith.constant dense<0xFF800000> : vector<14xf32>
    %785 = vector.multi_reduction <maximumf>, %784, %cst_349 [1] : vector<14x16xf32> to vector<14xf32>
    %786 = vector.shape_cast %785 : vector<14xf32> to vector<14x1xf32>
    %787 = vector.broadcast %786 : vector<14x1xf32> to vector<14x16xf32>
    %788 = arith.subf %784, %787 : vector<14x16xf32>
    %789 = math.exp %788 : vector<14x16xf32>
    %cst_350 = arith.constant dense<0.000000e+00> : vector<14xf32>
    %790 = vector.multi_reduction <add>, %789, %cst_350 [1] : vector<14x16xf32> to vector<14xf32>
    %791 = vector.shape_cast %790 : vector<14xf32> to vector<14x1xf32>
    %792 = vector.broadcast %791 : vector<14x1xf32> to vector<14x16xf32>
    %793 = arith.divf %789, %792 : vector<14x16xf32>
    %794 = arith.mulf %734, %778 : vector<16x32xf32>
    %cst_351 = arith.constant dense<0.000000e+00> : vector<14x32xf32>
    %795 = tpu.matmul %793, %794, %cst_351 {dimension_numbers = #tpu.dot_dimension_numbers<[1], [0], [0], [1], [0, 0, 1, 1], [], []>} : vector<14x16xf32>, vector<16x32xf32>, vector<14x32xf32> -> vector<14x32xf32>
    %796 = arith.addf %764, %795 : vector<14x32xf32>
    %c8_i32_352 = arith.constant 8 : i32
    %797 = vector.broadcast %c8_i32_352 : i32 to vector<14x32xi32>
    %798 = arith.cmpi sge, %762, %797 : vector<14x32xi32>
    %c16_i32_353 = arith.constant 16 : i32
    %799 = vector.broadcast %c16_i32_353 : i32 to vector<14x32xi32>
    %800 = arith.cmpi slt, %762, %799 : vector<14x32xi32>
    %801 = arith.andi %798, %800 : vector<14x32xi1>
    %802 = arith.extui %801 : vector<14x32xi1> to vector<14x32xi32>
    %803 = arith.sitofp %802 : vector<14x32xi32> to vector<14x32xf32>
    %c8_i32_354 = arith.constant 8 : i32
    %804 = vector.broadcast %c8_i32_354 : i32 to vector<16x32xi32>
    %805 = arith.cmpi sge, %763, %804 : vector<16x32xi32>
    %c16_i32_355 = arith.constant 16 : i32
    %806 = vector.broadcast %c16_i32_355 : i32 to vector<16x32xi32>
    %807 = arith.cmpi slt, %763, %806 : vector<16x32xi32>
    %808 = arith.andi %805, %807 : vector<16x32xi1>
    %809 = arith.extui %808 : vector<16x32xi1> to vector<16x32xi32>
    %810 = arith.sitofp %809 : vector<16x32xi32> to vector<16x32xf32>
    %811 = arith.mulf %732, %803 : vector<14x32xf32>
    %cst_356 = arith.constant dense<0.000000e+00> : vector<14x16xf32>
    %812 = tpu.matmul %811, %733, %cst_356 {dimension_numbers = #tpu.dot_dimension_numbers<[1], [1], [0], [0], [0, 0, 1, 0], [], []>} : vector<14x32xf32>, vector<16x32xf32>, vector<14x16xf32> -> vector<14x16xf32>
    %cst_357 = arith.constant 0.353553385 : f32
    %813 = vector.broadcast %cst_357 : f32 to vector<14x16xf32>
    %814 = arith.mulf %812, %813 : vector<14x16xf32>
    %cst_358 = arith.constant -1.000000e+30 : f32
    %815 = vector.broadcast %cst_358 : f32 to vector<14x16xf32>
    %816 = arith.select %761, %814, %815 : vector<14x16xi1>, vector<14x16xf32>
    %cst_359 = arith.constant dense<0xFF800000> : vector<14xf32>
    %817 = vector.multi_reduction <maximumf>, %816, %cst_359 [1] : vector<14x16xf32> to vector<14xf32>
    %818 = vector.shape_cast %817 : vector<14xf32> to vector<14x1xf32>
    %819 = vector.broadcast %818 : vector<14x1xf32> to vector<14x16xf32>
    %820 = arith.subf %816, %819 : vector<14x16xf32>
    %821 = math.exp %820 : vector<14x16xf32>
    %cst_360 = arith.constant dense<0.000000e+00> : vector<14xf32>
    %822 = vector.multi_reduction <add>, %821, %cst_360 [1] : vector<14x16xf32> to vector<14xf32>
    %823 = vector.shape_cast %822 : vector<14xf32> to vector<14x1xf32>
    %824 = vector.broadcast %823 : vector<14x1xf32> to vector<14x16xf32>
    %825 = arith.divf %821, %824 : vector<14x16xf32>
    %826 = arith.mulf %734, %810 : vector<16x32xf32>
    %cst_361 = arith.constant dense<0.000000e+00> : vector<14x32xf32>
    %827 = tpu.matmul %825, %826, %cst_361 {dimension_numbers = #tpu.dot_dimension_numbers<[1], [0], [0], [1], [0, 0, 1, 1], [], []>} : vector<14x16xf32>, vector<16x32xf32>, vector<14x32xf32> -> vector<14x32xf32>
    %828 = arith.addf %796, %827 : vector<14x32xf32>
    %c16_i32_362 = arith.constant 16 : i32
    %829 = vector.broadcast %c16_i32_362 : i32 to vector<14x32xi32>
    %830 = arith.cmpi sge, %762, %829 : vector<14x32xi32>
    %c24_i32_363 = arith.constant 24 : i32
    %831 = vector.broadcast %c24_i32_363 : i32 to vector<14x32xi32>
    %832 = arith.cmpi slt, %762, %831 : vector<14x32xi32>
    %833 = arith.andi %830, %832 : vector<14x32xi1>
    %834 = arith.extui %833 : vector<14x32xi1> to vector<14x32xi32>
    %835 = arith.sitofp %834 : vector<14x32xi32> to vector<14x32xf32>
    %c16_i32_364 = arith.constant 16 : i32
    %836 = vector.broadcast %c16_i32_364 : i32 to vector<16x32xi32>
    %837 = arith.cmpi sge, %763, %836 : vector<16x32xi32>
    %c24_i32_365 = arith.constant 24 : i32
    %838 = vector.broadcast %c24_i32_365 : i32 to vector<16x32xi32>
    %839 = arith.cmpi slt, %763, %838 : vector<16x32xi32>
    %840 = arith.andi %837, %839 : vector<16x32xi1>
    %841 = arith.extui %840 : vector<16x32xi1> to vector<16x32xi32>
    %842 = arith.sitofp %841 : vector<16x32xi32> to vector<16x32xf32>
    %843 = arith.mulf %732, %835 : vector<14x32xf32>
    %cst_366 = arith.constant dense<0.000000e+00> : vector<14x16xf32>
    %844 = tpu.matmul %843, %733, %cst_366 {dimension_numbers = #tpu.dot_dimension_numbers<[1], [1], [0], [0], [0, 0, 1, 0], [], []>} : vector<14x32xf32>, vector<16x32xf32>, vector<14x16xf32> -> vector<14x16xf32>
    %cst_367 = arith.constant 0.353553385 : f32
    %845 = vector.broadcast %cst_367 : f32 to vector<14x16xf32>
    %846 = arith.mulf %844, %845 : vector<14x16xf32>
    %cst_368 = arith.constant -1.000000e+30 : f32
    %847 = vector.broadcast %cst_368 : f32 to vector<14x16xf32>
    %848 = arith.select %761, %846, %847 : vector<14x16xi1>, vector<14x16xf32>
    %cst_369 = arith.constant dense<0xFF800000> : vector<14xf32>
    %849 = vector.multi_reduction <maximumf>, %848, %cst_369 [1] : vector<14x16xf32> to vector<14xf32>
    %850 = vector.shape_cast %849 : vector<14xf32> to vector<14x1xf32>
    %851 = vector.broadcast %850 : vector<14x1xf32> to vector<14x16xf32>
    %852 = arith.subf %848, %851 : vector<14x16xf32>
    %853 = math.exp %852 : vector<14x16xf32>
    %cst_370 = arith.constant dense<0.000000e+00> : vector<14xf32>
    %854 = vector.multi_reduction <add>, %853, %cst_370 [1] : vector<14x16xf32> to vector<14xf32>
    %855 = vector.shape_cast %854 : vector<14xf32> to vector<14x1xf32>
    %856 = vector.broadcast %855 : vector<14x1xf32> to vector<14x16xf32>
    %857 = arith.divf %853, %856 : vector<14x16xf32>
    %858 = arith.mulf %734, %842 : vector<16x32xf32>
    %cst_371 = arith.constant dense<0.000000e+00> : vector<14x32xf32>
    %859 = tpu.matmul %857, %858, %cst_371 {dimension_numbers = #tpu.dot_dimension_numbers<[1], [0], [0], [1], [0, 0, 1, 1], [], []>} : vector<14x16xf32>, vector<16x32xf32>, vector<14x32xf32> -> vector<14x32xf32>
    %860 = arith.addf %828, %859 : vector<14x32xf32>
    %c24_i32_372 = arith.constant 24 : i32
    %861 = vector.broadcast %c24_i32_372 : i32 to vector<14x32xi32>
    %862 = arith.cmpi sge, %762, %861 : vector<14x32xi32>
    %c32_i32_373 = arith.constant 32 : i32
    %863 = vector.broadcast %c32_i32_373 : i32 to vector<14x32xi32>
    %864 = arith.cmpi slt, %762, %863 : vector<14x32xi32>
    %865 = arith.andi %862, %864 : vector<14x32xi1>
    %866 = arith.extui %865 : vector<14x32xi1> to vector<14x32xi32>
    %867 = arith.sitofp %866 : vector<14x32xi32> to vector<14x32xf32>
    %c24_i32_374 = arith.constant 24 : i32
    %868 = vector.broadcast %c24_i32_374 : i32 to vector<16x32xi32>
    %869 = arith.cmpi sge, %763, %868 : vector<16x32xi32>
    %c32_i32_375 = arith.constant 32 : i32
    %870 = vector.broadcast %c32_i32_375 : i32 to vector<16x32xi32>
    %871 = arith.cmpi slt, %763, %870 : vector<16x32xi32>
    %872 = arith.andi %869, %871 : vector<16x32xi1>
    %873 = arith.extui %872 : vector<16x32xi1> to vector<16x32xi32>
    %874 = arith.sitofp %873 : vector<16x32xi32> to vector<16x32xf32>
    %875 = arith.mulf %732, %867 : vector<14x32xf32>
    %cst_376 = arith.constant dense<0.000000e+00> : vector<14x16xf32>
    %876 = tpu.matmul %875, %733, %cst_376 {dimension_numbers = #tpu.dot_dimension_numbers<[1], [1], [0], [0], [0, 0, 1, 0], [], []>} : vector<14x32xf32>, vector<16x32xf32>, vector<14x16xf32> -> vector<14x16xf32>
    %cst_377 = arith.constant 0.353553385 : f32
    %877 = vector.broadcast %cst_377 : f32 to vector<14x16xf32>
    %878 = arith.mulf %876, %877 : vector<14x16xf32>
    %cst_378 = arith.constant -1.000000e+30 : f32
    %879 = vector.broadcast %cst_378 : f32 to vector<14x16xf32>
    %880 = arith.select %761, %878, %879 : vector<14x16xi1>, vector<14x16xf32>
    %cst_379 = arith.constant dense<0xFF800000> : vector<14xf32>
    %881 = vector.multi_reduction <maximumf>, %880, %cst_379 [1] : vector<14x16xf32> to vector<14xf32>
    %882 = vector.shape_cast %881 : vector<14xf32> to vector<14x1xf32>
    %883 = vector.broadcast %882 : vector<14x1xf32> to vector<14x16xf32>
    %884 = arith.subf %880, %883 : vector<14x16xf32>
    %885 = math.exp %884 : vector<14x16xf32>
    %cst_380 = arith.constant dense<0.000000e+00> : vector<14xf32>
    %886 = vector.multi_reduction <add>, %885, %cst_380 [1] : vector<14x16xf32> to vector<14xf32>
    %887 = vector.shape_cast %886 : vector<14xf32> to vector<14x1xf32>
    %888 = vector.broadcast %887 : vector<14x1xf32> to vector<14x16xf32>
    %889 = arith.divf %885, %888 : vector<14x16xf32>
    %890 = arith.mulf %734, %874 : vector<16x32xf32>
    %cst_381 = arith.constant dense<0.000000e+00> : vector<14x32xf32>
    %891 = tpu.matmul %889, %890, %cst_381 {dimension_numbers = #tpu.dot_dimension_numbers<[1], [0], [0], [1], [0, 0, 1, 1], [], []>} : vector<14x16xf32>, vector<16x32xf32>, vector<14x32xf32> -> vector<14x32xf32>
    %892 = arith.addf %860, %891 : vector<14x32xf32>
    %cst_382 = arith.constant dense<0.000000e+00> : vector<14x32xf32>
    %893 = tpu.matmul %892, %42, %cst_382 {dimension_numbers = #tpu.dot_dimension_numbers<[1], [0], [0], [1], [0, 0, 1, 1], [], []>} : vector<14x32xf32>, vector<32x32xf32>, vector<14x32xf32> -> vector<14x32xf32>
    %894 = vector.broadcast %43 : vector<1x32xf32> to vector<14x32xf32>
    %895 = arith.addf %893, %894 : vector<14x32xf32>
    %896 = arith.addf %725, %895 : vector<14x32xf32>
    %cst_383 = arith.constant dense<0.000000e+00> : vector<14xf32>
    %897 = vector.multi_reduction <add>, %896, %cst_383 [1] : vector<14x32xf32> to vector<14xf32>
    %898 = vector.shape_cast %897 : vector<14xf32> to vector<14x1xf32>
    %cst_384 = arith.constant 3.200000e+01 : f32
    %899 = vector.broadcast %cst_384 : f32 to vector<14x1xf32>
    %900 = arith.divf %898, %899 : vector<14x1xf32>
    %901 = vector.broadcast %900 : vector<14x1xf32> to vector<14x32xf32>
    %902 = arith.subf %896, %901 : vector<14x32xf32>
    %903 = arith.mulf %902, %902 : vector<14x32xf32>
    %cst_385 = arith.constant dense<0.000000e+00> : vector<14xf32>
    %904 = vector.multi_reduction <add>, %903, %cst_385 [1] : vector<14x32xf32> to vector<14xf32>
    %905 = vector.shape_cast %904 : vector<14xf32> to vector<14x1xf32>
    %cst_386 = arith.constant 3.200000e+01 : f32
    %906 = vector.broadcast %cst_386 : f32 to vector<14x1xf32>
    %907 = arith.divf %905, %906 : vector<14x1xf32>
    %cst_387 = arith.constant 9.99999974E-6 : f32
    %908 = vector.broadcast %cst_387 : f32 to vector<14x1xf32>
    %909 = arith.addf %907, %908 : vector<14x1xf32>
    %910 = math.rsqrt %909 : vector<14x1xf32>
    %911 = vector.broadcast %910 : vector<14x1xf32> to vector<14x32xf32>
    %912 = arith.mulf %902, %911 : vector<14x32xf32>
    %913 = vector.broadcast %50 : vector<1x32xf32> to vector<14x32xf32>
    %914 = arith.mulf %912, %913 : vector<14x32xf32>
    %915 = vector.broadcast %51 : vector<1x32xf32> to vector<14x32xf32>
    %916 = arith.addf %914, %915 : vector<14x32xf32>
    %cst_388 = arith.constant dense<0.000000e+00> : vector<14x64xf32>
    %917 = tpu.matmul %916, %44, %cst_388 {dimension_numbers = #tpu.dot_dimension_numbers<[1], [0], [0], [1], [0, 0, 1, 1], [], []>} : vector<14x32xf32>, vector<32x64xf32>, vector<14x64xf32> -> vector<14x64xf32>
    %918 = vector.broadcast %45 : vector<1x64xf32> to vector<14x64xf32>
    %919 = arith.addf %917, %918 : vector<14x64xf32>
    %cst_389 = arith.constant 0.000000e+00 : f32
    %920 = vector.broadcast %cst_389 : f32 to vector<14x64xf32>
    %921 = arith.maximumf %919, %920 : vector<14x64xf32>
    %cst_390 = arith.constant dense<0.000000e+00> : vector<14x32xf32>
    %922 = tpu.matmul %921, %46, %cst_390 {dimension_numbers = #tpu.dot_dimension_numbers<[1], [0], [0], [1], [0, 0, 1, 1], [], []>} : vector<14x64xf32>, vector<64x32xf32>, vector<14x32xf32> -> vector<14x32xf32>
    %923 = vector.broadcast %47 : vector<1x32xf32> to vector<14x32xf32>
    %924 = arith.addf %922, %923 : vector<14x32xf32>
    %925 = arith.addf %916, %924 : vector<14x32xf32>
    %cst_391 = arith.constant dense<0.000000e+00> : vector<14xf32>
    %926 = vector.multi_reduction <add>, %925, %cst_391 [1] : vector<14x32xf32> to vector<14xf32>
    %927 = vector.shape_cast %926 : vector<14xf32> to vector<14x1xf32>
    %cst_392 = arith.constant 3.200000e+01 : f32
    %928 = vector.broadcast %cst_392 : f32 to vector<14x1xf32>
    %929 = arith.divf %927, %928 : vector<14x1xf32>
    %930 = vector.broadcast %929 : vector<14x1xf32> to vector<14x32xf32>
    %931 = arith.subf %925, %930 : vector<14x32xf32>
    %932 = arith.mulf %931, %931 : vector<14x32xf32>
    %cst_393 = arith.constant dense<0.000000e+00> : vector<14xf32>
    %933 = vector.multi_reduction <add>, %932, %cst_393 [1] : vector<14x32xf32> to vector<14xf32>
    %934 = vector.shape_cast %933 : vector<14xf32> to vector<14x1xf32>
    %cst_394 = arith.constant 3.200000e+01 : f32
    %935 = vector.broadcast %cst_394 : f32 to vector<14x1xf32>
    %936 = arith.divf %934, %935 : vector<14x1xf32>
    %cst_395 = arith.constant 9.99999974E-6 : f32
    %937 = vector.broadcast %cst_395 : f32 to vector<14x1xf32>
    %938 = arith.addf %936, %937 : vector<14x1xf32>
    %939 = math.rsqrt %938 : vector<14x1xf32>
    %940 = vector.broadcast %939 : vector<14x1xf32> to vector<14x32xf32>
    %941 = arith.mulf %931, %940 : vector<14x32xf32>
    %942 = vector.broadcast %52 : vector<1x32xf32> to vector<14x32xf32>
    %943 = arith.mulf %941, %942 : vector<14x32xf32>
    %944 = vector.broadcast %53 : vector<1x32xf32> to vector<14x32xf32>
    %945 = arith.addf %943, %944 : vector<14x32xf32>
    %cst_396 = arith.constant dense<0.000000e+00> : vector<14x96xf32>
    %946 = tpu.matmul %945, %54, %cst_396 {dimension_numbers = #tpu.dot_dimension_numbers<[1], [0], [0], [1], [0, 0, 1, 1], [], []>} : vector<14x32xf32>, vector<32x96xf32>, vector<14x96xf32> -> vector<14x96xf32>
    %947 = vector.broadcast %55 : vector<1x96xf32> to vector<14x96xf32>
    %948 = arith.addf %946, %947 : vector<14x96xf32>
    %949 = vector.extract_strided_slice %948 {offsets = [0, 0], sizes = [14, 32], strides = [1, 1]} : vector<14x96xf32> to vector<14x32xf32>
    %950 = vector.extract_strided_slice %948 {offsets = [0, 32], sizes = [14, 32], strides = [1, 1]} : vector<14x96xf32> to vector<14x32xf32>
    %951 = vector.extract_strided_slice %948 {offsets = [0, 64], sizes = [14, 32], strides = [1, 1]} : vector<14x96xf32> to vector<14x32xf32>
    %952 = tpu.iota {dimensions = array<i32: 0>} : vector<14x14xi32>
    %953 = tpu.iota {dimensions = array<i32: 1>} : vector<14x14xi32>
    %false_397 = arith.constant false
    %954 = vector.broadcast %false_397 : i1 to vector<14x14xi1>
    %c0_i32_398 = arith.constant 0 : i32
    %955 = vector.broadcast %c0_i32_398 : i32 to vector<14x14xi32>
    %956 = arith.cmpi sge, %952, %955 : vector<14x14xi32>
    %c7_i32_399 = arith.constant 7 : i32
    %957 = vector.broadcast %c7_i32_399 : i32 to vector<14x14xi32>
    %958 = arith.cmpi slt, %952, %957 : vector<14x14xi32>
    %959 = arith.andi %956, %958 : vector<14x14xi1>
    %c0_i32_400 = arith.constant 0 : i32
    %960 = vector.broadcast %c0_i32_400 : i32 to vector<14x14xi32>
    %961 = arith.cmpi sge, %953, %960 : vector<14x14xi32>
    %962 = arith.andi %959, %961 : vector<14x14xi1>
    %c7_i32_401 = arith.constant 7 : i32
    %963 = vector.broadcast %c7_i32_401 : i32 to vector<14x14xi32>
    %964 = arith.cmpi slt, %953, %963 : vector<14x14xi32>
    %965 = arith.andi %962, %964 : vector<14x14xi1>
    %966 = arith.ori %954, %965 : vector<14x14xi1>
    %c7_i32_402 = arith.constant 7 : i32
    %967 = vector.broadcast %c7_i32_402 : i32 to vector<14x14xi32>
    %968 = arith.cmpi sge, %952, %967 : vector<14x14xi32>
    %c14_i32_403 = arith.constant 14 : i32
    %969 = vector.broadcast %c14_i32_403 : i32 to vector<14x14xi32>
    %970 = arith.cmpi slt, %952, %969 : vector<14x14xi32>
    %971 = arith.andi %968, %970 : vector<14x14xi1>
    %c7_i32_404 = arith.constant 7 : i32
    %972 = vector.broadcast %c7_i32_404 : i32 to vector<14x14xi32>
    %973 = arith.cmpi sge, %953, %972 : vector<14x14xi32>
    %974 = arith.andi %971, %973 : vector<14x14xi1>
    %c14_i32_405 = arith.constant 14 : i32
    %975 = vector.broadcast %c14_i32_405 : i32 to vector<14x14xi32>
    %976 = arith.cmpi slt, %953, %975 : vector<14x14xi32>
    %977 = arith.andi %974, %976 : vector<14x14xi1>
    %978 = arith.ori %966, %977 : vector<14x14xi1>
    %979 = tpu.iota {dimensions = array<i32: 1>} : vector<14x32xi32>
    %980 = tpu.iota {dimensions = array<i32: 1>} : vector<14x32xi32>
    %cst_406 = arith.constant 0.000000e+00 : f32
    %981 = vector.broadcast %cst_406 : f32 to vector<14x32xf32>
    %c0_i32_407 = arith.constant 0 : i32
    %982 = vector.broadcast %c0_i32_407 : i32 to vector<14x32xi32>
    %983 = arith.cmpi sge, %979, %982 : vector<14x32xi32>
    %c8_i32_408 = arith.constant 8 : i32
    %984 = vector.broadcast %c8_i32_408 : i32 to vector<14x32xi32>
    %985 = arith.cmpi slt, %979, %984 : vector<14x32xi32>
    %986 = arith.andi %983, %985 : vector<14x32xi1>
    %987 = arith.extui %986 : vector<14x32xi1> to vector<14x32xi32>
    %988 = arith.sitofp %987 : vector<14x32xi32> to vector<14x32xf32>
    %c0_i32_409 = arith.constant 0 : i32
    %989 = vector.broadcast %c0_i32_409 : i32 to vector<14x32xi32>
    %990 = arith.cmpi sge, %980, %989 : vector<14x32xi32>
    %c8_i32_410 = arith.constant 8 : i32
    %991 = vector.broadcast %c8_i32_410 : i32 to vector<14x32xi32>
    %992 = arith.cmpi slt, %980, %991 : vector<14x32xi32>
    %993 = arith.andi %990, %992 : vector<14x32xi1>
    %994 = arith.extui %993 : vector<14x32xi1> to vector<14x32xi32>
    %995 = arith.sitofp %994 : vector<14x32xi32> to vector<14x32xf32>
    %996 = arith.mulf %949, %988 : vector<14x32xf32>
    %cst_411 = arith.constant dense<0.000000e+00> : vector<14x14xf32>
    %997 = tpu.matmul %996, %950, %cst_411 {dimension_numbers = #tpu.dot_dimension_numbers<[1], [1], [0], [0], [0, 0, 1, 0], [], []>} : vector<14x32xf32>, vector<14x32xf32>, vector<14x14xf32> -> vector<14x14xf32>
    %cst_412 = arith.constant 0.353553385 : f32
    %998 = vector.broadcast %cst_412 : f32 to vector<14x14xf32>
    %999 = arith.mulf %997, %998 : vector<14x14xf32>
    %cst_413 = arith.constant -1.000000e+30 : f32
    %1000 = vector.broadcast %cst_413 : f32 to vector<14x14xf32>
    %1001 = arith.select %978, %999, %1000 : vector<14x14xi1>, vector<14x14xf32>
    %cst_414 = arith.constant dense<0xFF800000> : vector<14xf32>
    %1002 = vector.multi_reduction <maximumf>, %1001, %cst_414 [1] : vector<14x14xf32> to vector<14xf32>
    %1003 = vector.shape_cast %1002 : vector<14xf32> to vector<14x1xf32>
    %1004 = vector.broadcast %1003 : vector<14x1xf32> to vector<14x14xf32>
    %1005 = arith.subf %1001, %1004 : vector<14x14xf32>
    %1006 = math.exp %1005 : vector<14x14xf32>
    %cst_415 = arith.constant dense<0.000000e+00> : vector<14xf32>
    %1007 = vector.multi_reduction <add>, %1006, %cst_415 [1] : vector<14x14xf32> to vector<14xf32>
    %1008 = vector.shape_cast %1007 : vector<14xf32> to vector<14x1xf32>
    %1009 = vector.broadcast %1008 : vector<14x1xf32> to vector<14x14xf32>
    %1010 = arith.divf %1006, %1009 : vector<14x14xf32>
    %1011 = arith.mulf %951, %995 : vector<14x32xf32>
    %cst_416 = arith.constant dense<0.000000e+00> : vector<14x32xf32>
    %1012 = tpu.matmul %1010, %1011, %cst_416 {dimension_numbers = #tpu.dot_dimension_numbers<[1], [0], [0], [1], [0, 0, 1, 1], [], []>} : vector<14x14xf32>, vector<14x32xf32>, vector<14x32xf32> -> vector<14x32xf32>
    %1013 = arith.addf %981, %1012 : vector<14x32xf32>
    %c8_i32_417 = arith.constant 8 : i32
    %1014 = vector.broadcast %c8_i32_417 : i32 to vector<14x32xi32>
    %1015 = arith.cmpi sge, %979, %1014 : vector<14x32xi32>
    %c16_i32_418 = arith.constant 16 : i32
    %1016 = vector.broadcast %c16_i32_418 : i32 to vector<14x32xi32>
    %1017 = arith.cmpi slt, %979, %1016 : vector<14x32xi32>
    %1018 = arith.andi %1015, %1017 : vector<14x32xi1>
    %1019 = arith.extui %1018 : vector<14x32xi1> to vector<14x32xi32>
    %1020 = arith.sitofp %1019 : vector<14x32xi32> to vector<14x32xf32>
    %c8_i32_419 = arith.constant 8 : i32
    %1021 = vector.broadcast %c8_i32_419 : i32 to vector<14x32xi32>
    %1022 = arith.cmpi sge, %980, %1021 : vector<14x32xi32>
    %c16_i32_420 = arith.constant 16 : i32
    %1023 = vector.broadcast %c16_i32_420 : i32 to vector<14x32xi32>
    %1024 = arith.cmpi slt, %980, %1023 : vector<14x32xi32>
    %1025 = arith.andi %1022, %1024 : vector<14x32xi1>
    %1026 = arith.extui %1025 : vector<14x32xi1> to vector<14x32xi32>
    %1027 = arith.sitofp %1026 : vector<14x32xi32> to vector<14x32xf32>
    %1028 = arith.mulf %949, %1020 : vector<14x32xf32>
    %cst_421 = arith.constant dense<0.000000e+00> : vector<14x14xf32>
    %1029 = tpu.matmul %1028, %950, %cst_421 {dimension_numbers = #tpu.dot_dimension_numbers<[1], [1], [0], [0], [0, 0, 1, 0], [], []>} : vector<14x32xf32>, vector<14x32xf32>, vector<14x14xf32> -> vector<14x14xf32>
    %cst_422 = arith.constant 0.353553385 : f32
    %1030 = vector.broadcast %cst_422 : f32 to vector<14x14xf32>
    %1031 = arith.mulf %1029, %1030 : vector<14x14xf32>
    %cst_423 = arith.constant -1.000000e+30 : f32
    %1032 = vector.broadcast %cst_423 : f32 to vector<14x14xf32>
    %1033 = arith.select %978, %1031, %1032 : vector<14x14xi1>, vector<14x14xf32>
    %cst_424 = arith.constant dense<0xFF800000> : vector<14xf32>
    %1034 = vector.multi_reduction <maximumf>, %1033, %cst_424 [1] : vector<14x14xf32> to vector<14xf32>
    %1035 = vector.shape_cast %1034 : vector<14xf32> to vector<14x1xf32>
    %1036 = vector.broadcast %1035 : vector<14x1xf32> to vector<14x14xf32>
    %1037 = arith.subf %1033, %1036 : vector<14x14xf32>
    %1038 = math.exp %1037 : vector<14x14xf32>
    %cst_425 = arith.constant dense<0.000000e+00> : vector<14xf32>
    %1039 = vector.multi_reduction <add>, %1038, %cst_425 [1] : vector<14x14xf32> to vector<14xf32>
    %1040 = vector.shape_cast %1039 : vector<14xf32> to vector<14x1xf32>
    %1041 = vector.broadcast %1040 : vector<14x1xf32> to vector<14x14xf32>
    %1042 = arith.divf %1038, %1041 : vector<14x14xf32>
    %1043 = arith.mulf %951, %1027 : vector<14x32xf32>
    %cst_426 = arith.constant dense<0.000000e+00> : vector<14x32xf32>
    %1044 = tpu.matmul %1042, %1043, %cst_426 {dimension_numbers = #tpu.dot_dimension_numbers<[1], [0], [0], [1], [0, 0, 1, 1], [], []>} : vector<14x14xf32>, vector<14x32xf32>, vector<14x32xf32> -> vector<14x32xf32>
    %1045 = arith.addf %1013, %1044 : vector<14x32xf32>
    %c16_i32_427 = arith.constant 16 : i32
    %1046 = vector.broadcast %c16_i32_427 : i32 to vector<14x32xi32>
    %1047 = arith.cmpi sge, %979, %1046 : vector<14x32xi32>
    %c24_i32_428 = arith.constant 24 : i32
    %1048 = vector.broadcast %c24_i32_428 : i32 to vector<14x32xi32>
    %1049 = arith.cmpi slt, %979, %1048 : vector<14x32xi32>
    %1050 = arith.andi %1047, %1049 : vector<14x32xi1>
    %1051 = arith.extui %1050 : vector<14x32xi1> to vector<14x32xi32>
    %1052 = arith.sitofp %1051 : vector<14x32xi32> to vector<14x32xf32>
    %c16_i32_429 = arith.constant 16 : i32
    %1053 = vector.broadcast %c16_i32_429 : i32 to vector<14x32xi32>
    %1054 = arith.cmpi sge, %980, %1053 : vector<14x32xi32>
    %c24_i32_430 = arith.constant 24 : i32
    %1055 = vector.broadcast %c24_i32_430 : i32 to vector<14x32xi32>
    %1056 = arith.cmpi slt, %980, %1055 : vector<14x32xi32>
    %1057 = arith.andi %1054, %1056 : vector<14x32xi1>
    %1058 = arith.extui %1057 : vector<14x32xi1> to vector<14x32xi32>
    %1059 = arith.sitofp %1058 : vector<14x32xi32> to vector<14x32xf32>
    %1060 = arith.mulf %949, %1052 : vector<14x32xf32>
    %cst_431 = arith.constant dense<0.000000e+00> : vector<14x14xf32>
    %1061 = tpu.matmul %1060, %950, %cst_431 {dimension_numbers = #tpu.dot_dimension_numbers<[1], [1], [0], [0], [0, 0, 1, 0], [], []>} : vector<14x32xf32>, vector<14x32xf32>, vector<14x14xf32> -> vector<14x14xf32>
    %cst_432 = arith.constant 0.353553385 : f32
    %1062 = vector.broadcast %cst_432 : f32 to vector<14x14xf32>
    %1063 = arith.mulf %1061, %1062 : vector<14x14xf32>
    %cst_433 = arith.constant -1.000000e+30 : f32
    %1064 = vector.broadcast %cst_433 : f32 to vector<14x14xf32>
    %1065 = arith.select %978, %1063, %1064 : vector<14x14xi1>, vector<14x14xf32>
    %cst_434 = arith.constant dense<0xFF800000> : vector<14xf32>
    %1066 = vector.multi_reduction <maximumf>, %1065, %cst_434 [1] : vector<14x14xf32> to vector<14xf32>
    %1067 = vector.shape_cast %1066 : vector<14xf32> to vector<14x1xf32>
    %1068 = vector.broadcast %1067 : vector<14x1xf32> to vector<14x14xf32>
    %1069 = arith.subf %1065, %1068 : vector<14x14xf32>
    %1070 = math.exp %1069 : vector<14x14xf32>
    %cst_435 = arith.constant dense<0.000000e+00> : vector<14xf32>
    %1071 = vector.multi_reduction <add>, %1070, %cst_435 [1] : vector<14x14xf32> to vector<14xf32>
    %1072 = vector.shape_cast %1071 : vector<14xf32> to vector<14x1xf32>
    %1073 = vector.broadcast %1072 : vector<14x1xf32> to vector<14x14xf32>
    %1074 = arith.divf %1070, %1073 : vector<14x14xf32>
    %1075 = arith.mulf %951, %1059 : vector<14x32xf32>
    %cst_436 = arith.constant dense<0.000000e+00> : vector<14x32xf32>
    %1076 = tpu.matmul %1074, %1075, %cst_436 {dimension_numbers = #tpu.dot_dimension_numbers<[1], [0], [0], [1], [0, 0, 1, 1], [], []>} : vector<14x14xf32>, vector<14x32xf32>, vector<14x32xf32> -> vector<14x32xf32>
    %1077 = arith.addf %1045, %1076 : vector<14x32xf32>
    %c24_i32_437 = arith.constant 24 : i32
    %1078 = vector.broadcast %c24_i32_437 : i32 to vector<14x32xi32>
    %1079 = arith.cmpi sge, %979, %1078 : vector<14x32xi32>
    %c32_i32_438 = arith.constant 32 : i32
    %1080 = vector.broadcast %c32_i32_438 : i32 to vector<14x32xi32>
    %1081 = arith.cmpi slt, %979, %1080 : vector<14x32xi32>
    %1082 = arith.andi %1079, %1081 : vector<14x32xi1>
    %1083 = arith.extui %1082 : vector<14x32xi1> to vector<14x32xi32>
    %1084 = arith.sitofp %1083 : vector<14x32xi32> to vector<14x32xf32>
    %c24_i32_439 = arith.constant 24 : i32
    %1085 = vector.broadcast %c24_i32_439 : i32 to vector<14x32xi32>
    %1086 = arith.cmpi sge, %980, %1085 : vector<14x32xi32>
    %c32_i32_440 = arith.constant 32 : i32
    %1087 = vector.broadcast %c32_i32_440 : i32 to vector<14x32xi32>
    %1088 = arith.cmpi slt, %980, %1087 : vector<14x32xi32>
    %1089 = arith.andi %1086, %1088 : vector<14x32xi1>
    %1090 = arith.extui %1089 : vector<14x32xi1> to vector<14x32xi32>
    %1091 = arith.sitofp %1090 : vector<14x32xi32> to vector<14x32xf32>
    %1092 = arith.mulf %949, %1084 : vector<14x32xf32>
    %cst_441 = arith.constant dense<0.000000e+00> : vector<14x14xf32>
    %1093 = tpu.matmul %1092, %950, %cst_441 {dimension_numbers = #tpu.dot_dimension_numbers<[1], [1], [0], [0], [0, 0, 1, 0], [], []>} : vector<14x32xf32>, vector<14x32xf32>, vector<14x14xf32> -> vector<14x14xf32>
    %cst_442 = arith.constant 0.353553385 : f32
    %1094 = vector.broadcast %cst_442 : f32 to vector<14x14xf32>
    %1095 = arith.mulf %1093, %1094 : vector<14x14xf32>
    %cst_443 = arith.constant -1.000000e+30 : f32
    %1096 = vector.broadcast %cst_443 : f32 to vector<14x14xf32>
    %1097 = arith.select %978, %1095, %1096 : vector<14x14xi1>, vector<14x14xf32>
    %cst_444 = arith.constant dense<0xFF800000> : vector<14xf32>
    %1098 = vector.multi_reduction <maximumf>, %1097, %cst_444 [1] : vector<14x14xf32> to vector<14xf32>
    %1099 = vector.shape_cast %1098 : vector<14xf32> to vector<14x1xf32>
    %1100 = vector.broadcast %1099 : vector<14x1xf32> to vector<14x14xf32>
    %1101 = arith.subf %1097, %1100 : vector<14x14xf32>
    %1102 = math.exp %1101 : vector<14x14xf32>
    %cst_445 = arith.constant dense<0.000000e+00> : vector<14xf32>
    %1103 = vector.multi_reduction <add>, %1102, %cst_445 [1] : vector<14x14xf32> to vector<14xf32>
    %1104 = vector.shape_cast %1103 : vector<14xf32> to vector<14x1xf32>
    %1105 = vector.broadcast %1104 : vector<14x1xf32> to vector<14x14xf32>
    %1106 = arith.divf %1102, %1105 : vector<14x14xf32>
    %1107 = arith.mulf %951, %1091 : vector<14x32xf32>
    %cst_446 = arith.constant dense<0.000000e+00> : vector<14x32xf32>
    %1108 = tpu.matmul %1106, %1107, %cst_446 {dimension_numbers = #tpu.dot_dimension_numbers<[1], [0], [0], [1], [0, 0, 1, 1], [], []>} : vector<14x14xf32>, vector<14x32xf32>, vector<14x32xf32> -> vector<14x32xf32>
    %1109 = arith.addf %1077, %1108 : vector<14x32xf32>
    %cst_447 = arith.constant dense<0.000000e+00> : vector<14x32xf32>
    %1110 = tpu.matmul %1109, %56, %cst_447 {dimension_numbers = #tpu.dot_dimension_numbers<[1], [0], [0], [1], [0, 0, 1, 1], [], []>} : vector<14x32xf32>, vector<32x32xf32>, vector<14x32xf32> -> vector<14x32xf32>
    %1111 = vector.broadcast %57 : vector<1x32xf32> to vector<14x32xf32>
    %1112 = arith.addf %1110, %1111 : vector<14x32xf32>
    %1113 = arith.addf %945, %1112 : vector<14x32xf32>
    %cst_448 = arith.constant dense<0.000000e+00> : vector<14xf32>
    %1114 = vector.multi_reduction <add>, %1113, %cst_448 [1] : vector<14x32xf32> to vector<14xf32>
    %1115 = vector.shape_cast %1114 : vector<14xf32> to vector<14x1xf32>
    %cst_449 = arith.constant 3.200000e+01 : f32
    %1116 = vector.broadcast %cst_449 : f32 to vector<14x1xf32>
    %1117 = arith.divf %1115, %1116 : vector<14x1xf32>
    %1118 = vector.broadcast %1117 : vector<14x1xf32> to vector<14x32xf32>
    %1119 = arith.subf %1113, %1118 : vector<14x32xf32>
    %1120 = arith.mulf %1119, %1119 : vector<14x32xf32>
    %cst_450 = arith.constant dense<0.000000e+00> : vector<14xf32>
    %1121 = vector.multi_reduction <add>, %1120, %cst_450 [1] : vector<14x32xf32> to vector<14xf32>
    %1122 = vector.shape_cast %1121 : vector<14xf32> to vector<14x1xf32>
    %cst_451 = arith.constant 3.200000e+01 : f32
    %1123 = vector.broadcast %cst_451 : f32 to vector<14x1xf32>
    %1124 = arith.divf %1122, %1123 : vector<14x1xf32>
    %cst_452 = arith.constant 9.99999974E-6 : f32
    %1125 = vector.broadcast %cst_452 : f32 to vector<14x1xf32>
    %1126 = arith.addf %1124, %1125 : vector<14x1xf32>
    %1127 = math.rsqrt %1126 : vector<14x1xf32>
    %1128 = vector.broadcast %1127 : vector<14x1xf32> to vector<14x32xf32>
    %1129 = arith.mulf %1119, %1128 : vector<14x32xf32>
    %1130 = vector.broadcast %66 : vector<1x32xf32> to vector<14x32xf32>
    %1131 = arith.mulf %1129, %1130 : vector<14x32xf32>
    %1132 = vector.broadcast %67 : vector<1x32xf32> to vector<14x32xf32>
    %1133 = arith.addf %1131, %1132 : vector<14x32xf32>
    %cst_453 = arith.constant dense<0.000000e+00> : vector<14x96xf32>
    %1134 = tpu.matmul %1133, %58, %cst_453 {dimension_numbers = #tpu.dot_dimension_numbers<[1], [0], [0], [1], [0, 0, 1, 1], [], []>} : vector<14x32xf32>, vector<32x96xf32>, vector<14x96xf32> -> vector<14x96xf32>
    %1135 = vector.broadcast %59 : vector<1x96xf32> to vector<14x96xf32>
    %1136 = arith.addf %1134, %1135 : vector<14x96xf32>
    %cst_454 = arith.constant dense<0.000000e+00> : vector<16x96xf32>
    %1137 = tpu.matmul %537, %58, %cst_454 {dimension_numbers = #tpu.dot_dimension_numbers<[1], [0], [0], [1], [0, 0, 1, 1], [], []>} : vector<16x32xf32>, vector<32x96xf32>, vector<16x96xf32> -> vector<16x96xf32>
    %1138 = vector.broadcast %59 : vector<1x96xf32> to vector<16x96xf32>
    %1139 = arith.addf %1137, %1138 : vector<16x96xf32>
    %1140 = vector.extract_strided_slice %1136 {offsets = [0, 0], sizes = [14, 32], strides = [1, 1]} : vector<14x96xf32> to vector<14x32xf32>
    %1141 = vector.extract_strided_slice %1139 {offsets = [0, 32], sizes = [16, 32], strides = [1, 1]} : vector<16x96xf32> to vector<16x32xf32>
    %1142 = vector.extract_strided_slice %1139 {offsets = [0, 64], sizes = [16, 32], strides = [1, 1]} : vector<16x96xf32> to vector<16x32xf32>
    %1143 = tpu.iota {dimensions = array<i32: 0>} : vector<14x16xi32>
    %1144 = tpu.iota {dimensions = array<i32: 1>} : vector<14x16xi32>
    %false_455 = arith.constant false
    %1145 = vector.broadcast %false_455 : i1 to vector<14x16xi1>
    %c0_i32_456 = arith.constant 0 : i32
    %1146 = vector.broadcast %c0_i32_456 : i32 to vector<14x16xi32>
    %1147 = arith.cmpi sge, %1143, %1146 : vector<14x16xi32>
    %c7_i32_457 = arith.constant 7 : i32
    %1148 = vector.broadcast %c7_i32_457 : i32 to vector<14x16xi32>
    %1149 = arith.cmpi slt, %1143, %1148 : vector<14x16xi32>
    %1150 = arith.andi %1147, %1149 : vector<14x16xi1>
    %c0_i32_458 = arith.constant 0 : i32
    %1151 = vector.broadcast %c0_i32_458 : i32 to vector<14x16xi32>
    %1152 = arith.cmpi sge, %1144, %1151 : vector<14x16xi32>
    %1153 = arith.andi %1150, %1152 : vector<14x16xi1>
    %c8_i32_459 = arith.constant 8 : i32
    %1154 = vector.broadcast %c8_i32_459 : i32 to vector<14x16xi32>
    %1155 = arith.cmpi slt, %1144, %1154 : vector<14x16xi32>
    %1156 = arith.andi %1153, %1155 : vector<14x16xi1>
    %1157 = arith.ori %1145, %1156 : vector<14x16xi1>
    %c7_i32_460 = arith.constant 7 : i32
    %1158 = vector.broadcast %c7_i32_460 : i32 to vector<14x16xi32>
    %1159 = arith.cmpi sge, %1143, %1158 : vector<14x16xi32>
    %c14_i32_461 = arith.constant 14 : i32
    %1160 = vector.broadcast %c14_i32_461 : i32 to vector<14x16xi32>
    %1161 = arith.cmpi slt, %1143, %1160 : vector<14x16xi32>
    %1162 = arith.andi %1159, %1161 : vector<14x16xi1>
    %c8_i32_462 = arith.constant 8 : i32
    %1163 = vector.broadcast %c8_i32_462 : i32 to vector<14x16xi32>
    %1164 = arith.cmpi sge, %1144, %1163 : vector<14x16xi32>
    %1165 = arith.andi %1162, %1164 : vector<14x16xi1>
    %c16_i32_463 = arith.constant 16 : i32
    %1166 = vector.broadcast %c16_i32_463 : i32 to vector<14x16xi32>
    %1167 = arith.cmpi slt, %1144, %1166 : vector<14x16xi32>
    %1168 = arith.andi %1165, %1167 : vector<14x16xi1>
    %1169 = arith.ori %1157, %1168 : vector<14x16xi1>
    %1170 = tpu.iota {dimensions = array<i32: 1>} : vector<14x32xi32>
    %1171 = tpu.iota {dimensions = array<i32: 1>} : vector<16x32xi32>
    %cst_464 = arith.constant 0.000000e+00 : f32
    %1172 = vector.broadcast %cst_464 : f32 to vector<14x32xf32>
    %c0_i32_465 = arith.constant 0 : i32
    %1173 = vector.broadcast %c0_i32_465 : i32 to vector<14x32xi32>
    %1174 = arith.cmpi sge, %1170, %1173 : vector<14x32xi32>
    %c8_i32_466 = arith.constant 8 : i32
    %1175 = vector.broadcast %c8_i32_466 : i32 to vector<14x32xi32>
    %1176 = arith.cmpi slt, %1170, %1175 : vector<14x32xi32>
    %1177 = arith.andi %1174, %1176 : vector<14x32xi1>
    %1178 = arith.extui %1177 : vector<14x32xi1> to vector<14x32xi32>
    %1179 = arith.sitofp %1178 : vector<14x32xi32> to vector<14x32xf32>
    %c0_i32_467 = arith.constant 0 : i32
    %1180 = vector.broadcast %c0_i32_467 : i32 to vector<16x32xi32>
    %1181 = arith.cmpi sge, %1171, %1180 : vector<16x32xi32>
    %c8_i32_468 = arith.constant 8 : i32
    %1182 = vector.broadcast %c8_i32_468 : i32 to vector<16x32xi32>
    %1183 = arith.cmpi slt, %1171, %1182 : vector<16x32xi32>
    %1184 = arith.andi %1181, %1183 : vector<16x32xi1>
    %1185 = arith.extui %1184 : vector<16x32xi1> to vector<16x32xi32>
    %1186 = arith.sitofp %1185 : vector<16x32xi32> to vector<16x32xf32>
    %1187 = arith.mulf %1140, %1179 : vector<14x32xf32>
    %cst_469 = arith.constant dense<0.000000e+00> : vector<14x16xf32>
    %1188 = tpu.matmul %1187, %1141, %cst_469 {dimension_numbers = #tpu.dot_dimension_numbers<[1], [1], [0], [0], [0, 0, 1, 0], [], []>} : vector<14x32xf32>, vector<16x32xf32>, vector<14x16xf32> -> vector<14x16xf32>
    %cst_470 = arith.constant 0.353553385 : f32
    %1189 = vector.broadcast %cst_470 : f32 to vector<14x16xf32>
    %1190 = arith.mulf %1188, %1189 : vector<14x16xf32>
    %cst_471 = arith.constant -1.000000e+30 : f32
    %1191 = vector.broadcast %cst_471 : f32 to vector<14x16xf32>
    %1192 = arith.select %1169, %1190, %1191 : vector<14x16xi1>, vector<14x16xf32>
    %cst_472 = arith.constant dense<0xFF800000> : vector<14xf32>
    %1193 = vector.multi_reduction <maximumf>, %1192, %cst_472 [1] : vector<14x16xf32> to vector<14xf32>
    %1194 = vector.shape_cast %1193 : vector<14xf32> to vector<14x1xf32>
    %1195 = vector.broadcast %1194 : vector<14x1xf32> to vector<14x16xf32>
    %1196 = arith.subf %1192, %1195 : vector<14x16xf32>
    %1197 = math.exp %1196 : vector<14x16xf32>
    %cst_473 = arith.constant dense<0.000000e+00> : vector<14xf32>
    %1198 = vector.multi_reduction <add>, %1197, %cst_473 [1] : vector<14x16xf32> to vector<14xf32>
    %1199 = vector.shape_cast %1198 : vector<14xf32> to vector<14x1xf32>
    %1200 = vector.broadcast %1199 : vector<14x1xf32> to vector<14x16xf32>
    %1201 = arith.divf %1197, %1200 : vector<14x16xf32>
    %1202 = arith.mulf %1142, %1186 : vector<16x32xf32>
    %cst_474 = arith.constant dense<0.000000e+00> : vector<14x32xf32>
    %1203 = tpu.matmul %1201, %1202, %cst_474 {dimension_numbers = #tpu.dot_dimension_numbers<[1], [0], [0], [1], [0, 0, 1, 1], [], []>} : vector<14x16xf32>, vector<16x32xf32>, vector<14x32xf32> -> vector<14x32xf32>
    %1204 = arith.addf %1172, %1203 : vector<14x32xf32>
    %c8_i32_475 = arith.constant 8 : i32
    %1205 = vector.broadcast %c8_i32_475 : i32 to vector<14x32xi32>
    %1206 = arith.cmpi sge, %1170, %1205 : vector<14x32xi32>
    %c16_i32_476 = arith.constant 16 : i32
    %1207 = vector.broadcast %c16_i32_476 : i32 to vector<14x32xi32>
    %1208 = arith.cmpi slt, %1170, %1207 : vector<14x32xi32>
    %1209 = arith.andi %1206, %1208 : vector<14x32xi1>
    %1210 = arith.extui %1209 : vector<14x32xi1> to vector<14x32xi32>
    %1211 = arith.sitofp %1210 : vector<14x32xi32> to vector<14x32xf32>
    %c8_i32_477 = arith.constant 8 : i32
    %1212 = vector.broadcast %c8_i32_477 : i32 to vector<16x32xi32>
    %1213 = arith.cmpi sge, %1171, %1212 : vector<16x32xi32>
    %c16_i32_478 = arith.constant 16 : i32
    %1214 = vector.broadcast %c16_i32_478 : i32 to vector<16x32xi32>
    %1215 = arith.cmpi slt, %1171, %1214 : vector<16x32xi32>
    %1216 = arith.andi %1213, %1215 : vector<16x32xi1>
    %1217 = arith.extui %1216 : vector<16x32xi1> to vector<16x32xi32>
    %1218 = arith.sitofp %1217 : vector<16x32xi32> to vector<16x32xf32>
    %1219 = arith.mulf %1140, %1211 : vector<14x32xf32>
    %cst_479 = arith.constant dense<0.000000e+00> : vector<14x16xf32>
    %1220 = tpu.matmul %1219, %1141, %cst_479 {dimension_numbers = #tpu.dot_dimension_numbers<[1], [1], [0], [0], [0, 0, 1, 0], [], []>} : vector<14x32xf32>, vector<16x32xf32>, vector<14x16xf32> -> vector<14x16xf32>
    %cst_480 = arith.constant 0.353553385 : f32
    %1221 = vector.broadcast %cst_480 : f32 to vector<14x16xf32>
    %1222 = arith.mulf %1220, %1221 : vector<14x16xf32>
    %cst_481 = arith.constant -1.000000e+30 : f32
    %1223 = vector.broadcast %cst_481 : f32 to vector<14x16xf32>
    %1224 = arith.select %1169, %1222, %1223 : vector<14x16xi1>, vector<14x16xf32>
    %cst_482 = arith.constant dense<0xFF800000> : vector<14xf32>
    %1225 = vector.multi_reduction <maximumf>, %1224, %cst_482 [1] : vector<14x16xf32> to vector<14xf32>
    %1226 = vector.shape_cast %1225 : vector<14xf32> to vector<14x1xf32>
    %1227 = vector.broadcast %1226 : vector<14x1xf32> to vector<14x16xf32>
    %1228 = arith.subf %1224, %1227 : vector<14x16xf32>
    %1229 = math.exp %1228 : vector<14x16xf32>
    %cst_483 = arith.constant dense<0.000000e+00> : vector<14xf32>
    %1230 = vector.multi_reduction <add>, %1229, %cst_483 [1] : vector<14x16xf32> to vector<14xf32>
    %1231 = vector.shape_cast %1230 : vector<14xf32> to vector<14x1xf32>
    %1232 = vector.broadcast %1231 : vector<14x1xf32> to vector<14x16xf32>
    %1233 = arith.divf %1229, %1232 : vector<14x16xf32>
    %1234 = arith.mulf %1142, %1218 : vector<16x32xf32>
    %cst_484 = arith.constant dense<0.000000e+00> : vector<14x32xf32>
    %1235 = tpu.matmul %1233, %1234, %cst_484 {dimension_numbers = #tpu.dot_dimension_numbers<[1], [0], [0], [1], [0, 0, 1, 1], [], []>} : vector<14x16xf32>, vector<16x32xf32>, vector<14x32xf32> -> vector<14x32xf32>
    %1236 = arith.addf %1204, %1235 : vector<14x32xf32>
    %c16_i32_485 = arith.constant 16 : i32
    %1237 = vector.broadcast %c16_i32_485 : i32 to vector<14x32xi32>
    %1238 = arith.cmpi sge, %1170, %1237 : vector<14x32xi32>
    %c24_i32_486 = arith.constant 24 : i32
    %1239 = vector.broadcast %c24_i32_486 : i32 to vector<14x32xi32>
    %1240 = arith.cmpi slt, %1170, %1239 : vector<14x32xi32>
    %1241 = arith.andi %1238, %1240 : vector<14x32xi1>
    %1242 = arith.extui %1241 : vector<14x32xi1> to vector<14x32xi32>
    %1243 = arith.sitofp %1242 : vector<14x32xi32> to vector<14x32xf32>
    %c16_i32_487 = arith.constant 16 : i32
    %1244 = vector.broadcast %c16_i32_487 : i32 to vector<16x32xi32>
    %1245 = arith.cmpi sge, %1171, %1244 : vector<16x32xi32>
    %c24_i32_488 = arith.constant 24 : i32
    %1246 = vector.broadcast %c24_i32_488 : i32 to vector<16x32xi32>
    %1247 = arith.cmpi slt, %1171, %1246 : vector<16x32xi32>
    %1248 = arith.andi %1245, %1247 : vector<16x32xi1>
    %1249 = arith.extui %1248 : vector<16x32xi1> to vector<16x32xi32>
    %1250 = arith.sitofp %1249 : vector<16x32xi32> to vector<16x32xf32>
    %1251 = arith.mulf %1140, %1243 : vector<14x32xf32>
    %cst_489 = arith.constant dense<0.000000e+00> : vector<14x16xf32>
    %1252 = tpu.matmul %1251, %1141, %cst_489 {dimension_numbers = #tpu.dot_dimension_numbers<[1], [1], [0], [0], [0, 0, 1, 0], [], []>} : vector<14x32xf32>, vector<16x32xf32>, vector<14x16xf32> -> vector<14x16xf32>
    %cst_490 = arith.constant 0.353553385 : f32
    %1253 = vector.broadcast %cst_490 : f32 to vector<14x16xf32>
    %1254 = arith.mulf %1252, %1253 : vector<14x16xf32>
    %cst_491 = arith.constant -1.000000e+30 : f32
    %1255 = vector.broadcast %cst_491 : f32 to vector<14x16xf32>
    %1256 = arith.select %1169, %1254, %1255 : vector<14x16xi1>, vector<14x16xf32>
    %cst_492 = arith.constant dense<0xFF800000> : vector<14xf32>
    %1257 = vector.multi_reduction <maximumf>, %1256, %cst_492 [1] : vector<14x16xf32> to vector<14xf32>
    %1258 = vector.shape_cast %1257 : vector<14xf32> to vector<14x1xf32>
    %1259 = vector.broadcast %1258 : vector<14x1xf32> to vector<14x16xf32>
    %1260 = arith.subf %1256, %1259 : vector<14x16xf32>
    %1261 = math.exp %1260 : vector<14x16xf32>
    %cst_493 = arith.constant dense<0.000000e+00> : vector<14xf32>
    %1262 = vector.multi_reduction <add>, %1261, %cst_493 [1] : vector<14x16xf32> to vector<14xf32>
    %1263 = vector.shape_cast %1262 : vector<14xf32> to vector<14x1xf32>
    %1264 = vector.broadcast %1263 : vector<14x1xf32> to vector<14x16xf32>
    %1265 = arith.divf %1261, %1264 : vector<14x16xf32>
    %1266 = arith.mulf %1142, %1250 : vector<16x32xf32>
    %cst_494 = arith.constant dense<0.000000e+00> : vector<14x32xf32>
    %1267 = tpu.matmul %1265, %1266, %cst_494 {dimension_numbers = #tpu.dot_dimension_numbers<[1], [0], [0], [1], [0, 0, 1, 1], [], []>} : vector<14x16xf32>, vector<16x32xf32>, vector<14x32xf32> -> vector<14x32xf32>
    %1268 = arith.addf %1236, %1267 : vector<14x32xf32>
    %c24_i32_495 = arith.constant 24 : i32
    %1269 = vector.broadcast %c24_i32_495 : i32 to vector<14x32xi32>
    %1270 = arith.cmpi sge, %1170, %1269 : vector<14x32xi32>
    %c32_i32_496 = arith.constant 32 : i32
    %1271 = vector.broadcast %c32_i32_496 : i32 to vector<14x32xi32>
    %1272 = arith.cmpi slt, %1170, %1271 : vector<14x32xi32>
    %1273 = arith.andi %1270, %1272 : vector<14x32xi1>
    %1274 = arith.extui %1273 : vector<14x32xi1> to vector<14x32xi32>
    %1275 = arith.sitofp %1274 : vector<14x32xi32> to vector<14x32xf32>
    %c24_i32_497 = arith.constant 24 : i32
    %1276 = vector.broadcast %c24_i32_497 : i32 to vector<16x32xi32>
    %1277 = arith.cmpi sge, %1171, %1276 : vector<16x32xi32>
    %c32_i32_498 = arith.constant 32 : i32
    %1278 = vector.broadcast %c32_i32_498 : i32 to vector<16x32xi32>
    %1279 = arith.cmpi slt, %1171, %1278 : vector<16x32xi32>
    %1280 = arith.andi %1277, %1279 : vector<16x32xi1>
    %1281 = arith.extui %1280 : vector<16x32xi1> to vector<16x32xi32>
    %1282 = arith.sitofp %1281 : vector<16x32xi32> to vector<16x32xf32>
    %1283 = arith.mulf %1140, %1275 : vector<14x32xf32>
    %cst_499 = arith.constant dense<0.000000e+00> : vector<14x16xf32>
    %1284 = tpu.matmul %1283, %1141, %cst_499 {dimension_numbers = #tpu.dot_dimension_numbers<[1], [1], [0], [0], [0, 0, 1, 0], [], []>} : vector<14x32xf32>, vector<16x32xf32>, vector<14x16xf32> -> vector<14x16xf32>
    %cst_500 = arith.constant 0.353553385 : f32
    %1285 = vector.broadcast %cst_500 : f32 to vector<14x16xf32>
    %1286 = arith.mulf %1284, %1285 : vector<14x16xf32>
    %cst_501 = arith.constant -1.000000e+30 : f32
    %1287 = vector.broadcast %cst_501 : f32 to vector<14x16xf32>
    %1288 = arith.select %1169, %1286, %1287 : vector<14x16xi1>, vector<14x16xf32>
    %cst_502 = arith.constant dense<0xFF800000> : vector<14xf32>
    %1289 = vector.multi_reduction <maximumf>, %1288, %cst_502 [1] : vector<14x16xf32> to vector<14xf32>
    %1290 = vector.shape_cast %1289 : vector<14xf32> to vector<14x1xf32>
    %1291 = vector.broadcast %1290 : vector<14x1xf32> to vector<14x16xf32>
    %1292 = arith.subf %1288, %1291 : vector<14x16xf32>
    %1293 = math.exp %1292 : vector<14x16xf32>
    %cst_503 = arith.constant dense<0.000000e+00> : vector<14xf32>
    %1294 = vector.multi_reduction <add>, %1293, %cst_503 [1] : vector<14x16xf32> to vector<14xf32>
    %1295 = vector.shape_cast %1294 : vector<14xf32> to vector<14x1xf32>
    %1296 = vector.broadcast %1295 : vector<14x1xf32> to vector<14x16xf32>
    %1297 = arith.divf %1293, %1296 : vector<14x16xf32>
    %1298 = arith.mulf %1142, %1282 : vector<16x32xf32>
    %cst_504 = arith.constant dense<0.000000e+00> : vector<14x32xf32>
    %1299 = tpu.matmul %1297, %1298, %cst_504 {dimension_numbers = #tpu.dot_dimension_numbers<[1], [0], [0], [1], [0, 0, 1, 1], [], []>} : vector<14x16xf32>, vector<16x32xf32>, vector<14x32xf32> -> vector<14x32xf32>
    %1300 = arith.addf %1268, %1299 : vector<14x32xf32>
    %cst_505 = arith.constant dense<0.000000e+00> : vector<14x32xf32>
    %1301 = tpu.matmul %1300, %60, %cst_505 {dimension_numbers = #tpu.dot_dimension_numbers<[1], [0], [0], [1], [0, 0, 1, 1], [], []>} : vector<14x32xf32>, vector<32x32xf32>, vector<14x32xf32> -> vector<14x32xf32>
    %1302 = vector.broadcast %61 : vector<1x32xf32> to vector<14x32xf32>
    %1303 = arith.addf %1301, %1302 : vector<14x32xf32>
    %1304 = arith.addf %1133, %1303 : vector<14x32xf32>
    %cst_506 = arith.constant dense<0.000000e+00> : vector<14xf32>
    %1305 = vector.multi_reduction <add>, %1304, %cst_506 [1] : vector<14x32xf32> to vector<14xf32>
    %1306 = vector.shape_cast %1305 : vector<14xf32> to vector<14x1xf32>
    %cst_507 = arith.constant 3.200000e+01 : f32
    %1307 = vector.broadcast %cst_507 : f32 to vector<14x1xf32>
    %1308 = arith.divf %1306, %1307 : vector<14x1xf32>
    %1309 = vector.broadcast %1308 : vector<14x1xf32> to vector<14x32xf32>
    %1310 = arith.subf %1304, %1309 : vector<14x32xf32>
    %1311 = arith.mulf %1310, %1310 : vector<14x32xf32>
    %cst_508 = arith.constant dense<0.000000e+00> : vector<14xf32>
    %1312 = vector.multi_reduction <add>, %1311, %cst_508 [1] : vector<14x32xf32> to vector<14xf32>
    %1313 = vector.shape_cast %1312 : vector<14xf32> to vector<14x1xf32>
    %cst_509 = arith.constant 3.200000e+01 : f32
    %1314 = vector.broadcast %cst_509 : f32 to vector<14x1xf32>
    %1315 = arith.divf %1313, %1314 : vector<14x1xf32>
    %cst_510 = arith.constant 9.99999974E-6 : f32
    %1316 = vector.broadcast %cst_510 : f32 to vector<14x1xf32>
    %1317 = arith.addf %1315, %1316 : vector<14x1xf32>
    %1318 = math.rsqrt %1317 : vector<14x1xf32>
    %1319 = vector.broadcast %1318 : vector<14x1xf32> to vector<14x32xf32>
    %1320 = arith.mulf %1310, %1319 : vector<14x32xf32>
    %1321 = vector.broadcast %68 : vector<1x32xf32> to vector<14x32xf32>
    %1322 = arith.mulf %1320, %1321 : vector<14x32xf32>
    %1323 = vector.broadcast %69 : vector<1x32xf32> to vector<14x32xf32>
    %1324 = arith.addf %1322, %1323 : vector<14x32xf32>
    %cst_511 = arith.constant dense<0.000000e+00> : vector<14x64xf32>
    %1325 = tpu.matmul %1324, %62, %cst_511 {dimension_numbers = #tpu.dot_dimension_numbers<[1], [0], [0], [1], [0, 0, 1, 1], [], []>} : vector<14x32xf32>, vector<32x64xf32>, vector<14x64xf32> -> vector<14x64xf32>
    %1326 = vector.broadcast %63 : vector<1x64xf32> to vector<14x64xf32>
    %1327 = arith.addf %1325, %1326 : vector<14x64xf32>
    %cst_512 = arith.constant 0.000000e+00 : f32
    %1328 = vector.broadcast %cst_512 : f32 to vector<14x64xf32>
    %1329 = arith.maximumf %1327, %1328 : vector<14x64xf32>
    %cst_513 = arith.constant dense<0.000000e+00> : vector<14x32xf32>
    %1330 = tpu.matmul %1329, %64, %cst_513 {dimension_numbers = #tpu.dot_dimension_numbers<[1], [0], [0], [1], [0, 0, 1, 1], [], []>} : vector<14x64xf32>, vector<64x32xf32>, vector<14x32xf32> -> vector<14x32xf32>
    %1331 = vector.broadcast %65 : vector<1x32xf32> to vector<14x32xf32>
    %1332 = arith.addf %1330, %1331 : vector<14x32xf32>
    %1333 = arith.addf %1324, %1332 : vector<14x32xf32>
    %cst_514 = arith.constant dense<0.000000e+00> : vector<14xf32>
    %1334 = vector.multi_reduction <add>, %1333, %cst_514 [1] : vector<14x32xf32> to vector<14xf32>
    %1335 = vector.shape_cast %1334 : vector<14xf32> to vector<14x1xf32>
    %cst_515 = arith.constant 3.200000e+01 : f32
    %1336 = vector.broadcast %cst_515 : f32 to vector<14x1xf32>
    %1337 = arith.divf %1335, %1336 : vector<14x1xf32>
    %1338 = vector.broadcast %1337 : vector<14x1xf32> to vector<14x32xf32>
    %1339 = arith.subf %1333, %1338 : vector<14x32xf32>
    %1340 = arith.mulf %1339, %1339 : vector<14x32xf32>
    %cst_516 = arith.constant dense<0.000000e+00> : vector<14xf32>
    %1341 = vector.multi_reduction <add>, %1340, %cst_516 [1] : vector<14x32xf32> to vector<14xf32>
    %1342 = vector.shape_cast %1341 : vector<14xf32> to vector<14x1xf32>
    %cst_517 = arith.constant 3.200000e+01 : f32
    %1343 = vector.broadcast %cst_517 : f32 to vector<14x1xf32>
    %1344 = arith.divf %1342, %1343 : vector<14x1xf32>
    %cst_518 = arith.constant 9.99999974E-6 : f32
    %1345 = vector.broadcast %cst_518 : f32 to vector<14x1xf32>
    %1346 = arith.addf %1344, %1345 : vector<14x1xf32>
    %1347 = math.rsqrt %1346 : vector<14x1xf32>
    %1348 = vector.broadcast %1347 : vector<14x1xf32> to vector<14x32xf32>
    %1349 = arith.mulf %1339, %1348 : vector<14x32xf32>
    %1350 = vector.broadcast %70 : vector<1x32xf32> to vector<14x32xf32>
    %1351 = arith.mulf %1349, %1350 : vector<14x32xf32>
    %1352 = vector.broadcast %71 : vector<1x32xf32> to vector<14x32xf32>
    %1353 = arith.addf %1351, %1352 : vector<14x32xf32>
    %cst_519 = arith.constant dense<0.000000e+00> : vector<14xf32>
    %1354 = vector.multi_reduction <add>, %1353, %cst_519 [1] : vector<14x32xf32> to vector<14xf32>
    %1355 = vector.shape_cast %1354 : vector<14xf32> to vector<14x1xf32>
    %cst_520 = arith.constant 3.200000e+01 : f32
    %1356 = vector.broadcast %cst_520 : f32 to vector<14x1xf32>
    %1357 = arith.divf %1355, %1356 : vector<14x1xf32>
    %1358 = vector.broadcast %1357 : vector<14x1xf32> to vector<14x32xf32>
    %1359 = arith.subf %1353, %1358 : vector<14x32xf32>
    %1360 = arith.mulf %1359, %1359 : vector<14x32xf32>
    %cst_521 = arith.constant dense<0.000000e+00> : vector<14xf32>
    %1361 = vector.multi_reduction <add>, %1360, %cst_521 [1] : vector<14x32xf32> to vector<14xf32>
    %1362 = vector.shape_cast %1361 : vector<14xf32> to vector<14x1xf32>
    %cst_522 = arith.constant 3.200000e+01 : f32
    %1363 = vector.broadcast %cst_522 : f32 to vector<14x1xf32>
    %1364 = arith.divf %1362, %1363 : vector<14x1xf32>
    %cst_523 = arith.constant 9.99999974E-6 : f32
    %1365 = vector.broadcast %cst_523 : f32 to vector<14x1xf32>
    %1366 = arith.addf %1364, %1365 : vector<14x1xf32>
    %1367 = math.rsqrt %1366 : vector<14x1xf32>
    %1368 = vector.broadcast %1367 : vector<14x1xf32> to vector<14x32xf32>
    %1369 = arith.mulf %1359, %1368 : vector<14x32xf32>
    %1370 = vector.broadcast %10 : vector<1x32xf32> to vector<14x32xf32>
    %1371 = arith.mulf %1369, %1370 : vector<14x32xf32>
    %1372 = vector.broadcast %11 : vector<1x32xf32> to vector<14x32xf32>
    %1373 = arith.addf %1371, %1372 : vector<14x32xf32>
    %cst_524 = arith.constant dense<0.000000e+00> : vector<14x64xf32>
    %1374 = tpu.matmul %1373, %6, %cst_524 {dimension_numbers = #tpu.dot_dimension_numbers<[1], [0], [0], [1], [0, 0, 1, 1], [], []>} : vector<14x32xf32>, vector<32x64xf32>, vector<14x64xf32> -> vector<14x64xf32>
    %1375 = vector.broadcast %7 : vector<1x64xf32> to vector<14x64xf32>
    %1376 = arith.addf %1374, %1375 : vector<14x64xf32>
    %c0_525 = arith.constant 0 : index
    %c0_526 = arith.constant 0 : index
    %1377 = vector.load %arg72[%c0_525, %c0_526] : memref<14x64xf32, #tpu.memory_space<vmem>>, vector<14x64xf32>
    tpu.vector_store %arg72[%c0_525, %c0_526], %1376 {strides = array<i32>} : memref<14x64xf32, #tpu.memory_space<vmem>>, vector<14x64xf32>,
    return
  }
}

</mosaic_0001>

<bundles_post_ra>
// kernel: tile.19
= control target key start
LH: loop header
LB: loop body
LE: loop exit
PB: predicated region body
PF: predicated region fallthrough
CT: control target
= control target key end

     0   :  { %vm3_vm0 = vcmask 261120   ;;  %s34_s0 = inlined_call_operand.vmem [shape: f32[2,7,32], index: 0, kind: input, shape index: {}]   ;;  %s35_s1 = inlined_call_operand.vmem [shape: f32[14,32], index: 1, kind: output, shape index: {}]  }
   0x1   :  { %v2_v0 = vld [vmem:[%s34_s0] sm:$0x7f]   ;;  %v10_v1 = vld [vmem:[%s34_s0 + $0x8] sm:$0x7f]  }
   0x2   :  { %4 = vst.msk [vmem:[%s35_s1] sm:$0x7f] %vm3_vm0, %v2_v0   ;;  %11 = vst.msk [vmem:[%s35_s1 + $0x7] sm:$0x7f] %vm3_vm0, %v10_v1  }

// kernel: lidar_transformer_forward.1
= control target key start
LH: loop header
LB: loop body
LE: loop exit
PB: predicated region body
PF: predicated region fallthrough
CT: control target
= control target key end

     0   :  { %s11373_s6 = smov 1   ;;  %s11374_s10 = smov 2   ;;  %s13257_s0 = inlined_call_operand.smem [shape: u32[73], index: -1, kind: input, shape index: {}] }
   0x1   :  { %s11481_s5 = sld [smem:[%s13257_s0]]   ;;  %s11375_s14 = smov 3  }
   0x2   :  { %s11486_s9 = sld [smem:[%s13257_s0 + %s11373_s6]]   ;;  %s11376_s18 = smov 4  }
   0x3   :  { %s11491_s13 = sld [smem:[%s13257_s0 + %s11374_s10]]   ;;  %s11377_s22 = smov 5  }
   0x4   :  { %s11496_s17 = sld [smem:[%s13257_s0 + %s11375_s14]]   ;;  %s11378_s26 = smov 6  }
   0x5   :  { %s11501_s21 = sld [smem:[%s13257_s0 + %s11376_s18]]   ;;  %s11379_s30 = smov 7  }
   0x6   :  { %s11506_s25 = sld [smem:[%s13257_s0 + %s11377_s22]]   ;;  %s11380_s4 = smov 8  }
   0x7   :  { %13300 = sst [smem:[#allocation52_spill]] %s11481_s5  ;;  %s11381_s10 = smov 9  }
   0x8   :  { %13301 = sst [smem:[#allocation53_spill]] %s11486_s9  ;;  %s11382_s15 = smov 10  }
   0x9   :  { %13302 = sst [smem:[#allocation54_spill]] %s11491_s13  ;;  %s11383_s20 = smov 11  }
   0xa   :  { %13303 = sst [smem:[#allocation55_spill]] %s11496_s17  ;;  %s11385_s1 = smov 13  }
   0xb   :  { %13304 = sst [smem:[#allocation56_spill]] %s11501_s21  ;;  %s11386_s7 = smov 14  }
   0xc   :  { %13305 = sst [smem:[#allocation57_spill]] %s11506_s25  ;;  %s11388_s22 = smov 16  }
   0xd   :  { %s11511_s29 = sld [smem:[%s13257_s0 + %s11378_s26]]   ;;  %s11384_s26 = smov 12  }
   0xe   :  { %s11516_s3 = sld [smem:[%s13257_s0 + %s11379_s30]]   ;;  %s11389_s28 = smov 17  }
   0xf   :  { %s11521_s8 = sld [smem:[%s13257_s0 + %s11380_s4]]  }
  0x10   :  { %s11526_s14 = sld [smem:[%s13257_s0 + %s11381_s10]]  }
  0x11   :  { %s11531_s19 = sld [smem:[%s13257_s0 + %s11382_s15]]   ;;  %s11387_s15 = smov 15  }
  0x12   :  { %s11536_s24 = sld [smem:[%s13257_s0 + %s11383_s20]]  }
  0x13   :  { %13306 = sst [smem:[#allocation58_spill]] %s11511_s29 }
  0x14   :  { %13307 = sst [smem:[#allocation59_spill]] %s11516_s3 }
  0x15   :  { %13308 = sst [smem:[#allocation60_spill]] %s11521_s8 }
  0x16   :  { %13309 = sst [smem:[#allocation61_spill]] %s11526_s14 }
  0x17   :  { %13310 = sst [smem:[#allocation62_spill]] %s11531_s19 }
  0x18   :  { %13311 = sst [smem:[#allocation63_spill]] %s11536_s24 }
  0x19   :  { %s11541_s30 = sld [smem:[%s13257_s0 + %s11384_s26]]  }
  0x1a   :  { %s11546_s6 = sld [smem:[%s13257_s0 + %s11385_s1]]  }
  0x1b   :  { %s11551_s12 = sld [smem:[%s13257_s0 + %s11386_s7]]   ;;  %s11390_s7 = smov 18  }
  0x1c   :  { %s11556_s20 = sld [smem:[%s13257_s0 + %s11387_s15]]   ;;  %s11391_s15 = smov 19  }
  0x1d   :  { %s11561_s27 = sld [smem:[%s13257_s0 + %s11388_s22]]   ;;  %s11392_s22 = smov 20  }
  0x1e   :  { %s11566_s4 = sld [smem:[%s13257_s0 + %s11389_s28]]   ;;  %s11393_s28 = smov 21  }
  0x1f   :  { %13312 = sst [smem:[#allocation64_spill]] %s11541_s30 }
  0x20   :  { %13313 = sst [smem:[#allocation65_spill]] %s11546_s6 }
  0x21   :  { %13314 = sst [smem:[#allocation66_spill]] %s11551_s12 }
  0x22   :  { %13315 = sst [smem:[#allocation67_spill]] %s11556_s20 }
  0x23   :  { %13316 = sst [smem:[#allocation68_spill]] %s11561_s27 }
  0x24   :  { %13317 = sst [smem:[#allocation69_spill]] %s11566_s4 }
  0x25   :  { %s11571_s3 = sld [smem:[%s13257_s0 + %s11390_s7]]   ;;  %s11394_s7 = smov 22  }
  0x26   :  { %s11576_s24 = sld [smem:[%s13257_s0 + %s11391_s15]]   ;;  %s11395_s15 = smov 23  }
  0x27   :  { %s11581_s19 = sld [smem:[%s13257_s0 + %s11392_s22]]   ;;  %s11396_s22 = smov 24  }
  0x28   :  { %s11586_s29 = sld [smem:[%s13257_s0 + %s11393_s28]]   ;;  %s11397_s28 = smov 25  }
  0x29   :  { %s11591_s14 = sld [smem:[%s13257_s0 + %s11394_s7]]   ;;  %s11398_s7 = smov 26  }
  0x2a   :  { %s11596_s8 = sld [smem:[%s13257_s0 + %s11395_s15]]   ;;  %s11399_s15 = smov 27  }
  0x2b   :  { %13318 = sst [smem:[#allocation70_spill]] %s11571_s3 }
  0x2c   :  { %13319 = sst [smem:[#allocation71_spill]] %s11576_s24 }
  0x2d   :  { %13320 = sst [smem:[#allocation72_spill]] %s11581_s19 }
  0x2e   :  { %13321 = sst [smem:[#allocation73_spill]] %s11586_s29 }
  0x2f   :  { %13322 = sst [smem:[#allocation74_spill]] %s11591_s14 }
  0x30   :  { %13323 = sst [smem:[#allocation75_spill]] %s11596_s8 }
  0x31   :  { %s11601_s17 = sld [smem:[%s13257_s0 + %s11396_s22]]   ;;  %s11400_s22 = smov 28  }
  0x32   :  { %s11606_s24 = sld [smem:[%s13257_s0 + %s11397_s28]]   ;;  %s11401_s28 = smov 29  }
  0x33   :  { %s11611_s14 = sld [smem:[%s13257_s0 + %s11398_s7]]   ;;  %s11402_s7 = smov 30  }
  0x34   :  { %s11616_s8 = sld [smem:[%s13257_s0 + %s11399_s15]]   ;;  %s11403_s15 = smov 31  }
  0x37   :  { %13324 = sst [smem:[#allocation76_spill]] %s11601_s17 }
  0x38   :  { %13325 = sst [smem:[#allocation77_spill]] %s11606_s24 }
  0x39   :  { %13326 = sst [smem:[#allocation78_spill]] %s11611_s14 }
  0x3a   :  { %13327 = sst [smem:[#allocation79_spill]] %s11616_s8 }
  0x3b   :  { %s11621_s17 = sld [smem:[%s13257_s0 + %s11400_s22]]   ;;  %s11404_s22 = smov 32  }
  0x3c   :  { %s11626_s24 = sld [smem:[%s13257_s0 + %s11401_s28]]   ;;  %s11405_s28 = smov 33  }
  0x3d   :  { %s11631_s14 = sld [smem:[%s13257_s0 + %s11402_s7]]   ;;  %s11406_s7 = smov 34  }
  0x3e   :  { %s11636_s8 = sld [smem:[%s13257_s0 + %s11403_s15]]   ;;  %s11407_s15 = smov 35  }
  0x41   :  { %13328 = sst [smem:[#allocation80_spill]] %s11621_s17 }
  0x42   :  { %13329 = sst [smem:[#allocation81_spill]] %s11626_s24 }
  0x43   :  { %13330 = sst [smem:[#allocation82_spill]] %s11631_s14 }
  0x44   :  { %13331 = sst [smem:[#allocation83_spill]] %s11636_s8 }
  0x45   :  { %s11641_s17 = sld [smem:[%s13257_s0 + %s11404_s22]]   ;;  %s11408_s22 = smov 36  }
  0x46   :  { %s11646_s24 = sld [smem:[%s13257_s0 + %s11405_s28]]   ;;  %s11409_s28 = smov 37  }
  0x47   :  { %s11651_s14 = sld [smem:[%s13257_s0 + %s11406_s7]]   ;;  %s11410_s7 = smov 38  }
  0x48   :  { %s11656_s8 = sld [smem:[%s13257_s0 + %s11407_s15]]   ;;  %s11411_s15 = smov 39  }
  0x4b   :  { %13332 = sst [smem:[#allocation84_spill]] %s11641_s17 }
  0x4c   :  { %13333 = sst [smem:[#allocation85_spill]] %s11646_s24 }
  0x4d   :  { %13334 = sst [smem:[#allocation86_spill]] %s11651_s14 }
  0x4e   :  { %13335 = sst [smem:[#allocation87_spill]] %s11656_s8 }
  0x4f   :  { %s11661_s17 = sld [smem:[%s13257_s0 + %s11408_s22]]   ;;  %s11412_s22 = smov 40  }
  0x50   :  { %s11666_s24 = sld [smem:[%s13257_s0 + %s11409_s28]]   ;;  %s11413_s28 = smov 41  }
  0x51   :  { %s11671_s14 = sld [smem:[%s13257_s0 + %s11410_s7]]   ;;  %s11414_s7 = smov 42  }
  0x52   :  { %s11676_s8 = sld [smem:[%s13257_s0 + %s11411_s15]]   ;;  %s11415_s15 = smov 43  }
  0x53   :  { %s11686_s4 = sld [smem:[%s13257_s0 + %s11413_s28]]   ;;  %s11417_s28 = smov 45  }
  0x54   :  { %s11696_s29 = sld [smem:[%s13257_s0 + %s11415_s15]]   ;;  %s11419_s15 = smov 47  }
  0x55   :  { %13336 = sst [smem:[#allocation88_spill]] %s11661_s17 }
  0x56   :  { %s11681_s17 = sld [smem:[%s13257_s0 + %s11412_s22]]   ;;  %s11416_s22 = smov 44  }
  0x57   :  { %13337 = sst [smem:[#allocation89_spill]] %s11671_s14 }
  0x58   :  { %s11691_s14 = sld [smem:[%s13257_s0 + %s11414_s7]]   ;;  %s11418_s7 = smov 46  }
  0x59   :  { %s11706_s19 = sld [smem:[%s13257_s0 + %s11417_s28]]   ;;  %s11421_s28 = smov 49  }
  0x5a   :  { %s11716_s3 = sld [smem:[%s13257_s0 + %s11419_s15]]   ;;  %s11423_s15 = smov 51  }
  0x5b   :  { %s11726_s27 = sld [smem:[%s13257_s0 + %s11421_s28]]   ;;  %s11425_s28 = smov 53  }
  0x5c   :  { %13338 = sst [smem:[#allocation90_spill]] %s11681_s17 }
  0x5d   :  { %s11701_s17 = sld [smem:[%s13257_s0 + %s11416_s22]]   ;;  %s11420_s22 = smov 48  }
  0x5e   :  { %13339 = sst [smem:[#allocation91_spill]] %s11691_s14 }
  0x5f   :  { %s11711_s14 = sld [smem:[%s13257_s0 + %s11418_s7]]   ;;  %s11422_s7 = smov 50  }
  0x60   :  { %s11736_s20 = sld [smem:[%s13257_s0 + %s11423_s15]]   ;;  %s11427_s15 = smov 55  }
  0x61   :  { %s11746_s6 = sld [smem:[%s13257_s0 + %s11425_s28]]   ;;  %s11429_s28 = smov 57  }
  0x62   :  { %s11756_s13 = sld [smem:[%s13257_s0 + %s11427_s15]]   ;;  %s11431_s15 = smov 59  }
  0x63   :  { %13340 = sst [smem:[#allocation92_spill]] %s11701_s17 }
  0x64   :  { %s11721_s17 = sld [smem:[%s13257_s0 + %s11420_s22]]   ;;  %s11424_s22 = smov 52  }
  0x65   :  { %13341 = sst [smem:[#allocation93_spill]] %s11711_s14 }
  0x66   :  { %s11731_s14 = sld [smem:[%s13257_s0 + %s11422_s7]]   ;;  %s11426_s7 = smov 54  }
  0x67   :  { %s11741_s12 = sld [smem:[%s13257_s0 + %s11424_s22]]   ;;  %s11428_s22 = smov 56  }
  0x68   :  { %s11751_s9 = sld [smem:[%s13257_s0 + %s11426_s7]]   ;;  %s11430_s7 = smov 58  }
  0x69   :  { %13345 = sst [smem:[#allocation97_spill]] %s11756_s13 }
  0x6a   :  { %s11761_s25 = sld [smem:[%s13257_s0 + %s11428_s22]]   ;;  %s11432_s22 = smov 60  }
  0x6b   :  { %s11766_s30 = sld [smem:[%s13257_s0 + %s11429_s28]]   ;;  %s11433_s28 = smov 61  }
  0x6c   :  { %13342 = sst [smem:[#allocation94_spill]] %s11731_s14 }
  0x6d   :  { %13343 = sst [smem:[#allocation95_spill]] %s11741_s12 }
  0x6e   :  { %13344 = sst [smem:[#allocation96_spill]] %s11751_s9 }
  0x6f   :  { %s11771_s9 = sld [smem:[%s13257_s0 + %s11430_s7]]   ;;  %s11434_s7 = smov 62  }
  0x70   :  { %13346 = sst [smem:[#allocation98_spill]] %s11761_s25 }
  0x71   :  { %s11776_s5 = sld [smem:[%s13257_s0 + %s11431_s15]]   ;;  %s11435_s15 = smov 63  }
  0x72   :  { %s11781_s25 = sld [smem:[%s13257_s0 + %s11432_s22]]   ;;  %s11436_s22 = smov 64  }
  0x73   :  { %s11786_s21 = sld [smem:[%s13257_s0 + %s11433_s28]]   ;;  %s11437_s28 = smov 65  }
  0x74   :  { %s11806_s13 = sld [smem:[%s13257_s0 + %s11437_s28]]   ;;  %s11441_s28 = smov 69  }
  0x75   :  { %13347 = sst [smem:[#allocation99_spill]] %s11771_s9 }
  0x76   :  { %s11791_s9 = sld [smem:[%s13257_s0 + %s11434_s7]]   ;;  %s11438_s7 = smov 66  }
  0x77   :  { %13348 = sst [smem:[#allocation100_spill]] %s11776_s5 }
  0x78   :  { %13349 = sst [smem:[#allocation101_spill]] %s11781_s25 }
  0x79   :  { %s11796_s5 = sld [smem:[%s13257_s0 + %s11435_s15]]   ;;  %s11439_s15 = smov 67  }
  0x7a   :  { %s11801_s25 = sld [smem:[%s13257_s0 + %s11436_s22]]   ;;  %s11440_s22 = smov 68  }
  0x7b   :  { %s11826_s12 = sld [smem:[%s13257_s0 + %s11441_s28]]  }
  0x7c   :  { %13350 = sst [smem:[#allocation102_spill]] %s11791_s9 }
  0x7d   :  { %s11811_s9 = sld [smem:[%s13257_s0 + %s11438_s7]]   ;;  %s11442_s7 = smov 70  }
  0x7f   :  { %13351 = sst [smem:[#allocation103_spill]] %s11796_s5 }
  0x80   :  { %13352 = sst [smem:[#allocation104_spill]] %s11801_s25 }
  0x81   :  { %s11816_s5 = sld [smem:[%s13257_s0 + %s11439_s15]]   ;;  %s11443_s15 = smov 71  }
  0x82   :  { %s11821_s25 = sld [smem:[%s13257_s0 + %s11440_s22]]   ;;  %s11444_s22 = smov 72  }
  0x83   :  { %13353 = sst [smem:[#allocation105_spill]] %s11811_s9 }
  0x84   :  { %s11831_s9 = sld [smem:[%s13257_s0 + %s11442_s7]]  }
  0x85   :  { %s11836_s14 = sld [smem:[%s13257_s0 + %s11443_s15]]  }
  0x88   :  { %13354 = sst [smem:[#allocation106_spill]] %s11821_s25 }
  0x89   :  { %s11841_s25 = sld [smem:[%s13257_s0 + %s11444_s22]]  }
  0x8a   :  { %150 = vsyncpa [#allocation3], 0 }
  0x8b   :  { %151 = vsyncpa [#allocation5], 0 }
  0x8c   :  { %152 = vsyncpa [#allocation8], 0 }
  0x8d   :  { %153 = vsyncpa [#allocation11], 0 }
  0x8e   :  { %154 = vsyncpa [#allocation14], 0 }
  0x8f   :  { %155 = vsyncpa [#allocation17], 0 }
  0x90   :  { %156 = vsyncpa [#allocation20], 0 }
  0x91   :  { %157 = vsyncpa [#allocation23], 0 }
  0x92   :  { %158 = vsyncpa [#allocation26], 0 }
  0x93   :  { %159 = vsyncpa [#allocation29], 0 }
  0x94   :  { %160 = vsyncpa [#allocation32], 0 }
  0x95   :  { %161 = vsyncpa [#allocation35], 0 }
  0x96   :  { %162 = vsyncpa [#allocation38], 0  ;;  %s11445_s28 = smov [#allocation4]   ;;  %s11446_s0 = smov [#allocation7]  }
  0x97   :  { %s255_s1 = sshll.u32 %s11445_s28, 4  ;;  %s279_s2 = sshll.u32 %s11446_s0, 4  ;;  %s256_s1 = int_to_ptr.vmem [resolvable:$true] %s255_s1  ;;  %s280_s2 = int_to_ptr.vmem [resolvable:$true] %s279_s2 }
  0x98   :  { %s10819_s7 = scalar_lea.hbm %s11676_s8, 16 }
  0x99   :  { %p10820_p0 = scmp.ne.s32.totalorder %s11676_s8, %s10819_s7  ;;  %p10823_p1 = scmp.lt.u32.totalorder %s10819_s7, %s11676_s8 }
  0x9b   :  { %p10825_p2 = pnand %p10823_p1, %p10820_p0 }
  0x9d   :  { %10828 = shalt.err (!%p10825_p2)
}
  0x9e   :  { %s10829_s10 = scalar_lea.vmem %s256_s1, 16  ;;  %s10833_s11 = scalar_lea.vmem %s256_s1, 32 }
  0x9f   :  { %p10830_p3 = scmp.ne.s32.totalorder %s256_s1, %s10829_s10  ;;  %p10834_p4 = scmp.lt.s32.totalorder %s256_s1, %s256_s1 }
  0xa0   :  { %p10835_p5 = scmp.lt.s32.totalorder %s10833_s11, %s10829_s10 }
  0xa2   :  { %p10836_p6 = por %p10835_p5, %p10834_p4 }
  0xa4   :  { %p10837_p7 = pnand %p10836_p6, %p10830_p3 }
  0xa6   :  { %10840 = shalt.err (!%p10837_p7)
}
  0xa7   :  { %258 = dma.hbm_to_vmem [thread:$0]  %s11676_s8, 16, %s256_s1, [#allocation5]  }
  0xa8   :  { %s10841_s15 = scalar_lea.hbm %s11696_s29, 16 }
  0xa9   :  { %p10842_p8 = scmp.ne.s32.totalorder %s11696_s29, %s10841_s15  ;;  %p10845_p9 = scmp.lt.u32.totalorder %s10841_s15, %s11696_s29 }
  0xab   :  { %p10847_p10 = pnand %p10845_p9, %p10842_p8 }
  0xad   :  { %10850 = shalt.err (!%p10847_p10)
}
  0xae   :  { %s10851_s16 = scalar_lea.vmem %s280_s2, 16  ;;  %s10855_s18 = scalar_lea.vmem %s280_s2, 32 }
  0xaf   :  { %p10852_p11 = scmp.ne.s32.totalorder %s280_s2, %s10851_s16  ;;  %p10856_p12 = scmp.lt.s32.totalorder %s280_s2, %s280_s2 }
  0xb0   :  { %p10857_p13 = scmp.lt.s32.totalorder %s10855_s18, %s10851_s16 }
  0xb2   :  { %p10858_p0 = por %p10857_p13, %p10856_p12 }
  0xb4   :  { %p10859_p1 = pnand %p10858_p0, %p10852_p11 }
  0xb6   :  { %10862 = shalt.err (!%p10859_p1)
}
  0xb7   :  { %282 = dma.hbm_to_vmem [thread:$0]  %s11696_s29, 16, %s280_s2, [#allocation8]  }
  0xb8   :  { %s11447_s22 = smov [#allocation10]   ;;  %s11448_s23 = smov [#allocation13]  }
  0xb9   :  { %s303_s8 = sshll.u32 %s11447_s22, 4  ;;  %s323_s26 = sshll.u32 %s11448_s23, 4  ;;  %s304_s8 = int_to_ptr.vmem [resolvable:$true] %s303_s8  ;;  %s324_s26 = int_to_ptr.vmem [resolvable:$true] %s323_s26 }
  0xba   :  { %s10863_s28 = scalar_lea.hbm %s11716_s3, 16 }
  0xbb   :  { %p10864_p2 = scmp.ne.s32.totalorder %s11716_s3, %s10863_s28  ;;  %p10867_p3 = scmp.lt.u32.totalorder %s10863_s28, %s11716_s3 }
  0xbd   :  { %p10869_p4 = pnand %p10867_p3, %p10864_p2 }
  0xbf   :  { %10872 = shalt.err (!%p10869_p4)
}
  0xc0   :  { %s10873_s1 = scalar_lea.vmem %s304_s8, 16  ;;  %s10877_s0 = scalar_lea.vmem %s304_s8, 32 }
  0xc1   :  { %p10874_p5 = scmp.ne.s32.totalorder %s304_s8, %s10873_s1  ;;  %p10878_p6 = scmp.lt.s32.totalorder %s304_s8, %s304_s8 }
  0xc2   :  { %p10879_p7 = scmp.lt.s32.totalorder %s10877_s0, %s10873_s1 }
  0xc4   :  { %p10880_p8 = por %p10879_p7, %p10878_p6 }
  0xc6   :  { %p10881_p9 = pnand %p10880_p8, %p10874_p5 }
  0xc8   :  { %10884 = shalt.err (!%p10881_p9)
}
  0xc9   :  { %306 = dma.hbm_to_vmem [thread:$0]  %s11716_s3, 16, %s304_s8, [#allocation11]  }
  0xca   :  { %s10885_s29 = scalar_lea.hbm %s11726_s27, 16 }
  0xcb   :  { %p10886_p10 = scmp.ne.s32.totalorder %s11726_s27, %s10885_s29  ;;  %p10889_p11 = scmp.lt.u32.totalorder %s10885_s29, %s11726_s27 }
  0xcd   :  { %p10891_p12 = pnand %p10889_p11, %p10886_p10 }
  0xcf   :  { %10894 = shalt.err (!%p10891_p12)
}
  0xd0   :  { %s10895_s2 = scalar_lea.vmem %s324_s26, 16  ;;  %s10899_s7 = scalar_lea.vmem %s324_s26, 32 }
  0xd1   :  { %p10896_p13 = scmp.ne.s32.totalorder %s324_s26, %s10895_s2  ;;  %p10900_p0 = scmp.lt.s32.totalorder %s324_s26, %s324_s26 }
  0xd2   :  { %p10901_p1 = scmp.lt.s32.totalorder %s10899_s7, %s10895_s2 }
  0xd4   :  { %p10902_p2 = por %p10901_p1, %p10900_p0 }
  0xd6   :  { %p10903_p3 = pnand %p10902_p2, %p10896_p13 }
  0xd8   :  { %10906 = shalt.err (!%p10903_p3)
}
  0xd9   :  { %326 = dma.hbm_to_vmem [thread:$0]  %s11726_s27, 16, %s324_s26, [#allocation14]  }
  0xda   :  { %s11449_s10 = smov [#allocation16]   ;;  %s11450_s11 = smov [#allocation19]  }
  0xdb   :  { %s343_s3 = sshll.u32 %s11449_s10, 4  ;;  %s363_s15 = sshll.u32 %s11450_s11, 4  ;;  %s344_s3 = int_to_ptr.vmem [resolvable:$true] %s343_s3  ;;  %s364_s15 = int_to_ptr.vmem [resolvable:$true] %s363_s15 }
  0xdc   :  { %s10907_s16 = scalar_lea.hbm %s11736_s20, 16 }
  0xdd   :  { %p10908_p4 = scmp.ne.s32.totalorder %s11736_s20, %s10907_s16  ;;  %p10911_p5 = scmp.lt.u32.totalorder %s10907_s16, %s11736_s20 }
  0xdf   :  { %p10913_p6 = pnand %p10911_p5, %p10908_p4 }
  0xe1   :  { %10916 = shalt.err (!%p10913_p6)
}
  0xe2   :  { %s10917_s18 = scalar_lea.vmem %s344_s3, 16  ;;  %s10921_s22 = scalar_lea.vmem %s344_s3, 32 }
  0xe3   :  { %p10918_p7 = scmp.ne.s32.totalorder %s344_s3, %s10917_s18  ;;  %p10922_p8 = scmp.lt.s32.totalorder %s344_s3, %s344_s3 }
  0xe4   :  { %p10923_p9 = scmp.lt.s32.totalorder %s10921_s22, %s10917_s18 }
  0xe6   :  { %p10924_p10 = por %p10923_p9, %p10922_p8 }
  0xe8   :  { %p10925_p11 = pnand %p10924_p10, %p10918_p7 }
  0xea   :  { %10928 = shalt.err (!%p10925_p11)
}
  0xeb   :  { %346 = dma.hbm_to_vmem [thread:$0]  %s11736_s20, 16, %s344_s3, [#allocation17]  }
  0xec   :  { %s10929_s27 = scalar_lea.hbm %s11746_s6, 16 }
  0xed   :  { %p10930_p12 = scmp.ne.s32.totalorder %s11746_s6, %s10929_s27  ;;  %p10933_p13 = scmp.lt.u32.totalorder %s10929_s27, %s11746_s6 }
  0xef   :  { %p10935_p0 = pnand %p10933_p13, %p10930_p12 }
  0xf1   :  { %10938 = shalt.err (!%p10935_p0)
}
  0xf2   :  { %s10939_s8 = scalar_lea.vmem %s364_s15, 16  ;;  %s10943_s23 = scalar_lea.vmem %s364_s15, 32 }
  0xf3   :  { %p10940_p1 = scmp.ne.s32.totalorder %s364_s15, %s10939_s8  ;;  %p10944_p2 = scmp.lt.s32.totalorder %s364_s15, %s364_s15 }
  0xf4   :  { %p10945_p3 = scmp.lt.s32.totalorder %s10943_s23, %s10939_s8 }
  0xf6   :  { %p10946_p4 = por %p10945_p3, %p10944_p2 }
  0xf8   :  { %p10947_p5 = pnand %p10946_p4, %p10940_p1 }
  0xfa   :  { %10950 = shalt.err (!%p10947_p5)
}
  0xfb   :  { %366 = dma.hbm_to_vmem [thread:$0]  %s11746_s6, 16, %s364_s15, [#allocation20]  }
  0xfc   :  { %s11451_s26 = smov [#allocation22]   ;;  %s11452_s28 = smov [#allocation25]  }
  0xfd   :  { %s387_s20 = sshll.u32 %s11451_s26, 4  ;;  %s411_s1 = sshll.u32 %s11452_s28, 4  ;;  %s388_s20 = int_to_ptr.vmem [resolvable:$true] %s387_s20  ;;  %s412_s1 = int_to_ptr.vmem [resolvable:$true] %s411_s1 }
  0xfe   :  { %s10951_s0 = scalar_lea.hbm %s11766_s30, 16 }
  0xff   :  { %p10952_p6 = scmp.ne.s32.totalorder %s11766_s30, %s10951_s0  ;;  %p10955_p7 = scmp.lt.u32.totalorder %s10951_s0, %s11766_s30 }
 0x101   :  { %p10957_p8 = pnand %p10955_p7, %p10952_p6 }
 0x103   :  { %10960 = shalt.err (!%p10957_p8)
}
 0x104   :  { %s10961_s29 = scalar_lea.vmem %s388_s20, 16  ;;  %s10965_s2 = scalar_lea.vmem %s388_s20, 32 }
 0x105   :  { %p10962_p9 = scmp.ne.s32.totalorder %s388_s20, %s10961_s29  ;;  %p10966_p10 = scmp.lt.s32.totalorder %s388_s20, %s388_s20 }
 0x106   :  { %p10967_p11 = scmp.lt.s32.totalorder %s10965_s2, %s10961_s29 }
 0x108   :  { %p10968_p12 = por %p10967_p11, %p10966_p10 }
 0x10a   :  { %p10969_p13 = pnand %p10968_p12, %p10962_p9 }
 0x10c   :  { %10972 = shalt.err (!%p10969_p13)
}
 0x10d   :  { %390 = dma.hbm_to_vmem [thread:$0]  %s11766_s30, 16, %s388_s20, [#allocation23]  }
 0x10e   :  { %s10973_s6 = scalar_lea.hbm %s11786_s21, 16 }
 0x10f   :  { %p10974_p0 = scmp.ne.s32.totalorder %s11786_s21, %s10973_s6  ;;  %p10977_p1 = scmp.lt.u32.totalorder %s10973_s6, %s11786_s21 }
 0x111   :  { %p10979_p2 = pnand %p10977_p1, %p10974_p0 }
 0x113   :  { %10982 = shalt.err (!%p10979_p2)
}
 0x114   :  { %s10983_s7 = scalar_lea.vmem %s412_s1, 16  ;;  %s10987_s10 = scalar_lea.vmem %s412_s1, 32 }
 0x115   :  { %p10984_p3 = scmp.ne.s32.totalorder %s412_s1, %s10983_s7  ;;  %p10988_p4 = scmp.lt.s32.totalorder %s412_s1, %s412_s1 }
 0x116   :  { %p10989_p5 = scmp.lt.s32.totalorder %s10987_s10, %s10983_s7 }
 0x118   :  { %p10990_p6 = por %p10989_p5, %p10988_p4 }
 0x11a   :  { %p10991_p7 = pnand %p10990_p6, %p10984_p3 }
 0x11c   :  { %10994 = shalt.err (!%p10991_p7)
}
 0x11d   :  { %414 = dma.hbm_to_vmem [thread:$0]  %s11786_s21, 16, %s412_s1, [#allocation26]  }
 0x11e   :  { %s11453_s3 = smov [#allocation28]   ;;  %s11454_s11 = smov [#allocation31]  }
 0x11f   :  { %s435_s30 = sshll.u32 %s11453_s3, 4  ;;  %s455_s15 = sshll.u32 %s11454_s11, 4  ;;  %s436_s30 = int_to_ptr.vmem [resolvable:$true] %s435_s30  ;;  %s456_s15 = int_to_ptr.vmem [resolvable:$true] %s455_s15 }
 0x120   :  { %s10995_s16 = scalar_lea.hbm %s11806_s13, 16 }
 0x121   :  { %p10996_p8 = scmp.ne.s32.totalorder %s11806_s13, %s10995_s16  ;;  %p10999_p9 = scmp.lt.u32.totalorder %s10995_s16, %s11806_s13 }
 0x123   :  { %p11001_p10 = pnand %p10999_p9, %p10996_p8 }
 0x125   :  { %11004 = shalt.err (!%p11001_p10)
}
 0x126   :  { %s11005_s18 = scalar_lea.vmem %s436_s30, 16  ;;  %s11009_s22 = scalar_lea.vmem %s436_s30, 32 }
 0x127   :  { %p11006_p11 = scmp.ne.s32.totalorder %s436_s30, %s11005_s18  ;;  %p11010_p12 = scmp.lt.s32.totalorder %s436_s30, %s436_s30 }
 0x128   :  { %p11011_p13 = scmp.lt.s32.totalorder %s11009_s22, %s11005_s18 }
 0x12a   :  { %p11012_p0 = por %p11011_p13, %p11010_p12 }
 0x12c   :  { %p11013_p1 = pnand %p11012_p0, %p11006_p11 }
 0x12e   :  { %11016 = shalt.err (!%p11013_p1)
}
 0x12f   :  { %438 = dma.hbm_to_vmem [thread:$0]  %s11806_s13, 16, %s436_s30, [#allocation29]  }
 0x130   :  { %s11017_s21 = scalar_lea.hbm %s11816_s5, 16 }
 0x131   :  { %p11018_p2 = scmp.ne.s32.totalorder %s11816_s5, %s11017_s21  ;;  %p11021_p3 = scmp.lt.u32.totalorder %s11017_s21, %s11816_s5 }
 0x133   :  { %p11023_p4 = pnand %p11021_p3, %p11018_p2 }
 0x135   :  { %11026 = shalt.err (!%p11023_p4)
}
 0x136   :  { %s11027_s27 = scalar_lea.vmem %s456_s15, 16  ;;  %s11031_s8 = scalar_lea.vmem %s456_s15, 32 }
 0x137   :  { %p11028_p5 = scmp.ne.s32.totalorder %s456_s15, %s11027_s27  ;;  %p11032_p6 = scmp.lt.s32.totalorder %s456_s15, %s456_s15 }
 0x138   :  { %p11033_p7 = scmp.lt.s32.totalorder %s11031_s8, %s11027_s27 }
 0x13a   :  { %p11034_p8 = por %p11033_p7, %p11032_p6 }
 0x13c   :  { %p11035_p9 = pnand %p11034_p8, %p11028_p5 }
 0x13e   :  { %11038 = shalt.err (!%p11035_p9)
}
 0x13f   :  { %458 = dma.hbm_to_vmem [thread:$0]  %s11816_s5, 16, %s456_s15, [#allocation32]  }
 0x140   :  { %s11455_s23 = smov [#allocation34]   ;;  %s11456_s26 = smov [#allocation2]  }
 0x141   :  { %s475_s13 = sshll.u32 %s11455_s23, 4  ;;  %s243_s20 = sshll.u32 %s11456_s26, 4  ;;  %s476_s13 = int_to_ptr.vmem [resolvable:$true] %s475_s13  ;;  %s244_s20 = int_to_ptr.vmem [resolvable:$true] %s243_s20 }
 0x142   :  { %s11039_s28 = scalar_lea.hbm %s11826_s12, 16 }
 0x143   :  { %p11040_p10 = scmp.ne.s32.totalorder %s11826_s12, %s11039_s28  ;;  %p11043_p11 = scmp.lt.u32.totalorder %s11039_s28, %s11826_s12 }
 0x145   :  { %p11045_p12 = pnand %p11043_p11, %p11040_p10 }
 0x147   :  { %11048 = shalt.err (!%p11045_p12)
}
 0x148   :  { %s11049_s1 = scalar_lea.vmem %s476_s13, 16  ;;  %s11053_s0 = scalar_lea.vmem %s476_s13, 32 }
 0x149   :  { %p11050_p13 = scmp.ne.s32.totalorder %s476_s13, %s11049_s1  ;;  %p11054_p0 = scmp.lt.s32.totalorder %s476_s13, %s476_s13 }
 0x14a   :  { %p11055_p1 = scmp.lt.s32.totalorder %s11053_s0, %s11049_s1 }
 0x14c   :  { %p11056_p2 = por %p11055_p1, %p11054_p0 }
 0x14e   :  { %p11057_p3 = pnand %p11056_p2, %p11050_p13 }
 0x150   :  { %11060 = shalt.err (!%p11057_p3)
}
 0x151   :  { %478 = dma.hbm_to_vmem [thread:$0]  %s11826_s12, 16, %s476_s13, [#allocation35]  }
 0x152   :  { %s11061_s5 = scalar_lea.hbm %s11666_s24, 16 }
 0x153   :  { %p11062_p4 = scmp.ne.s32.totalorder %s11666_s24, %s11061_s5  ;;  %p11065_p5 = scmp.lt.u32.totalorder %s11061_s5, %s11666_s24 }
 0x155   :  { %p11067_p6 = pnand %p11065_p5, %p11062_p4 }
 0x157   :  { %11070 = shalt.err (!%p11067_p6)
}
 0x158   :  { %s11071_s29 = scalar_lea.vmem %s244_s20, 16  ;;  %s11075_s2 = scalar_lea.vmem %s244_s20, 32 }
 0x159   :  { %p11072_p7 = scmp.ne.s32.totalorder %s244_s20, %s11071_s29  ;;  %p11076_p8 = scmp.lt.s32.totalorder %s244_s20, %s244_s20 }
 0x15a   :  { %p11077_p9 = scmp.lt.s32.totalorder %s11075_s2, %s11071_s29 }
 0x15c   :  { %p11078_p10 = por %p11077_p9, %p11076_p8 }
 0x15e   :  { %p11079_p11 = pnand %p11078_p10, %p11072_p7 }
 0x160   :  { %11082 = shalt.err (!%p11079_p11)
}
 0x161   :  { %246 = dma.hbm_to_vmem [thread:$0]  %s11666_s24, 16, %s244_s20, [#allocation3]  }
 0x162   :  { %s11457_s6 = smov [#allocation6]   ;;  %s11458_s7 = smov [#allocation9]  }
 0x163   :  { %s267_s12 = sshll.u32 %s11457_s6, 4  ;;  %s291_s10 = sshll.u32 %s11458_s7, 4  ;;  %s268_s12 = int_to_ptr.vmem [resolvable:$true] %s267_s12  ;;  %s292_s10 = int_to_ptr.vmem [resolvable:$true] %s291_s10 }
 0x164   :  { %s11083_s3 = scalar_lea.hbm %s11686_s4, 16 }
 0x165   :  { %p11084_p12 = scmp.ne.s32.totalorder %s11686_s4, %s11083_s3  ;;  %p11087_p13 = scmp.lt.u32.totalorder %s11083_s3, %s11686_s4 }
 0x167   :  { %p11089_p0 = pnand %p11087_p13, %p11084_p12 }
 0x169   :  { %11092 = shalt.err (!%p11089_p0)
}
 0x16a   :  { %s11093_s30 = scalar_lea.vmem %s268_s12, 16  ;;  %s11097_s11 = scalar_lea.vmem %s268_s12, 32 }
 0x16b   :  { %p11094_p1 = scmp.ne.s32.totalorder %s268_s12, %s11093_s30  ;;  %p11098_p2 = scmp.lt.s32.totalorder %s268_s12, %s268_s12 }
 0x16c   :  { %p11099_p3 = scmp.lt.s32.totalorder %s11097_s11, %s11093_s30 }
 0x16e   :  { %p11100_p4 = por %p11099_p3, %p11098_p2 }
 0x170   :  { %p11101_p5 = pnand %p11100_p4, %p11094_p1 }
 0x172   :  { %11104 = shalt.err (!%p11101_p5)
}
 0x173   :  { %270 = dma.hbm_to_vmem [thread:$0]  %s11686_s4, 16, %s268_s12, [#allocation5]  }
 0x174   :  { %s11105_s24 = scalar_lea.hbm %s11706_s19, 16 }
 0x175   :  { %p11106_p6 = scmp.ne.s32.totalorder %s11706_s19, %s11105_s24  ;;  %p11109_p7 = scmp.lt.u32.totalorder %s11105_s24, %s11706_s19 }
 0x177   :  { %p11111_p8 = pnand %p11109_p7, %p11106_p6 }
 0x179   :  { %11114 = shalt.err (!%p11111_p8)
}
 0x17a   :  { %s11115_s15 = scalar_lea.vmem %s292_s10, 16  ;;  %s11119_s16 = scalar_lea.vmem %s292_s10, 32 }
 0x17b   :  { %p11116_p9 = scmp.ne.s32.totalorder %s292_s10, %s11115_s15  ;;  %p11120_p10 = scmp.lt.s32.totalorder %s292_s10, %s292_s10 }
 0x17c   :  { %p11121_p11 = scmp.lt.s32.totalorder %s11119_s16, %s11115_s15 }
 0x17e   :  { %p11122_p12 = por %p11121_p11, %p11120_p10 }
 0x180   :  { %p11123_p13 = pnand %p11122_p12, %p11116_p9 }
 0x182   :  { %11126 = shalt.err (!%p11123_p13)
}
 0x183   :  { %294 = dma.hbm_to_vmem [thread:$0]  %s11706_s19, 16, %s292_s10, [#allocation8]  }
 0x184   :  { %s11459_s18 = smov [#allocation12]   ;;  %s11460_s22 = smov [#allocation15]  }
 0x185   :  { %s313_s4 = sshll.u32 %s11459_s18, 4  ;;  %s333_s21 = sshll.u32 %s11460_s22, 4  ;;  %s314_s4 = int_to_ptr.vmem [resolvable:$true] %s313_s4  ;;  %s334_s21 = int_to_ptr.vmem [resolvable:$true] %s333_s21 }
 0x186   :  { %s11127_s27 = scalar_lea.hbm %s11721_s17, 16 }
 0x187   :  { %p11128_p0 = scmp.ne.s32.totalorder %s11721_s17, %s11127_s27  ;;  %p11131_p1 = scmp.lt.u32.totalorder %s11127_s27, %s11721_s17 }
 0x189   :  { %p11133_p2 = pnand %p11131_p1, %p11128_p0 }
 0x18b   :  { %11136 = shalt.err (!%p11133_p2)
}
 0x18c   :  { %s11137_s8 = scalar_lea.vmem %s314_s4, 16  ;;  %s11141_s23 = scalar_lea.vmem %s314_s4, 32 }
 0x18d   :  { %p11138_p3 = scmp.ne.s32.totalorder %s314_s4, %s11137_s8  ;;  %p11142_p4 = scmp.lt.s32.totalorder %s314_s4, %s314_s4 }
 0x18e   :  { %p11143_p5 = scmp.lt.s32.totalorder %s11141_s23, %s11137_s8 }
 0x190   :  { %p11144_p6 = por %p11143_p5, %p11142_p4 }
 0x192   :  { %p11145_p7 = pnand %p11144_p6, %p11138_p3 }
 0x194   :  { %11148 = shalt.err (!%p11145_p7)
}
 0x195   :  { %s13355_s19 = sld [smem:[#allocation94_spill]] }
 0x196   :  { %316 = dma.hbm_to_vmem [thread:$0]  %s11721_s17, 16, %s314_s4, [#allocation11]  }
 0x19b   :  { %s11149_s13 = scalar_lea.hbm %s13355_s19, 16 }
 0x19c   :  { %p11150_p8 = scmp.ne.s32.totalorder %s13355_s19, %s11149_s13  ;;  %p11153_p9 = scmp.lt.u32.totalorder %s11149_s13, %s13355_s19 }
 0x19e   :  { %p11155_p10 = pnand %p11153_p9, %p11150_p8 }
 0x1a0   :  { %11158 = shalt.err (!%p11155_p10)
}
 0x1a1   :  { %s11159_s26 = scalar_lea.vmem %s334_s21, 16  ;;  %s11163_s20 = scalar_lea.vmem %s334_s21, 32 }
 0x1a2   :  { %p11160_p11 = scmp.ne.s32.totalorder %s334_s21, %s11159_s26  ;;  %p11164_p12 = scmp.lt.s32.totalorder %s334_s21, %s334_s21 }
 0x1a3   :  { %p11165_p13 = scmp.lt.s32.totalorder %s11163_s20, %s11159_s26 }
 0x1a5   :  { %p11166_p0 = por %p11165_p13, %p11164_p12 }
 0x1a7   :  { %p11167_p1 = pnand %p11166_p0, %p11160_p11 }
 0x1a9   :  { %11170 = shalt.err (!%p11167_p1)
}
 0x1aa   :  { %s13356_s28 = sld [smem:[#allocation95_spill]]  ;;  %s11461_s1 = smov [#allocation18]  }
 0x1ab   :  { %336 = dma.hbm_to_vmem [thread:$0]  %s13355_s19, 16, %s334_s21, [#allocation14]  }
 0x1ac   :  { %s353_s17 = sshll.u32 %s11461_s1, 4  ;;  %s11462_s0 = smov [#allocation21]   ;;  %s354_s17 = int_to_ptr.vmem [resolvable:$true] %s353_s17 }
 0x1ad   :  { %s375_s5 = sshll.u32 %s11462_s0, 4  ;;  %s376_s5 = int_to_ptr.vmem [resolvable:$true] %s375_s5 }
 0x1b0   :  { %s11171_s29 = scalar_lea.hbm %s13356_s28, 16 }
 0x1b1   :  { %p11172_p2 = scmp.ne.s32.totalorder %s13356_s28, %s11171_s29  ;;  %p11175_p3 = scmp.lt.u32.totalorder %s11171_s29, %s13356_s28 }
 0x1b3   :  { %p11177_p4 = pnand %p11175_p3, %p11172_p2 }
 0x1b5   :  { %11180 = shalt.err (!%p11177_p4)
}
 0x1b6   :  { %s11181_s2 = scalar_lea.vmem %s354_s17, 16  ;;  %s11185_s6 = scalar_lea.vmem %s354_s17, 32 }
 0x1b7   :  { %p11182_p5 = scmp.ne.s32.totalorder %s354_s17, %s11181_s2  ;;  %p11186_p6 = scmp.lt.s32.totalorder %s354_s17, %s354_s17 }
 0x1b8   :  { %p11187_p7 = scmp.lt.s32.totalorder %s11185_s6, %s11181_s2 }
 0x1ba   :  { %p11188_p8 = por %p11187_p7, %p11186_p6 }
 0x1bc   :  { %p11189_p9 = pnand %p11188_p8, %p11182_p5 }
 0x1be   :  { %11192 = shalt.err (!%p11189_p9)
}
 0x1bf   :  { %s13357_s12 = sld [smem:[#allocation97_spill]] }
 0x1c0   :  { %356 = dma.hbm_to_vmem [thread:$0]  %s13356_s28, 16, %s354_s17, [#allocation17]  }
 0x1c5   :  { %s11193_s7 = scalar_lea.hbm %s13357_s12, 16 }
 0x1c6   :  { %p11194_p10 = scmp.ne.s32.totalorder %s13357_s12, %s11193_s7  ;;  %p11197_p11 = scmp.lt.u32.totalorder %s11193_s7, %s13357_s12 }
 0x1c8   :  { %p11199_p12 = pnand %p11197_p11, %p11194_p10 }
 0x1ca   :  { %11202 = shalt.err (!%p11199_p12)
}
 0x1cb   :  { %s11203_s10 = scalar_lea.vmem %s376_s5, 16  ;;  %s11207_s3 = scalar_lea.vmem %s376_s5, 32 }
 0x1cc   :  { %p11204_p13 = scmp.ne.s32.totalorder %s376_s5, %s11203_s10  ;;  %p11208_p0 = scmp.lt.s32.totalorder %s376_s5, %s376_s5 }
 0x1cd   :  { %p11209_p1 = scmp.lt.s32.totalorder %s11207_s3, %s11203_s10 }
 0x1cf   :  { %p11210_p2 = por %p11209_p1, %p11208_p0 }
 0x1d1   :  { %p11211_p3 = pnand %p11210_p2, %p11204_p13 }
 0x1d3   :  { %11214 = shalt.err (!%p11211_p3)
}
 0x1d4   :  { %s13358_s30 = sld [smem:[#allocation100_spill]]  ;;  %s11463_s11 = smov [#allocation24]  }
 0x1d5   :  { %378 = dma.hbm_to_vmem [thread:$0]  %s13357_s12, 16, %s376_s5, [#allocation20]  }
 0x1d6   :  { %s399_s24 = sshll.u32 %s11463_s11, 4  ;;  %s11464_s15 = smov [#allocation27]   ;;  %s400_s24 = int_to_ptr.vmem [resolvable:$true] %s399_s24 }
 0x1d7   :  { %s423_s16 = sshll.u32 %s11464_s15, 4  ;;  %s424_s16 = int_to_ptr.vmem [resolvable:$true] %s423_s16 }
 0x1da   :  { %s11215_s18 = scalar_lea.hbm %s13358_s30, 16 }
 0x1db   :  { %p11216_p4 = scmp.ne.s32.totalorder %s13358_s30, %s11215_s18  ;;  %p11219_p5 = scmp.lt.u32.totalorder %s11215_s18, %s13358_s30 }
 0x1dd   :  { %p11221_p6 = pnand %p11219_p5, %p11216_p4 }
 0x1df   :  { %11224 = shalt.err (!%p11221_p6)
}
 0x1e0   :  { %s11225_s4 = scalar_lea.vmem %s400_s24, 16  ;;  %s11229_s22 = scalar_lea.vmem %s400_s24, 32 }
 0x1e1   :  { %p11226_p7 = scmp.ne.s32.totalorder %s400_s24, %s11225_s4  ;;  %p11230_p8 = scmp.lt.s32.totalorder %s400_s24, %s400_s24 }
 0x1e2   :  { %p11231_p9 = scmp.lt.s32.totalorder %s11229_s22, %s11225_s4 }
 0x1e4   :  { %p11232_p10 = por %p11231_p9, %p11230_p8 }
 0x1e6   :  { %p11233_p11 = pnand %p11232_p10, %p11226_p7 }
 0x1e8   :  { %11236 = shalt.err (!%p11233_p11)
}
 0x1e9   :  { %s13359_s21 = sld [smem:[#allocation103_spill]] }
 0x1ea   :  { %402 = dma.hbm_to_vmem [thread:$0]  %s13358_s30, 16, %s400_s24, [#allocation23]  }
 0x1ef   :  { %s11237_s27 = scalar_lea.hbm %s13359_s21, 16 }
 0x1f0   :  { %p11238_p12 = scmp.ne.s32.totalorder %s13359_s21, %s11237_s27  ;;  %p11241_p13 = scmp.lt.u32.totalorder %s11237_s27, %s13359_s21 }
 0x1f2   :  { %p11243_p0 = pnand %p11241_p13, %p11238_p12 }
 0x1f4   :  { %11246 = shalt.err (!%p11243_p0)
}
 0x1f5   :  { %s11247_s8 = scalar_lea.vmem %s424_s16, 16  ;;  %s11251_s23 = scalar_lea.vmem %s424_s16, 32 }
 0x1f6   :  { %p11248_p1 = scmp.ne.s32.totalorder %s424_s16, %s11247_s8  ;;  %p11252_p2 = scmp.lt.s32.totalorder %s424_s16, %s424_s16 }
 0x1f7   :  { %p11253_p3 = scmp.lt.s32.totalorder %s11251_s23, %s11247_s8 }
 0x1f9   :  { %p11254_p4 = por %p11253_p3, %p11252_p2 }
 0x1fb   :  { %p11255_p5 = pnand %p11254_p4, %p11248_p1 }
 0x1fd   :  { %11258 = shalt.err (!%p11255_p5)
}
 0x1fe   :  { %s13360_s19 = sld [smem:[#allocation105_spill]]  ;;  %s11465_s13 = smov [#allocation30]  }
 0x1ff   :  { %426 = dma.hbm_to_vmem [thread:$0]  %s13359_s21, 16, %s424_s16, [#allocation26]  }
 0x200   :  { %s445_s26 = sshll.u32 %s11465_s13, 4  ;;  %s11466_s20 = smov [#allocation33]   ;;  %s446_s26 = int_to_ptr.vmem [resolvable:$true] %s445_s26 }
 0x201   :  { %s465_s28 = sshll.u32 %s11466_s20, 4  ;;  %s466_s28 = int_to_ptr.vmem [resolvable:$true] %s465_s28 }
 0x204   :  { %s11259_s1 = scalar_lea.hbm %s13360_s19, 16 }
 0x205   :  { %p11260_p6 = scmp.ne.s32.totalorder %s13360_s19, %s11259_s1  ;;  %p11263_p7 = scmp.lt.u32.totalorder %s11259_s1, %s13360_s19 }
 0x207   :  { %p11265_p8 = pnand %p11263_p7, %p11260_p6 }
 0x209   :  { %11268 = shalt.err (!%p11265_p8)
}
 0x20a   :  { %s11269_s17 = scalar_lea.vmem %s446_s26, 16  ;;  %s11273_s0 = scalar_lea.vmem %s446_s26, 32 }
 0x20b   :  { %p11270_p9 = scmp.ne.s32.totalorder %s446_s26, %s11269_s17  ;;  %p11274_p10 = scmp.lt.s32.totalorder %s446_s26, %s446_s26 }
 0x20c   :  { %p11275_p11 = scmp.lt.s32.totalorder %s11273_s0, %s11269_s17 }
 0x20e   :  { %p11276_p12 = por %p11275_p11, %p11274_p10 }
 0x210   :  { %p11277_p13 = pnand %p11276_p12, %p11270_p9 }
 0x212   :  { %11280 = shalt.err (!%p11277_p13)
}
 0x213   :  { %s13361_s5 = sld [smem:[#allocation106_spill]] }
 0x214   :  { %448 = dma.hbm_to_vmem [thread:$0]  %s13360_s19, 16, %s446_s26, [#allocation29]  }
 0x219   :  { %s11281_s29 = scalar_lea.hbm %s13361_s5, 16 }
 0x21a   :  { %p11282_p0 = scmp.ne.s32.totalorder %s13361_s5, %s11281_s29  ;;  %p11285_p1 = scmp.lt.u32.totalorder %s11281_s29, %s13361_s5 }
 0x21c   :  { %p11287_p2 = pnand %p11285_p1, %p11282_p0 }
 0x21e   :  { %11290 = shalt.err (!%p11287_p2)
}
 0x21f   :  { %s11291_s2 = scalar_lea.vmem %s466_s28, 16  ;;  %s11295_s6 = scalar_lea.vmem %s466_s28, 32 }
 0x220   :  { %p11292_p3 = scmp.ne.s32.totalorder %s466_s28, %s11291_s2  ;;  %p11296_p4 = scmp.lt.s32.totalorder %s466_s28, %s466_s28 }
 0x221   :  { %p11297_p5 = scmp.lt.s32.totalorder %s11295_s6, %s11291_s2 }
 0x223   :  { %p11298_p6 = por %p11297_p5, %p11296_p4 }
 0x225   :  { %p11299_p7 = pnand %p11298_p6, %p11292_p3 }
 0x227   :  { %11302 = shalt.err (!%p11299_p7)
}
 0x228   :  { %468 = dma.hbm_to_vmem [thread:$0]  %s13361_s5, 16, %s466_s28, [#allocation32]  }
 0x229   :  { %s11467_s12 = smov [#allocation36]   ;;  %s11468_s10 = smov [#allocation37]  }
 0x22a   :  { %s485_s7 = sshll.u32 %s11467_s12, 4  ;;  %s495_s3 = sshll.u32 %s11468_s10, 4  ;;  %s486_s7 = int_to_ptr.vmem [resolvable:$true] %s485_s7  ;;  %s496_s3 = int_to_ptr.vmem [resolvable:$true] %s495_s3 }
 0x22b   :  { %s11303_s30 = scalar_lea.hbm %s11831_s9, 16 }
 0x22c   :  { %p11304_p8 = scmp.ne.s32.totalorder %s11831_s9, %s11303_s30  ;;  %p11307_p9 = scmp.lt.u32.totalorder %s11303_s30, %s11831_s9 }
 0x22e   :  { %p11309_p10 = pnand %p11307_p9, %p11304_p8 }
 0x230   :  { %11312 = shalt.err (!%p11309_p10)
}
 0x231   :  { %s11313_s11 = scalar_lea.vmem %s486_s7, 16  ;;  %s11317_s24 = scalar_lea.vmem %s486_s7, 32 }
 0x232   :  { %p11314_p11 = scmp.ne.s32.totalorder %s486_s7, %s11313_s11  ;;  %p11318_p12 = scmp.lt.s32.totalorder %s486_s7, %s486_s7 }
 0x233   :  { %p11319_p13 = scmp.lt.s32.totalorder %s11317_s24, %s11313_s11 }
 0x235   :  { %p11320_p0 = por %p11319_p13, %p11318_p12 }
 0x237   :  { %p11321_p1 = pnand %p11320_p0, %p11314_p11 }
 0x239   :  { %11324 = shalt.err (!%p11321_p1)
}
 0x23a   :  { %488 = dma.hbm_to_vmem [thread:$0]  %s11831_s9, 16, %s486_s7, [#allocation35]  }
 0x23b   :  { %s11325_s15 = scalar_lea.hbm %s11836_s14, 16 }
 0x23c   :  { %p11326_p2 = scmp.ne.s32.totalorder %s11836_s14, %s11325_s15  ;;  %p11329_p3 = scmp.lt.u32.totalorder %s11325_s15, %s11836_s14 }
 0x23e   :  { %p11331_p4 = pnand %p11329_p3, %p11326_p2 }
 0x240   :  { %11334 = shalt.err (!%p11331_p4)
}
 0x241   :  { %s11335_s16 = scalar_lea.vmem %s496_s3, 16  ;;  %s11339_s18 = scalar_lea.vmem %s496_s3, 32 }
 0x242   :  { %p11336_p5 = scmp.ne.s32.totalorder %s496_s3, %s11335_s16  ;;  %p11340_p6 = scmp.lt.s32.totalorder %s496_s3, %s496_s3 }
 0x243   :  { %p11341_p7 = scmp.lt.s32.totalorder %s11339_s18, %s11335_s16 }
 0x245   :  { %p11342_p8 = por %p11341_p7, %p11340_p6 }
 0x247   :  { %p11343_p9 = pnand %p11342_p8, %p11336_p5 }
 0x249   :  { %11346 = shalt.err (!%p11343_p9)
}
 0x24a   :  { %498 = dma.hbm_to_vmem [thread:$0]  %s11836_s14, 16, %s496_s3, [#allocation38]  }
 0x24b   :  { %11347 = dma.done.wait [#allocation3], 16  }
 0x24c   :  { %11348 = vsyncadd [#allocation3], 4294967280 }
 0x24d   :  { %11349 = dma.done.wait [#allocation5], 32  }
 0x24e   :  { %11350 = vsyncadd [#allocation5], 4294967264 }
 0x24f   :  { %11351 = dma.done.wait [#allocation8], 32  }
 0x250   :  { %11352 = vsyncadd [#allocation8], 4294967264 }
 0x251   :  { %11353 = dma.done.wait [#allocation11], 32  }
 0x252   :  { %11354 = vsyncadd [#allocation11], 4294967264 }
 0x253   :  { %11355 = dma.done.wait [#allocation14], 32  }
 0x254   :  { %11356 = vsyncadd [#allocation14], 4294967264 }
 0x255   :  { %11357 = dma.done.wait [#allocation17], 32  }
 0x256   :  { %11358 = vsyncadd [#allocation17], 4294967264 }
 0x257   :  { %11359 = dma.done.wait [#allocation20], 32  }
 0x258   :  { %11360 = vsyncadd [#allocation20], 4294967264 }
 0x259   :  { %11361 = dma.done.wait [#allocation23], 32  }
 0x25a   :  { %11362 = vsyncadd [#allocation23], 4294967264 }
 0x25b   :  { %11363 = dma.done.wait [#allocation26], 32  }
 0x25c   :  { %11364 = vsyncadd [#allocation26], 4294967264 }
 0x25d   :  { %11365 = dma.done.wait [#allocation29], 32  }
 0x25e   :  { %11366 = vsyncadd [#allocation29], 4294967264 }
 0x25f   :  { %11367 = dma.done.wait [#allocation32], 32  }
 0x260   :  { %11368 = vsyncadd [#allocation32], 4294967264 }
 0x261   :  { %11369 = dma.done.wait [#allocation35], 32  }
 0x262   :  { %11370 = vsyncadd [#allocation35], 4294967264 }
 0x263   :  { %11371 = dma.done.wait [#allocation38], 16  }
 0x264   :  { %11372 = vsyncadd [#allocation38], 4294967280  ;;  %s13362_s9 = sld [smem:[#allocation56_spill]]  ;;  %s13363_s14 = sld [smem:[#allocation52_spill]]  ;;  %vm13292_vm0 = vcmask 523264   ;;  %vm13299_vm1 = vcmask 261120   ;;  %v998_v33 = vlaneseq }
 0x265   :  { %s13364_s4 = sld [smem:[#allocation64_spill]]  ;;  %s13365_s22 = sld [smem:[#allocation57_spill]]  ;;  %v11469_v40 = vmov 0.0   ;;  %vm12014_vm6 = vmpackc.low %vm13299_vm1, %vm13299_vm1  ;;  %vm13293_vm10 = vcmask 130048  }
 0x266   :  { %s13366_s21 = sld [smem:[#allocation54_spill]]  ;;  %s13367_s27 = sld [smem:[#allocation53_spill]]  ;;  %v11971_v34 = vand.u32 127, %v998_v33 }
 0x267   :  { %s13368_s8 = sld [smem:[#allocation65_spill]]  ;;  %s11470_s23 = smov 96  }
 0x268   :  { %vm1021_vm2 = vcmp.ge.s32.totalorder %v11971_v34, 8  ;;  %vm13294_vm3 = vcmp.lt.s32.totalorder %v11971_v34, 16  ;;  %vm13295_vm4 = vcmp.lt.s32.totalorder %v11971_v34, 8  ;;  %vm1454_vm7 = vcmp.ge.s32.totalorder %v11971_v34, 16  ;;  %s11471_s19 = smov 64   ;;  %s13373_s13 = sld [smem:[#allocation66_spill]] }
 0x269   :  { %vm11981_vm5 = vmand %vm1021_vm2, %vm13294_vm3  ;;  %v11990_v41 = vsel %vm13295_vm4, 1.0, %v11469_v40  ;;  %vm1455_vm8 = vcmp.lt.s32.totalorder %v11971_v34, 24  ;;  %vm1665_vm11 = vcmp.ge.s32.totalorder %v11971_v34, 24  ;;  %vm1666_vm12 = vcmp.lt.s32.totalorder %v11971_v34, 32  ;;  %s13374_s26 = sld [smem:[#allocation67_spill]]  ;;  %s13375_s20 = sld [smem:[#allocation68_spill]] }
 0x26a   :  { %v579_v0 = vld [vmem:[%s13362_s9] sm:$0xff]  ;;  %v580_v1 = vld [vmem:[%s13362_s9 + $0x8] sm:$0xff]  ;;  %v581_v2 = vld [vmem:[%s13362_s9 + $0x10] sm:$0xff]  ;;  %v11995_v42 = vsel %vm11981_vm5, 1.0, %v11469_v40  ;;  %s13376_s28 = sld [smem:[#allocation70_spill]]  ;;  %s13377_s1 = sld [smem:[#allocation72_spill]] }
 0x26b   :  { %v9788_v3 = vpack.c.bf16 %v580_v1, %v579_v0  ;;  %v582_v4 = vld [vmem:[%s13362_s9 + $0x18] sm:$0xff]  ;;  %v583_v6 = vld [vmem:[%s13362_s9 + $0x20] sm:$0xff]  ;;  %v584_v7 = vld [vmem:[%s13362_s9 + $0x28] sm:$0xff]  ;;  %s13378_s17 = sld [smem:[#allocation73_spill]]  ;;  %s13379_s0 = sld [smem:[#allocation69_spill]]  ;;  %vm3624_vm15 = vcmp.ge.s32.totalorder %v11971_v34, 7 }
 0x26c   :  { %v9792_v5 = vpack.c.bf16 %v582_v4, %v581_v2  ;;  %v571_v8 = vld [vmem:[%s13363_s14] sm:$0xff]  ;;  %v9796_v9 = vpack.c.bf16 %v584_v7, %v583_v6  ;;  %v585_v10 = vld [vmem:[%s13362_s9 + $0x30] sm:$0xff]  ;;  %v586_v11 = vld [vmem:[%s13362_s9 + $0x38] sm:$0xff]  ;;  %s13380_s5 = sld [smem:[#allocation71_spill]]  ;;  %s13381_s29 = sld [smem:[#allocation76_spill]]  ;;  %vm13296_vm3 = vcmask 113664  }
 0x26d   :  { %9789 = vmatprep.subr.bf16.mxu0 %v9788_v3  ;;  %9145 = vmatprep.mubr.msk.f32.mxu0 %vm13292_vm0, %v571_v8  ;;  %v9800_v12 = vpack.c.bf16 %v586_v11, %v585_v10  ;;  %v572_v13 = vld [vmem:[%s13363_s14 + $0x8] sm:$0xff]  ;;  %v597_v14 = vld [vmem:[%s13364_s4] sm:$0xff]  ;;  %v599_v17 = vld [vmem:[%s13364_s4 + $0x10] sm:$0xff]  ;;  %s13382_s2 = sld [smem:[#allocation74_spill]]  ;;  %s13383_s6 = sld [smem:[#allocation75_spill]] }
 0x26e   :  { %9791 = vmatpush3.bf16.msra.mxu0 %v9788_v3  ;;  %9805 = vmatprep.subr.bf16.mxu1 %v9788_v3  ;;  %v598_v15 = vld [vmem:[%s13364_s4 + $0x8] sm:$0xff]  ;;  %v600_v18 = vld [vmem:[%s13364_s4 + $0x18] sm:$0xff]  ;;  %v8511_v20 = vld [vmem:[%s13365_s22] ss:$0 sm:$0xff]  ;;  %s13384_s12 = sld [smem:[#allocation77_spill]]  ;;  %s13385_s7 = sld [smem:[#allocation78_spill]] }
 0x26f   :  { %9793 = vmatprep.subr.bf16.mxu0 %v9792_v5  ;;  %9807 = vmatpush3.bf16.msra.mxu1 %v9788_v3  ;;  %v9820_v16 = vpack.c.bf16 %v598_v15, %v597_v14  ;;  %v9824_v19 = vpack.c.bf16 %v600_v18, %v599_v17  ;;  %v575_v26 = vld [vmem:[%s13366_s21] sm:$0xff]  ;;  %v576_v27 = vld [vmem:[%s13366_s21 + $0x8] sm:$0xff]  ;;  %vm1456_vm9 = vmand %vm1454_vm7, %vm1455_vm8  ;;  %s13386_s10 = sld [smem:[#allocation79_spill]]  ;;  %s13387_s3 = sld [smem:[#allocation80_spill]]  ;;  %vm3615_vm7 = vcmp.lt.s32.totalorder %v11971_v34, 7 }
 0x270   :  { %9809 = vmatprep.subr.bf16.mxu1 %v9792_v5  ;;  %v573_v31 = vld [vmem:[%s13367_s27] sm:$0xff]  ;;  %v574_v32 = vld [vmem:[%s13367_s27 + $0x8] sm:$0x3f]  ;;  %v12038_v54 = vsel %vm1456_vm9, 1.0, %v11469_v40  ;;  %vm1667_vm13 = vmand %vm1665_vm11, %vm1666_vm12  ;;  %s13388_s30 = sld [smem:[#allocation88_spill]]  ;;  %s13389_s11 = sld [smem:[#allocation82_spill]] }
 0x271   :  { %9164 = vmatprep.mubr.msk.f32.mxu1 %vm13292_vm0, %v573_v31  ;;  %v8516_v35 = vld [vmem:[%s13368_s8] ss:$0 sm:$0xff]  ;;  %s13390_s24 = sld [smem:[#allocation84_spill]]  ;;  %s13391_s15 = sld [smem:[#allocation85_spill]]  ;;  %vm3627_vm9 = vcmp.lt.s32.totalorder %v11971_v34, 14 }
 0x272   :  { %9795 = vmatpush3.bf16.msra.mxu0 %v9792_v5  ;;  %s13392_s16 = sld [smem:[#allocation55_spill]]  ;;  %s13393_s18 = sld [smem:[#allocation81_spill]] }
 0x273   :  { %9797 = vmatprep.subr.bf16.mxu0 %v9796_v9  ;;  %9811 = vmatpush3.bf16.msra.mxu1 %v9792_v5  ;;  %s13400_s9 = sld [smem:[#allocation83_spill]]  ;;  %s13401_s14 = sld [smem:[#allocation89_spill]] }
 0x274   :  { %9813 = vmatprep.subr.bf16.mxu1 %v9796_v9  ;;  %s13402_s4 = sld [smem:[#allocation86_spill]]  ;;  %s13404_s21 = sld [smem:[#allocation90_spill]] }
 0x275   :  { %s13405_s27 = sld [smem:[#allocation60_spill]]  ;;  %s13406_s8 = sld [smem:[#allocation61_spill]] }
 0x276   :  { %9799 = vmatpush3.bf16.msra.mxu0 %v9796_v9 }
 0x277   :  { %9801 = vmatprep.subr.bf16.mxu0 %v9800_v12  ;;  %9815 = vmatpush3.bf16.msra.mxu1 %v9796_v9 }
 0x278   :  { %9817 = vmatprep.subr.bf16.mxu1 %v9800_v12 }
 0x27a   :  { %9803 = vmatpush3.bf16.msra.mxu0 %v9800_v12 }
 0x27b   :  { %9819 = vmatpush3.bf16.msra.mxu1 %v9800_v12  ;;  %9821 = vmatprep.subr.bf16.mxu0 %v9820_v16 }
 0x27d   :  { %9146 = vmatmul.mubr.msk.f32.vlgmr.msra.gmra.mrb[0].mxu0 %vm13292_vm0, %v572_v13 }
 0x27e   :  { %9823 = vmatpush3.bf16.msra.mxu0 %v9820_v16  ;;  %9165 = vmatmul.mubr.msk.f32.vlgmr.msra.gmra.mrb[0].mxu1 %vm13292_vm0, %v574_v32 }
 0x27f   :  { %9825 = vmatprep.subr.bf16.mxu0 %v9824_v19 }
 0x282   :  { %9827 = vmatpush3.bf16.msra.mxu0 %v9824_v19 }
 0x350   :  { %v9147_v21 = vpop.f32.mrb[0].mxu0 }
 0x351   :  { %v818_v22 = vadd.f32 %v9147_v21, %v8511_v20  ;;  %v812_v23 = vpop.f32.mrb[1].mxu0  ;;  %v12008_v47 = vpop.f32.mrb[0].mxu1 }
 0x352   :  { %v813_v24 = vadd.f32 %v8511_v20, %v812_v23  ;;  %v12010_v48 = vpop.f32.mrb[1].mxu1 }
 0x353   :  { %v822_v25 = vmul.f32 5.656854, %v818_v22 }
 0x354   :  { %v821_v28 = vmul.f32 5.656854, %v813_v24 }
 0x355   :  { %v11960_v30 = vadd.f32 %v822_v25, %v576_v27 }
 0x356   :  { %v11958_v29 = vadd.f32 %v821_v28, %v575_v26 }
 0x358   :  { %9175 = vmatprep.mubr.msk.f32.mxu0 %vm13299_vm1, %v11958_v29 }
 0x359   :  { %9176 = vmatmul.mubr.msk.f32.vlgmr.msra.gmra.mrb[2].mxu0 %vm13299_vm1, %v11960_v30 }
 0x42c   :  { %v9177_v37 = vpop.f32.mrb[2].mxu0 }
 0x42d   :  { %v11985_v38 = vadd.f32 %v9177_v37, %v8516_v35  ;;  %v989_v39 = vpop.f32.mrb[3].mxu0 }
 0x42e   :  { %v11997_v43 = vadd.f32 %v8516_v35, %v989_v39 }
 0x42f   :  { %v1033_v55 = vmul.f32 %v11990_v41, %v11985_v38  ;;  %v1162_v56 = vmul.f32 %v11995_v42, %v11985_v38  ;;  %v1460_v58 = vmul.f32 %v12038_v54, %v11985_v38 }
 0x430   :  { %v10428_v44 = vpack.i.bf16 %v11985_v38, %v11997_v43  ;;  %v1032_v45 = vmul.f32 %v11990_v41, %v11997_v43  ;;  %v1161_v46 = vmul.f32 %v11995_v42, %v11997_v43  ;;  %v1459_v57 = vmul.f32 %v12038_v54, %v11997_v43 }
 0x432   :  { %10429 = vrot.lane.b32.xlu0 %v10428_v44, %s11470_s23  ;;  %9182 = vmatprep.mubr.msk.f32.mxu1 %vm13299_vm1, %v1032_v45 }
 0x433   :  { %9189 = vmatprep.mubr.msk.f32.mxu0 %vm13299_vm1, %v1161_v46 }
 0x4a4   :  { %v10430_v49 = vpop.permute.xlu0 %10429 }
 0x4a5   :  { %v10432_v50 = vunpack.i.h.bf16 %v10430_v49  ;;  %v10431_v51 = vunpack.i.l.bf16 %v10430_v49 }
 0x4a7   :  { %v12018_v53 = vpack.c.bf16 %v10432_v50, %v10431_v51 }
 0x4a9   :  { %9830 = vmatprep.subr.msk.bf16.mxu1 %vm12014_vm6, %v12018_v53  ;;  %9836 = vmatprep.subr.msk.bf16.mxu0 %vm12014_vm6, %v12018_v53 }
 0x4aa   :  { %9833 = vmatpush3.bf16.xpose.msk.msra.mxu1 %vm12014_vm6, %v12018_v53  ;;  %9839 = vmatpush3.bf16.xpose.msk.msra.mxu0 %vm12014_vm6, %v12018_v53 }
 0x4ab   :  { %9850 = vmatprep.subr.msk.bf16.mxu0 %vm12014_vm6, %v12018_v53 }
 0x4b1   :  { %9183 = vmatmul.mubr.msk.f32.vlgmr.msra.gmra.mrb[2].mxu1 %vm13299_vm1, %v1033_v55  ;;  %9190 = vmatmul.mubr.msk.f32.vlgmr.msra.gmra.mrb[4].mxu0 %vm13299_vm1, %v1162_v56 }
 0x4b2   :  { %9853 = vmatpush3.bf16.xpose.msk.msra.mxu0 %vm12014_vm6, %v12018_v53  ;;  %9210 = vmatprep.mubr.msk.f32.mxu0 %vm13299_vm1, %v1459_v57 }
 0x4b9   :  { %9211 = vmatmul.mubr.msk.f32.vlgmr.msra.gmra.mrb[6].mxu0 %vm13299_vm1, %v1460_v58 }
 0x584   :  { %v9184_v59 = vpop.f32.mrb[2].mxu1  ;;  %v9191_v60 = vpop.f32.mrb[4].mxu0 }
 0x585   :  { %v1126_v61 = vmul.f32 0.35355338, %v9184_v59  ;;  %v1245_v62 = vmul.f32 0.35355338, %v9191_v60  ;;  %v1116_v63 = vpop.f32.mrb[3].mxu1  ;;  %v1235_v0 = vpop.f32.mrb[5].mxu0 }
 0x586   :  { %v1244_v1 = vmul.f32 0.35355338, %v1235_v0  ;;  %v1125_v10 = vmul.f32 0.35355338, %v1116_v63 }
 0x587   :  { %v1247_v2 = vsel %vm11981_vm5, %v1245_v62, -1e+30  ;;  %v1128_v6 = vsel %vm11981_vm5, %v1126_v61, -1e+30 }
 0x588   :  { %v1251_v3 = vsel %vm13293_vm10, %v1247_v2, -inf  ;;  %v1246_v4 = vsel %vm13295_vm4, %v1244_v1, -1e+30  ;;  %v1133_v8 = vsel %vm13293_vm10, %v1128_v6, -inf  ;;  %v1127_v12 = vsel %vm13295_vm4, %v1125_v10, -1e+30 }
 0x589   :  { %1252 = vmax.xlane.f32.xlu1 %v1251_v3  ;;  %v1248_v5 = vsel %vm13293_vm10, %v1246_v4, -inf  ;;  %v1130_v13 = vsel %vm13293_vm10, %v1127_v12, -inf }
 0x58a   :  { %1249 = vmax.xlane.f32.xlu0 %v1248_v5 }
 0x58c   :  { %v9212_v7 = vpop.f32.mrb[6].mxu0 }
 0x58d   :  { %v1533_v9 = vpop.f32.mrb[7].mxu0  ;;  %1134 = vmax.xlane.f32.xlu1 %v1133_v8  ;;  %v1543_v11 = vmul.f32 0.35355338, %v9212_v7 }
 0x58e   :  { %v1542_v14 = vmul.f32 0.35355338, %v1533_v9 }
 0x58f   :  { %v1545_v15 = vsel %vm11981_vm5, %v1543_v11, -1e+30 }
 0x590   :  { %v1549_v16 = vsel %vm13293_vm10, %v1545_v15, -inf  ;;  %v1544_v17 = vsel %vm13295_vm4, %v1542_v14, -1e+30 }
 0x591   :  { %v1546_v18 = vsel %vm13293_vm10, %v1544_v17, -inf }
 0x59e   :  { %1271 = vrot.lane.b32.xlu1 %v11995_v42, %s11471_s19 }
 0x5a0   :  { %1153 = vrot.lane.b32.xlu0 %v11990_v41, %s11471_s19 }
 0x5c2   :  { %1131 = vmax.xlane.f32.xlu1 %v1130_v13 }
 0x5c6   :  { %1550 = vmax.xlane.f32.xlu1 %v1549_v16 }
 0x5ca   :  { %1547 = vmax.xlane.f32.xlu1 %v1546_v18 }
 0x5db   :  { %1569 = vrot.lane.b32.xlu1 %v12038_v54, %s11471_s19 }
 0x616   :  { %v1253_v19 = vpop.xlane.xlu1 %1252 }
 0x617   :  { %v1255_v20 = vsub.f32 %v1247_v2, %v1253_v19  ;;  %v1250_v32 = vpop.xlane.xlu0 %1249 }
 0x618   :  { %v1254_v35 = vsub.f32 %v1246_v4, %v1250_v32 }
 0x619   :  { %v1258_v21 = vmul.f32 1.442695, %v1255_v20 }
 0x61a   :  { %v1135_v22 = vpop.xlane.xlu1 %1134  ;;  %v1256_v39 = vmul.f32 1.442695, %v1254_v35 }
 0x61b   :  { %10578 = vpow2.f32 %v1258_v21  ;;  %v1137_v31 = vsub.f32 %v1128_v6, %v1135_v22  ;;  %v12100_v5 = vpop.permute.xlu0 %1153 }
 0x61c   :  { %v1156_v8 = vmul.f32 %v12100_v5, %v11997_v43  ;;  %v1157_v9 = vmul.f32 %v12100_v5, %v11985_v38 }
 0x61d   :  { %v1140_v37 = vmul.f32 1.442695, %v1137_v31 }
 0x61e   :  { %v12079_v23 = vpop.permute.xlu1 %1271  ;;  %v10438_v11 = vpack.i.bf16 %v1157_v9, %v1156_v8 }
 0x61f   :  { %v1274_v24 = vmul.f32 %v12079_v23, %v11997_v43  ;;  %v1275_v25 = vmul.f32 %v12079_v23, %v11985_v38  ;;  %10580 = vpow2.f32 %v1140_v37 }
 0x620   :  { %10582 = vpow2.f32 %v1256_v39 }
 0x621   :  { %v10433_v26 = vpack.i.bf16 %v1275_v25, %v1274_v24 }
 0x623   :  { %10434 = vrot.lane.b32.xlu1 %v10433_v26, %s11471_s19 }
 0x625   :  { %v10579_v27 = vpop.eup %10578 }
 0x626   :  { %v1263_v28 = vsel %vm13293_vm10, %v10579_v27, 0.0 }
 0x627   :  { %1264 = vadd.xlane.f32.xlu0 %v1263_v28 }
 0x629   :  { %v12087_v44 = vpop.eup %10580 }
 0x62a   :  { %v1145_v45 = vsel %vm13293_vm10, %v12087_v44, 0.0  ;;  %v10583_v46 = vpop.eup %10582 }
 0x62b   :  { %v1260_v49 = vsel %vm13293_vm10, %v10583_v46, 0.0 }
 0x647   :  { %1146 = vadd.xlane.f32.xlu1 %v1145_v45 }
 0x64b   :  { %1261 = vadd.xlane.f32.xlu1 %v1260_v49 }
 0x64f   :  { %v1132_v50 = vpop.xlane.xlu1 %1131 }
 0x650   :  { %v1136_v51 = vsub.f32 %v1127_v12, %v1132_v50 }
 0x652   :  { %v1138_v55 = vmul.f32 1.442695, %v1136_v51 }
 0x653   :  { %v1551_v56 = vpop.xlane.xlu1 %1550 }
 0x654   :  { %10584 = vpow2.f32 %v1138_v55  ;;  %v1553_v57 = vsub.f32 %v1545_v15, %v1551_v56 }
 0x656   :  { %v1556_v58 = vmul.f32 1.442695, %v1553_v57 }
 0x657   :  { %v1548_v59 = vpop.xlane.xlu1 %1547 }
 0x658   :  { %10586 = vpow2.f32 %v1556_v58  ;;  %v1552_v60 = vsub.f32 %v1544_v17, %v1548_v59  ;;  %v12123_v58 = vsel %vm1667_vm13, 1.0, %v11469_v40 }
 0x659   :  { %v1670_v59 = vmul.f32 %v12123_v58, %v11997_v43 }
 0x65a   :  { %v1554_v61 = vmul.f32 1.442695, %v1552_v60  ;;  %v1671_v60 = vmul.f32 %v12123_v58, %v11985_v38 }
 0x65b   :  { %v12098_v4 = vpop.permute.xlu1 %1569 }
 0x65c   :  { %10588 = vpow2.f32 %v1554_v61  ;;  %v1572_v6 = vmul.f32 %v12098_v4, %v11997_v43  ;;  %v1573_v7 = vmul.f32 %v12098_v4, %v11985_v38 }
 0x65e   :  { %v10585_v62 = vpop.eup %10584  ;;  %v10443_v10 = vpack.i.bf16 %v1573_v7, %v1572_v6 }
 0x65f   :  { %v1142_v63 = vsel %vm13293_vm10, %v10585_v62, 0.0 }
 0x660   :  { %1143 = vadd.xlane.f32.xlu1 %v1142_v63 }
 0x662   :  { %v12093_v0 = vpop.eup %10586 }
 0x663   :  { %v1561_v1 = vsel %vm13293_vm10, %v12093_v0, 0.0 }
 0x664   :  { %1562 = vadd.xlane.f32.xlu0 %v1561_v1 }
 0x666   :  { %v10589_v2 = vpop.eup %10588 }
 0x667   :  { %v1558_v3 = vsel %vm13293_vm10, %v10589_v2, 0.0 }
 0x668   :  { %1559 = vadd.xlane.f32.xlu1 %v1558_v3 }
 0x679   :  { %10444 = vrot.lane.b32.xlu1 %v10443_v10, %s11471_s19 }
 0x67a   :  { %10439 = vrot.lane.b32.xlu0 %v10438_v11, %s11471_s19 }
 0x695   :  { %v10435_v12 = vpop.permute.xlu1 %10434 }
 0x696   :  { %v10437_v13 = vunpack.i.h.bf16 %v10435_v12  ;;  %v10436_v14 = vunpack.i.l.bf16 %v10435_v12 }
 0x698   :  { %v9840_v15 = vpack.c.bf16 %v10437_v13, %v10436_v14 }
 0x69a   :  { %9841 = vmatprep.subr.bf16.mxu1 %v9840_v15 }
 0x69b   :  { %9843 = vmatpush3.bf16.msra.mxu1 %v9840_v15 }
 0x6b4   :  { %v1265_v17 = vpop.xlane.xlu0 %1264 }
 0x6b5   :  { %10590 = vrcp.f32 %v1265_v17 }
 0x6bf   :  { %v10591_v19 = vpop.eup %10590 }
 0x6c0   :  { %v1269_v22 = vmul.f32 %v10591_v19, %v10579_v27  ;;  %v602_v19 = vld [vmem:[%s13373_s13] sm:$0xff] }
 0x6d4   :  { %v1147_v16 = vpop.xlane.xlu1 %1146 }
 0x6d8   :  { %v1262_v18 = vpop.xlane.xlu1 %1261 }
 0x6d9   :  { %10592 = vrcp.f32 %v1262_v18 }
 0x6e3   :  { %v10593_v20 = vpop.eup %10592 }
 0x6e4   :  { %v1267_v21 = vmul.f32 %v10593_v20, %v10583_v46  ;;  %v603_v20 = vld [vmem:[%s13373_s13 + $0x8] sm:$0xff] }
 0x6e6   :  { %9196 = vmatprep.mubr.msk.f32.mxu1 %vm13293_vm10, %v1267_v21  ;;  %v604_v21 = vld [vmem:[%s13373_s13 + $0x10] sm:$0xff] }
 0x6e7   :  { %9197 = vmatmul.mubr.msk.f32.vlgmr.msra.gmra.mrb[4].mxu1 %vm13293_vm10, %v1269_v22  ;;  %v9868_v22 = vpack.c.bf16 %v603_v20, %v602_v19  ;;  %v617_v19 = vld [vmem:[%s13376_s28 + $0x28] sm:$0xff] }
 0x6e9   :  { %9869 = vmatprep.subr.bf16.mxu0 %v9868_v22 }
 0x6ea   :  { %9871 = vmatpush3.bf16.msra.mxu0 %v9868_v22 }
 0x6ed   :  { %v1144_v24 = vpop.xlane.xlu1 %1143 }
 0x6ee   :  { %10594 = vrcp.f32 %v1144_v24  ;;  %v605_v24 = vld [vmem:[%s13373_s13 + $0x18] sm:$0xff]  ;;  %s13425_s13 = sld [smem:[#allocation91_spill]] }
 0x6ef   :  { %10596 = vrcp.f32 %v1147_v16 }
 0x6f1   :  { %v1563_v25 = vpop.xlane.xlu0 %1562 }
 0x6f5   :  { %v10440_v26 = vpop.permute.xlu0 %10439  ;;  %v1560_v28 = vpop.xlane.xlu1 %1559 }
 0x6f6   :  { %v10442_v31 = vunpack.i.h.bf16 %v10440_v26  ;;  %v10441_v32 = vunpack.i.l.bf16 %v10440_v26  ;;  %10598 = vrcp.f32 %v1560_v28 }
 0x6f7   :  { %10600 = vrcp.f32 %v1563_v25  ;;  %v9872_v25 = vpack.c.bf16 %v605_v24, %v604_v21 }
 0x6f8   :  { %v10595_v35 = vpop.eup %10594  ;;  %v9844_v37 = vpack.c.bf16 %v10442_v31, %v10441_v32 }
 0x6f9   :  { %v10597_v39 = vpop.eup %10596  ;;  %v10445_v45 = vpop.permute.xlu1 %10444  ;;  %v1149_v46 = vmul.f32 %v10595_v35, %v10585_v62  ;;  %9873 = vmatprep.subr.bf16.mxu0 %v9872_v25 }
 0x6fa   :  { %v10447_v27 = vunpack.i.h.bf16 %v10445_v45  ;;  %v10446_v49 = vunpack.i.l.bf16 %v10445_v45  ;;  %9845 = vmatprep.subr.bf16.mxu1 %v9844_v37  ;;  %v1151_v50 = vmul.f32 %v10597_v39, %v12087_v44  ;;  %9875 = vmatpush3.bf16.msra.mxu0 %v9872_v25 }
 0x6fb   :  { %9847 = vmatpush3.bf16.msra.mxu1 %v9844_v37  ;;  %9203 = vmatprep.mubr.msk.f32.mxu1 %vm13293_vm10, %v1149_v46 }
 0x6fc   :  { %v9854_v51 = vpack.c.bf16 %v10447_v27, %v10446_v49  ;;  %v8547_v49 = vld [vmem:[%s13374_s26] ss:$0 sm:$0xff]  ;;  %s13434_s26 = sld [smem:[#allocation92_spill]] }
 0x6fe   :  { %9204 = vmatmul.mubr.msk.f32.vlgmr.msra.gmra.mrb[4].mxu1 %vm13293_vm10, %v1151_v50  ;;  %9855 = vmatprep.subr.bf16.mxu1 %v9854_v51 }
 0x6ff   :  { %9857 = vmatpush3.bf16.msra.mxu1 %v9854_v51 }
 0x700   :  { %v10599_v55 = vpop.eup %10598  ;;  %9860 = vmatprep.subr.msk.bf16.mxu1 %vm12014_vm6, %v12018_v53 }
 0x701   :  { %v10601_v56 = vpop.eup %10600  ;;  %v1565_v57 = vmul.f32 %v10599_v55, %v10589_v2 }
 0x702   :  { %v1567_v44 = vmul.f32 %v10601_v56, %v12093_v0 }
 0x703   :  { %9217 = vmatprep.mubr.msk.f32.mxu1 %vm13293_vm10, %v1565_v57 }
 0x706   :  { %9218 = vmatmul.mubr.msk.f32.vlgmr.msra.gmra.mrb[4].mxu1 %vm13293_vm10, %v1567_v44 }
 0x707   :  { %9224 = vmatprep.mubr.msk.f32.mxu1 %vm13299_vm1, %v1670_v59 }
 0x708   :  { %9863 = vmatpush3.bf16.xpose.msk.msra.mxu1 %vm12014_vm6, %v12018_v53 }
 0x70f   :  { %9225 = vmatmul.mubr.msk.f32.vlgmr.msra.gmra.mrb[6].mxu1 %vm13299_vm1, %v1671_v60 }
 0x7e2   :  { %v9226_v40 = vpop.f32.mrb[6].mxu1 }
 0x7e3   :  { %v1754_v61 = vmul.f32 0.35355338, %v9226_v40  ;;  %v1744_v62 = vpop.f32.mrb[7].mxu1 }
 0x7e4   :  { %v1753_v63 = vmul.f32 0.35355338, %v1744_v62 }
 0x7e5   :  { %v1756_v0 = vsel %vm11981_vm5, %v1754_v61, -1e+30 }
 0x7e6   :  { %v1760_v1 = vsel %vm13293_vm10, %v1756_v0, -inf  ;;  %v1755_v2 = vsel %vm13295_vm4, %v1753_v63, -1e+30 }
 0x7e7   :  { %1761 = vmax.xlane.f32.xlu0 %v1760_v1  ;;  %v1757_v53 = vsel %vm13293_vm10, %v1755_v2, -inf }
 0x7e8   :  { %1758 = vmax.xlane.f32.xlu1 %v1757_v53 }
 0x7fd   :  { %1780 = vrot.lane.b32.xlu0 %v12123_v58, %s11471_s19 }
 0x874   :  { %v1762_v3 = vpop.xlane.xlu0 %1761 }
 0x875   :  { %v1764_v6 = vsub.f32 %v1756_v0, %v1762_v3  ;;  %v1759_v7 = vpop.xlane.xlu1 %1758  ;;  %v607_v3 = vld [vmem:[%s13375_s20] sm:$0xff] }
 0x876   :  { %v1763_v8 = vsub.f32 %v1755_v2, %v1759_v7  ;;  %v609_v7 = vld [vmem:[%s13375_s20 + $0x10] sm:$0xff] }
 0x877   :  { %v1767_v9 = vmul.f32 1.442695, %v1764_v6  ;;  %v608_v6 = vld [vmem:[%s13375_s20 + $0x8] sm:$0xff] }
 0x878   :  { %v1765_v10 = vmul.f32 1.442695, %v1763_v8  ;;  %v12147_v15 = vpop.permute.xlu0 %1780  ;;  %v9876_v8 = vpack.c.bf16 %v608_v6, %v607_v3 }
 0x879   :  { %10602 = vpow2.f32 %v1767_v9  ;;  %v1783_v16 = vmul.f32 %v12147_v15, %v11997_v43  ;;  %v1784_v17 = vmul.f32 %v12147_v15, %v11985_v38  ;;  %v610_v9 = vld [vmem:[%s13375_s20 + $0x18] sm:$0xff]  ;;  %s13436_s20 = sld [smem:[#allocation93_spill]] }
 0x87a   :  { %10604 = vpow2.f32 %v1765_v10  ;;  %v9880_v10 = vpack.c.bf16 %v610_v9, %v609_v7  ;;  %9877 = vmatprep.subr.bf16.mxu0 %v9876_v8 }
 0x87b   :  { %v10448_v18 = vpack.i.bf16 %v1784_v17, %v1783_v16  ;;  %v615_v16 = vld [vmem:[%s13376_s28 + $0x18] sm:$0xff] }
 0x883   :  { %v10603_v11 = vpop.eup %10602 }
 0x884   :  { %v1772_v12 = vsel %vm13293_vm10, %v10603_v11, 0.0  ;;  %v10605_v13 = vpop.eup %10604 }
 0x885   :  { %1773 = vadd.xlane.f32.xlu1 %v1772_v12  ;;  %v1769_v14 = vsel %vm13293_vm10, %v10605_v13, 0.0  ;;  %v613_v12 = vld [vmem:[%s13376_s28 + $0x8] sm:$0xff] }
 0x889   :  { %1770 = vadd.xlane.f32.xlu1 %v1769_v14 }
 0x89a   :  { %10449 = vrot.lane.b32.xlu1 %v10448_v18, %s11471_s19  ;;  %v616_v18 = vld [vmem:[%s13376_s28 + $0x20] sm:$0xff] }
 0x89b   :  { %v9892_v20 = vpack.c.bf16 %v617_v19, %v616_v18  ;;  %v627_v18 = vld [vmem:[%s13381_s29 + $0x10] sm:$0xff] }
 0x912   :  { %v1774_v26 = vpop.xlane.xlu1 %1773 }
 0x913   :  { %10606 = vrcp.f32 %v1774_v26 }
 0x916   :  { %v1771_v28 = vpop.xlane.xlu1 %1770 }
 0x917   :  { %10608 = vrcp.f32 %v1771_v28 }
 0x91a   :  { %v10450_v43 = vpop.permute.xlu1 %10449 }
 0x91b   :  { %v10452_v38 = vunpack.i.h.bf16 %v10450_v43  ;;  %v10451_v31 = vunpack.i.l.bf16 %v10450_v43 }
 0x91d   :  { %v9864_v32 = vpack.c.bf16 %v10452_v38, %v10451_v31  ;;  %v10607_v35 = vpop.eup %10606  ;;  %v8550_v38 = vld [vmem:[%s13377_s1] ss:$0 sm:$0xff]  ;;  %s13477_s1 = sld [smem:[#allocation98_spill]] }
 0x91e   :  { %v1778_v45 = vmul.f32 %v10607_v35, %v10603_v11  ;;  %v612_v11 = vld [vmem:[%s13376_s28] sm:$0xff] }
 0x91f   :  { %9865 = vmatprep.subr.bf16.mxu1 %v9864_v32  ;;  %v9884_v14 = vpack.c.bf16 %v613_v12, %v612_v11 }
 0x920   :  { %9867 = vmatpush3.bf16.msra.mxu1 %v9864_v32  ;;  %v8551_v32 = vld [vmem:[%s13378_s17] ss:$0 sm:$0xff]  ;;  %s13478_s17 = sld [smem:[#allocation99_spill]] }
 0x921   :  { %v10609_v37 = vpop.eup %10608  ;;  %9885 = vmatprep.subr.bf16.mxu1 %v9884_v14 }
 0x922   :  { %v1776_v39 = vmul.f32 %v10609_v37, %v10605_v13  ;;  %v614_v13 = vld [vmem:[%s13376_s28 + $0x10] sm:$0xff] }
 0x923   :  { %v9888_v17 = vpack.c.bf16 %v615_v16, %v614_v13  ;;  %v625_v16 = vld [vmem:[%s13381_s29] sm:$0xff] }
 0x924   :  { %9231 = vmatprep.mubr.msk.f32.mxu1 %vm13293_vm10, %v1776_v39 }
 0x925   :  { %9232 = vmatmul.mubr.msk.f32.vlgmr.msra.gmra.mrb[4].mxu1 %vm13293_vm10, %v1778_v45 }
 0x926   :  { %9887 = vmatpush3.bf16.msra.mxu1 %v9884_v14 }
 0x927   :  { %9889 = vmatprep.subr.bf16.mxu1 %v9888_v17 }
 0x92a   :  { %9891 = vmatpush3.bf16.msra.mxu1 %v9888_v17  ;;  %v626_v17 = vld [vmem:[%s13381_s29 + $0x8] sm:$0xff] }
 0x92b   :  { %9893 = vmatprep.subr.bf16.mxu1 %v9892_v20  ;;  %v9900_v19 = vpack.c.bf16 %v626_v17, %v625_v16 }
 0x92e   :  { %9895 = vmatpush3.bf16.msra.mxu1 %v9892_v20  ;;  %v628_v20 = vld [vmem:[%s13381_s29 + $0x18] sm:$0xff]  ;;  %s13538_s29 = sld [smem:[#allocation62_spill]] }
 0x9f8   :  { %v9233_v46 = vpop.f32.mrb[4].mxu1 }
 0x9f9   :  { %v1865_v27 = vpop.f32.mrb[5].mxu1 }
 0x9fa   :  { %9242 = vmatprep.mubr.msk.f32.mxu0 %vm13299_vm1, %v1865_v27 }
 0x9fb   :  { %9243 = vmatmul.mubr.msk.f32.vlgmr.msra.gmra.mrb[8].mxu0 %vm13299_vm1, %v9233_v46 }
 0x9fc   :  { %9879 = vmatpush3.bf16.msra.mxu0 %v9876_v8 }
 0x9fd   :  { %9881 = vmatprep.subr.bf16.mxu0 %v9880_v10 }
 0xa00   :  { %9883 = vmatpush3.bf16.msra.mxu0 %v9880_v10 }
 0xa01   :  { %9901 = vmatprep.subr.bf16.mxu0 %v9900_v19 }
 0xace   :  { %v9244_v50 = vpop.f32.mrb[8].mxu0 }
 0xacf   :  { %v1960_v51 = vadd.f32 %v9244_v50, %v8547_v49  ;;  %v1954_v55 = vpop.f32.mrb[9].mxu0  ;;  %v619_v50 = vld [vmem:[%s13376_s28 + $0x38] sm:$0xff] }
 0xad0   :  { %v1955_v56 = vadd.f32 %v8547_v49, %v1954_v55  ;;  %v618_v49 = vld [vmem:[%s13376_s28 + $0x30] sm:$0xff]  ;;  %v8552_v55 = vld [vmem:[%s13379_s0] ss:$0 sm:$0xff]  ;;  %s13444_s28 = sld [smem:[#allocation96_spill]] }
 0xad1   :  { %v1964_v57 = vadd.f32 %v1960_v51, %v11960_v30  ;;  %v9896_v51 = vpack.c.bf16 %v619_v50, %v618_v49  ;;  %v8560_v50 = vld [vmem:[%s13384_s12] ss:$0 sm:$0xff]  ;;  %s13522_s0 = sld [smem:[#allocation104_spill]] }
 0xad2   :  { %v1963_v44 = vadd.f32 %v1955_v56, %v11958_v29 }
 0xad3   :  { %v1968_v59 = vsel %vm13299_vm1, %v1964_v57, 0.0  ;;  %9897 = vmatprep.subr.bf16.mxu1 %v9896_v51 }
 0xad4   :  { %1969 = vadd.xlane.f32.xlu1 %v1968_v59  ;;  %v1965_v60 = vsel %vm13299_vm1, %v1963_v44, 0.0  ;;  %9899 = vmatpush3.bf16.msra.mxu1 %v9896_v51 }
 0xad5   :  { %1966 = vadd.xlane.f32.xlu0 %v1965_v60 }
 0xb61   :  { %v1970_v40 = vpop.xlane.xlu1 %1969 }
 0xb62   :  { %v1973_v61 = vmul.f32 0.03125, %v1970_v40  ;;  %v1967_v62 = vpop.xlane.xlu0 %1966 }
 0xb63   :  { %v1972_v63 = vmul.f32 0.03125, %v1967_v62 }
 0xb64   :  { %v1975_v0 = vsub.f32 %v1964_v57, %v1973_v61  ;;  %v8555_v61 = vld [vmem:[%s13380_s5] ss:$0 sm:$0xff]  ;;  %s13534_s5 = sld [smem:[#allocation58_spill]] }
 0xb65   :  { %v1974_v1 = vsub.f32 %v1963_v44, %v1972_v63 }
 0xb66   :  { %v1977_v30 = vmul.f32 %v1975_v0, %v1975_v0 }
 0xb67   :  { %v1976_v2 = vmul.f32 %v1974_v1, %v1974_v1 }
 0xb68   :  { %v1981_v53 = vsel %vm13299_vm1, %v1977_v30, 0.0 }
 0xb69   :  { %v1978_v29 = vsel %vm13299_vm1, %v1976_v2, 0.0 }
 0xb6a   :  { %1979 = vadd.xlane.f32.xlu0 %v1978_v29 }
 0xb6e   :  { %1982 = vadd.xlane.f32.xlu0 %v1981_v53 }
 0xbf7   :  { %v1980_v21 = vpop.xlane.xlu0 %1979 }
 0xbf8   :  { %v1984_v22 = vmul.f32 0.03125, %v1980_v21  ;;  %v9904_v21 = vpack.c.bf16 %v628_v20, %v627_v18 }
 0xbfa   :  { %v1986_v24 = vadd.f32 1e-05, %v1984_v22 }
 0xbfb   :  { %v1983_v25 = vpop.xlane.xlu0 %1982 }
 0xbfc   :  { %10610 = vrsqrt.f32 %v1986_v24  ;;  %v1985_v26 = vmul.f32 0.03125, %v1983_v25 }
 0xbfe   :  { %v1987_v28 = vadd.f32 1e-05, %v1985_v26 }
 0xc00   :  { %10612 = vrsqrt.f32 %v1987_v28 }
 0xc06   :  { %v10611_v43 = vpop.eup %10610 }
 0xc07   :  { %v1990_v31 = vmul.f32 %v10611_v43, %v1974_v1 }
 0xc09   :  { %v1998_v35 = vmul.f32 %v8550_v38, %v1990_v31  ;;  %v8558_v31 = vld [vmem:[%s13382_s2] ss:$0 sm:$0xff]  ;;  %s13539_s2 = sld [smem:[#allocation63_spill]] }
 0xc0a   :  { %v10613_v37 = vpop.eup %10612 }
 0xc0b   :  { %v1991_v39 = vmul.f32 %v10613_v37, %v1975_v0  ;;  %v2006_v45 = vadd.f32 %v8551_v32, %v1998_v35 }
 0xc0d   :  { %v1999_v46 = vmul.f32 %v8550_v38, %v1991_v39  ;;  %9253 = vmatprep.mubr.msk.f32.mxu0 %vm13299_vm1, %v2006_v45  ;;  %v8559_v39 = vld [vmem:[%s13383_s6] ss:$0 sm:$0xff]  ;;  %s13540_s6 = sld [smem:[#allocation59_spill]] }
 0xc0f   :  { %v2007_v27 = vadd.f32 %v8551_v32, %v1999_v46 }
 0xc11   :  { %9254 = vmatmul.mubr.msk.f32.vlgmr.msra.gmra.mrb[10].mxu0 %vm13299_vm1, %v2007_v27 }
 0xc12   :  { %9903 = vmatpush3.bf16.msra.mxu0 %v9900_v19 }
 0xc13   :  { %9905 = vmatprep.subr.bf16.mxu0 %v9904_v21 }
 0xc16   :  { %9907 = vmatpush3.bf16.msra.mxu0 %v9904_v21 }
 0xce4   :  { %v9255_v56 = vpop.f32.mrb[10].mxu0 }
 0xce5   :  { %v2092_v57 = vadd.f32 %v9255_v56, %v8552_v55  ;;  %v2086_v44 = vpop.f32.mrb[11].mxu0 }
 0xce6   :  { %v2087_v59 = vadd.f32 %v8552_v55, %v2086_v44 }
 0xce7   :  { %v2096_v40 = vmax.f32 %v2092_v57, 0.0 }
 0xce8   :  { %v2095_v60 = vmax.f32 %v2087_v59, 0.0 }
 0xcea   :  { %9272 = vmatprep.mubr.msk.f32.mxu1 %vm13292_vm0, %v2095_v60 }
 0xceb   :  { %9273 = vmatmul.mubr.msk.f32.vlgmr.msra.gmra.mrb[8].mxu1 %vm13292_vm0, %v2096_v40 }
 0xdbe   :  { %v9274_v62 = vpop.f32.mrb[8].mxu1 }
 0xdbf   :  { %v2181_v63 = vadd.f32 %v9274_v62, %v8555_v61  ;;  %v2175_v0 = vpop.f32.mrb[9].mxu1 }
 0xdc0   :  { %v2176_v1 = vadd.f32 %v8555_v61, %v2175_v0 }
 0xdc1   :  { %v2185_v2 = vadd.f32 %v2181_v63, %v2007_v27 }
 0xdc2   :  { %v2184_v29 = vadd.f32 %v2176_v1, %v2006_v45 }
 0xdc3   :  { %v2189_v30 = vsel %vm13299_vm1, %v2185_v2, 0.0 }
 0xdc4   :  { %2190 = vadd.xlane.f32.xlu1 %v2189_v30  ;;  %v2186_v53 = vsel %vm13299_vm1, %v2184_v29, 0.0 }
 0xdc5   :  { %2187 = vadd.xlane.f32.xlu0 %v2186_v53 }
 0xe51   :  { %v2191_v3 = vpop.xlane.xlu1 %2190 }
 0xe52   :  { %v2193_v6 = vmul.f32 0.03125, %v2191_v3  ;;  %v2188_v7 = vpop.xlane.xlu0 %2187 }
 0xe53   :  { %v2192_v8 = vmul.f32 0.03125, %v2188_v7 }
 0xe54   :  { %v2195_v9 = vsub.f32 %v2185_v2, %v2193_v6 }
 0xe55   :  { %v2194_v10 = vsub.f32 %v2184_v29, %v2192_v8 }
 0xe56   :  { %v2197_v11 = vmul.f32 %v2195_v9, %v2195_v9 }
 0xe57   :  { %v2196_v12 = vmul.f32 %v2194_v10, %v2194_v10 }
 0xe58   :  { %v2201_v13 = vsel %vm13299_vm1, %v2197_v11, 0.0 }
 0xe59   :  { %2202 = vadd.xlane.f32.xlu1 %v2201_v13  ;;  %v2198_v14 = vsel %vm13299_vm1, %v2196_v12, 0.0 }
 0xe5a   :  { %2199 = vadd.xlane.f32.xlu0 %v2198_v14 }
 0xee6   :  { %v2203_v22 = vpop.xlane.xlu1 %2202 }
 0xee7   :  { %v2205_v24 = vmul.f32 0.03125, %v2203_v22  ;;  %v2200_v25 = vpop.xlane.xlu0 %2199 }
 0xee8   :  { %v2204_v26 = vmul.f32 0.03125, %v2200_v25 }
 0xee9   :  { %v2207_v28 = vadd.f32 1e-05, %v2205_v24 }
 0xeea   :  { %v2206_v43 = vadd.f32 1e-05, %v2204_v26 }
 0xeeb   :  { %10614 = vrsqrt.f32 %v2207_v28 }
 0xeec   :  { %10616 = vrsqrt.f32 %v2206_v43 }
 0xef5   :  { %v10615_v38 = vpop.eup %10614 }
 0xef6   :  { %v10617_v32 = vpop.eup %10616  ;;  %v2211_v35 = vmul.f32 %v10615_v38, %v2195_v9 }
 0xef7   :  { %v2210_v37 = vmul.f32 %v10617_v32, %v2194_v10 }
 0xef8   :  { %v2219_v45 = vmul.f32 %v8558_v31, %v2211_v35 }
 0xef9   :  { %v2218_v46 = vmul.f32 %v8558_v31, %v2210_v37 }
 0xefa   :  { %v12201_v49 = vadd.f32 %v8559_v39, %v2219_v45 }
 0xefb   :  { %v12199_v27 = vadd.f32 %v8559_v39, %v2218_v46 }
 0xefd   :  { %9283 = vmatprep.mubr.msk.f32.mxu0 %vm13299_vm1, %v12199_v27 }
 0xefe   :  { %9284 = vmatmul.mubr.msk.f32.vlgmr.msra.gmra.mrb[12].mxu0 %vm13299_vm1, %v12201_v49 }
 0xfd1   :  { %v9285_v51 = vpop.f32.mrb[12].mxu0 }
 0xfd2   :  { %v12208_v55 = vadd.f32 %v9285_v51, %v8560_v50  ;;  %v2306_v56 = vpop.f32.mrb[13].mxu0 }
 0xfd3   :  { %v12210_v57 = vadd.f32 %v8560_v50, %v2306_v56 }
 0xfd4   :  { %v2546_v44 = vmul.f32 %v12208_v55, %v12079_v23  ;;  %v12230_v0 = vmul.f32 %v12208_v55, %v12098_v4  ;;  %v12239_v2 = vmul.f32 %v12208_v55, %v12100_v5  ;;  %v12247_v30 = vmul.f32 %v12208_v55, %v12147_v15 }
 0xfd5   :  { %v10453_v59 = vpack.i.bf16 %v12208_v55, %v12210_v57  ;;  %v2315_v60 = vmul.f32 %v11990_v41, %v12210_v57  ;;  %v2436_v40 = vmul.f32 %v11995_v42, %v12210_v57  ;;  %v2545_v61 = vmul.f32 %v12210_v57, %v12079_v23 }
 0xfd6   :  { %v12224_v62 = vmul.f32 %v12210_v57, %v12098_v4  ;;  %v12234_v1 = vmul.f32 %v12210_v57, %v12100_v5  ;;  %v12243_v29 = vmul.f32 %v12210_v57, %v12147_v15  ;;  %v2316_v11 = vmul.f32 %v11990_v41, %v12208_v55 }
 0xfd7   :  { %10454 = vrot.lane.b32.xlu0 %v10453_v59, %s11470_s23  ;;  %9290 = vmatprep.mubr.msk.f32.mxu0 %vm13299_vm1, %v2315_v60  ;;  %v10458_v63 = vpack.i.bf16 %v2546_v44, %v2545_v61  ;;  %v2437_v12 = vmul.f32 %v11995_v42, %v12208_v55 }
 0xfd8   :  { %9297 = vmatprep.mubr.msk.f32.mxu1 %vm13299_vm1, %v2436_v40  ;;  %v10468_v53 = vpack.i.bf16 %v12230_v0, %v12224_v62  ;;  %v10463_v3 = vpack.i.bf16 %v12239_v2, %v12234_v1  ;;  %v10473_v6 = vpack.i.bf16 %v12247_v30, %v12243_v29 }
0x1049   :  { %v10455_v7 = vpop.permute.xlu0 %10454 }
0x104a   :  { %v10457_v8 = vunpack.i.h.bf16 %v10455_v7  ;;  %v10456_v9 = vunpack.i.l.bf16 %v10455_v7 }
0x104c   :  { %v12255_v10 = vpack.c.bf16 %v10457_v8, %v10456_v9 }
0x104e   :  { %9910 = vmatprep.subr.msk.bf16.mxu0 %vm12014_vm6, %v12255_v10  ;;  %9916 = vmatprep.subr.msk.bf16.mxu1 %vm12014_vm6, %v12255_v10 }
0x104f   :  { %9913 = vmatpush3.bf16.xpose.msk.msra.mxu0 %vm12014_vm6, %v12255_v10  ;;  %9919 = vmatpush3.bf16.xpose.msk.msra.mxu1 %vm12014_vm6, %v12255_v10 }
0x1056   :  { %9291 = vmatmul.mubr.msk.f32.vlgmr.msra.gmra.mrb[14].mxu0 %vm13299_vm1, %v2316_v11  ;;  %9298 = vmatmul.mubr.msk.f32.vlgmr.msra.gmra.mrb[10].mxu1 %vm13299_vm1, %v2437_v12 }
0x1129   :  { %v9292_v13 = vpop.f32.mrb[14].mxu0  ;;  %v9299_v14 = vpop.f32.mrb[10].mxu1 }
0x112a   :  { %v2399_v16 = vpop.f32.mrb[15].mxu0  ;;  %v2510_v17 = vpop.f32.mrb[11].mxu1  ;;  %v2520_v18 = vmul.f32 0.35355338, %v9299_v14  ;;  %v2409_v51 = vmul.f32 0.35355338, %v9292_v13  ;;  %v2725_v13 = vmul.f32 %v12038_v54, %v12210_v57  ;;  %v2726_v14 = vmul.f32 %v12038_v54, %v12208_v55 }
0x112b   :  { %v2408_v19 = vmul.f32 0.35355338, %v2399_v16  ;;  %v2519_v20 = vmul.f32 0.35355338, %v2510_v17  ;;  %v2927_v16 = vmul.f32 %v12123_v58, %v12210_v57  ;;  %v2928_v17 = vmul.f32 %v12123_v58, %v12208_v55 }
0x112c   :  { %v2522_v26 = vsel %vm11981_vm5, %v2520_v18, -1e+30  ;;  %v2411_v56 = vsel %vm11981_vm5, %v2409_v51, -1e+30 }
0x112d   :  { %v2521_v21 = vsel %vm13295_vm4, %v2519_v20, -1e+30  ;;  %v12279_v22 = vsel %vm13295_vm4, %v2408_v19, -1e+30  ;;  %v2526_v28 = vsel %vm13293_vm10, %v2522_v26, -inf  ;;  %v2415_v44 = vsel %vm13293_vm10, %v2411_v56, -inf }
0x112e   :  { %v2523_v24 = vsel %vm13293_vm10, %v2521_v21, -inf  ;;  %v2412_v25 = vsel %vm13293_vm10, %v12279_v22, -inf }
0x112f   :  { %2524 = vmax.xlane.f32.xlu1 %v2523_v24  ;;  %2413 = vmax.xlane.f32.xlu0 %v2412_v25 }
0x1133   :  { %2527 = vmax.xlane.f32.xlu1 %v2526_v28 }
0x11bc   :  { %v2525_v43 = vpop.xlane.xlu1 %2524  ;;  %v2414_v25 = vpop.xlane.xlu0 %2413 }
0x11bd   :  { %v2529_v38 = vsub.f32 %v2521_v21, %v2525_v43 }
0x11bf   :  { %v2531_v35 = vmul.f32 1.442695, %v2529_v38 }
0x11c0   :  { %v2528_v31 = vpop.xlane.xlu1 %2527 }
0x11c1   :  { %v2530_v32 = vsub.f32 %v2522_v26, %v2528_v31  ;;  %v2418_v26 = vsub.f32 %v12279_v22, %v2414_v25 }
0x11c3   :  { %v2533_v37 = vmul.f32 1.442695, %v2530_v32  ;;  %v2420_v31 = vmul.f32 1.442695, %v2418_v26 }
0x11c5   :  { %10618 = vpow2.f32 %v2533_v37 }
0x11c6   :  { %10620 = vpow2.f32 %v2531_v35 }
0x11cf   :  { %v10619_v39 = vpop.eup %10618 }
0x11d0   :  { %v2538_v45 = vsel %vm13293_vm10, %v10619_v39, 0.0  ;;  %v10621_v46 = vpop.eup %10620 }
0x11d1   :  { %2539 = vadd.xlane.f32.xlu1 %v2538_v45  ;;  %v2535_v50 = vsel %vm13293_vm10, %v10621_v46, 0.0 }
0x11d5   :  { %2536 = vadd.xlane.f32.xlu1 %v2535_v50 }
0x11e6   :  { %10459 = vrot.lane.b32.xlu1 %v10458_v63, %s11471_s19 }
0x120a   :  { %2416 = vmax.xlane.f32.xlu1 %v2415_v44 }
0x125e   :  { %v2540_v59 = vpop.xlane.xlu1 %2539 }
0x125f   :  { %10622 = vrcp.f32 %v2540_v59 }
0x1262   :  { %v2537_v60 = vpop.xlane.xlu1 %2536 }
0x1263   :  { %10624 = vrcp.f32 %v2537_v60 }
0x1266   :  { %v10460_v40 = vpop.permute.xlu1 %10459 }
0x1267   :  { %v10462_v61 = vunpack.i.h.bf16 %v10460_v40  ;;  %v10461_v7 = vunpack.i.l.bf16 %v10460_v40 }
0x1269   :  { %v9920_v8 = vpack.c.bf16 %v10462_v61, %v10461_v7  ;;  %v10623_v9 = vpop.eup %10622 }
0x126a   :  { %v2544_v12 = vmul.f32 %v10623_v9, %v10619_v39 }
0x126b   :  { %9921 = vmatprep.subr.bf16.mxu1 %v9920_v8 }
0x126c   :  { %9923 = vmatpush3.bf16.msra.mxu1 %v9920_v8 }
0x126d   :  { %v10625_v11 = vpop.eup %10624  ;;  %9930 = vmatprep.subr.msk.bf16.mxu1 %vm12014_vm6, %v12255_v10 }
0x126e   :  { %v2542_v63 = vmul.f32 %v10625_v11, %v10621_v46 }
0x1270   :  { %9304 = vmatprep.mubr.msk.f32.mxu1 %vm13293_vm10, %v2542_v63 }
0x1271   :  { %9305 = vmatmul.mubr.msk.f32.vlgmr.msra.gmra.mrb[12].mxu1 %vm13293_vm10, %v2544_v12 }
0x1272   :  { %9318 = vmatprep.mubr.msk.f32.mxu1 %vm13299_vm1, %v2725_v13 }
0x1275   :  { %9933 = vmatpush3.bf16.xpose.msk.msra.mxu1 %vm12014_vm6, %v12255_v10 }
0x1276   :  { %9940 = vmatprep.subr.msk.bf16.mxu1 %vm12014_vm6, %v12255_v10 }
0x127c   :  { %9319 = vmatmul.mubr.msk.f32.vlgmr.msra.gmra.mrb[14].mxu1 %vm13299_vm1, %v2726_v14 }
0x127d   :  { %9943 = vmatpush3.bf16.xpose.msk.msra.mxu1 %vm12014_vm6, %v12255_v10  ;;  %9332 = vmatprep.mubr.msk.f32.mxu1 %vm13299_vm1, %v2927_v16 }
0x1284   :  { %9333 = vmatmul.mubr.msk.f32.vlgmr.msra.gmra.mrb[16].mxu1 %vm13299_vm1, %v2928_v17 }
0x1297   :  { %v2417_v18 = vpop.xlane.xlu1 %2416 }
0x1298   :  { %v2419_v19 = vsub.f32 %v2411_v56, %v2417_v18 }
0x129a   :  { %v2422_v20 = vmul.f32 1.442695, %v2419_v19 }
0x129c   :  { %10626 = vpow2.f32 %v2422_v20 }
0x129d   :  { %10628 = vpow2.f32 %v2420_v31 }
0x12a6   :  { %v12319_v21 = vpop.eup %10626 }
0x12a7   :  { %v2427_v57 = vsel %vm13293_vm10, %v12319_v21, 0.0  ;;  %v10629_v60 = vpop.eup %10628 }
0x12a8   :  { %2428 = vadd.xlane.f32.xlu1 %v2427_v57  ;;  %v2424_v40 = vsel %vm13293_vm10, %v10629_v60, 0.0 }
0x1344   :  { %v12323_v24 = vpop.f32.mrb[12].mxu1 }
0x1345   :  { %v12325_v10 = vpop.f32.mrb[13].mxu1 }
0x134f   :  { %v9320_v55 = vpop.f32.mrb[14].mxu1 }
0x1350   :  { %v2799_v28 = vpop.f32.mrb[15].mxu1  ;;  %v2809_v43 = vmul.f32 0.35355338, %v9320_v55 }
0x1351   :  { %v2808_v38 = vmul.f32 0.35355338, %v2799_v28 }
0x1352   :  { %v2811_v37 = vsel %vm11981_vm5, %v2809_v43, -1e+30 }
0x1353   :  { %v2810_v32 = vsel %vm13295_vm4, %v2808_v38, -1e+30  ;;  %v2815_v46 = vsel %vm13293_vm10, %v2811_v37, -inf }
0x1354   :  { %v2812_v35 = vsel %vm13293_vm10, %v2810_v32, -inf }
0x1355   :  { %2813 = vmax.xlane.f32.xlu0 %v2812_v35 }
0x1357   :  { %v9334_v39 = vpop.f32.mrb[16].mxu1 }
0x1358   :  { %v3001_v45 = vpop.f32.mrb[17].mxu1  ;;  %v3011_v22 = vmul.f32 0.35355338, %v9334_v39 }
0x1359   :  { %v3010_v50 = vmul.f32 0.35355338, %v3001_v45  ;;  %2816 = vmax.xlane.f32.xlu0 %v2815_v46 }
0x135a   :  { %v3013_v44 = vsel %vm11981_vm5, %v3011_v22, -1e+30 }
0x135b   :  { %v3012_v51 = vsel %vm13295_vm4, %v3010_v50, -1e+30  ;;  %v3017_v59 = vsel %vm13293_vm10, %v3013_v44, -inf }
0x135c   :  { %v3014_v56 = vsel %vm13293_vm10, %v3012_v51, -inf }
0x135d   :  { %3015 = vmax.xlane.f32.xlu0 %v3014_v56 }
0x1361   :  { %3018 = vmax.xlane.f32.xlu0 %v3017_v59 }
0x1365   :  { %2425 = vadd.xlane.f32.xlu0 %v2424_v40  ;;  %v630_v40 = vld [vmem:[%s13385_s7] sm:$0xff] }
0x13e2   :  { %v2814_v61 = vpop.xlane.xlu0 %2813 }
0x13e3   :  { %v2818_v7 = vsub.f32 %v2810_v32, %v2814_v61  ;;  %v2429_v32 = vpop.xlane.xlu1 %2428  ;;  %v631_v61 = vld [vmem:[%s13385_s7 + $0x8] sm:$0xff] }
0x13e5   :  { %v2820_v8 = vmul.f32 1.442695, %v2818_v7 }
0x13e6   :  { %v2817_v9 = vpop.xlane.xlu0 %2816 }
0x13e7   :  { %10630 = vpow2.f32 %v2820_v8  ;;  %v2819_v11 = vsub.f32 %v2811_v37, %v2817_v9  ;;  %v9948_v8 = vpack.c.bf16 %v631_v61, %v630_v40 }
0x13e9   :  { %v2822_v63 = vmul.f32 1.442695, %v2819_v11 }
0x13ea   :  { %v3016_v12 = vpop.xlane.xlu0 %3015 }
0x13eb   :  { %10632 = vpow2.f32 %v2822_v63  ;;  %v3020_v13 = vsub.f32 %v3012_v51, %v3016_v12  ;;  %v632_v12 = vld [vmem:[%s13385_s7 + $0x10] sm:$0xff] }
0x13ed   :  { %v3022_v14 = vmul.f32 1.442695, %v3020_v13  ;;  %v633_v13 = vld [vmem:[%s13385_s7 + $0x18] sm:$0xff] }
0x13ee   :  { %v3019_v36 = vpop.xlane.xlu0 %3018 }
0x13ef   :  { %10634 = vpow2.f32 %v3022_v14  ;;  %v3021_v16 = vsub.f32 %v3013_v44, %v3019_v36  ;;  %v9952_v14 = vpack.c.bf16 %v633_v13, %v632_v12  ;;  %v8590_v12 = vld [vmem:[%s13390_s24] ss:$0 sm:$0xff] }
0x13f1   :  { %v10631_v17 = vpop.eup %10630  ;;  %v3024_v18 = vmul.f32 1.442695, %v3021_v16 }
0x13f2   :  { %v2426_v19 = vpop.xlane.xlu0 %2425  ;;  %v2824_v20 = vsel %vm13293_vm10, %v10631_v17, 0.0 }
0x13f3   :  { %10636 = vpow2.f32 %v3024_v18  ;;  %2825 = vadd.xlane.f32.xlu0 %v2824_v20 }
0x13f4   :  { %10638 = vrcp.f32 %v2426_v19  ;;  %v8587_v19 = vld [vmem:[%s13386_s10] ss:$0 sm:$0xff] }
0x13f5   :  { %v10633_v57 = vpop.eup %10632  ;;  %10640 = vrcp.f32 %v2429_v32 }
0x13f6   :  { %v2827_v25 = vsel %vm13293_vm10, %v10633_v57, 0.0 }
0x13f7   :  { %2828 = vadd.xlane.f32.xlu1 %v2827_v25 }
0x13f9   :  { %v10635_v26 = vpop.eup %10634 }
0x13fa   :  { %v3026_v55 = vsel %vm13293_vm10, %v10635_v26, 0.0 }
0x13fb   :  { %3027 = vadd.xlane.f32.xlu0 %v3026_v55 }
0x13fd   :  { %v10637_v28 = vpop.eup %10636 }
0x13fe   :  { %v10639_v43 = vpop.eup %10638  ;;  %v3029_v38 = vsel %vm13293_vm10, %v10637_v28, 0.0 }
0x13ff   :  { %3030 = vadd.xlane.f32.xlu1 %v3029_v38  ;;  %v2431_v31 = vmul.f32 %v10639_v43, %v10629_v60  ;;  %v10641_v1 = vpop.eup %10640 }
0x1400   :  { %v2433_v29 = vmul.f32 %v10641_v1, %v12319_v21  ;;  %v638_v1 = vld [vmem:[%s13387_s3 + $0x18] sm:$0xff] }
0x1401   :  { %9311 = vmatprep.mubr.msk.f32.mxu0 %vm13293_vm10, %v2431_v31 }
0x1410   :  { %10469 = vrot.lane.b32.xlu1 %v10468_v53, %s11471_s19 }
0x1411   :  { %10464 = vrot.lane.b32.xlu0 %v10463_v3, %s11471_s19 }
0x1414   :  { %10474 = vrot.lane.b32.xlu1 %v10473_v6, %s11471_s19 }
0x1480   :  { %v2826_v35 = vpop.xlane.xlu0 %2825 }
0x1481   :  { %10642 = vrcp.f32 %v2826_v35 }
0x1484   :  { %v2829_v37 = vpop.xlane.xlu1 %2828 }
0x1485   :  { %10644 = vrcp.f32 %v2829_v37 }
0x1488   :  { %v3028_v39 = vpop.xlane.xlu0 %3027 }
0x1489   :  { %10646 = vrcp.f32 %v3028_v39 }
0x148b   :  { %v10643_v3 = vpop.eup %10642 }
0x148c   :  { %v3031_v45 = vpop.xlane.xlu1 %3030  ;;  %v10465_v46 = vpop.permute.xlu0 %10464  ;;  %v2831_v51 = vmul.f32 %v10643_v3, %v10631_v17  ;;  %v653_v3 = vld [vmem:[%s13388_s30] sm:$0xff] }
0x148d   :  { %v10467_v62 = vunpack.i.h.bf16 %v10465_v46  ;;  %v10466_v0 = vunpack.i.l.bf16 %v10465_v46  ;;  %10648 = vrcp.f32 %v3031_v45  ;;  %v635_v46 = vld [vmem:[%s13387_s3] sm:$0xff] }
0x148f   :  { %v9924_v53 = vpack.c.bf16 %v10467_v62, %v10466_v0  ;;  %v10645_v60 = vpop.eup %10644  ;;  %v636_v62 = vld [vmem:[%s13387_s3 + $0x8] sm:$0xff]  ;;  %v637_v0 = vld [vmem:[%s13387_s3 + $0x10] sm:$0xff] }
0x1490   :  { %v10470_v2 = vpop.permute.xlu1 %10469  ;;  %v2833_v21 = vmul.f32 %v10645_v60, %v10633_v57  ;;  %v645_v60 = vld [vmem:[%s13389_s11 + $0x28] sm:$0xff] }
0x1491   :  { %v10472_v22 = vunpack.i.h.bf16 %v10470_v2  ;;  %v10471_v50 = vunpack.i.l.bf16 %v10470_v2  ;;  %9925 = vmatprep.subr.bf16.mxu0 %v9924_v53  ;;  %v9960_v2 = vpack.c.bf16 %v638_v1, %v637_v0 }
0x1492   :  { %9927 = vmatpush3.bf16.msra.mxu0 %v9924_v53  ;;  %v9956_v53 = vpack.c.bf16 %v636_v62, %v635_v46 }
0x1493   :  { %v9934_v30 = vpack.c.bf16 %v10472_v22, %v10471_v50  ;;  %v10647_v7 = vpop.eup %10646  ;;  %v654_v22 = vld [vmem:[%s13388_s30 + $0x8] sm:$0xff] }
0x1494   :  { %v10475_v6 = vpop.permute.xlu1 %10474  ;;  %v3033_v9 = vmul.f32 %v10647_v7, %v10635_v26  ;;  %9957 = vmatprep.subr.bf16.mxu1 %v9956_v53  ;;  %v9980_v50 = vpack.c.bf16 %v654_v22, %v653_v3 }
0x1495   :  { %v10477_v56 = vunpack.i.h.bf16 %v10475_v6  ;;  %v10476_v44 = vunpack.i.l.bf16 %v10475_v6  ;;  %9312 = vmatmul.mubr.msk.f32.vlgmr.msra.gmra.mrb[16].mxu0 %vm13293_vm10, %v2433_v29  ;;  %9935 = vmatprep.subr.bf16.mxu0 %v9934_v30  ;;  %v640_v29 = vld [vmem:[%s13389_s11] sm:$0xff]  ;;  %v642_v6 = vld [vmem:[%s13389_s11 + $0x10] sm:$0xff] }
0x1496   :  { %9937 = vmatpush3.bf16.msra.mxu0 %v9934_v30  ;;  %9325 = vmatprep.mubr.msk.f32.mxu0 %vm13293_vm10, %v2831_v51  ;;  %v641_v30 = vld [vmem:[%s13389_s11 + $0x8] sm:$0xff] }
0x1497   :  { %v9944_v59 = vpack.c.bf16 %v10477_v56, %v10476_v44  ;;  %v10649_v11 = vpop.eup %10648  ;;  %9959 = vmatpush3.bf16.msra.mxu1 %v9956_v53  ;;  %v9964_v51 = vpack.c.bf16 %v641_v30, %v640_v29  ;;  %v643_v56 = vld [vmem:[%s13389_s11 + $0x18] sm:$0xff]  ;;  %v8602_v53 = vld [vmem:[#allocation2] ss:$0 sm:$0xff] }
0x1498   :  { %v3035_v63 = vmul.f32 %v10649_v11, %v10637_v28  ;;  %9961 = vmatprep.subr.bf16.mxu1 %v9960_v2  ;;  %v9968_v44 = vpack.c.bf16 %v643_v56, %v642_v6 }
0x1499   :  { %9945 = vmatprep.subr.bf16.mxu0 %v9944_v59 }
0x149b   :  { %9963 = vmatpush3.bf16.msra.mxu1 %v9960_v2 }
0x149c   :  { %9981 = vmatprep.subr.bf16.mxu1 %v9980_v50 }
0x149d   :  { %9326 = vmatmul.mubr.msk.f32.vlgmr.msra.gmra.mrb[16].mxu0 %vm13293_vm10, %v2833_v21 }
0x149e   :  { %9947 = vmatpush3.bf16.msra.mxu0 %v9944_v59  ;;  %9339 = vmatprep.mubr.msk.f32.mxu0 %vm13293_vm10, %v3033_v9  ;;  %v644_v59 = vld [vmem:[%s13389_s11 + $0x20] sm:$0xff] }
0x149f   :  { %9949 = vmatprep.subr.bf16.mxu0 %v9948_v8  ;;  %v9972_v40 = vpack.c.bf16 %v645_v60, %v644_v59 }
0x14a5   :  { %9340 = vmatmul.mubr.msk.f32.vlgmr.msra.gmra.mrb[16].mxu0 %vm13293_vm10, %v3035_v63 }
0x14a6   :  { %9951 = vmatpush3.bf16.msra.mxu0 %v9948_v8 }
0x14a7   :  { %9953 = vmatprep.subr.bf16.mxu0 %v9952_v14 }
0x14aa   :  { %9955 = vmatpush3.bf16.msra.mxu0 %v9952_v14  ;;  %v10818_v14 = vld [vmem:[%s13365_s22] ss:$0 sm:$0xff]  ;;  %s13403_s22 = sld [smem:[#allocation87_spill]] }
0x14ab   :  { %9965 = vmatprep.subr.bf16.mxu0 %v9964_v51 }
0x1578   :  { %v9341_v36 = vpop.f32.mrb[16].mxu0 }
0x1579   :  { %v10292_v16 = vadd.f32 %v9341_v36, %v12323_v24  ;;  %v3118_v17 = vpop.f32.mrb[17].mxu0  ;;  %v898_v36 = vadd.f32 %v10818_v14, %v12010_v48 }
0x157a   :  { %v10293_v18 = vadd.f32 %v3118_v17, %v12325_v10 }
0x157c   :  { %9350 = vmatprep.mubr.msk.f32.mxu0 %vm13299_vm1, %v10293_v18 }
0x157d   :  { %9351 = vmatmul.mubr.msk.f32.vlgmr.msra.gmra.mrb[18].mxu0 %vm13299_vm1, %v10292_v16  ;;  %v8591_v16 = vld [vmem:[%s13391_s15] ss:$0 sm:$0xff] }
0x157e   :  { %9967 = vmatpush3.bf16.msra.mxu0 %v9964_v51 }
0x157f   :  { %9969 = vmatprep.subr.bf16.mxu0 %v9968_v44 }
0x1582   :  { %9971 = vmatpush3.bf16.msra.mxu0 %v9968_v44 }
0x1583   :  { %9973 = vmatprep.subr.bf16.mxu0 %v9972_v40 }
0x1586   :  { %9975 = vmatpush3.bf16.msra.mxu0 %v9972_v40 }
0x1650   :  { %v9352_v20 = vpop.f32.mrb[18].mxu0 }
0x1651   :  { %v3213_v57 = vadd.f32 %v9352_v20, %v8587_v19  ;;  %v3207_v25 = vpop.f32.mrb[19].mxu0 }
0x1652   :  { %v3208_v26 = vadd.f32 %v8587_v19, %v3207_v25  ;;  %v655_v25 = vld [vmem:[%s13388_s30 + $0x10] sm:$0xff] }
0x1653   :  { %v3217_v55 = vadd.f32 %v3213_v57, %v12201_v49  ;;  %v906_v57 = vmul.f32 5.656854, %v898_v36 }
0x1654   :  { %v3216_v28 = vadd.f32 %v3208_v26, %v12199_v27  ;;  %v656_v26 = vld [vmem:[%s13388_s30 + $0x18] sm:$0xff] }
0x1655   :  { %v3221_v43 = vsel %vm13299_vm1, %v3217_v55, 0.0 }
0x1656   :  { %3222 = vadd.xlane.f32.xlu1 %v3221_v43  ;;  %v3218_v24 = vsel %vm13299_vm1, %v3216_v28, 0.0  ;;  %v903_v43 = vadd.f32 %v10818_v14, %v12008_v47  ;;  %v646_v47 = vld [vmem:[%s13389_s11 + $0x30] sm:$0xff] }
0x1657   :  { %3219 = vadd.xlane.f32.xlu0 %v3218_v24  ;;  %v9984_v24 = vpack.c.bf16 %v656_v26, %v655_v25 }
0x16e3   :  { %v3223_v10 = vpop.xlane.xlu1 %3222 }
0x16e4   :  { %v3225_v38 = vmul.f32 0.03125, %v3223_v10  ;;  %v3220_v31 = vpop.xlane.xlu0 %3219 }
0x16e5   :  { %v3224_v32 = vmul.f32 0.03125, %v3220_v31  ;;  %v578_v31 = vld [vmem:[%s13392_s16 + $0x8] sm:$0x3f] }
0x16e6   :  { %v3227_v35 = vsub.f32 %v3217_v55, %v3225_v38  ;;  %v577_v55 = vld [vmem:[%s13392_s16] sm:$0xff]  ;;  %v907_v38 = vmul.f32 5.656854, %v903_v43 }
0x16e7   :  { %v3226_v37 = vsub.f32 %v3216_v28, %v3224_v32  ;;  %v12405_v10 = vadd.f32 %v906_v57, %v577_v55  ;;  %v12511_v57 = vshrl.u32 %v998_v33, 7 }
0x16e8   :  { %v3229_v49 = vmul.f32 %v3227_v35, %v3227_v35  ;;  %v12412_v32 = vadd.f32 %v907_v38, %v578_v31 }
0x16e9   :  { %v3228_v39 = vmul.f32 %v3226_v37, %v3226_v37  ;;  %vm3618_vm14 = vcmp.ge.s32.totalorder %v12511_v57, 7  ;;  %v12516_v25 = vadd.s32 8, %v12511_v57  ;;  %vm3609_vm5 = vcmp.lt.s32.totalorder %v12511_v57, 7 }
0x16ea   :  { %v3233_v45 = vsel %vm13299_vm1, %v3229_v49, 0.0  ;;  %vm3625_vm8 = vmand %vm3618_vm14, %vm3624_vm15 }
0x16eb   :  { %v3230_v27 = vsel %vm13299_vm1, %v3228_v39, 0.0  ;;  %v8592_v39 = vld [vmem:[%s13393_s18] ss:$0 sm:$0xff]  ;;  %vm3616_vm11 = vmand %vm3609_vm5, %vm3615_vm7  ;;  %vm3621_vm12 = vcmp.lt.s32.totalorder %v12516_v25, 14  ;;  %vm11472_vm7 = vmmov 1  }
0x16ec   :  { %3231 = vadd.xlane.f32.xlu0 %v3230_v27  ;;  %vm3628_vm13 = vmand %vm3625_vm8, %vm3627_vm9 }
0x16ed   :  { %vm12528_vm10 = vmor %vm3616_vm11, %vm3628_vm13 }
0x16ee   :  { %vm4755_vm11 = vmand %vm3618_vm14, %vm1021_vm2 }
0x16ef   :  { %vm4756_vm13 = vmand %vm3621_vm12, %vm1021_vm2  ;;  %vm4861_vm2 = vcmask 128000  }
0x16f0   :  { %3234 = vadd.xlane.f32.xlu0 %v3233_v45 }
0x1779   :  { %v3232_v61 = vpop.xlane.xlu0 %3231 }
0x177a   :  { %v3236_v7 = vmul.f32 0.03125, %v3232_v61 }
0x177c   :  { %v3238_v21 = vadd.f32 1e-05, %v3236_v7 }
0x177d   :  { %v3235_v8 = vpop.xlane.xlu0 %3234 }
0x177e   :  { %10650 = vrsqrt.f32 %v3238_v21  ;;  %v3237_v9 = vmul.f32 0.03125, %v3235_v8 }
0x1780   :  { %v3239_v11 = vadd.f32 1e-05, %v3237_v9 }
0x1782   :  { %10652 = vrsqrt.f32 %v3239_v11 }
0x1788   :  { %v10651_v63 = vpop.eup %10650 }
0x1789   :  { %v3242_v13 = vmul.f32 %v10651_v63, %v3226_v37 }
0x178b   :  { %v3250_v17 = vmul.f32 %v8590_v12, %v3242_v13 }
0x178c   :  { %v10653_v18 = vpop.eup %10652 }
0x178d   :  { %v3243_v19 = vmul.f32 %v10653_v18, %v3227_v35  ;;  %v12395_v20 = vadd.f32 %v8591_v16, %v3250_v17  ;;  %v647_v35 = vld [vmem:[%s13389_s11 + $0x38] sm:$0xff] }
0x178e   :  { %v9976_v37 = vpack.c.bf16 %v647_v35, %v646_v47 }
0x178f   :  { %v3251_v28 = vmul.f32 %v8590_v12, %v3243_v19  ;;  %9361 = vmatprep.mubr.msk.f32.mxu1 %vm13299_vm1, %v12395_v20 }
0x1790   :  { %9977 = vmatprep.subr.bf16.mxu0 %v9976_v37 }
0x1791   :  { %v12403_v48 = vadd.f32 %v8591_v16, %v3251_v28  ;;  %9979 = vmatpush3.bf16.msra.mxu0 %v9976_v37 }
0x1793   :  { %9362 = vmatmul.mubr.msk.f32.vlgmr.msra.gmra.mrb[18].mxu1 %vm13299_vm1, %v12403_v48 }
0x1794   :  { %9983 = vmatpush3.bf16.msra.mxu1 %v9980_v50  ;;  %9391 = vmatprep.mubr.msk.f32.mxu1 %vm13299_vm1, %v12405_v10 }
0x1795   :  { %9985 = vmatprep.subr.bf16.mxu1 %v9984_v24 }
0x1798   :  { %9987 = vmatpush3.bf16.msra.mxu1 %v9984_v24 }
0x179b   :  { %9392 = vmatmul.mubr.msk.f32.vlgmr.msra.gmra.mrb[20].mxu1 %vm13299_vm1, %v12412_v32 }
0x1866   :  { %v9363_v27 = vpop.f32.mrb[18].mxu1 }
0x1867   :  { %v3344_v49 = vadd.f32 %v9363_v27, %v8592_v39  ;;  %v3338_v45 = vpop.f32.mrb[19].mxu1 }
0x1868   :  { %v3339_v46 = vadd.f32 %v8592_v39, %v3338_v45 }
0x1869   :  { %v3348_v0 = vmax.f32 %v3344_v49, 0.0 }
0x186a   :  { %v3347_v62 = vmax.f32 %v3339_v46, 0.0 }
0x186c   :  { %9380 = vmatprep.mubr.msk.f32.mxu0 %vm13292_vm0, %v3347_v62 }
0x186d   :  { %9381 = vmatmul.mubr.msk.f32.vlgmr.msra.gmra.mrb[20].mxu0 %vm13292_vm0, %v3348_v0  ;;  %vm3626_vm0 = vmand %vm3621_vm12, %vm3624_vm15  ;;  %vm13297_vm15 = vcmask 111616  }
0x186e   :  { %v9393_v1 = vpop.f32.mrb[20].mxu1  ;;  %vm12532_vm4 = vmand %vm3626_vm0, %vm3627_vm9  ;;  %vm3879_vm0 = vcmask 1045504   ;;  %vm13298_vm9 = vcmask 259072  }
0x186f   :  { %v12421_v2 = vadd.f32 %v9393_v1, %v8602_v53  ;;  %v3600_v3 = vpop.f32.mrb[21].mxu1  ;;  %vm12563_vm8 = vmpackc.low %vm3879_vm0, %vm11472_vm7  ;;  %vm13407_vm0 = vcmp.lt.s32.totalorder %v11971_v34, 8 }
0x1870   :  { %v12423_v22 = vadd.f32 %v8602_v53, %v3600_v3  ;;  %vm4753_vm7 = vmand %vm3609_vm5, %vm13407_vm0 }
0x1871   :  { %v12427_v50 = vmul.f32 %v12421_v2, %v12100_v5  ;;  %v12445_v44 = vmul.f32 %v12421_v2, %v12079_v23  ;;  %v12455_v60 = vmul.f32 %v12421_v2, %v12098_v4  ;;  %v12468_v21 = vmul.f32 %v12421_v2, %v12147_v15 }
0x1872   :  { %v10478_v29 = vpack.i.bf16 %v12421_v2, %v12423_v22  ;;  %v3632_v30 = vmul.f32 %v11990_v41, %v12423_v22  ;;  %v3755_v6 = vmul.f32 %v11995_v42, %v12423_v22  ;;  %v12437_v51 = vmul.f32 %v12423_v22, %v12100_v5 }
0x1873   :  { %v12441_v56 = vmul.f32 %v12423_v22, %v12079_v23  ;;  %v12449_v59 = vmul.f32 %v12423_v22, %v12098_v4  ;;  %v12464_v7 = vmul.f32 %v12423_v22, %v12147_v15  ;;  %v3633_v14 = vmul.f32 %v11990_v41, %v12421_v2 }
0x1874   :  { %10479 = vrot.lane.b32.xlu1 %v10478_v29, %s11470_s23  ;;  %9398 = vmatprep.mubr.msk.f32.mxu1 %vm13299_vm1, %v3632_v30  ;;  %v10488_v40 = vpack.i.bf16 %v12427_v50, %v12437_v51  ;;  %v3756_v36 = vmul.f32 %v11995_v42, %v12421_v2  ;;  %v4047_v16 = vmul.f32 %v12038_v54, %v12423_v22 }
0x1875   :  { %9405 = vmatprep.mubr.msk.f32.mxu0 %vm13299_vm1, %v3755_v6  ;;  %v10483_v61 = vpack.i.bf16 %v12445_v44, %v12441_v56  ;;  %v10493_v8 = vpack.i.bf16 %v12455_v60, %v12449_v59  ;;  %v10498_v9 = vpack.i.bf16 %v12468_v21, %v12464_v7  ;;  %v4048_v17 = vmul.f32 %v12038_v54, %v12421_v2 }
0x18e6   :  { %v10480_v11 = vpop.permute.xlu1 %10479 }
0x18e7   :  { %v10482_v63 = vunpack.i.h.bf16 %v10480_v11  ;;  %v10481_v12 = vunpack.i.l.bf16 %v10480_v11 }
0x18e9   :  { %v12474_v13 = vpack.c.bf16 %v10482_v63, %v10481_v12 }
0x18eb   :  { %9990 = vmatprep.subr.msk.bf16.mxu1 %vm12014_vm6, %v12474_v13  ;;  %9996 = vmatprep.subr.msk.bf16.mxu0 %vm12014_vm6, %v12474_v13 }
0x18ec   :  { %9993 = vmatpush3.bf16.xpose.msk.msra.mxu1 %vm12014_vm6, %v12474_v13  ;;  %9999 = vmatpush3.bf16.xpose.msk.msra.mxu0 %vm12014_vm6, %v12474_v13 }
0x18ed   :  { %10014 = vmatprep.subr.msk.bf16.mxu0 %vm12014_vm6, %v12474_v13 }
0x18f3   :  { %9399 = vmatmul.mubr.msk.f32.vlgmr.msra.gmra.mrb[22].mxu1 %vm13299_vm1, %v3633_v14  ;;  %9406 = vmatmul.mubr.msk.f32.vlgmr.msra.gmra.mrb[22].mxu0 %vm13299_vm1, %v3756_v36 }
0x18f4   :  { %10017 = vmatpush3.bf16.xpose.msk.msra.mxu0 %vm12014_vm6, %v12474_v13  ;;  %9426 = vmatprep.mubr.msk.f32.mxu0 %vm13299_vm1, %v4047_v16 }
0x18fb   :  { %9427 = vmatmul.mubr.msk.f32.vlgmr.msra.gmra.mrb[24].mxu0 %vm13299_vm1, %v4048_v17 }
0x1940   :  { %v12506_v18 = vpop.f32.mrb[20].mxu0 }
0x1941   :  { %v12508_v19 = vpop.f32.mrb[21].mxu0 }
0x19c6   :  { %v9400_v33 = vpop.f32.mrb[22].mxu1  ;;  %v9407_v26 = vpop.f32.mrb[22].mxu0 }
0x19c7   :  { %v3716_v55 = vpop.f32.mrb[23].mxu1  ;;  %v3829_v28 = vpop.f32.mrb[23].mxu0  ;;  %v3839_v24 = vmul.f32 0.35355338, %v9407_v26  ;;  %v3726_v46 = vmul.f32 0.35355338, %v9400_v33 }
0x19c8   :  { %v3838_v38 = vmul.f32 0.35355338, %v3829_v28  ;;  %v3725_v37 = vmul.f32 0.35355338, %v3716_v55 }
0x19c9   :  { %v3841_v39 = vsel %vm12532_vm4, %v3839_v24, -1e+30  ;;  %v3728_v30 = vsel %vm12532_vm4, %v3726_v46, -1e+30 }
0x19ca   :  { %v3840_v47 = vsel %vm12528_vm10, %v3838_v38, -1e+30  ;;  %v3845_v45 = vsel %vm13297_vm15, %v3841_v39, -inf  ;;  %v3727_v0 = vsel %vm12528_vm10, %v3725_v37, -1e+30  ;;  %v3734_v6 = vsel %vm13297_vm15, %v3728_v30, -inf }
0x19cb   :  { %v3842_v35 = vsel %vm13296_vm3, %v3840_v47, -inf  ;;  %v3730_v3 = vsel %vm13296_vm3, %v3727_v0, -inf }
0x19cc   :  { %3843 = vmax.xlane.f32.xlu0 %v3842_v35 }
0x19ce   :  { %v9428_v27 = vpop.f32.mrb[24].mxu0 }
0x19cf   :  { %v4121_v49 = vpop.f32.mrb[25].mxu0  ;;  %v4131_v29 = vmul.f32 0.35355338, %v9428_v27 }
0x19d0   :  { %v4130_v62 = vmul.f32 0.35355338, %v4121_v49  ;;  %3846 = vmax.xlane.f32.xlu0 %v3845_v45 }
0x19d1   :  { %v4133_v11 = vsel %vm12532_vm4, %v4131_v29, -1e+30 }
0x19d2   :  { %v4132_v53 = vsel %vm12528_vm10, %v4130_v62, -1e+30  ;;  %v4137_v63 = vsel %vm13297_vm15, %v4133_v11, -inf }
0x19d3   :  { %v4134_v1 = vsel %vm13296_vm3, %v4132_v53, -inf }
0x19d4   :  { %4135 = vmax.xlane.f32.xlu1 %v4134_v1  ;;  %3731 = vmax.xlane.f32.xlu0 %v3730_v3 }
0x19d8   :  { %3735 = vmax.xlane.f32.xlu0 %v3734_v6 }
0x19dc   :  { %4138 = vmax.xlane.f32.xlu0 %v4137_v63 }
0x19e5   :  { %10489 = vrot.lane.b32.xlu1 %v10488_v40, %s11471_s19 }
0x19f2   :  { %10484 = vrot.lane.b32.xlu0 %v10483_v61, %s11471_s19 }
0x1a59   :  { %v3844_v12 = vpop.xlane.xlu0 %3843 }
0x1a5a   :  { %v3848_v33 = vsub.f32 %v3840_v47, %v3844_v12 }
0x1a5c   :  { %v3850_v24 = vmul.f32 1.442695, %v3848_v33 }
0x1a5d   :  { %v3847_v14 = vpop.xlane.xlu0 %3846 }
0x1a5e   :  { %v3849_v36 = vsub.f32 %v3841_v39, %v3847_v14 }
0x1a60   :  { %v3852_v16 = vmul.f32 1.442695, %v3849_v36 }
0x1a61   :  { %v3732_v17 = vpop.xlane.xlu0 %3731  ;;  %v4136_v26 = vpop.xlane.xlu1 %4135 }
0x1a62   :  { %10654 = vpow2.f32 %v3852_v16  ;;  %v3737_v38 = vsub.f32 %v3727_v0, %v3732_v17  ;;  %v4140_v46 = vsub.f32 %v4132_v53, %v4136_v26 }
0x1a64   :  { %v3739_v56 = vmul.f32 1.442695, %v3737_v38  ;;  %v4142_v29 = vmul.f32 1.442695, %v4140_v46  ;;  %v4250_v46 = vmul.f32 %v12123_v58, %v12423_v22 }
0x1a65   :  { %v3736_v55 = vpop.xlane.xlu0 %3735  ;;  %v10490_v51 = vpop.permute.xlu1 %10489 }
0x1a66   :  { %v3738_v28 = vsub.f32 %v3728_v30, %v3736_v55  ;;  %v10492_v39 = vunpack.i.h.bf16 %v10490_v51  ;;  %v10491_v27 = vunpack.i.l.bf16 %v10490_v51 }
0x1a68   :  { %v3741_v35 = vmul.f32 1.442695, %v3738_v28  ;;  %v10006_v1 = vpack.c.bf16 %v10492_v39, %v10491_v27 }
0x1a69   :  { %v4139_v50 = vpop.xlane.xlu0 %4138 }
0x1a6a   :  { %10656 = vpow2.f32 %v3741_v35  ;;  %v4141_v44 = vsub.f32 %v4133_v11, %v4139_v50 }
0x1a6b   :  { %10658 = vpow2.f32 %v3850_v24 }
0x1a6c   :  { %v10655_v40 = vpop.eup %10654  ;;  %10660 = vpow2.f32 %v3739_v56  ;;  %v4144_v62 = vmul.f32 1.442695, %v4141_v44 }
0x1a6d   :  { %v10485_v61 = vpop.permute.xlu0 %10484  ;;  %v3857_v37 = vsel %vm13297_vm15, %v10655_v40, 0.0 }
0x1a6e   :  { %v10487_v47 = vunpack.i.h.bf16 %v10485_v61  ;;  %v10486_v49 = vunpack.i.l.bf16 %v10485_v61  ;;  %3858 = vadd.xlane.f32.xlu0 %v3857_v37  ;;  %10662 = vpow2.f32 %v4144_v62  ;;  %v4251_v62 = vmul.f32 %v12123_v58, %v12421_v2 }
0x1a6f   :  { %10664 = vpow2.f32 %v4142_v29 }
0x1a70   :  { %v10000_v0 = vpack.c.bf16 %v10487_v47, %v10486_v49 }
0x1a72   :  { %10002 = vmatprep.subr.msk.bf16.mxu1 %vm12563_vm8, %v10000_v0 }
0x1a73   :  { %10005 = vmatpush3.bf16.msk.msra.mxu1 %vm12563_vm8, %v10000_v0 }
0x1a74   :  { %v10657_v3 = vpop.eup %10656  ;;  %10008 = vmatprep.subr.msk.bf16.mxu1 %vm12563_vm8, %v10006_v1 }
0x1a75   :  { %v3746_v30 = vsel %vm13297_vm15, %v10657_v3, 0.0  ;;  %v10659_v6 = vpop.eup %10658 }
0x1a76   :  { %3747 = vadd.xlane.f32.xlu0 %v3746_v30  ;;  %v3854_v53 = vsel %vm13296_vm3, %v10659_v6, 0.0  ;;  %v10661_v11 = vpop.eup %10660 }
0x1a77   :  { %v3743_v63 = vsel %vm13296_vm3, %v10661_v11, 0.0 }
0x1a78   :  { %v10663_v12 = vpop.eup %10662 }
0x1a79   :  { %v4149_v14 = vsel %vm13297_vm15, %v10663_v12, 0.0  ;;  %v10665_v36 = vpop.eup %10664 }
0x1a7a   :  { %3855 = vadd.xlane.f32.xlu0 %v3854_v53  ;;  %v4146_v16 = vsel %vm13296_vm3, %v10665_v36, 0.0 }
0x1a7e   :  { %3744 = vadd.xlane.f32.xlu0 %v3743_v63 }
0x1a82   :  { %4150 = vadd.xlane.f32.xlu0 %v4149_v14 }
0x1a86   :  { %4147 = vadd.xlane.f32.xlu0 %v4146_v16 }
0x1a9c   :  { %10494 = vrot.lane.b32.xlu0 %v10493_v8, %s11471_s19 }
0x1afb   :  { %v3859_v17 = vpop.xlane.xlu0 %3858 }
0x1afc   :  { %10666 = vrcp.f32 %v3859_v17 }
0x1b03   :  { %v3748_v33 = vpop.xlane.xlu0 %3747 }
0x1b06   :  { %v10667_v24 = vpop.eup %10666 }
0x1b07   :  { %v3856_v26 = vpop.xlane.xlu0 %3855  ;;  %v3863_v51 = vmul.f32 %v10667_v24, %v10655_v40 }
0x1b08   :  { %10668 = vrcp.f32 %v3856_v26 }
0x1b0b   :  { %v3745_v55 = vpop.xlane.xlu0 %3744 }
0x1b0c   :  { %10670 = vrcp.f32 %v3745_v55 }
0x1b0d   :  { %10672 = vrcp.f32 %v3748_v33 }
0x1b0f   :  { %v4151_v28 = vpop.xlane.xlu0 %4150 }
0x1b12   :  { %v10669_v38 = vpop.eup %10668 }
0x1b13   :  { %v4148_v35 = vpop.xlane.xlu0 %4147  ;;  %v3861_v50 = vmul.f32 %v10669_v38, %v10659_v6 }
0x1b14   :  { %10674 = vrcp.f32 %v4148_v35 }
0x1b15   :  { %9412 = vmatprep.mubr.msk.f32.mxu1 %vm13296_vm3, %v3861_v50  ;;  %10676 = vrcp.f32 %v4151_v28 }
0x1b16   :  { %v10671_v56 = vpop.eup %10670  ;;  %9413 = vmatmul.mubr.msk.f32.vlgmr.msra.gmra.mrb[24].mxu1 %vm13296_vm3, %v3863_v51 }
0x1b17   :  { %10011 = vmatpush3.bf16.msk.msra.mxu1 %vm12563_vm8, %v10006_v1  ;;  %v10495_v59 = vpop.permute.xlu0 %10494  ;;  %v3750_v60 = vmul.f32 %v10671_v56, %v10661_v11  ;;  %v10673_v61 = vpop.eup %10672 }
0x1b18   :  { %v10497_v8 = vunpack.i.h.bf16 %v10495_v59  ;;  %v10496_v44 = vunpack.i.l.bf16 %v10495_v59  ;;  %v3752_v40 = vmul.f32 %v10673_v61, %v10657_v3 }
0x1b19   :  { %9419 = vmatprep.mubr.msk.f32.mxu1 %vm13296_vm3, %v3750_v60 }
0x1b1a   :  { %v10018_v37 = vpack.c.bf16 %v10497_v8, %v10496_v44 }
0x1b1c   :  { %10020 = vmatprep.subr.msk.bf16.mxu1 %vm12563_vm8, %v10018_v37 }
0x1b1e   :  { %v10675_v39 = vpop.eup %10674  ;;  %9420 = vmatmul.mubr.msk.f32.vlgmr.msra.gmra.mrb[24].mxu1 %vm13296_vm3, %v3752_v40 }
0x1b1f   :  { %10023 = vmatpush3.bf16.msk.msra.mxu1 %vm12563_vm8, %v10018_v37  ;;  %v4153_v27 = vmul.f32 %v10675_v39, %v10665_v36  ;;  %v10677_v47 = vpop.eup %10676  ;;  %v8595_v36 = vld [vmem:[%s13400_s9] ss:$0 sm:$0xff] }
0x1b20   :  { %10026 = vmatprep.subr.msk.bf16.mxu1 %vm12014_vm6, %v12474_v13  ;;  %v4155_v49 = vmul.f32 %v10677_v47, %v10663_v12  ;;  %v3428_v16 = vadd.f32 %v8595_v36, %v12508_v19  ;;  %v3433_v26 = vadd.f32 %v12506_v18, %v8595_v36 }
0x1b21   :  { %9433 = vmatprep.mubr.msk.f32.mxu1 %vm13296_vm3, %v4153_v27 }
0x1b22   :  { %v3436_v28 = vadd.f32 %v3428_v16, %v12395_v20  ;;  %v3437_v35 = vadd.f32 %v3433_v26, %v12403_v48 }
0x1b24   :  { %v3438_v38 = vsel %vm13299_vm1, %v3436_v28, 0.0  ;;  %v3441_v50 = vsel %vm13299_vm1, %v3437_v35, 0.0 }
0x1b26   :  { %9434 = vmatmul.mubr.msk.f32.vlgmr.msra.gmra.mrb[24].mxu1 %vm13296_vm3, %v4155_v49 }
0x1b27   :  { %9440 = vmatprep.mubr.msk.f32.mxu1 %vm13299_vm1, %v4250_v46  ;;  %v658_v46 = vld [vmem:[%s13401_s14] sm:$0xff] }
0x1b28   :  { %10029 = vmatpush3.bf16.xpose.msk.msra.mxu1 %vm12014_vm6, %v12474_v13 }
0x1b2f   :  { %9441 = vmatmul.mubr.msk.f32.vlgmr.msra.gmra.mrb[26].mxu1 %vm13299_vm1, %v4251_v62  ;;  %v659_v62 = vld [vmem:[%s13401_s14 + $0x8] sm:$0xff] }
0x1c02   :  { %v9442_v0 = vpop.f32.mrb[26].mxu1 }
0x1c03   :  { %v4334_v1 = vmul.f32 0.35355338, %v9442_v0  ;;  %v4324_v3 = vpop.f32.mrb[27].mxu1  ;;  %v660_v0 = vld [vmem:[%s13401_s14 + $0x10] sm:$0xff] }
0x1c04   :  { %v4333_v29 = vmul.f32 0.35355338, %v4324_v3  ;;  %v661_v3 = vld [vmem:[%s13401_s14 + $0x18] sm:$0xff] }
0x1c05   :  { %v4336_v22 = vsel %vm12532_vm4, %v4334_v1, -1e+30  ;;  %v10036_v1 = vpack.c.bf16 %v659_v62, %v658_v46  ;;  %v665_v46 = vld [vmem:[%s13404_s21 + $0x10] sm:$0xff] }
0x1c06   :  { %v4340_v30 = vsel %vm13297_vm15, %v4336_v22, -inf  ;;  %v4335_v6 = vsel %vm12528_vm10, %v4333_v29, -1e+30  ;;  %v10040_v29 = vpack.c.bf16 %v661_v3, %v660_v0 }
0x1c07   :  { %4341 = vmax.xlane.f32.xlu0 %v4340_v30  ;;  %v4337_v13 = vsel %vm13296_vm3, %v4335_v6, -inf  ;;  %10037 = vmatprep.subr.bf16.mxu0 %v10036_v1 }
0x1c08   :  { %4338 = vmax.xlane.f32.xlu1 %v4337_v13  ;;  %10039 = vmatpush3.bf16.msra.mxu0 %v10036_v1 }
0x1c09   :  { %10041 = vmatprep.subr.bf16.mxu0 %v10040_v29 }
0x1c0c   :  { %10043 = vmatpush3.bf16.msra.mxu0 %v10040_v29 }
0x1c94   :  { %v4342_v2 = vpop.xlane.xlu0 %4341 }
0x1c95   :  { %v4344_v53 = vsub.f32 %v4336_v22, %v4342_v2  ;;  %v4339_v11 = vpop.xlane.xlu1 %4338 }
0x1c96   :  { %v4343_v63 = vsub.f32 %v4335_v6, %v4339_v11 }
0x1c97   :  { %v4347_v12 = vmul.f32 1.442695, %v4344_v53 }
0x1c98   :  { %v4345_v14 = vmul.f32 1.442695, %v4343_v63  ;;  %v8598_v63 = vld [vmem:[%s13402_s4] ss:$0 sm:$0xff] }
0x1c99   :  { %10678 = vpow2.f32 %v4347_v12 }
0x1c9a   :  { %10680 = vpow2.f32 %v4345_v14  ;;  %v8599_v14 = vld [vmem:[%s13403_s22] ss:$0 sm:$0xff] }
0x1ca3   :  { %v10679_v17 = vpop.eup %10678 }
0x1ca4   :  { %v10681_v33 = vpop.eup %10680  ;;  %v4352_v55 = vsel %vm13297_vm15, %v10679_v17, 0.0 }
0x1ca5   :  { %4353 = vadd.xlane.f32.xlu1 %v4352_v55  ;;  %v4349_v24 = vsel %vm13296_vm3, %v10681_v33, 0.0 }
0x1ca6   :  { %4350 = vadd.xlane.f32.xlu0 %v4349_v24 }
0x1ca9   :  { %3439 = vadd.xlane.f32.xlu1 %v3438_v38 }
0x1cad   :  { %3442 = vadd.xlane.f32.xlu1 %v3441_v50 }
0x1cbc   :  { %10499 = vrot.lane.b32.xlu0 %v10498_v9, %s11471_s19 }
0x1d32   :  { %v4354_v18 = vpop.xlane.xlu1 %4353 }
0x1d33   :  { %10682 = vrcp.f32 %v4354_v18  ;;  %v4351_v20 = vpop.xlane.xlu0 %4350  ;;  %v8633_v18 = vld [vmem:[#allocation4] ss:$0 sm:$0xff] }
0x1d34   :  { %10684 = vrcp.f32 %v4351_v20 }
0x1d36   :  { %v3440_v19 = vpop.xlane.xlu1 %3439 }
0x1d37   :  { %v3444_v51 = vmul.f32 0.03125, %v3440_v19  ;;  %v10500_v56 = vpop.permute.xlu0 %10499 }
0x1d38   :  { %v10502_v59 = vunpack.i.h.bf16 %v10500_v56  ;;  %v10501_v60 = vunpack.i.l.bf16 %v10500_v56 }
0x1d39   :  { %v3446_v8 = vsub.f32 %v3436_v28, %v3444_v51 }
0x1d3a   :  { %v10030_v48 = vpack.c.bf16 %v10502_v59, %v10501_v60  ;;  %v3443_v44 = vpop.xlane.xlu1 %3442 }
0x1d3b   :  { %v3445_v61 = vmul.f32 0.03125, %v3443_v44  ;;  %v3448_v37 = vmul.f32 %v3446_v8, %v3446_v8 }
0x1d3c   :  { %10032 = vmatprep.subr.msk.bf16.mxu1 %vm12563_vm8, %v10030_v48 }
0x1d3d   :  { %v10683_v7 = vpop.eup %10682  ;;  %v3447_v21 = vsub.f32 %v3437_v35, %v3445_v61  ;;  %10035 = vmatpush3.bf16.msk.msra.mxu1 %vm12563_vm8, %v10030_v48  ;;  %v3450_v9 = vsel %vm13299_vm1, %v3448_v37, 0.0 }
0x1d3e   :  { %v10685_v40 = vpop.eup %10684  ;;  %3451 = vadd.xlane.f32.xlu1 %v3450_v9  ;;  %v4358_v47 = vmul.f32 %v10683_v7, %v10679_v17 }
0x1d3f   :  { %v4356_v39 = vmul.f32 %v10685_v40, %v10681_v33  ;;  %v3449_v27 = vmul.f32 %v3447_v21, %v3447_v21 }
0x1d41   :  { %9447 = vmatprep.mubr.msk.f32.mxu1 %vm13296_vm3, %v4356_v39  ;;  %v3453_v49 = vsel %vm13299_vm1, %v3449_v27, 0.0  ;;  %v663_v27 = vld [vmem:[%s13404_s21] sm:$0xff] }
0x1d42   :  { %9448 = vmatmul.mubr.msk.f32.vlgmr.msra.gmra.mrb[24].mxu1 %vm13296_vm3, %v4358_v47  ;;  %3454 = vadd.xlane.f32.xlu1 %v3453_v49  ;;  %v664_v47 = vld [vmem:[%s13404_s21 + $0x8] sm:$0xff]  ;;  %vm13408_vm3 = vcmp.lt.s32.totalorder %v11971_v34, 16 }
0x1d43   :  { %v10044_v49 = vpack.c.bf16 %v664_v47, %v663_v27  ;;  %vm4757_vm15 = vmand %vm4755_vm11, %vm13408_vm3 }
0x1d44   :  { %vm12758_vm14 = vmor %vm4753_vm7, %vm4757_vm15 }
0x1d45   :  { %10053 = vmatprep.subr.bf16.mxu1 %v10044_v49  ;;  %10045 = vmatprep.subr.bf16.mxu0 %v10044_v49 }
0x1d46   :  { %10055 = vmatpush3.bf16.msra.mxu1 %v10044_v49 }
0x1dcb   :  { %v3452_v22 = vpop.xlane.xlu1 %3451 }
0x1dcc   :  { %v3456_v30 = vmul.f32 0.03125, %v3452_v22 }
0x1dce   :  { %v3458_v6 = vadd.f32 1e-05, %v3456_v30 }
0x1dcf   :  { %v3455_v13 = vpop.xlane.xlu1 %3454 }
0x1dd0   :  { %10686 = vrsqrt.f32 %v3458_v6  ;;  %v3457_v2 = vmul.f32 0.03125, %v3455_v13 }
0x1dd2   :  { %v3459_v53 = vadd.f32 1e-05, %v3457_v2 }
0x1dd4   :  { %10688 = vrsqrt.f32 %v3459_v53 }
0x1dda   :  { %v10687_v11 = vpop.eup %10686 }
0x1ddb   :  { %v3462_v12 = vmul.f32 %v10687_v11, %v3446_v8 }
0x1ddd   :  { %v3470_v36 = vmul.f32 %v8598_v63, %v3462_v12 }
0x1dde   :  { %v10689_v16 = vpop.eup %10688 }
0x1ddf   :  { %v3478_v17 = vadd.f32 %v8599_v14, %v3470_v36  ;;  %v3463_v33 = vmul.f32 %v10689_v16, %v3447_v21 }
0x1de1   :  { %v3480_v26 = vsel %vm13299_vm1, %v3478_v17, 0.0  ;;  %v3471_v55 = vmul.f32 %v8598_v63, %v3463_v33  ;;  %v8600_v33 = vld [vmem:[%s13405_s27] ss:$0 sm:$0xff] }
0x1de2   :  { %3481 = vadd.xlane.f32.xlu1 %v3480_v26 }
0x1de3   :  { %v3479_v28 = vadd.f32 %v8599_v14, %v3471_v55  ;;  %v8601_v55 = vld [vmem:[%s13406_s8] ss:$0 sm:$0xff] }
0x1de5   :  { %v3483_v24 = vsel %vm13299_vm1, %v3479_v28, 0.0 }
0x1de6   :  { %3484 = vadd.xlane.f32.xlu0 %v3483_v24 }
0x1e15   :  { %v9449_v38 = vpop.f32.mrb[24].mxu1 }
0x1e16   :  { %v4442_v35 = vpop.f32.mrb[25].mxu1 }
0x1e17   :  { %9458 = vmatprep.mubr.msk.f32.mxu0 %vm13299_vm1, %v4442_v35 }
0x1e18   :  { %9459 = vmatmul.mubr.msk.f32.vlgmr.msra.gmra.mrb[26].mxu0 %vm13299_vm1, %v9449_v38 }
0x1e19   :  { %10047 = vmatpush3.bf16.msra.mxu0 %v10044_v49 }
0x1e6f   :  { %v3482_v50 = vpop.xlane.xlu1 %3481 }
0x1e70   :  { %v3486_v51 = vmul.f32 0.03125, %v3482_v50 }
0x1e72   :  { %v3488_v48 = vsub.f32 %v3478_v17, %v3486_v51 }
0x1e73   :  { %v3485_v60 = vpop.xlane.xlu0 %3484 }
0x1e74   :  { %v3487_v44 = vmul.f32 0.03125, %v3485_v60  ;;  %v3490_v9 = vmul.f32 %v3488_v48, %v3488_v48 }
0x1e76   :  { %v3489_v7 = vsub.f32 %v3479_v28, %v3487_v44  ;;  %v3492_v40 = vsel %vm13299_vm1, %v3490_v9, 0.0 }
0x1eeb   :  { %v9460_v20 = vpop.f32.mrb[26].mxu0 }
0x1eec   :  { %v4531_v19 = vpop.f32.mrb[27].mxu0  ;;  %v4537_v56 = vadd.f32 %v9460_v20, %v8633_v18 }
0x1eed   :  { %v4532_v59 = vadd.f32 %v8633_v18, %v4531_v19 }
0x1eee   :  { %v4541_v37 = vadd.f32 %v4537_v56, %v12412_v32  ;;  %v666_v32 = vld [vmem:[%s13404_s21 + $0x18] sm:$0xff] }
0x1eef   :  { %v4540_v8 = vadd.f32 %v4532_v59, %v12405_v10  ;;  %v3491_v10 = vmul.f32 %v3489_v7, %v3489_v7  ;;  %v10048_v62 = vpack.c.bf16 %v666_v32, %v665_v46 }
0x1ef0   :  { %v4546_v21 = vsel %vm13298_vm9, %v4541_v37, 0.0 }
0x1ef1   :  { %v4542_v61 = vsel %vm13299_vm1, %v4540_v8, 0.0  ;;  %v3495_v39 = vsel %vm13299_vm1, %v3491_v10, 0.0  ;;  %10057 = vmatprep.subr.bf16.mxu1 %v10048_v62  ;;  %10049 = vmatprep.subr.bf16.mxu0 %v10048_v62 }
0x1ef2   :  { %4543 = vadd.xlane.f32.xlu1 %v4542_v61  ;;  %10059 = vmatpush3.bf16.msra.mxu1 %v10048_v62  ;;  %v8637_v61 = vld [vmem:[#allocation13] ss:$0 sm:$0xff] }
0x1ef3   :  { %10051 = vmatpush3.bf16.msra.mxu0 %v10048_v62 }
0x1ef6   :  { %4547 = vadd.xlane.f32.xlu1 %v4546_v21 }
0x1efa   :  { %3493 = vadd.xlane.f32.xlu1 %v3492_v40 }
0x1efe   :  { %3496 = vadd.xlane.f32.xlu1 %v3495_v39  ;;  %v8638_v39 = vld [vmem:[#allocation6] ss:$0 sm:$0xff] }
0x1f7f   :  { %v4544_v0 = vpop.xlane.xlu1 %4543 }
0x1f80   :  { %v4549_v1 = vmul.f32 0.03125, %v4544_v0 }
0x1f82   :  { %v4551_v3 = vsub.f32 %v4540_v8, %v4549_v1 }
0x1f83   :  { %v4548_v29 = vpop.xlane.xlu1 %4547 }
0x1f84   :  { %v4550_v22 = vmul.f32 0.03125, %v4548_v29  ;;  %v4553_v30 = vmul.f32 %v4551_v3, %v4551_v3 }
0x1f86   :  { %v4552_v6 = vsub.f32 %v4541_v37, %v4550_v22  ;;  %v4555_v13 = vsel %vm13299_vm1, %v4553_v30, 0.0 }
0x1f87   :  { %4556 = vadd.xlane.f32.xlu1 %v4555_v13  ;;  %v3494_v2 = vpop.xlane.xlu1 %3493 }
0x1f88   :  { %v3498_v53 = vmul.f32 0.03125, %v3494_v2  ;;  %v4554_v11 = vmul.f32 %v4552_v6, %v4552_v6 }
0x1f8a   :  { %v3500_v63 = vadd.f32 1e-05, %v3498_v53  ;;  %v4558_v12 = vsel %vm13298_vm9, %v4554_v11, 0.0  ;;  %vm13409_vm9 = vmmov %vm13408_vm3  ;;  %vm13414_vm3 = vcmask 130048  }
0x1f8b   :  { %4559 = vadd.xlane.f32.xlu1 %v4558_v12  ;;  %v3497_v14 = vpop.xlane.xlu1 %3496  ;;  %vm13415_vm5 = vmmov %vm13414_vm3 }
0x1f8c   :  { %10690 = vrsqrt.f32 %v3500_v63  ;;  %v3499_v36 = vmul.f32 0.03125, %v3497_v14  ;;  %vm13416_vm12 = vmmov %vm13414_vm3 }
0x1f8d   :  { %vm13417_vm15 = vmmov %vm13414_vm3 }
0x1f8e   :  { %v3501_v16 = vadd.f32 1e-05, %v3499_v36  ;;  %vm13419_vm11 = vmmov %vm13414_vm3 }
0x1f8f   :  { %vm13421_vm0 = vmmov %vm13414_vm3 }
0x1f90   :  { %10692 = vrsqrt.f32 %v3501_v16  ;;  %vm13422_vm7 = vmmov %vm13421_vm0 }
0x1f96   :  { %v10691_v17 = vpop.eup %10690 }
0x1f97   :  { %v3504_v26 = vmul.f32 %v10691_v17, %v3488_v48  ;;  %v8636_v48 = vld [vmem:[#allocation12] ss:$0 sm:$0xff] }
0x1f99   :  { %v3512_v28 = vmul.f32 %v8600_v33, %v3504_v26 }
0x1f9a   :  { %v10693_v24 = vpop.eup %10692 }
0x1f9b   :  { %v3505_v38 = vmul.f32 %v10693_v24, %v3489_v7  ;;  %v12657_v35 = vadd.f32 %v8601_v55, %v3512_v28 }
0x1f9d   :  { %v3513_v50 = vmul.f32 %v8600_v33, %v3505_v38  ;;  %9480 = vmatprep.mubr.msk.f32.mxu1 %vm13299_vm1, %v12657_v35 }
0x1f9f   :  { %v12661_v18 = vadd.f32 %v8601_v55, %v3513_v50 }
0x1fa1   :  { %9481 = vmatmul.mubr.msk.f32.vlgmr.msra.gmra.mrb[28].mxu1 %vm13299_vm1, %v12661_v18 }
0x2014   :  { %v4557_v20 = vpop.xlane.xlu1 %4556 }
0x2015   :  { %v4561_v19 = vmul.f32 0.03125, %v4557_v20 }
0x2017   :  { %v4563_v51 = vadd.f32 1e-05, %v4561_v19 }
0x2018   :  { %v4560_v56 = vpop.xlane.xlu1 %4559 }
0x2019   :  { %10694 = vrsqrt.f32 %v4563_v51  ;;  %v4562_v59 = vmul.f32 0.03125, %v4560_v56 }
0x201b   :  { %v4564_v60 = vadd.f32 1e-05, %v4562_v59 }
0x201d   :  { %10696 = vrsqrt.f32 %v4564_v60 }
0x2023   :  { %v10695_v8 = vpop.eup %10694 }
0x2024   :  { %v4567_v44 = vmul.f32 %v10695_v8, %v4551_v3 }
0x2026   :  { %v4575_v37 = vmul.f32 %v8636_v48, %v4567_v44 }
0x2027   :  { %v10697_v7 = vpop.eup %10696 }
0x2028   :  { %v4568_v21 = vmul.f32 %v10697_v7, %v4552_v6  ;;  %v12665_v9 = vadd.f32 %v8637_v61, %v4575_v37 }
0x202a   :  { %v4576_v40 = vmul.f32 %v8636_v48, %v4568_v21  ;;  %9469 = vmatprep.mubr.msk.f32.mxu0 %vm13299_vm1, %v12665_v9 }
0x202c   :  { %v12669_v10 = vadd.f32 %v8637_v61, %v4576_v40 }
0x202e   :  { %9470 = vmatmul.mubr.msk.f32.vlgmr.msra.gmra.mrb[28].mxu0 %vm13299_vm1, %v12669_v10 }
0x2074   :  { %v9482_v27 = vpop.f32.mrb[28].mxu1 }
0x2075   :  { %v4750_v47 = vadd.f32 %v9482_v27, %v8638_v39  ;;  %v4744_v49 = vpop.f32.mrb[29].mxu1 }
0x2076   :  { %v4745_v46 = vadd.f32 %v8638_v39, %v4744_v49 }
0x2077   :  { %v12674_v32 = vmul.f32 %v4750_v47, %v12079_v23  ;;  %v12677_v62 = vmul.f32 %v4750_v47, %v12098_v4  ;;  %v12680_v0 = vmul.f32 %v4750_v47, %v12100_v5  ;;  %v12683_v1 = vmul.f32 %v4750_v47, %v12147_v15 }
0x2078   :  { %v10503_v3 = vpack.i.bf16 %v4750_v47, %v4745_v46  ;;  %v12686_v29 = vmul.f32 %v4745_v46, %v12079_v23  ;;  %v12689_v22 = vmul.f32 %v4745_v46, %v12098_v4  ;;  %v12692_v30 = vmul.f32 %v4745_v46, %v12100_v5 }
0x2079   :  { %v12695_v6 = vmul.f32 %v4745_v46, %v12147_v15 }
0x207a   :  { %10504 = vrot.lane.b32.xlu1 %v10503_v3, %s11470_s23  ;;  %v10508_v13 = vpack.i.bf16 %v12674_v32, %v12686_v29  ;;  %v10518_v2 = vpack.i.bf16 %v12677_v62, %v12689_v22  ;;  %v10513_v53 = vpack.i.bf16 %v12680_v0, %v12692_v30 }
0x207b   :  { %v10523_v11 = vpack.i.bf16 %v12683_v1, %v12695_v6 }
0x20ec   :  { %v10505_v63 = vpop.permute.xlu1 %10504 }
0x20ed   :  { %v10507_v12 = vunpack.i.h.bf16 %v10505_v63  ;;  %v10506_v14 = vunpack.i.l.bf16 %v10505_v63 }
0x20ef   :  { %v10060_v36 = vpack.c.bf16 %v10507_v12, %v10506_v14 }
0x20f1   :  { %10062 = vmatprep.subr.msk.bf16.mxu0 %vm12014_vm6, %v10060_v36  ;;  %10068 = vmatprep.subr.msk.bf16.mxu1 %vm12014_vm6, %v10060_v36 }
0x20f2   :  { %10065 = vmatpush3.bf16.xpose.msk.msra.mxu0 %vm12014_vm6, %v10060_v36  ;;  %10071 = vmatpush3.bf16.xpose.msk.msra.mxu1 %vm12014_vm6, %v10060_v36 }
0x20f3   :  { %10082 = vmatprep.subr.msk.bf16.mxu1 %vm12014_vm6, %v10060_v36 }
0x2101   :  { %v9471_v16 = vpop.f32.mrb[28].mxu0 }
0x2102   :  { %v4669_v17 = vadd.f32 %v9471_v16, %v8638_v39  ;;  %v4663_v33 = vpop.f32.mrb[29].mxu0 }
0x2103   :  { %v4664_v26 = vadd.f32 %v8638_v39, %v4663_v33 }
0x2104   :  { %v4762_v24 = vmul.f32 %v11990_v41, %v4669_v17  ;;  %v4884_v38 = vmul.f32 %v11995_v42, %v4669_v17  ;;  %v5173_v20 = vmul.f32 %v12038_v54, %v4669_v17  ;;  %v5375_v51 = vmul.f32 %v12123_v58, %v4669_v17 }
0x2105   :  { %v4761_v55 = vmul.f32 %v11990_v41, %v4664_v26  ;;  %v4883_v28 = vmul.f32 %v11995_v42, %v4664_v26  ;;  %v5172_v50 = vmul.f32 %v12038_v54, %v4664_v26  ;;  %v5374_v19 = vmul.f32 %v12123_v58, %v4664_v26 }
0x2107   :  { %9487 = vmatprep.mubr.msk.f32.mxu0 %vm13299_vm1, %v4761_v55  ;;  %9494 = vmatprep.mubr.msk.f32.mxu1 %vm13299_vm1, %v4883_v28 }
0x2108   :  { %9488 = vmatmul.mubr.msk.f32.vlgmr.msra.gmra.mrb[30].mxu0 %vm13299_vm1, %v4762_v24  ;;  %9495 = vmatmul.mubr.msk.f32.vlgmr.msra.gmra.mrb[30].mxu1 %vm13299_vm1, %v4884_v38 }
0x2109   :  { %10085 = vmatpush3.bf16.xpose.msk.msra.mxu1 %vm12014_vm6, %v10060_v36  ;;  %9515 = vmatprep.mubr.msk.f32.mxu1 %vm13299_vm1, %v5172_v50 }
0x210a   :  { %10092 = vmatprep.subr.msk.bf16.mxu1 %vm12014_vm6, %v10060_v36 }
0x2110   :  { %9516 = vmatmul.mubr.msk.f32.vlgmr.msra.gmra.mrb[32].mxu1 %vm13299_vm1, %v5173_v20 }
0x2111   :  { %10095 = vmatpush3.bf16.xpose.msk.msra.mxu1 %vm12014_vm6, %v10060_v36  ;;  %9529 = vmatprep.mubr.msk.f32.mxu1 %vm13299_vm1, %v5374_v19 }
0x2118   :  { %9530 = vmatmul.mubr.msk.f32.vlgmr.msra.gmra.mrb[34].mxu1 %vm13299_vm1, %v5375_v51  ;;  %vm12754_vm1 = vmand %vm4756_vm13, %vm13409_vm9 }
0x2119   :  { %vm13418_vm9 = vmmov %vm13414_vm3 }
0x211a   :  { %vm13420_vm13 = vmmov %vm13414_vm3 }
0x21db   :  { %v9489_v59 = vpop.f32.mrb[30].mxu0  ;;  %v9496_v60 = vpop.f32.mrb[30].mxu1 }
0x21dc   :  { %v4855_v8 = vmul.f32 0.35355338, %v9489_v59  ;;  %v4845_v48 = vpop.f32.mrb[31].mxu0  ;;  %v4957_v25 = vpop.f32.mrb[31].mxu1  ;;  %v4967_v57 = vmul.f32 0.35355338, %v9496_v60 }
0x21dd   :  { %v4966_v61 = vmul.f32 0.35355338, %v4957_v25  ;;  %v4854_v40 = vmul.f32 0.35355338, %v4845_v48 }
0x21de   :  { %v4857_v37 = vsel %vm12754_vm1, %v4855_v8, -1e+30  ;;  %v4969_v39 = vsel %vm12754_vm1, %v4967_v57, -1e+30 }
0x21df   :  { %v4862_v34 = vsel %vm4861_vm2, %v4857_v37, -inf  ;;  %v4968_v7 = vsel %vm12758_vm14, %v4966_v61, -1e+30  ;;  %v4973_v49 = vsel %vm4861_vm2, %v4969_v39, -inf  ;;  %v4856_v3 = vsel %vm12758_vm14, %v4854_v40, -1e+30 }
0x21e0   :  { %4863 = vmax.xlane.f32.xlu1 %v4862_v34  ;;  %v4970_v21 = vsel %vm13414_vm3, %v4968_v7, -inf  ;;  %v4858_v63 = vsel %vm13415_vm5, %v4856_v3, -inf  ;;  %vm13423_vm3 = vmmov %vm13421_vm0 }
0x21e1   :  { %4971 = vmax.xlane.f32.xlu0 %v4970_v21  ;;  %vm13424_vm5 = vmmov %vm13421_vm0 }
0x21e3   :  { %v9517_v27 = vpop.f32.mrb[32].mxu1 }
0x21e4   :  { %v5246_v47 = vpop.f32.mrb[33].mxu1  ;;  %v5256_v12 = vmul.f32 0.35355338, %v9517_v27 }
0x21e5   :  { %v5255_v46 = vmul.f32 0.35355338, %v5246_v47  ;;  %4974 = vmax.xlane.f32.xlu0 %v4973_v49 }
0x21e6   :  { %v5258_v26 = vsel %vm12754_vm1, %v5256_v12, -1e+30 }
0x21e7   :  { %v5257_v14 = vsel %vm12758_vm14, %v5255_v46, -1e+30  ;;  %v5262_v55 = vsel %vm4861_vm2, %v5258_v26, -inf }
0x21e8   :  { %v5259_v17 = vsel %vm13416_vm12, %v5257_v14, -inf  ;;  %vm13426_vm12 = vmmov %vm13421_vm0 }
0x21e9   :  { %4859 = vmax.xlane.f32.xlu0 %v4858_v63 }
0x21eb   :  { %v9531_v36 = vpop.f32.mrb[34].mxu1 }
0x21ec   :  { %v5448_v16 = vpop.f32.mrb[35].mxu1  ;;  %v5458_v28 = vmul.f32 0.35355338, %v9531_v36 }
0x21ed   :  { %v5457_v33 = vmul.f32 0.35355338, %v5448_v16  ;;  %5260 = vmax.xlane.f32.xlu0 %v5259_v17 }
0x21ee   :  { %v5460_v50 = vsel %vm12754_vm1, %v5458_v28, -1e+30 }
0x21ef   :  { %v5459_v24 = vsel %vm12758_vm14, %v5457_v33, -1e+30  ;;  %v5464_v20 = vsel %vm4861_vm2, %v5460_v50, -inf }
0x21f0   :  { %v5461_v38 = vsel %vm13417_vm15, %v5459_v24, -inf  ;;  %vm13427_vm15 = vmmov %vm13421_vm0 }
0x21f1   :  { %5263 = vmax.xlane.f32.xlu0 %v5262_v55 }
0x21f5   :  { %5462 = vmax.xlane.f32.xlu0 %v5461_v38 }
0x21f9   :  { %5465 = vmax.xlane.f32.xlu0 %v5464_v20 }
0x220f   :  { %10509 = vrot.lane.b32.xlu0 %v10508_v13, %s11471_s19 }
0x226d   :  { %v4864_v19 = vpop.xlane.xlu1 %4863 }
0x226e   :  { %v4972_v51 = vpop.xlane.xlu0 %4971  ;;  %v4866_v59 = vsub.f32 %v4857_v37, %v4864_v19 }
0x226f   :  { %v4976_v25 = vsub.f32 %v4968_v7, %v4972_v51 }
0x2270   :  { %v4869_v48 = vmul.f32 1.442695, %v4866_v59 }
0x2271   :  { %v4978_v34 = vmul.f32 1.442695, %v4976_v25 }
0x2272   :  { %v4975_v60 = vpop.xlane.xlu0 %4974 }
0x2273   :  { %v4977_v8 = vsub.f32 %v4969_v39, %v4975_v60 }
0x2275   :  { %v4980_v57 = vmul.f32 1.442695, %v4977_v8 }
0x2276   :  { %v4860_v61 = vpop.xlane.xlu0 %4859 }
0x2277   :  { %10698 = vpow2.f32 %v4980_v57  ;;  %v4865_v21 = vsub.f32 %v4856_v3, %v4860_v61 }
0x2278   :  { %10700 = vpow2.f32 %v4869_v48 }
0x2279   :  { %10702 = vpow2.f32 %v4978_v34  ;;  %v4867_v27 = vmul.f32 1.442695, %v4865_v21 }
0x227a   :  { %v5261_v40 = vpop.xlane.xlu0 %5260 }
0x227b   :  { %v5265_v47 = vsub.f32 %v5257_v14, %v5261_v40  ;;  %10704 = vpow2.f32 %v4867_v27 }
0x227d   :  { %v5267_v13 = vmul.f32 1.442695, %v5265_v47 }
0x227e   :  { %v5264_v49 = vpop.xlane.xlu0 %5263 }
0x227f   :  { %v5266_v32 = vsub.f32 %v5258_v26, %v5264_v49 }
0x2281   :  { %v10699_v29 = vpop.eup %10698  ;;  %v5269_v37 = vmul.f32 1.442695, %v5266_v32 }
0x2282   :  { %v5463_v46 = vpop.xlane.xlu0 %5462  ;;  %v4985_v39 = vsel %vm4861_vm2, %v10699_v29, 0.0  ;;  %v12791_v7 = vpop.eup %10700 }
0x2283   :  { %10706 = vpow2.f32 %v5269_v37  ;;  %4986 = vadd.xlane.f32.xlu0 %v4985_v39  ;;  %v5467_v63 = vsub.f32 %v5459_v24, %v5463_v46  ;;  %v4874_v12 = vsel %vm4861_vm2, %v12791_v7, 0.0  ;;  %v10703_v14 = vpop.eup %10702 }
0x2284   :  { %10708 = vpow2.f32 %v5267_v13  ;;  %v4982_v26 = vsel %vm13418_vm9, %v10703_v14, 0.0  ;;  %vm13428_vm9 = vmmov %vm13421_vm0 }
0x2285   :  { %v5469_v16 = vmul.f32 1.442695, %v5467_v63  ;;  %v10705_v55 = vpop.eup %10704 }
0x2286   :  { %v5466_v3 = vpop.xlane.xlu0 %5465  ;;  %v4871_v19 = vsel %vm13419_vm11, %v10705_v55, 0.0  ;;  %vm13429_vm11 = vmmov %vm13421_vm0 }
0x2287   :  { %v5468_v36 = vsub.f32 %v5460_v50, %v5466_v3  ;;  %4875 = vadd.xlane.f32.xlu0 %v4874_v12 }
0x2289   :  { %v5471_v17 = vmul.f32 1.442695, %v5468_v36 }
0x228a   :  { %v10510_v33 = vpop.permute.xlu0 %10509 }
0x228b   :  { %10710 = vpow2.f32 %v5471_v17  ;;  %v10512_v28 = vunpack.i.h.bf16 %v10510_v33  ;;  %v10511_v38 = vunpack.i.l.bf16 %v10510_v33  ;;  %4983 = vadd.xlane.f32.xlu0 %v4982_v26  ;;  %v668_v26 = vld [vmem:[%s13425_s13] sm:$0xff] }
0x228c   :  { %10712 = vpow2.f32 %v5469_v16 }
0x228d   :  { %v12796_v20 = vpop.eup %10706  ;;  %v10072_v24 = vpack.c.bf16 %v10512_v28, %v10511_v38 }
0x228e   :  { %v5274_v50 = vsel %vm4861_vm2, %v12796_v20, 0.0  ;;  %v10709_v51 = vpop.eup %10708 }
0x228f   :  { %4872 = vadd.xlane.f32.xlu0 %v4871_v19  ;;  %5275 = vadd.xlane.f32.xlu1 %v5274_v50  ;;  %v5271_v59 = vsel %vm13420_vm13, %v10709_v51, 0.0  ;;  %v670_v50 = vld [vmem:[%s13425_s13 + $0x10] sm:$0xff]  ;;  %vm13430_vm13 = vmmov %vm13421_vm0 }
0x2290   :  { %10073 = vmatprep.subr.bf16.mxu0 %v10072_v24 }
0x2291   :  { %10075 = vmatpush3.bf16.msra.mxu0 %v10072_v24 }
0x2293   :  { %5272 = vadd.xlane.f32.xlu0 %v5271_v59 }
0x2295   :  { %v12802_v60 = vpop.eup %10710 }
0x2296   :  { %v5476_v8 = vsel %vm4861_vm2, %v12802_v60, 0.0  ;;  %v10713_v48 = vpop.eup %10712 }
0x2297   :  { %5477 = vadd.xlane.f32.xlu1 %v5476_v8  ;;  %v5473_v25 = vsel %vm13421_vm0, %v10713_v48, 0.0  ;;  %vm13431_vm0 = vcmask 261120  }
0x229b   :  { %5474 = vadd.xlane.f32.xlu1 %v5473_v25 }
0x22a9   :  { %10519 = vrot.lane.b32.xlu0 %v10518_v2, %s11471_s19 }
0x22ac   :  { %10514 = vrot.lane.b32.xlu1 %v10513_v53, %s11471_s19 }
0x22ad   :  { %10524 = vrot.lane.b32.xlu0 %v10523_v11, %s11471_s19 }
0x2310   :  { %v4987_v57 = vpop.xlane.xlu0 %4986 }
0x2311   :  { %10714 = vrcp.f32 %v4987_v57 }
0x2314   :  { %v4876_v61 = vpop.xlane.xlu0 %4875 }
0x2318   :  { %v4984_v34 = vpop.xlane.xlu0 %4983 }
0x2319   :  { %10716 = vrcp.f32 %v4984_v34 }
0x231b   :  { %v10715_v62 = vpop.eup %10714 }
0x231c   :  { %v4873_v21 = vpop.xlane.xlu0 %4872  ;;  %v5276_v40 = vpop.xlane.xlu1 %5275  ;;  %v4991_v0 = vmul.f32 %v10715_v62, %v10699_v29 }
0x231d   :  { %10718 = vrcp.f32 %v4873_v21 }
0x231e   :  { %10720 = vrcp.f32 %v4876_v61 }
0x2320   :  { %v5273_v22 = vpop.xlane.xlu0 %5272 }
0x2321   :  { %10722 = vrcp.f32 %v5273_v22 }
0x2322   :  { %10724 = vrcp.f32 %v5276_v40 }
0x2323   :  { %v10717_v2 = vpop.eup %10716 }
0x2324   :  { %v5478_v27 = vpop.xlane.xlu1 %5477  ;;  %v4989_v47 = vmul.f32 %v10717_v2, %v10703_v14  ;;  %v10520_v30 = vpop.permute.xlu0 %10519 }
0x2325   :  { %v10522_v49 = vunpack.i.h.bf16 %v10520_v30  ;;  %v10521_v32 = vunpack.i.l.bf16 %v10520_v30 }
0x2326   :  { %9501 = vmatprep.mubr.msk.f32.mxu0 %vm13422_vm7, %v4989_v47  ;;  %vm13432_vm7 = vmmov %vm13431_vm0 }
0x2327   :  { %9502 = vmatmul.mubr.msk.f32.vlgmr.msra.gmra.mrb[32].mxu0 %vm13423_vm3, %v4991_v0  ;;  %v10719_v1 = vpop.eup %10718  ;;  %v10086_v3 = vpack.c.bf16 %v10522_v49, %v10521_v32  ;;  %vm13433_vm3 = vcmask 259072   ;;  %v674_v49 = vld [vmem:[%s13434_s26 + $0x8] sm:$0xff]  ;;  %v675_v32 = vld [vmem:[%s13434_s26 + $0x10] sm:$0xff] }
0x2328   :  { %v5475_v6 = vpop.xlane.xlu1 %5474  ;;  %v4878_v53 = vmul.f32 %v10719_v1, %v10705_v55  ;;  %v10525_v46 = vpop.permute.xlu0 %10524  ;;  %v669_v55 = vld [vmem:[%s13425_s13 + $0x8] sm:$0xff] }
0x2329   :  { %10726 = vrcp.f32 %v5475_v6  ;;  %v10721_v39 = vpop.eup %10720  ;;  %v10527_v12 = vunpack.i.h.bf16 %v10525_v46  ;;  %v10526_v14 = vunpack.i.l.bf16 %v10525_v46  ;;  %v10100_v24 = vpack.c.bf16 %v669_v55, %v668_v26 }
0x232a   :  { %9508 = vmatprep.mubr.msk.f32.mxu0 %vm13424_vm5, %v4878_v53  ;;  %v4880_v36 = vmul.f32 %v10721_v39, %v12791_v7  ;;  %10728 = vrcp.f32 %v5478_v27  ;;  %vm13435_vm5 = vmmov %vm13431_vm0  ;;  %v679_v39 = vld [vmem:[%s13436_s20 + $0x8] sm:$0xff] }
0x232b   :  { %v10723_v63 = vpop.eup %10722  ;;  %v10096_v17 = vpack.c.bf16 %v10527_v12, %v10526_v14  ;;  %v681_v12 = vld [vmem:[%s13436_s20 + $0x18] sm:$0xff] }
0x232c   :  { %v10515_v11 = vpop.permute.xlu1 %10514  ;;  %v5278_v16 = vmul.f32 %v10723_v63, %v10709_v51  ;;  %v10725_v33 = vpop.eup %10724  ;;  %v671_v51 = vld [vmem:[%s13425_s13 + $0x18] sm:$0xff]  ;;  %v680_v63 = vld [vmem:[%s13436_s20 + $0x10] sm:$0xff] }
0x232d   :  { %v10517_v13 = vunpack.i.h.bf16 %v10515_v11  ;;  %v10516_v37 = vunpack.i.l.bf16 %v10515_v11  ;;  %v5280_v38 = vmul.f32 %v10725_v33, %v12796_v20  ;;  %v10104_v8 = vpack.c.bf16 %v671_v51, %v670_v50  ;;  %v673_v11 = vld [vmem:[%s13434_s26] sm:$0xff] }
0x232e   :  { %v10120_v14 = vpack.c.bf16 %v681_v12, %v680_v63 }
0x232f   :  { %v10076_v29 = vpack.c.bf16 %v10517_v13, %v10516_v37  ;;  %v10108_v13 = vpack.c.bf16 %v674_v49, %v673_v11  ;;  %v676_v37 = vld [vmem:[%s13434_s26 + $0x18] sm:$0xff] }
0x2330   :  { %v10112_v46 = vpack.c.bf16 %v676_v37, %v675_v32 }
0x2331   :  { %10077 = vmatprep.subr.bf16.mxu0 %v10076_v29  ;;  %10109 = vmatprep.subr.bf16.mxu1 %v10108_v13 }
0x2332   :  { %10079 = vmatpush3.bf16.msra.mxu0 %v10076_v29  ;;  %10111 = vmatpush3.bf16.msra.mxu1 %v10108_v13  ;;  %v678_v29 = vld [vmem:[%s13436_s20] sm:$0xff] }
0x2333   :  { %10087 = vmatprep.subr.bf16.mxu0 %v10086_v3  ;;  %v10727_v28 = vpop.eup %10726  ;;  %10113 = vmatprep.subr.bf16.mxu1 %v10112_v46 }
0x2334   :  { %v5480_v7 = vmul.f32 %v10727_v28, %v10713_v48  ;;  %v10729_v19 = vpop.eup %10728  ;;  %v8667_v48 = vld [vmem:[#allocation7] ss:$0 sm:$0xff] }
0x2335   :  { %9509 = vmatmul.mubr.msk.f32.vlgmr.msra.gmra.mrb[32].mxu0 %vm13426_vm12, %v4880_v36  ;;  %v5482_v59 = vmul.f32 %v10729_v19, %v12802_v60  ;;  %vm13437_vm12 = vmmov %vm13433_vm3  ;;  %v682_v36 = vld [vmem:[%s13436_s20 + $0x20] sm:$0xff]  ;;  %v8670_v19 = vld [vmem:[#allocation15] ss:$0 sm:$0xff] }
0x2336   :  { %10089 = vmatpush3.bf16.msra.mxu0 %v10086_v3  ;;  %9522 = vmatprep.mubr.msk.f32.mxu0 %vm13427_vm15, %v5278_v16  ;;  %vm13438_vm15 = vmmov %vm13431_vm0  ;;  %v10116_v3 = vpack.c.bf16 %v679_v39, %v678_v29  ;;  %v683_v16 = vld [vmem:[%s13436_s20 + $0x28] sm:$0xff] }
0x2337   :  { %10097 = vmatprep.subr.bf16.mxu0 %v10096_v17  ;;  %10115 = vmatpush3.bf16.msra.mxu1 %v10112_v46 }
0x233d   :  { %9523 = vmatmul.mubr.msk.f32.vlgmr.msra.gmra.mrb[32].mxu0 %vm13428_vm9, %v5280_v38  ;;  %vm13439_vm9 = vmmov %vm13431_vm0 }
0x233e   :  { %10099 = vmatpush3.bf16.msra.mxu0 %v10096_v17  ;;  %9536 = vmatprep.mubr.msk.f32.mxu0 %vm13429_vm11, %v5480_v7  ;;  %v10124_v17 = vpack.c.bf16 %v683_v16, %v682_v36  ;;  %vm13440_vm11 = vmmov %vm13431_vm0  ;;  %v693_v36 = vld [vmem:[%s13444_s28] sm:$0xff]  ;;  %v694_v16 = vld [vmem:[%s13444_s28 + $0x8] sm:$0xff] }
0x233f   :  { %10101 = vmatprep.subr.bf16.mxu0 %v10100_v24 }
0x2345   :  { %9537 = vmatmul.mubr.msk.f32.vlgmr.msra.gmra.mrb[32].mxu0 %vm13430_vm13, %v5482_v59  ;;  %vm13441_vm13 = vcmask 523264  }
0x2346   :  { %10103 = vmatpush3.bf16.msra.mxu0 %v10100_v24 }
0x2347   :  { %10105 = vmatprep.subr.bf16.mxu0 %v10104_v8 }
0x234a   :  { %10107 = vmatpush3.bf16.msra.mxu0 %v10104_v8  ;;  %v8671_v8 = vld [vmem:[#allocation16] ss:$0 sm:$0xff] }
0x234b   :  { %10117 = vmatprep.subr.bf16.mxu0 %v10116_v3 }
0x2418   :  { %v9538_v20 = vpop.f32.mrb[32].mxu0 }
0x2419   :  { %v5565_v25 = vpop.f32.mrb[33].mxu0 }
0x241a   :  { %9547 = vmatprep.mubr.msk.f32.mxu0 %vm13431_vm0, %v5565_v25  ;;  %vm13442_vm0 = vmmov %vm13441_vm13 }
0x241b   :  { %9548 = vmatmul.mubr.msk.f32.vlgmr.msra.gmra.mrb[34].mxu0 %vm13432_vm7, %v9538_v20  ;;  %vm13443_vm7 = vmmov %vm13433_vm3 }
0x241c   :  { %10119 = vmatpush3.bf16.msra.mxu0 %v10116_v3 }
0x241d   :  { %10121 = vmatprep.subr.bf16.mxu0 %v10120_v14 }
0x2420   :  { %10123 = vmatpush3.bf16.msra.mxu0 %v10120_v14 }
0x2421   :  { %10125 = vmatprep.subr.bf16.mxu0 %v10124_v17 }
0x2424   :  { %10127 = vmatpush3.bf16.msra.mxu0 %v10124_v17  ;;  %v695_v17 = vld [vmem:[%s13444_s28 + $0x10] sm:$0xff] }
0x24ee   :  { %v9549_v57 = vpop.f32.mrb[34].mxu0 }
0x24ef   :  { %v5660_v61 = vadd.f32 %v9549_v57, %v8667_v48  ;;  %v5654_v34 = vpop.f32.mrb[35].mxu0 }
0x24f0   :  { %v5655_v21 = vadd.f32 %v8667_v48, %v5654_v34  ;;  %v685_v34 = vld [vmem:[%s13436_s20 + $0x38] sm:$0xff] }
0x24f1   :  { %v5664_v40 = vadd.f32 %v5660_v61, %v12669_v10  ;;  %v684_v61 = vld [vmem:[%s13436_s20 + $0x30] sm:$0xff] }
0x24f2   :  { %v5663_v60 = vadd.f32 %v5655_v21, %v12665_v9  ;;  %v10128_v21 = vpack.c.bf16 %v685_v34, %v684_v61 }
0x24f3   :  { %v5668_v62 = vsel %vm13433_vm3, %v5664_v40, 0.0  ;;  %vm13445_vm3 = vmmov %vm13435_vm5 }
0x24f4   :  { %5669 = vadd.xlane.f32.xlu0 %v5668_v62  ;;  %v5665_v22 = vsel %vm13435_vm5, %v5663_v60, 0.0  ;;  %10129 = vmatprep.subr.bf16.mxu0 %v10128_v21  ;;  %vm13446_vm5 = vmmov %vm13443_vm7 }
0x24f5   :  { %5666 = vadd.xlane.f32.xlu1 %v5665_v22  ;;  %10131 = vmatpush3.bf16.msra.mxu0 %v10128_v21 }
0x2581   :  { %v5670_v2 = vpop.xlane.xlu0 %5669 }
0x2582   :  { %v5672_v27 = vmul.f32 0.03125, %v5670_v2  ;;  %v5667_v47 = vpop.xlane.xlu1 %5666 }
0x2583   :  { %v5671_v0 = vmul.f32 0.03125, %v5667_v47 }
0x2584   :  { %v5674_v1 = vsub.f32 %v5664_v40, %v5672_v27  ;;  %v8672_v40 = vld [vmem:[#allocation9] ss:$0 sm:$0xff] }
0x2585   :  { %v5673_v30 = vsub.f32 %v5663_v60, %v5671_v0  ;;  %v8675_v0 = vld [vmem:[#allocation10] ss:$0 sm:$0xff] }
0x2586   :  { %v5676_v6 = vmul.f32 %v5674_v1, %v5674_v1 }
0x2587   :  { %v5675_v10 = vmul.f32 %v5673_v30, %v5673_v30 }
0x2588   :  { %v5680_v9 = vsel %vm13437_vm12, %v5676_v6, 0.0  ;;  %vm13447_vm12 = vmmov %vm13445_vm3 }
0x2589   :  { %5681 = vadd.xlane.f32.xlu1 %v5680_v9  ;;  %v5677_v53 = vsel %vm13438_vm15, %v5675_v10, 0.0  ;;  %vm13448_vm15 = vmmov %vm13445_vm3 }
0x258a   :  { %5678 = vadd.xlane.f32.xlu0 %v5677_v53 }
0x2616   :  { %v5682_v33 = vpop.xlane.xlu1 %5681 }
0x2617   :  { %v5684_v26 = vmul.f32 0.03125, %v5682_v33  ;;  %v5679_v55 = vpop.xlane.xlu0 %5678  ;;  %v10132_v33 = vpack.c.bf16 %v694_v16, %v693_v36 }
0x2618   :  { %v5683_v28 = vmul.f32 0.03125, %v5679_v55 }
0x2619   :  { %v5686_v38 = vadd.f32 1e-05, %v5684_v26  ;;  %v696_v26 = vld [vmem:[%s13444_s28 + $0x18] sm:$0xff]  ;;  %10133 = vmatprep.subr.bf16.mxu1 %v10132_v33 }
0x261a   :  { %v5685_v24 = vadd.f32 1e-05, %v5683_v28  ;;  %v10136_v55 = vpack.c.bf16 %v696_v26, %v695_v17 }
0x261b   :  { %10730 = vrsqrt.f32 %v5686_v38 }
0x261c   :  { %10732 = vrsqrt.f32 %v5685_v24 }
0x2625   :  { %v10731_v7 = vpop.eup %10730 }
0x2626   :  { %v10733_v50 = vpop.eup %10732  ;;  %v5690_v51 = vmul.f32 %v10731_v7, %v5674_v1 }
0x2627   :  { %v5689_v59 = vmul.f32 %v10733_v50, %v5673_v30 }
0x2628   :  { %v5698_v20 = vmul.f32 %v8670_v19, %v5690_v51 }
0x2629   :  { %v5697_v25 = vmul.f32 %v8670_v19, %v5689_v59  ;;  %v8678_v59 = vld [vmem:[#allocation18] ss:$0 sm:$0xff] }
0x262a   :  { %v5706_v57 = vadd.f32 %v8671_v8, %v5698_v20 }
0x262b   :  { %v5705_v48 = vadd.f32 %v8671_v8, %v5697_v25 }
0x262d   :  { %9558 = vmatprep.mubr.msk.f32.mxu1 %vm13439_vm9, %v5705_v48  ;;  %vm13449_vm9 = vmmov %vm13445_vm3 }
0x262e   :  { %9559 = vmatmul.mubr.msk.f32.vlgmr.msra.gmra.mrb[36].mxu1 %vm13440_vm11, %v5706_v57  ;;  %vm13450_vm11 = vmmov %vm13445_vm3 }
0x262f   :  { %10135 = vmatpush3.bf16.msra.mxu1 %v10132_v33 }
0x2630   :  { %10137 = vmatprep.subr.bf16.mxu1 %v10136_v55 }
0x2633   :  { %10139 = vmatpush3.bf16.msra.mxu1 %v10136_v55 }
0x2701   :  { %v9560_v60 = vpop.f32.mrb[36].mxu1 }
0x2702   :  { %v5791_v62 = vadd.f32 %v9560_v60, %v8672_v40  ;;  %v5785_v22 = vpop.f32.mrb[37].mxu1 }
0x2703   :  { %v5786_v2 = vadd.f32 %v8672_v40, %v5785_v22  ;;  %v8680_v40 = vld [vmem:[#allocation21] ss:$0 sm:$0xff] }
0x2704   :  { %v5795_v47 = vmax.f32 %v5791_v62, 0.0 }
0x2705   :  { %v5794_v27 = vmax.f32 %v5786_v2, 0.0 }
0x2707   :  { %9577 = vmatprep.mubr.msk.f32.mxu0 %vm13441_vm13, %v5794_v27  ;;  %vm13451_vm13 = vmmov %vm13445_vm3 }
0x2708   :  { %9578 = vmatmul.mubr.msk.f32.vlgmr.msra.gmra.mrb[36].mxu0 %vm13442_vm0, %v5795_v47  ;;  %vm13452_vm0 = vmmov %vm13445_vm3 }
0x27db   :  { %v9579_v1 = vpop.f32.mrb[36].mxu0 }
0x27dc   :  { %v5880_v30 = vadd.f32 %v9579_v1, %v8675_v0  ;;  %v5874_v6 = vpop.f32.mrb[37].mxu0 }
0x27dd   :  { %v5875_v10 = vadd.f32 %v8675_v0, %v5874_v6 }
0x27de   :  { %v5884_v9 = vadd.f32 %v5880_v30, %v5706_v57 }
0x27df   :  { %v5883_v53 = vadd.f32 %v5875_v10, %v5705_v48  ;;  %v8679_v48 = vld [vmem:[#allocation19] ss:$0 sm:$0xff] }
0x27e0   :  { %v5888_v11 = vsel %vm13443_vm7, %v5884_v9, 0.0  ;;  %vm13453_vm7 = vmmov %vm13452_vm0 }
0x27e1   :  { %5889 = vadd.xlane.f32.xlu1 %v5888_v11  ;;  %v5885_v49 = vsel %vm13445_vm3, %v5883_v53, 0.0  ;;  %vm13454_vm3 = vmmov %vm13452_vm0 }
0x27e2   :  { %5886 = vadd.xlane.f32.xlu0 %v5885_v49 }
0x286e   :  { %v5890_v32 = vpop.xlane.xlu1 %5889 }
0x286f   :  { %v5892_v13 = vmul.f32 0.03125, %v5890_v32  ;;  %v5887_v37 = vpop.xlane.xlu0 %5886 }
0x2870   :  { %v5891_v46 = vmul.f32 0.03125, %v5887_v37 }
0x2871   :  { %v5894_v29 = vsub.f32 %v5884_v9, %v5892_v13 }
0x2872   :  { %v5893_v39 = vsub.f32 %v5883_v53, %v5891_v46 }
0x2873   :  { %v5896_v63 = vmul.f32 %v5894_v29, %v5894_v29 }
0x2874   :  { %v5895_v3 = vmul.f32 %v5893_v39, %v5893_v39 }
0x2875   :  { %v5900_v12 = vsel %vm13446_vm5, %v5896_v63, 0.0  ;;  %vm13455_vm5 = vmmov %vm13452_vm0 }
0x2876   :  { %5901 = vadd.xlane.f32.xlu1 %v5900_v12  ;;  %v5897_v14 = vsel %vm13447_vm12, %v5895_v3, 0.0  ;;  %vm13456_vm12 = vcmask 111616  }
0x2877   :  { %5898 = vadd.xlane.f32.xlu0 %v5897_v14 }
0x2903   :  { %v5902_v28 = vpop.xlane.xlu1 %5901 }
0x2904   :  { %v5904_v38 = vmul.f32 0.03125, %v5902_v28  ;;  %v5899_v24 = vpop.xlane.xlu0 %5898 }
0x2905   :  { %v5903_v7 = vmul.f32 0.03125, %v5899_v24 }
0x2906   :  { %v5906_v19 = vadd.f32 1e-05, %v5904_v38 }
0x2907   :  { %v5905_v50 = vadd.f32 1e-05, %v5903_v7 }
0x2908   :  { %10734 = vrsqrt.f32 %v5906_v19 }
0x2909   :  { %10736 = vrsqrt.f32 %v5905_v50 }
0x2912   :  { %v10735_v51 = vpop.eup %10734 }
0x2913   :  { %v10737_v8 = vpop.eup %10736  ;;  %v5910_v20 = vmul.f32 %v10735_v51, %v5894_v29 }
0x2914   :  { %v5909_v25 = vmul.f32 %v10737_v8, %v5893_v39 }
0x2915   :  { %v5918_v57 = vmul.f32 %v8678_v59, %v5910_v20 }
0x2916   :  { %v5917_v61 = vmul.f32 %v8678_v59, %v5909_v25 }
0x2917   :  { %v12868_v21 = vadd.f32 %v8679_v48, %v5918_v57 }
0x2918   :  { %v12866_v34 = vadd.f32 %v8679_v48, %v5917_v61 }
0x291a   :  { %9588 = vmatprep.mubr.msk.f32.mxu1 %vm13448_vm15, %v12866_v34  ;;  %vm13457_vm15 = vcmask 113664  }
0x291b   :  { %9589 = vmatmul.mubr.msk.f32.vlgmr.msra.gmra.mrb[38].mxu1 %vm13449_vm9, %v12868_v21  ;;  %vm13458_vm9 = vmmov %vm13456_vm12 }
0x29ee   :  { %v9590_v60 = vpop.f32.mrb[38].mxu1 }
0x29ef   :  { %v12874_v62 = vadd.f32 %v9590_v60, %v8680_v40  ;;  %v6005_v22 = vpop.f32.mrb[39].mxu1 }
0x29f0   :  { %v12876_v2 = vadd.f32 %v8680_v40, %v6005_v22 }
0x29f1   :  { %v12880_v27 = vmul.f32 %v12874_v62, %v12100_v5  ;;  %v6245_v10 = vmul.f32 %v12874_v62, %v12079_v23  ;;  %v12902_v53 = vmul.f32 %v12874_v62, %v12098_v4  ;;  %v12912_v13 = vmul.f32 %v12874_v62, %v12147_v15 }
0x29f2   :  { %v10528_v47 = vpack.i.bf16 %v12874_v62, %v12876_v2  ;;  %v6014_v0 = vmul.f32 %v11990_v41, %v12876_v2  ;;  %v6135_v1 = vmul.f32 %v11995_v42, %v12876_v2  ;;  %v6133_v30 = vmul.f32 %v12876_v2, %v12100_v5 }
0x29f3   :  { %v6244_v6 = vmul.f32 %v12876_v2, %v12079_v23  ;;  %v12896_v9 = vmul.f32 %v12876_v2, %v12098_v4  ;;  %v12908_v32 = vmul.f32 %v12876_v2, %v12147_v15  ;;  %v6015_v12 = vmul.f32 %v11990_v41, %v12874_v62 }
0x29f4   :  { %10529 = vrot.lane.b32.xlu0 %v10528_v47, %s11470_s23  ;;  %9595 = vmatprep.mubr.msk.f32.mxu1 %vm13450_vm11, %v6014_v0  ;;  %v10538_v11 = vpack.i.bf16 %v12880_v27, %v6133_v30  ;;  %v6136_v14 = vmul.f32 %v11995_v42, %v12874_v62  ;;  %v6426_v36 = vmul.f32 %v12038_v54, %v12876_v2  ;;  %vm13459_vm11 = vmmov %vm13458_vm9 }
0x29f5   :  { %9602 = vmatprep.mubr.msk.f32.mxu0 %vm13451_vm13, %v6135_v1  ;;  %v10533_v49 = vpack.i.bf16 %v6245_v10, %v6244_v6  ;;  %v10543_v37 = vpack.i.bf16 %v12902_v53, %v12896_v9  ;;  %v10548_v46 = vpack.i.bf16 %v12912_v13, %v12908_v32  ;;  %v6427_v16 = vmul.f32 %v12038_v54, %v12874_v62  ;;  %vm13460_vm13 = vmmov %vm13457_vm15 }
0x2a66   :  { %v10530_v29 = vpop.permute.xlu0 %10529 }
0x2a67   :  { %v10532_v39 = vunpack.i.h.bf16 %v10530_v29  ;;  %v10531_v63 = vunpack.i.l.bf16 %v10530_v29 }
0x2a69   :  { %v12918_v3 = vpack.c.bf16 %v10532_v39, %v10531_v63 }
0x2a6b   :  { %10142 = vmatprep.subr.msk.bf16.mxu1 %vm12014_vm6, %v12918_v3  ;;  %10148 = vmatprep.subr.msk.bf16.mxu0 %vm12014_vm6, %v12918_v3 }
0x2a6c   :  { %10145 = vmatpush3.bf16.xpose.msk.msra.mxu1 %vm12014_vm6, %v12918_v3  ;;  %10151 = vmatpush3.bf16.xpose.msk.msra.mxu0 %vm12014_vm6, %v12918_v3 }
0x2a6d   :  { %10166 = vmatprep.subr.msk.bf16.mxu0 %vm12014_vm6, %v12918_v3 }
0x2a73   :  { %9596 = vmatmul.mubr.msk.f32.vlgmr.msra.gmra.mrb[40].mxu1 %vm13452_vm0, %v6015_v12  ;;  %9603 = vmatmul.mubr.msk.f32.vlgmr.msra.gmra.mrb[38].mxu0 %vm13453_vm7, %v6136_v14  ;;  %vm13461_vm0 = vmmov %vm13460_vm13 }
0x2a74   :  { %10169 = vmatpush3.bf16.xpose.msk.msra.mxu0 %vm12014_vm6, %v12918_v3  ;;  %9623 = vmatprep.mubr.msk.f32.mxu0 %vm13454_vm3, %v6426_v36  ;;  %vm13462_vm7 = vmmov %vm13458_vm9 }
0x2a75   :  { %vm13463_vm3 = vmmov %vm13462_vm7 }
0x2a7b   :  { %9624 = vmatmul.mubr.msk.f32.vlgmr.msra.gmra.mrb[40].mxu0 %vm13455_vm5, %v6427_v16  ;;  %vm13464_vm5 = vmmov %vm13461_vm0 }
0x2b46   :  { %v9597_v17 = vpop.f32.mrb[40].mxu1  ;;  %v9604_v33 = vpop.f32.mrb[38].mxu0 }
0x2b47   :  { %v6219_v26 = vmul.f32 0.35355338, %v9604_v33  ;;  %v6098_v55 = vpop.f32.mrb[41].mxu1  ;;  %v6209_v28 = vpop.f32.mrb[39].mxu0  ;;  %v6108_v19 = vmul.f32 0.35355338, %v9597_v17 }
0x2b48   :  { %v6218_v38 = vmul.f32 0.35355338, %v6209_v28  ;;  %v6107_v51 = vmul.f32 0.35355338, %v6098_v55 }
0x2b49   :  { %v6221_v24 = vsel %vm12532_vm4, %v6219_v26, -1e+30  ;;  %v6110_v20 = vsel %vm12532_vm4, %v6108_v19, -1e+30 }
0x2b4a   :  { %v6225_v7 = vsel %vm13456_vm12, %v6221_v24, -inf  ;;  %v6220_v50 = vsel %vm12528_vm10, %v6218_v38, -1e+30  ;;  %v6114_v40 = vsel %vm13459_vm11, %v6110_v20, -inf  ;;  %v6109_v60 = vsel %vm12528_vm10, %v6107_v51, -1e+30  ;;  %vm13465_vm12 = vmmov %vm13461_vm0 }
0x2b4b   :  { %6226 = vmax.xlane.f32.xlu1 %v6225_v7  ;;  %v6222_v8 = vsel %vm13457_vm15, %v6220_v50, -inf  ;;  %v6111_v27 = vsel %vm13460_vm13, %v6109_v60, -inf  ;;  %vm13466_vm15 = vmmov %vm13463_vm3 }
0x2b4c   :  { %vm13468_vm11 = vmmov %vm13461_vm0 }
0x2b4d   :  { %vm13469_vm13 = vmmov %vm13461_vm0 }
0x2b4e   :  { %v9625_v59 = vpop.f32.mrb[40].mxu0 }
0x2b4f   :  { %v6510_v25 = vmul.f32 0.35355338, %v9625_v59  ;;  %v6500_v48 = vpop.f32.mrb[41].mxu0  ;;  %6223 = vmax.xlane.f32.xlu1 %v6222_v8 }
0x2b50   :  { %v6509_v22 = vmul.f32 0.35355338, %v6500_v48 }
0x2b51   :  { %v6512_v57 = vsel %vm12532_vm4, %v6510_v25, -1e+30 }
0x2b52   :  { %v6516_v61 = vsel %vm13458_vm9, %v6512_v57, -inf  ;;  %v6511_v47 = vsel %vm12528_vm10, %v6509_v22, -1e+30  ;;  %vm13467_vm9 = vmmov %vm13461_vm0 }
0x2b53   :  { %6517 = vmax.xlane.f32.xlu0 %v6516_v61  ;;  %6115 = vmax.xlane.f32.xlu1 %v6114_v40  ;;  %v6513_v0 = vsel %vm13461_vm0, %v6511_v47, -inf }
0x2b57   :  { %6112 = vmax.xlane.f32.xlu1 %v6111_v27 }
0x2b5b   :  { %6514 = vmax.xlane.f32.xlu1 %v6513_v0 }
0x2b69   :  { %10539 = vrot.lane.b32.xlu0 %v10538_v11, %s11471_s19 }
0x2b6c   :  { %10534 = vrot.lane.b32.xlu1 %v10533_v49, %s11471_s19 }
0x2bd8   :  { %v6227_v1 = vpop.xlane.xlu1 %6226 }
0x2bd9   :  { %v6229_v30 = vsub.f32 %v6221_v24, %v6227_v1 }
0x2bdb   :  { %v6232_v6 = vmul.f32 1.442695, %v6229_v30 }
0x2bdc   :  { %v6224_v10 = vpop.xlane.xlu1 %6223 }
0x2bdd   :  { %10738 = vpow2.f32 %v6232_v6  ;;  %v6228_v29 = vsub.f32 %v6220_v50, %v6224_v10 }
0x2bdf   :  { %v6230_v14 = vmul.f32 1.442695, %v6228_v29 }
0x2be0   :  { %v6116_v39 = vpop.xlane.xlu1 %6115  ;;  %v6518_v36 = vpop.xlane.xlu0 %6517 }
0x2be1   :  { %v6118_v63 = vsub.f32 %v6110_v20, %v6116_v39  ;;  %v6520_v26 = vsub.f32 %v6512_v57, %v6518_v36 }
0x2be3   :  { %v6121_v12 = vmul.f32 1.442695, %v6118_v63  ;;  %v6523_v38 = vmul.f32 1.442695, %v6520_v26 }
0x2be4   :  { %v6113_v16 = vpop.xlane.xlu1 %6112  ;;  %v10540_v28 = vpop.permute.xlu0 %10539 }
0x2be5   :  { %v6117_v17 = vsub.f32 %v6109_v60, %v6113_v16  ;;  %10740 = vpow2.f32 %v6121_v12  ;;  %v10542_v19 = vunpack.i.h.bf16 %v10540_v28  ;;  %v10541_v50 = vunpack.i.l.bf16 %v10540_v28 }
0x2be6   :  { %10742 = vpow2.f32 %v6230_v14 }
0x2be7   :  { %v10739_v33 = vpop.eup %10738  ;;  %v6119_v11 = vmul.f32 1.442695, %v6117_v17  ;;  %v10158_v48 = vpack.c.bf16 %v10542_v19, %v10541_v50  ;;  %v6630_v19 = vmul.f32 %v12123_v58, %v12874_v62 }
0x2be8   :  { %v6515_v55 = vpop.xlane.xlu1 %6514  ;;  %v6237_v49 = vsel %vm13462_vm7, %v10739_v33, 0.0  ;;  %vm13470_vm7 = vmmov %vm13461_vm0 }
0x2be9   :  { %6238 = vadd.xlane.f32.xlu1 %v6237_v49  ;;  %10744 = vpow2.f32 %v6119_v11  ;;  %v6519_v24 = vsub.f32 %v6511_v47, %v6515_v55 }
0x2bea   :  { %10746 = vpow2.f32 %v6523_v38 }
0x2beb   :  { %v6521_v25 = vmul.f32 1.442695, %v6519_v24 }
0x2bec   :  { %v10535_v7 = vpop.permute.xlu1 %10534 }
0x2bed   :  { %v10537_v51 = vunpack.i.h.bf16 %v10535_v7  ;;  %v10536_v59 = vunpack.i.l.bf16 %v10535_v7  ;;  %10748 = vpow2.f32 %v6521_v25  ;;  %v6629_v7 = vmul.f32 %v12123_v58, %v12876_v2 }
0x2bef   :  { %v10152_v8 = vpack.c.bf16 %v10537_v51, %v10536_v59  ;;  %v10741_v20 = vpop.eup %10740 }
0x2bf0   :  { %v6126_v57 = vsel %vm13463_vm3, %v10741_v20, 0.0  ;;  %v10743_v61 = vpop.eup %10742  ;;  %vm13471_vm3 = vmmov %vm13461_vm0 }
0x2bf1   :  { %10154 = vmatprep.subr.msk.bf16.mxu1 %vm12563_vm8, %v10152_v8  ;;  %6127 = vadd.xlane.f32.xlu1 %v6126_v57  ;;  %v6234_v40 = vsel %vm13464_vm5, %v10743_v61, 0.0  ;;  %vm13472_vm5 = vmmov %vm13461_vm0 }
0x2bf2   :  { %10157 = vmatpush3.bf16.msk.msra.mxu1 %vm12563_vm8, %v10152_v8 }
0x2bf3   :  { %10160 = vmatprep.subr.msk.bf16.mxu1 %vm12563_vm8, %v10158_v48  ;;  %v10745_v60 = vpop.eup %10744 }
0x2bf4   :  { %v6123_v22 = vsel %vm13465_vm12, %v10745_v60, 0.0  ;;  %v10747_v27 = vpop.eup %10746  ;;  %vm13473_vm12 = vcmask 261120  }
0x2bf5   :  { %6235 = vadd.xlane.f32.xlu1 %v6234_v40  ;;  %v6528_v47 = vsel %vm13466_vm15, %v10747_v27, 0.0  ;;  %vm13474_vm15 = vmmov %vm13473_vm12 }
0x2bf7   :  { %v10749_v0 = vpop.eup %10748 }
0x2bf8   :  { %v6525_v1 = vsel %vm13467_vm9, %v10749_v0, 0.0  ;;  %vm13475_vm9 = vcmask 111616  }
0x2bf9   :  { %6124 = vadd.xlane.f32.xlu1 %v6123_v22 }
0x2bfd   :  { %6529 = vadd.xlane.f32.xlu1 %v6528_v47  ;;  %v698_v47 = vld [vmem:[%s13477_s1] sm:$0xff] }
0x2c01   :  { %6526 = vadd.xlane.f32.xlu1 %v6525_v1  ;;  %v700_v1 = vld [vmem:[%s13477_s1 + $0x10] sm:$0xff] }
0x2c12   :  { %10544 = vrot.lane.b32.xlu1 %v10543_v37, %s11471_s19 }
0x2c76   :  { %v6239_v30 = vpop.xlane.xlu1 %6238 }
0x2c77   :  { %10750 = vrcp.f32 %v6239_v30 }
0x2c7e   :  { %v6128_v6 = vpop.xlane.xlu1 %6127 }
0x2c81   :  { %v10751_v63 = vpop.eup %10750 }
0x2c82   :  { %v6236_v10 = vpop.xlane.xlu1 %6235  ;;  %v6243_v16 = vmul.f32 %v10751_v63, %v10739_v33 }
0x2c83   :  { %10752 = vrcp.f32 %v6236_v10 }
0x2c86   :  { %v6125_v29 = vpop.xlane.xlu1 %6124 }
0x2c87   :  { %10754 = vrcp.f32 %v6125_v29  ;;  %v703_v29 = vld [vmem:[%s13478_s17] sm:$0xff] }
0x2c88   :  { %10756 = vrcp.f32 %v6128_v6  ;;  %v701_v6 = vld [vmem:[%s13477_s1 + $0x18] sm:$0xff] }
0x2c89   :  { %v10192_v10 = vpack.c.bf16 %v701_v6, %v700_v1 }
0x2c8a   :  { %v6530_v39 = vpop.xlane.xlu1 %6529 }
0x2c8d   :  { %v10753_v12 = vpop.eup %10752 }
0x2c8e   :  { %v6527_v14 = vpop.xlane.xlu1 %6526  ;;  %v6241_v36 = vmul.f32 %v10753_v12, %v10743_v61 }
0x2c8f   :  { %10758 = vrcp.f32 %v6527_v14 }
0x2c90   :  { %9609 = vmatprep.mubr.msk.f32.mxu1 %vm13468_vm11, %v6241_v36  ;;  %10760 = vrcp.f32 %v6530_v39  ;;  %vm13476_vm11 = vmmov %vm13461_vm0  ;;  %v704_v39 = vld [vmem:[%s13478_s17 + $0x8] sm:$0xff] }
0x2c91   :  { %v10755_v17 = vpop.eup %10754  ;;  %9610 = vmatmul.mubr.msk.f32.vlgmr.msra.gmra.mrb[42].mxu1 %vm13469_vm13, %v6243_v16  ;;  %v10196_v63 = vpack.c.bf16 %v704_v39, %v703_v29  ;;  %vm13481_vm13 = vmmov %vm13461_vm0 }
0x2c92   :  { %10163 = vmatpush3.bf16.msk.msra.mxu1 %vm12563_vm8, %v10158_v48  ;;  %v10545_v9 = vpop.permute.xlu1 %10544  ;;  %v6130_v53 = vmul.f32 %v10755_v17, %v10745_v60  ;;  %v10757_v11 = vpop.eup %10756  ;;  %v705_v17 = vld [vmem:[%s13478_s17 + $0x10] sm:$0xff] }
0x2c93   :  { %v10547_v37 = vunpack.i.h.bf16 %v10545_v9  ;;  %v10546_v26 = vunpack.i.l.bf16 %v10545_v9  ;;  %v6132_v49 = vmul.f32 %v10757_v11, %v10741_v20  ;;  %v706_v9 = vld [vmem:[%s13478_s17 + $0x18] sm:$0xff] }
0x2c94   :  { %9616 = vmatprep.mubr.msk.f32.mxu1 %vm13461_vm0, %v6130_v53  ;;  %v10200_v11 = vpack.c.bf16 %v706_v9, %v705_v17  ;;  %v8715_v9 = vld [vmem:[#allocation31] ss:$0 sm:$0xff] }
0x2c95   :  { %v10170_v55 = vpack.c.bf16 %v10547_v37, %v10546_v26 }
0x2c97   :  { %10172 = vmatprep.subr.msk.bf16.mxu1 %vm12563_vm8, %v10170_v55 }
0x2c99   :  { %v10759_v33 = vpop.eup %10758  ;;  %9617 = vmatmul.mubr.msk.f32.vlgmr.msra.gmra.mrb[42].mxu1 %vm13470_vm7, %v6132_v49  ;;  %vm13482_vm7 = vmmov %vm13473_vm12  ;;  %v13042_v49 = vld [vmem:[#allocation24] ss:$0 sm:$0xff] }
0x2c9a   :  { %10175 = vmatpush3.bf16.msk.msra.mxu1 %vm12563_vm8, %v10170_v55  ;;  %v6532_v28 = vmul.f32 %v10759_v33, %v10749_v0  ;;  %v10761_v38 = vpop.eup %10760  ;;  %v699_v0 = vld [vmem:[%s13477_s1 + $0x8] sm:$0xff] }
0x2c9b   :  { %10178 = vmatprep.subr.msk.bf16.mxu1 %vm12014_vm6, %v12918_v3  ;;  %v6534_v24 = vmul.f32 %v10761_v38, %v10747_v27  ;;  %v10188_v30 = vpack.c.bf16 %v699_v0, %v698_v47 }
0x2c9c   :  { %9630 = vmatprep.mubr.msk.f32.mxu1 %vm13471_vm3, %v6532_v28  ;;  %vm13483_vm3 = vmmov %vm13482_vm7 }
0x2c9d   :  { %10189 = vmatprep.subr.bf16.mxu0 %v10188_v30 }
0x2c9e   :  { %10191 = vmatpush3.bf16.msra.mxu0 %v10188_v30 }
0x2c9f   :  { %10193 = vmatprep.subr.bf16.mxu0 %v10192_v10 }
0x2ca1   :  { %9631 = vmatmul.mubr.msk.f32.vlgmr.msra.gmra.mrb[42].mxu1 %vm13472_vm5, %v6534_v24  ;;  %vm13485_vm5 = vmmov %vm13483_vm3 }
0x2ca2   :  { %9637 = vmatprep.mubr.msk.f32.mxu1 %vm13473_vm12, %v6629_v7  ;;  %10195 = vmatpush3.bf16.msra.mxu0 %v10192_v10  ;;  %vm13486_vm12 = vmmov %vm13483_vm3 }
0x2ca3   :  { %10181 = vmatpush3.bf16.xpose.msk.msra.mxu1 %vm12014_vm6, %v12918_v3  ;;  %10197 = vmatprep.subr.bf16.mxu0 %v10196_v63 }
0x2caa   :  { %9638 = vmatmul.mubr.msk.f32.vlgmr.msra.gmra.mrb[44].mxu1 %vm13474_vm15, %v6630_v19  ;;  %vm13487_vm15 = vcmask 259072  }
0x2d7d   :  { %v9639_v50 = vpop.f32.mrb[44].mxu1 }
0x2d7e   :  { %v6713_v51 = vmul.f32 0.35355338, %v9639_v50  ;;  %v6703_v59 = vpop.f32.mrb[45].mxu1 }
0x2d7f   :  { %v6712_v8 = vmul.f32 0.35355338, %v6703_v59 }
0x2d80   :  { %v6715_v2 = vsel %vm12532_vm4, %v6713_v51, -1e+30  ;;  %vm13479_vm4 = vmmov %vm13475_vm9 }
0x2d81   :  { %v6714_v20 = vsel %vm12528_vm10, %v6712_v8, -1e+30  ;;  %v6719_v25 = vsel %vm13475_vm9, %v6715_v2, -inf  ;;  %vm13480_vm10 = vmmov %vm13461_vm0 }
0x2d82   :  { %6720 = vmax.xlane.f32.xlu0 %v6719_v25  ;;  %v6716_v3 = vsel %vm13476_vm11, %v6714_v20, -inf  ;;  %vm13488_vm9 = vmmov %vm13483_vm3 }
0x2d83   :  { %6717 = vmax.xlane.f32.xlu1 %v6716_v3  ;;  %vm13489_vm11 = vmmov %vm13487_vm15 }
0x2e0f   :  { %v6721_v62 = vpop.xlane.xlu0 %6720 }
0x2e10   :  { %v6723_v48 = vsub.f32 %v6715_v2, %v6721_v62  ;;  %v6718_v57 = vpop.xlane.xlu1 %6717 }
0x2e11   :  { %v6722_v61 = vsub.f32 %v6714_v20, %v6718_v57 }
0x2e12   :  { %v6726_v40 = vmul.f32 1.442695, %v6723_v48 }
0x2e13   :  { %v6724_v31 = vmul.f32 1.442695, %v6722_v61 }
0x2e14   :  { %10762 = vpow2.f32 %v6726_v40 }
0x2e15   :  { %10764 = vpow2.f32 %v6724_v31 }
0x2e1e   :  { %v10763_v43 = vpop.eup %10762 }
0x2e1f   :  { %v10765_v60 = vpop.eup %10764  ;;  %v6731_v22 = vsel %vm13479_vm4, %v10763_v43, 0.0  ;;  %vm13490_vm4 = vmmov %vm13483_vm3 }
0x2e20   :  { %6732 = vadd.xlane.f32.xlu0 %v6731_v22  ;;  %v6728_v27 = vsel %vm13480_vm10, %v10765_v60, 0.0  ;;  %vm13491_vm10 = vmmov %vm13483_vm3 }
0x2e21   :  { %6729 = vadd.xlane.f32.xlu1 %v6728_v27 }
0x2e32   :  { %10549 = vrot.lane.b32.xlu1 %v10548_v46, %s11471_s19 }
0x2ead   :  { %v6733_v12 = vpop.xlane.xlu0 %6732 }
0x2eae   :  { %10766 = vrcp.f32 %v6733_v12  ;;  %v6730_v32 = vpop.xlane.xlu1 %6729 }
0x2eaf   :  { %10768 = vrcp.f32 %v6730_v32 }
0x2eb2   :  { %v10550_v13 = vpop.permute.xlu1 %10549 }
0x2eb3   :  { %v10552_v46 = vunpack.i.h.bf16 %v10550_v13  ;;  %v10551_v14 = vunpack.i.l.bf16 %v10550_v13 }
0x2eb5   :  { %v10182_v36 = vpack.c.bf16 %v10552_v46, %v10551_v14 }
0x2eb7   :  { %10184 = vmatprep.subr.msk.bf16.mxu1 %vm12563_vm8, %v10182_v36 }
0x2eb8   :  { %v10767_v16 = vpop.eup %10766  ;;  %10187 = vmatpush3.bf16.msk.msra.mxu1 %vm12563_vm8, %v10182_v36  ;;  %vm13484_vm8 = vmmov %vm13483_vm3 }
0x2eb9   :  { %v10769_v53 = vpop.eup %10768  ;;  %10205 = vmatprep.subr.bf16.mxu1 %v10196_v63  ;;  %v6737_v26 = vmul.f32 %v10767_v16, %v10763_v43  ;;  %v8714_v16 = vld [vmem:[#allocation30] ss:$0 sm:$0xff] }
0x2eba   :  { %v6735_v37 = vmul.f32 %v10769_v53, %v10765_v60 }
0x2ebc   :  { %9644 = vmatprep.mubr.msk.f32.mxu1 %vm13481_vm13, %v6735_v37  ;;  %vm13492_vm13 = vmmov %vm13483_vm3 }
0x2ebd   :  { %9645 = vmatmul.mubr.msk.f32.vlgmr.msra.gmra.mrb[42].mxu1 %vm13461_vm0, %v6737_v26  ;;  %vm13493_vm0 = vmmov %vm13483_vm3 }
0x2ebe   :  { %10207 = vmatpush3.bf16.msra.mxu1 %v10196_v63  ;;  %9677 = vmatprep.mubr.msk.f32.mxu1 %vm13482_vm7, %v12657_v35  ;;  %vm13494_vm7 = vmmov %vm13493_vm0 }
0x2ebf   :  { %10209 = vmatprep.subr.bf16.mxu1 %v10200_v11 }
0x2ec2   :  { %10211 = vmatpush3.bf16.msra.mxu1 %v10200_v11 }
0x2ec5   :  { %9678 = vmatmul.mubr.msk.f32.vlgmr.msra.gmra.mrb[46].mxu1 %vm13483_vm3, %v12661_v18  ;;  %vm13495_vm3 = vmmov %vm13493_vm0 }
0x2f90   :  { %v9646_v45 = vpop.f32.mrb[42].mxu1 }
0x2f91   :  { %v6821_v55 = vpop.f32.mrb[43].mxu1 }
0x2f92   :  { %9655 = vmatprep.mubr.msk.f32.mxu0 %vm13484_vm8, %v6821_v55  ;;  %vm13496_vm8 = vmmov %vm13493_vm0 }
0x2f93   :  { %9656 = vmatmul.mubr.msk.f32.vlgmr.msra.gmra.mrb[42].mxu0 %vm13485_vm5, %v9646_v45  ;;  %vm13497_vm5 = vmmov %vm13493_vm0 }
0x2f94   :  { %10199 = vmatpush3.bf16.msra.mxu0 %v10196_v63 }
0x2f95   :  { %10201 = vmatprep.subr.bf16.mxu0 %v10200_v11 }
0x2f98   :  { %v9679_v33 = vpop.f32.mrb[46].mxu1  ;;  %10203 = vmatpush3.bf16.msra.mxu0 %v10200_v11 }
0x2f99   :  { %v7122_v28 = vadd.f32 %v9679_v33, %v13042_v49  ;;  %v7116_v35 = vpop.f32.mrb[47].mxu1 }
0x2f9a   :  { %v7117_v38 = vadd.f32 %v13042_v49, %v7116_v35 }
0x2f9b   :  { %v13047_v24 = vmul.f32 %v7122_v28, %v12079_v23  ;;  %v13050_v18 = vmul.f32 %v7122_v28, %v12098_v4  ;;  %v13053_v7 = vmul.f32 %v7122_v28, %v12147_v15  ;;  %v13056_v19 = vmul.f32 %v7122_v28, %v12100_v5 }
0x2f9c   :  { %v10553_v50 = vpack.i.bf16 %v7122_v28, %v7117_v38  ;;  %v13059_v51 = vmul.f32 %v7117_v38, %v12079_v23  ;;  %v13062_v59 = vmul.f32 %v7117_v38, %v12098_v4  ;;  %v13065_v8 = vmul.f32 %v7117_v38, %v12147_v15 }
0x2f9d   :  { %v13068_v2 = vmul.f32 %v7117_v38, %v12100_v5  ;;  %v8711_v5 = vld [vmem:[#allocation22] ss:$0 sm:$0xff] }
0x2f9e   :  { %10554 = vrot.lane.b32.xlu1 %v10553_v50, %s11470_s23  ;;  %v10558_v20 = vpack.i.bf16 %v13047_v24, %v13059_v51  ;;  %v10568_v25 = vpack.i.bf16 %v13050_v18, %v13062_v59  ;;  %v10573_v23 = vpack.i.bf16 %v13053_v7, %v13065_v8  ;;  %s13511_s23 = sld [smem:[#allocation101_spill]] }
0x2f9f   :  { %v10563_v4 = vpack.i.bf16 %v13056_v19, %v13068_v2 }
0x3010   :  { %v10555_v3 = vpop.permute.xlu1 %10554 }
0x3011   :  { %v10557_v15 = vunpack.i.h.bf16 %v10555_v3  ;;  %v10556_v62 = vunpack.i.l.bf16 %v10555_v3 }
0x3013   :  { %v13079_v48 = vpack.c.bf16 %v10557_v15, %v10556_v62 }
0x3015   :  { %10214 = vmatprep.subr.msk.bf16.mxu0 %vm12014_vm6, %v13079_v48  ;;  %10220 = vmatprep.subr.msk.bf16.mxu1 %vm12014_vm6, %v13079_v48 }
0x3016   :  { %10223 = vmatpush3.bf16.xpose.msk.msra.mxu1 %vm12014_vm6, %v13079_v48 }
0x3017   :  { %10234 = vmatprep.subr.msk.bf16.mxu1 %vm12014_vm6, %v13079_v48 }
0x3066   :  { %v9657_v57 = vpop.f32.mrb[42].mxu0 }
0x3067   :  { %v6910_v61 = vpop.f32.mrb[43].mxu0  ;;  %v6916_v40 = vadd.f32 %v9657_v57, %v8711_v5 }
0x3068   :  { %v6911_v31 = vadd.f32 %v8711_v5, %v6910_v61 }
0x3069   :  { %v6920_v60 = vadd.f32 %v6916_v40, %v12868_v21 }
0x306a   :  { %v6919_v43 = vadd.f32 %v6911_v31, %v12866_v34 }
0x306b   :  { %v6924_v27 = vsel %vm13487_vm15, %v6920_v60, 0.0  ;;  %vm13499_vm15 = vmmov %vm13493_vm0 }
0x306c   :  { %v6921_v22 = vsel %vm13486_vm12, %v6919_v43, 0.0  ;;  %vm13498_vm12 = vmmov %vm13493_vm0 }
0x306d   :  { %6922 = vadd.xlane.f32.xlu0 %v6921_v22 }
0x3071   :  { %6925 = vadd.xlane.f32.xlu0 %v6924_v27 }
0x30fa   :  { %v6923_v47 = vpop.xlane.xlu0 %6922 }
0x30fb   :  { %v6927_v0 = vmul.f32 0.03125, %v6923_v47 }
0x30fd   :  { %v6929_v1 = vsub.f32 %v6919_v43, %v6927_v0 }
0x30fe   :  { %v6926_v30 = vpop.xlane.xlu0 %6925 }
0x30ff   :  { %v6928_v6 = vmul.f32 0.03125, %v6926_v30  ;;  %v6931_v10 = vmul.f32 %v6929_v1, %v6929_v1 }
0x3101   :  { %v6930_v29 = vsub.f32 %v6920_v60, %v6928_v6  ;;  %v6933_v39 = vsel %vm13488_vm9, %v6931_v10, 0.0 }
0x3102   :  { %6934 = vadd.xlane.f32.xlu0 %v6933_v39 }
0x3103   :  { %v6932_v63 = vmul.f32 %v6930_v29, %v6930_v29 }
0x3105   :  { %v6936_v34 = vsel %vm13489_vm11, %v6932_v63, 0.0 }
0x3106   :  { %6937 = vadd.xlane.f32.xlu0 %v6936_v34 }
0x318f   :  { %v6935_v21 = vpop.xlane.xlu0 %6934 }
0x3190   :  { %v6939_v12 = vmul.f32 0.03125, %v6935_v21 }
0x3192   :  { %v6941_v32 = vadd.f32 1e-05, %v6939_v12 }
0x3193   :  { %v6938_v13 = vpop.xlane.xlu0 %6937 }
0x3194   :  { %10770 = vrsqrt.f32 %v6941_v32  ;;  %v6940_v46 = vmul.f32 0.03125, %v6938_v13 }
0x3196   :  { %v6942_v14 = vadd.f32 1e-05, %v6940_v46 }
0x3198   :  { %10772 = vrsqrt.f32 %v6942_v14 }
0x319e   :  { %v10771_v36 = vpop.eup %10770 }
0x319f   :  { %v6945_v17 = vmul.f32 %v10771_v36, %v6929_v1 }
0x31a1   :  { %v6953_v53 = vmul.f32 %v8714_v16, %v6945_v17 }
0x31a2   :  { %v10773_v37 = vpop.eup %10772 }
0x31a3   :  { %v6946_v26 = vmul.f32 %v10773_v37, %v6930_v29  ;;  %v13099_v11 = vadd.f32 %v8715_v9, %v6953_v53 }
0x31a5   :  { %v6954_v45 = vmul.f32 %v8714_v16, %v6946_v26  ;;  %9666 = vmatprep.mubr.msk.f32.mxu0 %vm13490_vm4, %v13099_v11 }
0x31a7   :  { %v13103_v55 = vadd.f32 %v8715_v9, %v6954_v45 }
0x31a9   :  { %9667 = vmatmul.mubr.msk.f32.vlgmr.msra.gmra.mrb[44].mxu0 %vm13491_vm10, %v13103_v55 }
0x31aa   :  { %10217 = vmatpush3.bf16.xpose.msk.msra.mxu0 %vm12014_vm6, %v13079_v48 }
0x327c   :  { %v9668_v33 = vpop.f32.mrb[44].mxu0 }
0x327d   :  { %v7047_v28 = vadd.f32 %v9668_v33, %v13042_v49  ;;  %v7041_v35 = vpop.f32.mrb[45].mxu0 }
0x327e   :  { %v7042_v38 = vadd.f32 %v13042_v49, %v7041_v35 }
0x327f   :  { %v7126_v15 = vmul.f32 %v11990_v41, %v7047_v28  ;;  %v7247_v62 = vmul.f32 %v11995_v42, %v7047_v28  ;;  %v7738_v49 = vmul.f32 %v12123_v58, %v7047_v28 }
0x3280   :  { %v7125_v50 = vmul.f32 %v11990_v41, %v7042_v38  ;;  %v7246_v3 = vmul.f32 %v11995_v42, %v7042_v38  ;;  %v7535_v5 = vmul.f32 %v12038_v54, %v7042_v38  ;;  %v7536_v41 = vmul.f32 %v12038_v54, %v7047_v28 }
0x3281   :  { %v7737_v42 = vmul.f32 %v12123_v58, %v7042_v38 }
0x3282   :  { %9684 = vmatprep.mubr.msk.f32.mxu0 %vm13492_vm13, %v7125_v50  ;;  %9691 = vmatprep.mubr.msk.f32.mxu1 %vm13493_vm0, %v7246_v3 }
0x3283   :  { %9685 = vmatmul.mubr.msk.f32.vlgmr.msra.gmra.mrb[46].mxu0 %vm13494_vm7, %v7126_v15  ;;  %9692 = vmatmul.mubr.msk.f32.vlgmr.msra.gmra.mrb[48].mxu1 %vm13495_vm3, %v7247_v62 }
0x3284   :  { %10237 = vmatpush3.bf16.xpose.msk.msra.mxu1 %vm12014_vm6, %v13079_v48  ;;  %9712 = vmatprep.mubr.msk.f32.mxu1 %vm13496_vm8, %v7535_v5 }
0x3285   :  { %10244 = vmatprep.subr.msk.bf16.mxu1 %vm12014_vm6, %v13079_v48 }
0x328b   :  { %9713 = vmatmul.mubr.msk.f32.vlgmr.msra.gmra.mrb[50].mxu1 %vm13497_vm5, %v7536_v41 }
0x328c   :  { %10247 = vmatpush3.bf16.xpose.msk.msra.mxu1 %vm12014_vm6, %v13079_v48  ;;  %9726 = vmatprep.mubr.msk.f32.mxu1 %vm13498_vm12, %v7737_v42  ;;  %vm13500_vm6 = vcmask 130048  }
0x328d   :  { %vm13501_vm9 = vmmov %vm13500_vm6 }
0x328e   :  { %vm13502_vm11 = vmmov %vm13500_vm6 }
0x328f   :  { %vm13503_vm4 = vmmov %vm13500_vm6 }
0x3293   :  { %9727 = vmatmul.mubr.msk.f32.vlgmr.msra.gmra.mrb[52].mxu1 %vm13499_vm15, %v7738_v49 }
0x3356   :  { %v9686_v57 = vpop.f32.mrb[46].mxu0  ;;  %v9693_v61 = vpop.f32.mrb[48].mxu1 }
0x3357   :  { %v7330_v40 = vmul.f32 0.35355338, %v9693_v61  ;;  %v7209_v31 = vpop.f32.mrb[47].mxu0  ;;  %v7320_v43 = vpop.f32.mrb[49].mxu1  ;;  %v7219_v27 = vmul.f32 0.35355338, %v9686_v57 }
0x3358   :  { %v7218_v54 = vmul.f32 0.35355338, %v7209_v31  ;;  %v7329_v60 = vmul.f32 0.35355338, %v7320_v43 }
0x3359   :  { %v7332_v22 = vsel %vm12754_vm1, %v7330_v40, -1e+30  ;;  %v7221_v6 = vsel %vm12754_vm1, %v7219_v27, -1e+30 }
0x335a   :  { %v7331_v52 = vsel %vm12758_vm14, %v7329_v60, -1e+30  ;;  %v7336_v48 = vsel %vm4861_vm2, %v7332_v22, -inf  ;;  %v7220_v47 = vsel %vm12758_vm14, %v7218_v54, -1e+30  ;;  %v7225_v29 = vsel %vm4861_vm2, %v7221_v6, -inf }
0x335b   :  { %7337 = vmax.xlane.f32.xlu1 %v7336_v48  ;;  %v7333_v58 = vsel %vm13500_vm6, %v7331_v52, -inf  ;;  %v7222_v30 = vsel %vm13501_vm9, %v7220_v47, -inf  ;;  %vm13517_vm6 = vcmask 261120  }
0x335c   :  { %7334 = vmax.xlane.f32.xlu0 %v7333_v58  ;;  %vm13518_vm9 = vmmov %vm13517_vm6 }
0x335e   :  { %v9714_v0 = vpop.f32.mrb[50].mxu1 }
0x335f   :  { %v7609_v1 = vpop.f32.mrb[51].mxu1  ;;  %v7619_v39 = vmul.f32 0.35355338, %v9714_v0 }
0x3360   :  { %v7618_v10 = vmul.f32 0.35355338, %v7609_v1  ;;  %7223 = vmax.xlane.f32.xlu0 %v7222_v30 }
0x3361   :  { %v7621_v32 = vsel %vm12754_vm1, %v7619_v39, -1e+30 }
0x3362   :  { %v7620_v63 = vsel %vm12758_vm14, %v7618_v10, -1e+30  ;;  %v7625_v46 = vsel %vm4861_vm2, %v7621_v32, -inf }
0x3363   :  { %v7622_v12 = vsel %vm13502_vm11, %v7620_v63, -inf  ;;  %vm13519_vm11 = vcmask 259072  }
0x3364   :  { %7226 = vmax.xlane.f32.xlu0 %v7225_v29 }
0x3366   :  { %v9728_v34 = vpop.f32.mrb[52].mxu1 }
0x3367   :  { %v7811_v21 = vpop.f32.mrb[53].mxu1  ;;  %v7821_v14 = vmul.f32 0.35355338, %v9728_v34 }
0x3368   :  { %v7820_v13 = vmul.f32 0.35355338, %v7811_v21  ;;  %7623 = vmax.xlane.f32.xlu0 %v7622_v12 }
0x3369   :  { %v7823_v17 = vsel %vm12754_vm1, %v7821_v14, -1e+30  ;;  %vm13504_vm1 = vmmov %vm13503_vm4 }
0x336a   :  { %v7822_v36 = vsel %vm12758_vm14, %v7820_v13, -1e+30  ;;  %v7827_v9 = vsel %vm4861_vm2, %v7823_v17, -inf  ;;  %vm13505_vm14 = vmmov %vm13504_vm1 }
0x336b   :  { %v7824_v16 = vsel %vm13503_vm4, %v7822_v36, -inf  ;;  %vm13506_vm10 = vmmov %vm13504_vm1 }
0x336c   :  { %7626 = vmax.xlane.f32.xlu0 %v7625_v46  ;;  %vm13507_vm13 = vmmov %vm13504_vm1 }
0x336d   :  { %vm13509_vm0 = vmmov %vm13504_vm1 }
0x336e   :  { %vm13510_vm7 = vmmov %vm13509_vm0 }
0x336f   :  { %vm13512_vm3 = vmmov %vm13509_vm0 }
0x3370   :  { %7825 = vmax.xlane.f32.xlu0 %v7824_v16  ;;  %vm13513_vm8 = vmmov %vm13509_vm0 }
0x3371   :  { %vm13514_vm5 = vmmov %vm13509_vm0 }
0x3372   :  { %vm13515_vm12 = vmmov %vm13509_vm0 }
0x3373   :  { %vm13516_vm15 = vmmov %vm13509_vm0 }
0x3374   :  { %7828 = vmax.xlane.f32.xlu0 %v7827_v9  ;;  %vm13521_vm4 = vmmov %vm13517_vm6 }
0x338a   :  { %10559 = vrot.lane.b32.xlu0 %v10558_v20, %s11471_s19 }
0x33e8   :  { %v7338_v53 = vpop.xlane.xlu1 %7337 }
0x33e9   :  { %v7340_v37 = vsub.f32 %v7332_v22, %v7338_v53  ;;  %v7335_v26 = vpop.xlane.xlu0 %7334 }
0x33ea   :  { %v7339_v44 = vsub.f32 %v7331_v52, %v7335_v26 }
0x33eb   :  { %v7343_v45 = vmul.f32 1.442695, %v7340_v37 }
0x33ec   :  { %v7341_v33 = vmul.f32 1.442695, %v7339_v44 }
0x33ed   :  { %10774 = vpow2.f32 %v7343_v45  ;;  %v7224_v28 = vpop.xlane.xlu0 %7223 }
0x33ee   :  { %v7228_v35 = vsub.f32 %v7220_v47, %v7224_v28  ;;  %10776 = vpow2.f32 %v7341_v33 }
0x33f0   :  { %v7230_v56 = vmul.f32 1.442695, %v7228_v35 }
0x33f1   :  { %v7227_v38 = vpop.xlane.xlu0 %7226 }
0x33f2   :  { %v7229_v50 = vsub.f32 %v7221_v6, %v7227_v38  ;;  %10778 = vpow2.f32 %v7230_v56 }
0x33f4   :  { %v7232_v3 = vmul.f32 1.442695, %v7229_v50 }
0x33f5   :  { %v7624_v15 = vpop.xlane.xlu0 %7623 }
0x33f6   :  { %10780 = vpow2.f32 %v7232_v3  ;;  %v7628_v62 = vsub.f32 %v7620_v63, %v7624_v15 }
0x33f7   :  { %v10775_v24 = vpop.eup %10774 }
0x33f8   :  { %v7630_v51 = vmul.f32 1.442695, %v7628_v62  ;;  %v7348_v20 = vsel %vm4861_vm2, %v10775_v24, 0.0  ;;  %v10777_v5 = vpop.eup %10776  ;;  %v708_v62 = vld [vmem:[%s13511_s23] sm:$0xff] }
0x33f9   :  { %7349 = vadd.xlane.f32.xlu0 %v7348_v20  ;;  %v7627_v41 = vpop.xlane.xlu0 %7626  ;;  %v7345_v57 = vsel %vm13504_vm1, %v10777_v5, 0.0 }
0x33fa   :  { %10782 = vpow2.f32 %v7630_v51  ;;  %v7629_v42 = vsub.f32 %v7621_v32, %v7627_v41 }
0x33fc   :  { %v7632_v49 = vmul.f32 1.442695, %v7629_v42  ;;  %v10779_v61 = vpop.eup %10778 }
0x33fd   :  { %7346 = vadd.xlane.f32.xlu0 %v7345_v57  ;;  %v7826_v40 = vpop.xlane.xlu0 %7825  ;;  %v7234_v54 = vsel %vm13505_vm14, %v10779_v61, 0.0  ;;  %v711_v57 = vld [vmem:[%s13511_s23 + $0x18] sm:$0xff]  ;;  %vm13524_vm14 = vmmov %vm13521_vm4 }
0x33fe   :  { %10784 = vpow2.f32 %v7632_v49  ;;  %v7830_v43 = vsub.f32 %v7822_v36, %v7826_v40  ;;  %v710_v49 = vld [vmem:[%s13511_s23 + $0x10] sm:$0xff] }
0x33ff   :  { %v10256_v40 = vpack.c.bf16 %v711_v57, %v710_v49 }
0x3400   :  { %v13167_v31 = vpop.eup %10780  ;;  %v7832_v58 = vmul.f32 1.442695, %v7830_v43 }
0x3401   :  { %7235 = vadd.xlane.f32.xlu0 %v7234_v54  ;;  %v7829_v60 = vpop.xlane.xlu0 %7828  ;;  %v7237_v22 = vsel %vm4861_vm2, %v13167_v31, 0.0  ;;  %v8745_v54 = vld [vmem:[#allocation25] ss:$0 sm:$0xff] }
0x3402   :  { %v7831_v52 = vsub.f32 %v7823_v17, %v7829_v60  ;;  %7238 = vadd.xlane.f32.xlu1 %v7237_v22 }
0x3404   :  { %v13172_v48 = vpop.eup %10782  ;;  %v7834_v27 = vmul.f32 1.442695, %v7831_v52 }
0x3405   :  { %v10560_v47 = vpop.permute.xlu0 %10559  ;;  %v7634_v0 = vsel %vm13506_vm10, %v13172_v48, 0.0  ;;  %vm13525_vm10 = vmmov %vm13521_vm4 }
0x3406   :  { %10786 = vpow2.f32 %v7834_v27  ;;  %v10562_v1 = vunpack.i.h.bf16 %v10560_v47  ;;  %v10561_v30 = vunpack.i.l.bf16 %v10560_v47  ;;  %7635 = vadd.xlane.f32.xlu0 %v7634_v0 }
0x3407   :  { %10788 = vpow2.f32 %v7832_v58 }
0x3408   :  { %v13176_v6 = vpop.eup %10784  ;;  %v10224_v10 = vpack.c.bf16 %v10562_v1, %v10561_v30 }
0x3409   :  { %v7637_v29 = vsel %vm4861_vm2, %v13176_v6, 0.0 }
0x340a   :  { %7638 = vadd.xlane.f32.xlu1 %v7637_v29  ;;  %10225 = vmatprep.subr.bf16.mxu0 %v10224_v10 }
0x340b   :  { %10227 = vmatpush3.bf16.msra.mxu0 %v10224_v10 }
0x3410   :  { %v13180_v39 = vpop.eup %10786 }
0x3411   :  { %v7839_v63 = vsel %vm4861_vm2, %v13180_v39, 0.0  ;;  %v10789_v34 = vpop.eup %10788  ;;  %vm13508_vm2 = vmmov %vm13504_vm1 }
0x3412   :  { %7840 = vadd.xlane.f32.xlu1 %v7839_v63  ;;  %v7836_v21 = vsel %vm13507_vm13, %v10789_v34, 0.0  ;;  %vm13523_vm1 = vmmov %vm13519_vm11 }
0x3413   :  { %vm13526_vm13 = vmmov %vm13521_vm4 }
0x3416   :  { %7837 = vadd.xlane.f32.xlu1 %v7836_v21 }
0x341c   :  { %10569 = vrot.lane.b32.xlu0 %v10568_v25, %s11471_s19 }
0x3420   :  { %10574 = vrot.lane.b32.xlu0 %v10573_v23, %s11471_s19 }
0x3427   :  { %10564 = vrot.lane.b32.xlu1 %v10563_v4, %s11471_s19  ;;  %s13520_s19 = sld [smem:[#allocation102_spill]] }
0x342d   :  { %v713_v21 = vld [vmem:[%s13520_s19] sm:$0xff] }
0x3486   :  { %v7350_v12 = vpop.xlane.xlu0 %7349 }
0x3487   :  { %10790 = vrcp.f32 %v7350_v12  ;;  %v714_v12 = vld [vmem:[%s13520_s19 + $0x8] sm:$0xff] }
0x348a   :  { %v7347_v32 = vpop.xlane.xlu0 %7346 }
0x348b   :  { %10792 = vrcp.f32 %v7347_v32  ;;  %v10260_v32 = vpack.c.bf16 %v714_v12, %v713_v21 }
0x348d   :  { %10261 = vmatprep.subr.bf16.mxu1 %v10260_v32 }
0x348e   :  { %v7236_v13 = vpop.xlane.xlu0 %7235  ;;  %10263 = vmatpush3.bf16.msra.mxu1 %v10260_v32 }
0x348f   :  { %10794 = vrcp.f32 %v7236_v13  ;;  %v7239_v25 = vpop.xlane.xlu1 %7238  ;;  %v715_v13 = vld [vmem:[%s13520_s19 + $0x10] sm:$0xff] }
0x3490   :  { %10796 = vrcp.f32 %v7239_v25  ;;  %v720_v25 = vld [vmem:[%s13522_s0 + $0x10] sm:$0xff] }
0x3491   :  { %v10791_v46 = vpop.eup %10790 }
0x3492   :  { %v7354_v59 = vmul.f32 %v10791_v46, %v10775_v24  ;;  %v709_v24 = vld [vmem:[%s13511_s23 + $0x8] sm:$0xff]  ;;  %v716_v46 = vld [vmem:[%s13520_s19 + $0x18] sm:$0xff] }
0x3493   :  { %v7636_v19 = vpop.xlane.xlu0 %7635 }
0x3494   :  { %10798 = vrcp.f32 %v7636_v19  ;;  %v722_v19 = vld [vmem:[%s13522_s0 + $0x20] sm:$0xff] }
0x3495   :  { %v10793_v14 = vpop.eup %10792 }
0x3496   :  { %v7352_v18 = vmul.f32 %v10793_v14, %v10777_v5  ;;  %v10252_v5 = vpack.c.bf16 %v709_v24, %v708_v62  ;;  %v10264_v14 = vpack.c.bf16 %v716_v46, %v715_v13  ;;  %v725_v62 = vld [vmem:[%s13522_s0 + $0x38] sm:$0xff]  ;;  %v8756_v13 = vld [vmem:[#allocation36] ss:$0 sm:$0xff] }
0x3497   :  { %v7639_v23 = vpop.xlane.xlu1 %7638  ;;  %v10570_v4 = vpop.permute.xlu0 %10569 }
0x3498   :  { %9698 = vmatprep.mubr.msk.f32.mxu0 %vm13508_vm2, %v7352_v18  ;;  %v10572_v17 = vunpack.i.h.bf16 %v10570_v4  ;;  %v10571_v9 = vunpack.i.l.bf16 %v10570_v4  ;;  %10800 = vrcp.f32 %v7639_v23  ;;  %10265 = vmatprep.subr.bf16.mxu1 %v10264_v14  ;;  %v718_v18 = vld [vmem:[%s13522_s0] sm:$0xff]  ;;  %vm13527_vm2 = vcmask 523264  }
0x3499   :  { %v10795_v7 = vpop.eup %10794  ;;  %9699 = vmatmul.mubr.msk.f32.vlgmr.msra.gmra.mrb[48].mxu0 %vm13509_vm0, %v7354_v59  ;;  %10267 = vmatpush3.bf16.msra.mxu1 %v10264_v14  ;;  %v719_v59 = vld [vmem:[%s13522_s0 + $0x8] sm:$0xff]  ;;  %vm13528_vm0 = vmmov %vm13527_vm2 }
0x349a   :  { %v7241_v8 = vmul.f32 %v10795_v7, %v10779_v61  ;;  %v10797_v45 = vpop.eup %10796  ;;  %v10238_v28 = vpack.c.bf16 %v10572_v17, %v10571_v9  ;;  %v10268_v7 = vpack.c.bf16 %v719_v59, %v718_v18  ;;  %v8757_v18 = vld [vmem:[#allocation37] ss:$0 sm:$0xff] }
0x349b   :  { %v10575_v26 = vpop.permute.xlu0 %10574  ;;  %v7243_v38 = vmul.f32 %v10797_v45, %v13167_v31 }
0x349c   :  { %9705 = vmatprep.mubr.msk.f32.mxu0 %vm13510_vm7, %v7241_v8  ;;  %v10577_v35 = vunpack.i.h.bf16 %v10575_v26  ;;  %v10576_v56 = vunpack.i.l.bf16 %v10575_v26  ;;  %v721_v8 = vld [vmem:[%s13522_s0 + $0x18] sm:$0xff]  ;;  %vm13529_vm7 = vmmov %vm13523_vm1 }
0x349d   :  { %v10272_v23 = vpack.c.bf16 %v721_v8, %v720_v25 }
0x349e   :  { %v10799_v33 = vpop.eup %10798  ;;  %v10248_v3 = vpack.c.bf16 %v10577_v35, %v10576_v56  ;;  %v8749_v35 = vld [vmem:[#allocation34] ss:$0 sm:$0xff] }
0x349f   :  { %v7841_v2 = vpop.xlane.xlu1 %7840  ;;  %v7641_v50 = vmul.f32 %v10799_v33, %v13172_v48 }
0x34a2   :  { %v10801_v15 = vpop.eup %10800 }
0x34a3   :  { %v7838_v36 = vpop.xlane.xlu1 %7837  ;;  %v7643_v20 = vmul.f32 %v10801_v15, %v13176_v6  ;;  %v724_v15 = vld [vmem:[%s13522_s0 + $0x30] sm:$0xff] }
0x34a4   :  { %10802 = vrcp.f32 %v7838_v36  ;;  %v10280_v24 = vpack.c.bf16 %v725_v62, %v724_v15 }
0x34a5   :  { %10804 = vrcp.f32 %v7841_v2  ;;  %v723_v2 = vld [vmem:[%s13522_s0 + $0x28] sm:$0xff] }
0x34a6   :  { %v10276_v4 = vpack.c.bf16 %v723_v2, %v722_v19 }
0x34a7   :  { %v10565_v16 = vpop.permute.xlu1 %10564 }
0x34a8   :  { %v10567_v53 = vunpack.i.h.bf16 %v10565_v16  ;;  %v10566_v37 = vunpack.i.l.bf16 %v10565_v16 }
0x34aa   :  { %v10228_v44 = vpack.c.bf16 %v10567_v53, %v10566_v37 }
0x34ac   :  { %10229 = vmatprep.subr.bf16.mxu0 %v10228_v44 }
0x34ad   :  { %10231 = vmatpush3.bf16.msra.mxu0 %v10228_v44  ;;  %v8748_v44 = vld [vmem:[#allocation33] ss:$0 sm:$0xff] }
0x34ae   :  { %10239 = vmatprep.subr.bf16.mxu0 %v10238_v28  ;;  %v10803_v51 = vpop.eup %10802 }
0x34af   :  { %v7843_v41 = vmul.f32 %v10803_v51, %v10789_v34  ;;  %v10805_v42 = vpop.eup %10804  ;;  %v8750_v51 = vld [vmem:[#allocation27] ss:$0 sm:$0xff] }
0x34b0   :  { %9706 = vmatmul.mubr.msk.f32.vlgmr.msra.gmra.mrb[48].mxu0 %vm13512_vm3, %v7243_v38  ;;  %v7845_v61 = vmul.f32 %v10805_v42, %v13180_v39  ;;  %vm13530_vm3 = vmmov %vm13521_vm4 }
0x34b1   :  { %10241 = vmatpush3.bf16.msra.mxu0 %v10238_v28  ;;  %9719 = vmatprep.mubr.msk.f32.mxu0 %vm13513_vm8, %v7641_v50  ;;  %vm13531_vm8 = vmmov %vm13523_vm1 }
0x34b2   :  { %10249 = vmatprep.subr.bf16.mxu0 %v10248_v3 }
0x34b8   :  { %9720 = vmatmul.mubr.msk.f32.vlgmr.msra.gmra.mrb[48].mxu0 %vm13514_vm5, %v7643_v20  ;;  %vm13532_vm5 = vmmov %vm13530_vm3 }
0x34b9   :  { %10251 = vmatpush3.bf16.msra.mxu0 %v10248_v3  ;;  %9733 = vmatprep.mubr.msk.f32.mxu0 %vm13515_vm12, %v7843_v41  ;;  %vm13533_vm12 = vmmov %vm13523_vm1 }
0x34ba   :  { %10253 = vmatprep.subr.bf16.mxu0 %v10252_v5 }
0x34c0   :  { %9734 = vmatmul.mubr.msk.f32.vlgmr.msra.gmra.mrb[48].mxu0 %vm13516_vm15, %v7845_v61  ;;  %v8753_v61 = vld [vmem:[#allocation28] ss:$0 sm:$0xff]  ;;  %vm13535_vm15 = vmmov %vm13530_vm3 }
0x34c1   :  { %10255 = vmatpush3.bf16.msra.mxu0 %v10252_v5 }
0x34c2   :  { %10257 = vmatprep.subr.bf16.mxu0 %v10256_v40 }
0x34c5   :  { %10259 = vmatpush3.bf16.msra.mxu0 %v10256_v40 }
0x34c6   :  { %10269 = vmatprep.subr.bf16.mxu0 %v10268_v7 }
0x3593   :  { %v9735_v31 = vpop.f32.mrb[48].mxu0 }
0x3594   :  { %v7928_v43 = vpop.f32.mrb[49].mxu0 }
0x3595   :  { %9744 = vmatprep.mubr.msk.f32.mxu0 %vm13517_vm6, %v7928_v43  ;;  %vm13536_vm6 = vmmov %vm13523_vm1 }
0x3596   :  { %9745 = vmatmul.mubr.msk.f32.vlgmr.msra.gmra.mrb[50].mxu0 %vm13518_vm9, %v9735_v31  ;;  %vm13537_vm9 = vmmov %vm13530_vm3 }
0x3597   :  { %10271 = vmatpush3.bf16.msra.mxu0 %v10268_v7 }
0x3598   :  { %10273 = vmatprep.subr.bf16.mxu0 %v10272_v23 }
0x359b   :  { %10275 = vmatpush3.bf16.msra.mxu0 %v10272_v23 }
0x359c   :  { %10277 = vmatprep.subr.bf16.mxu0 %v10276_v4 }
0x359f   :  { %10279 = vmatpush3.bf16.msra.mxu0 %v10276_v4 }
0x35a0   :  { %10281 = vmatprep.subr.bf16.mxu0 %v10280_v24 }
0x35a3   :  { %10283 = vmatpush3.bf16.msra.mxu0 %v10280_v24 }
0x3669   :  { %v9746_v60 = vpop.f32.mrb[50].mxu0 }
0x366a   :  { %v8023_v22 = vadd.f32 %v9746_v60, %v8745_v54  ;;  %v8017_v52 = vpop.f32.mrb[51].mxu0 }
0x366b   :  { %v8018_v48 = vadd.f32 %v8745_v54, %v8017_v52 }
0x366c   :  { %v8027_v58 = vadd.f32 %v8023_v22, %v13103_v55 }
0x366d   :  { %v8026_v27 = vadd.f32 %v8018_v48, %v13099_v11 }
0x366e   :  { %v8031_v47 = vsel %vm13519_vm11, %v8027_v58, 0.0  ;;  %vm13541_vm11 = vmmov %vm13530_vm3 }
0x366f   :  { %8032 = vadd.xlane.f32.xlu0 %v8031_v47  ;;  %v8028_v0 = vsel %vm13521_vm4, %v8026_v27, 0.0  ;;  %vm13542_vm4 = vmmov %vm13530_vm3 }
0x3670   :  { %8029 = vadd.xlane.f32.xlu1 %v8028_v0 }
0x36fc   :  { %v8033_v1 = vpop.xlane.xlu0 %8032 }
0x36fd   :  { %v8035_v30 = vmul.f32 0.03125, %v8033_v1  ;;  %v8030_v6 = vpop.xlane.xlu1 %8029 }
0x36fe   :  { %v8034_v10 = vmul.f32 0.03125, %v8030_v6 }
0x36ff   :  { %v8037_v29 = vsub.f32 %v8027_v58, %v8035_v30 }
0x3700   :  { %v8036_v39 = vsub.f32 %v8026_v27, %v8034_v10 }
0x3701   :  { %v8039_v63 = vmul.f32 %v8037_v29, %v8037_v29 }
0x3702   :  { %v8038_v55 = vmul.f32 %v8036_v39, %v8036_v39 }
0x3703   :  { %v8043_v11 = vsel %vm13523_vm1, %v8039_v63, 0.0  ;;  %vm8420_vm1 = vcmask 521216  }
0x3704   :  { %8044 = vadd.xlane.f32.xlu1 %v8043_v11  ;;  %v8040_v34 = vsel %vm13524_vm14, %v8038_v55, 0.0  ;;  %vm13543_vm14 = vmmov %vm13528_vm0 }
0x3705   :  { %8041 = vadd.xlane.f32.xlu0 %v8040_v34 }
0x3791   :  { %v8045_v36 = vpop.xlane.xlu1 %8044 }
0x3792   :  { %v8047_v16 = vmul.f32 0.03125, %v8045_v36  ;;  %v8042_v17 = vpop.xlane.xlu0 %8041 }
0x3793   :  { %v8046_v9 = vmul.f32 0.03125, %v8042_v17 }
0x3794   :  { %v8049_v53 = vadd.f32 1e-05, %v8047_v16 }
0x3795   :  { %v8048_v37 = vadd.f32 1e-05, %v8046_v9 }
0x3796   :  { %10806 = vrsqrt.f32 %v8049_v53 }
0x3797   :  { %10808 = vrsqrt.f32 %v8048_v37 }
0x37a0   :  { %v10807_v26 = vpop.eup %10806 }
0x37a1   :  { %v10809_v45 = vpop.eup %10808  ;;  %v8053_v33 = vmul.f32 %v10807_v26, %v8037_v29 }
0x37a2   :  { %v8052_v28 = vmul.f32 %v10809_v45, %v8036_v39 }
0x37a3   :  { %v8061_v56 = vmul.f32 %v8748_v44, %v8053_v33  ;;  %v588_v33 = vld [vmem:[%s13534_s5] sm:$0xff] }
0x37a4   :  { %v8060_v38 = vmul.f32 %v8748_v44, %v8052_v28  ;;  %v589_v28 = vld [vmem:[%s13534_s5 + $0x8] sm:$0xff] }
0x37a5   :  { %v8069_v3 = vadd.f32 %v8749_v35, %v8061_v56  ;;  %v590_v56 = vld [vmem:[%s13534_s5 + $0x10] sm:$0xff] }
0x37a6   :  { %v8068_v50 = vadd.f32 %v8749_v35, %v8060_v38  ;;  %v10284_v35 = vpack.c.bf16 %v589_v28, %v588_v33  ;;  %v591_v38 = vld [vmem:[%s13534_s5 + $0x18] sm:$0xff] }
0x37a8   :  { %9755 = vmatprep.mubr.msk.f32.mxu1 %vm13525_vm10, %v8068_v50  ;;  %10285 = vmatprep.subr.bf16.mxu1 %v10284_v35 }
0x37a9   :  { %9756 = vmatmul.mubr.msk.f32.vlgmr.msra.gmra.mrb[54].mxu1 %vm13526_vm13, %v8069_v3 }
0x37aa   :  { %10287 = vmatpush3.bf16.msra.mxu1 %v10284_v35 }
0x387c   :  { %v9757_v20 = vpop.f32.mrb[54].mxu1 }
0x387d   :  { %v8154_v5 = vadd.f32 %v9757_v20, %v8750_v51  ;;  %v8148_v41 = vpop.f32.mrb[55].mxu1 }
0x387e   :  { %v8149_v42 = vadd.f32 %v8750_v51, %v8148_v41  ;;  %v8758_v41 = vld [vmem:[%s13538_s29] ss:$0 sm:$0xff] }
0x387f   :  { %v8158_v57 = vmax.f32 %v8154_v5, 0.0 }
0x3880   :  { %v8157_v49 = vmax.f32 %v8149_v42, 0.0 }
0x3882   :  { %9774 = vmatprep.mubr.msk.f32.mxu0 %vm13527_vm2, %v8157_v49 }
0x3883   :  { %9775 = vmatmul.mubr.msk.f32.vlgmr.msra.gmra.mrb[52].mxu0 %vm13528_vm0, %v8158_v57 }
0x3956   :  { %v9776_v40 = vpop.f32.mrb[52].mxu0 }
0x3957   :  { %v8243_v31 = vadd.f32 %v9776_v40, %v8753_v61  ;;  %v8237_v43 = vpop.f32.mrb[53].mxu0 }
0x3958   :  { %v8238_v54 = vadd.f32 %v8753_v61, %v8237_v43  ;;  %v8759_v61 = vld [vmem:[%s13539_s2] ss:$0 sm:$0xff] }
0x3959   :  { %v8247_v60 = vadd.f32 %v8243_v31, %v8069_v3 }
0x395a   :  { %v8246_v22 = vadd.f32 %v8238_v54, %v8068_v50  ;;  %v10288_v50 = vpack.c.bf16 %v591_v38, %v590_v56 }
0x395b   :  { %v8251_v52 = vsel %vm13529_vm7, %v8247_v60, 0.0 }
0x395c   :  { %8252 = vadd.xlane.f32.xlu1 %v8251_v52  ;;  %v8248_v48 = vsel %vm13530_vm3, %v8246_v22, 0.0  ;;  %10289 = vmatprep.subr.bf16.mxu1 %v10288_v50 }
0x395d   :  { %8249 = vadd.xlane.f32.xlu0 %v8248_v48  ;;  %10291 = vmatpush3.bf16.msra.mxu1 %v10288_v50 }
0x39e9   :  { %v8253_v58 = vpop.xlane.xlu1 %8252 }
0x39ea   :  { %v8255_v27 = vmul.f32 0.03125, %v8253_v58  ;;  %v8250_v47 = vpop.xlane.xlu0 %8249 }
0x39eb   :  { %v8254_v0 = vmul.f32 0.03125, %v8250_v47 }
0x39ec   :  { %v8257_v1 = vsub.f32 %v8247_v60, %v8255_v27  ;;  %v8760_v60 = vld [vmem:[%s13540_s6] ss:$0 sm:$0xff] }
0x39ed   :  { %v8256_v30 = vsub.f32 %v8246_v22, %v8254_v0 }
0x39ee   :  { %v8259_v6 = vmul.f32 %v8257_v1, %v8257_v1 }
0x39ef   :  { %v8258_v10 = vmul.f32 %v8256_v30, %v8256_v30 }
0x39f0   :  { %v8263_v29 = vsel %vm13531_vm8, %v8259_v6, 0.0 }
0x39f1   :  { %8264 = vadd.xlane.f32.xlu1 %v8263_v29  ;;  %v8260_v39 = vsel %vm13532_vm5, %v8258_v10, 0.0 }
0x39f2   :  { %8261 = vadd.xlane.f32.xlu0 %v8260_v39 }
0x3a7e   :  { %v8265_v63 = vpop.xlane.xlu1 %8264 }
0x3a7f   :  { %v8267_v55 = vmul.f32 0.03125, %v8265_v63  ;;  %v8262_v11 = vpop.xlane.xlu0 %8261 }
0x3a80   :  { %v8266_v34 = vmul.f32 0.03125, %v8262_v11 }
0x3a81   :  { %v8269_v21 = vadd.f32 1e-05, %v8267_v55 }
0x3a82   :  { %v8268_v12 = vadd.f32 1e-05, %v8266_v34 }
0x3a83   :  { %10810 = vrsqrt.f32 %v8269_v21 }
0x3a84   :  { %10812 = vrsqrt.f32 %v8268_v12 }
0x3a8d   :  { %v10811_v32 = vpop.eup %10810 }
0x3a8e   :  { %v10813_v46 = vpop.eup %10812  ;;  %v8273_v14 = vmul.f32 %v10811_v32, %v8257_v1 }
0x3a8f   :  { %v8272_v59 = vmul.f32 %v10813_v46, %v8256_v30 }
0x3a90   :  { %v8281_v25 = vmul.f32 %v8756_v13, %v8273_v14 }
0x3a91   :  { %v8280_v7 = vmul.f32 %v8756_v13, %v8272_v59 }
0x3a92   :  { %v8289_v8 = vadd.f32 %v8757_v18, %v8281_v25 }
0x3a93   :  { %v8288_v23 = vadd.f32 %v8757_v18, %v8280_v7 }
0x3a94   :  { %v8293_v19 = vsel %vm13533_vm12, %v8289_v8, 0.0 }
0x3a95   :  { %8294 = vadd.xlane.f32.xlu1 %v8293_v19  ;;  %v8290_v2 = vsel %vm13535_vm15, %v8288_v23, 0.0 }
0x3a96   :  { %8291 = vadd.xlane.f32.xlu0 %v8290_v2 }
0x3b22   :  { %v8295_v4 = vpop.xlane.xlu1 %8294 }
0x3b23   :  { %v8297_v36 = vmul.f32 0.03125, %v8295_v4  ;;  %v8292_v16 = vpop.xlane.xlu0 %8291 }
0x3b24   :  { %v8296_v17 = vmul.f32 0.03125, %v8292_v16 }
0x3b25   :  { %v8299_v9 = vsub.f32 %v8289_v8, %v8297_v36 }
0x3b26   :  { %v8298_v53 = vsub.f32 %v8288_v23, %v8296_v17 }
0x3b27   :  { %v8301_v37 = vmul.f32 %v8299_v9, %v8299_v9 }
0x3b28   :  { %v8300_v26 = vmul.f32 %v8298_v53, %v8298_v53 }
0x3b29   :  { %v8305_v44 = vsel %vm13536_vm6, %v8301_v37, 0.0 }
0x3b2a   :  { %8306 = vadd.xlane.f32.xlu1 %v8305_v44  ;;  %v8302_v45 = vsel %vm13537_vm9, %v8300_v26, 0.0 }
0x3b2b   :  { %8303 = vadd.xlane.f32.xlu0 %v8302_v45 }
0x3bb7   :  { %v8307_v3 = vpop.xlane.xlu1 %8306 }
0x3bb8   :  { %v8309_v15 = vmul.f32 0.03125, %v8307_v3  ;;  %v8304_v62 = vpop.xlane.xlu0 %8303 }
0x3bb9   :  { %v8308_v24 = vmul.f32 0.03125, %v8304_v62 }
0x3bba   :  { %v8311_v51 = vadd.f32 1e-05, %v8309_v15 }
0x3bbb   :  { %v8310_v20 = vadd.f32 1e-05, %v8308_v24 }
0x3bbc   :  { %10814 = vrsqrt.f32 %v8311_v51 }
0x3bbd   :  { %10816 = vrsqrt.f32 %v8310_v20 }
0x3bc6   :  { %v10815_v5 = vpop.eup %10814 }
0x3bc7   :  { %v10817_v42 = vpop.eup %10816  ;;  %v8315_v49 = vmul.f32 %v10815_v5, %v8299_v9 }
0x3bc8   :  { %v8314_v57 = vmul.f32 %v10817_v42, %v8298_v53 }
0x3bc9   :  { %v8323_v40 = vmul.f32 %v8758_v41, %v8315_v49 }
0x3bca   :  { %v8322_v31 = vmul.f32 %v8758_v41, %v8314_v57 }
0x3bcb   :  { %v8331_v54 = vadd.f32 %v8759_v61, %v8323_v40 }
0x3bcc   :  { %v8330_v43 = vadd.f32 %v8759_v61, %v8322_v31 }
0x3bce   :  { %9785 = vmatprep.mubr.msk.f32.mxu1 %vm13541_vm11, %v8330_v43 }
0x3bcf   :  { %9786 = vmatmul.mubr.msk.f32.vlgmr.msra.gmra.mrb[56].mxu1 %vm13542_vm4, %v8331_v54 }
0x3ca2   :  { %v9787_v22 = vpop.f32.mrb[56].mxu1 }
0x3ca3   :  { %v8416_v52 = vadd.f32 %v9787_v22, %v8760_v60  ;;  %v8410_v48 = vpop.f32.mrb[57].mxu1 }
0x3ca4   :  { %v8411_v58 = vadd.f32 %v8760_v60, %v8410_v48 }
0x3ca5   :  { %8421 = vst.msk [vmem:[%s11841_s25 + $0x8] sm:$0x3f] %vm8420_vm1, %v8416_v52 }
0x3ca6   :  { %8419 = vst.msk [vmem:[%s11841_s25] sm:$0xff] %vm13543_vm14, %v8411_v58 }
0x3ca7   :  { %8426 = vsyncpa [#allocation3], 1 }
0x3ca8   :  { %8427 = vsyncpa [#allocation5], 1 }
0x3ca9   :  { %8428 = vsyncpa [#allocation8], 1 }
0x3caa   :  { %8429 = vsyncpa [#allocation11], 1 }
0x3cab   :  { %8430 = vsyncpa [#allocation14], 1 }
0x3cac   :  { %8431 = vsyncpa [#allocation17], 1 }
0x3cad   :  { %8432 = vsyncpa [#allocation20], 1 }
0x3cae   :  { %8433 = vsyncpa [#allocation23], 1 }
0x3caf   :  { %8434 = vsyncpa [#allocation26], 1 }
0x3cb0   :  { %8435 = vsyncpa [#allocation29], 1 }
0x3cb1   :  { %8436 = vsyncpa [#allocation32], 1 }
0x3cb2   :  { %8437 = vsyncpa [#allocation35], 1 }
0x3cb3   :  { %8438 = vsyncpa [#allocation38], 1 }

</bundles_post_ra>
